<compile_context>
chip_gen: v7x
topology: tpu7x:2x2x1
jax: 0.10.0
libtpu: 0.0.40
codegen_flags: <defaults>
</compile_context>

<pallas_src>
import math

import jax
import jax.numpy as jnp
from jax.experimental import pallas as pl
from jax.experimental.pallas import tpu as pltpu


# -----------------------------------------------------------------------------
# Fused model kernel
# -----------------------------------------------------------------------------
def _make_model_kernel(n_heads):
    H = n_heads

    def kernel(x_ref, emb_w_ref, pe_ref,
               wqkv_ref, bqkv_ref, wo_ref, bo_ref, bn1s_ref, bn1b_ref,
               w1_ref, b1_ref, w2_ref, b2_ref, bn2s_ref, bn2b_ref,
               out_w_ref, out_b_ref, o_ref, h_ref):
        l = pl.program_id(1)
        Bt, S, Fin = x_ref.shape
        D = emb_w_ref.shape[1]
        Fpad = out_w_ref.shape[1]
        hd = D // H
        N = Bt * S
        bf16 = jnp.bfloat16

        def mxu(a, w):
            # activations cast to bf16; weights are already bf16; f32 accumulate.
            return jnp.dot(a.astype(bf16), w, preferred_element_type=jnp.float32)

        # ---- first layer step: input embedding + positional encoding -------
        # (embedding bias is pre-folded into pe on the host)
        @pl.when(l == 0)
        def _():
            h_ref[...] = mxu(x_ref[...].reshape(N, Fin), emb_w_ref[...]) + pe_ref[...]

        h = h_ref[...]

        # ---- multi-head self-attention (transpose-free) ---------------------
        # 1/sqrt(hd) is folded into the q section of wqkv/bqkv on the host.
        qkv = mxu(h, wqkv_ref[...]) + bqkv_ref[...]                  # (N, 3D) f32
        attn = jnp.zeros((N, D), jnp.float32)
        for hh in range(H):                                          # static loop
            lo = hh * hd
            q = qkv[:, lo:lo + hd].reshape(Bt, S, hd)
            k = qkv[:, D + lo:D + lo + hd].reshape(Bt, S, hd)
            v = qkv[:, 2 * D + lo:2 * D + lo + hd].reshape(Bt, S, hd)
            s = jnp.einsum("bqd,bkd->bqk", q.astype(bf16), k.astype(bf16),
                           preferred_element_type=jnp.float32)       # (Bt,S,S)
            s = s - jnp.max(s, axis=-1, keepdims=True)
            p = jnp.exp(s)                                           # EUP
            p = p * pl.reciprocal(jnp.sum(p, axis=-1, keepdims=True), approx=True)
            a = jnp.einsum("bqk,bkd->bqd", p.astype(bf16), v.astype(bf16),
                           preferred_element_type=jnp.float32)       # (Bt,S,hd)
            # head merge folded into the output projection (no concat / transpose)
            attn = attn + mxu(a.reshape(N, hd), wo_ref[lo:lo + hd, :])
        attn = attn + bo_ref[...]

        # ---- residual + batchnorm1 (eval-mode per-channel affine) -----------
        x1 = (h + attn) * bn1s_ref[...] + bn1b_ref[...]

        # ---- feed-forward ----------------------------------------------------
        hid = jnp.maximum(mxu(x1, w1_ref[...]) + b1_ref[...], 0.0)
        ff = mxu(hid, w2_ref[...]) + b2_ref[...]

        # ---- residual + batchnorm2 -> carried activation ---------------------
        h_new = (x1 + ff) * bn2s_ref[...] + bn2b_ref[...]
        h_ref[...] = h_new

        # ---- last layer step: lane-dense (128-wide) output projection -------
        @pl.when(l == pl.num_programs(1) - 1)
        def _():
            out = mxu(h_new, out_w_ref[...]) + out_b_ref[...]
            o_ref[...] = out.reshape(Bt, S, Fpad).astype(o_ref.dtype)

    return kernel


# -----------------------------------------------------------------------------
# Batch-block heuristic: fill the MXU (>=256 tokens per block is enough for
# v6e/v7x, 128 for v5e) while keeping >=2 blocks so v7x megacore has work.
# -----------------------------------------------------------------------------
def _default_batch_block(batch, seq_len, target_tokens=256):
    divs = [d for d in range(1, batch + 1) if batch % d == 0]
    both = [d for d in divs if d * seq_len >= target_tokens and batch // d >= 2]
    if both:
        return min(both)
    fill = [d for d in divs if d * seq_len >= target_tokens]
    if fill:
        return min(fill)
    par = [d for d in divs if batch // d >= 2]
    return max(par) if par else batch


# -----------------------------------------------------------------------------
# Wrapper: host-side weight folding/casting + the fused pallas_call
# -----------------------------------------------------------------------------
def masked_prediction_model(x, params, n_heads, *, batch_block=None):
    B, S, Fin = x.shape
    D = params["emb_w"].shape[1]
    Fout = params["out_w"].shape[1]
    L = params["wqkv"].shape[0]
    ff_dim = params["w1"].shape[2]
    assert D % n_heads == 0
    hd = D // n_heads

    Bt = _default_batch_block(B, S) if batch_block is None else min(batch_block, B)
    assert B % Bt == 0, "batch must divide evenly into batch blocks"
    N = Bt * S
    grid = (B // Bt, L)

    # ---- host-side folds + bf16 weight casts --------------------------------
    bf16 = jnp.bfloat16
    scale = 1.0 / math.sqrt(hd)
    # fold 1/sqrt(head_dim) into BOTH the q weight columns and the q bias
    wqkv = params["wqkv"].at[:, :, :D].multiply(scale).astype(bf16)
    bqkv = params["bqkv"].at[:, :, :D].multiply(scale)
    # fold the embedding bias into the positional encoding; pre-broadcast over
    # the batch block so the kernel adds a plain (N, D) slab (no broadcasts).
    pe_tok = jnp.broadcast_to(params["pe"] + params["emb_b"], (Bt, S, D)).reshape(N, D)
    # zero-pad output head to a lane-dense width (multiple of 128)
    Fpad = max(128, ((Fout + 127) // 128) * 128)
    out_w = jnp.zeros((D, Fpad), jnp.float32).at[:, :Fout].set(params["out_w"]).astype(bf16)
    out_b = jnp.zeros((1, Fpad), jnp.float32).at[:, :Fout].set(params["out_b"])
    emb_w = params["emb_w"].astype(bf16)
    wo = params["wo"].astype(bf16)
    w1 = params["w1"].astype(bf16)
    w2 = params["w2"].astype(bf16)
    bo, b1, b2 = params["bo"], params["b1"], params["b2"]
    bn1s, bn1b = params["bn1s"], params["bn1b"]
    bn2s, bn2b = params["bn2s"], params["bn2b"]

    # ---- BlockSpecs -----------------------------------------------------------
    full_vmem = pl.BlockSpec(memory_space=pltpu.MemorySpace.VMEM)

    def layer_spec(*dims):
        # one layer's slab, streamed along the "arbitrary" layer grid axis
        return pl.BlockSpec((pl.Squeezed(),) + dims, lambda b, l: (l, 0, 0))

    in_specs = [
        pl.BlockSpec((Bt, S, Fin), lambda b, l: (b, 0, 0)),     # x
        full_vmem,                                              # emb_w  (bf16)
        full_vmem,                                              # pe_tok (f32)
        layer_spec(D, 3 * D),                                   # wqkv   (bf16)
        layer_spec(1, 3 * D),                                   # bqkv
        layer_spec(D, D),                                       # wo     (bf16)
        layer_spec(1, D),                                       # bo
        layer_spec(1, D), layer_spec(1, D),                     # bn1s, bn1b
        layer_spec(D, ff_dim),                                  # w1     (bf16)
        layer_spec(1, ff_dim),                                  # b1
        layer_spec(ff_dim, D),                                  # w2     (bf16)
        layer_spec(1, D),                                       # b2
        layer_spec(1, D), layer_spec(1, D),                     # bn2s, bn2b
        full_vmem,                                              # out_w  (padded, bf16)
        full_vmem,                                              # out_b  (padded)
    ]
    out_spec = pl.BlockSpec((Bt, S, Fpad), lambda b, l: (b, 0, 0))

    # ---- VMEM budget + cost estimate ------------------------------------------
    def nbytes(a):
        return int(a.size) * a.dtype.itemsize

    resident = sum(nbytes(a) for a in (emb_w, pe_tok, out_w, out_b))
    per_layer = sum(nbytes(a) // L for a in
                    (wqkv, bqkv, wo, bo, bn1s, bn1b, w1, b1, w2, b2, bn2s, bn2b))
    io_block = N * (Fin + Fpad) * 4
    temps = N * (3 * D + 4 * D + 2 * ff_dim) * 4                # qkv / attn / ff temporaries
    est = resident + 2 * (per_layer + io_block) + N * D * 4 + temps
    vmem_limit = int(min(max(2 * est, 32 * 1024 * 1024), 48 * 1024 * 1024))

    tokens = B * S
    flops = 2 * tokens * (Fin * D + Fpad * D
                          + L * (3 * D * D + D * D + 2 * S * D + 2 * D * ff_dim))
    transcendentals = L * B * n_heads * S * S
    bytes_accessed = (nbytes(x) + tokens * Fpad * 4
                      + (B // Bt) * L * per_layer + resident)

    out = pl.pallas_call(
        _make_model_kernel(n_heads),
        out_shape=jax.ShapeDtypeStruct((B, S, Fpad), jnp.float32),
        grid=grid,
        in_specs=in_specs,
        out_specs=out_spec,
        scratch_shapes=[pltpu.VMEM((N, D), jnp.float32)],       # carried activation
        compiler_params=pltpu.CompilerParams(
            dimension_semantics=("parallel", "arbitrary"),
            vmem_limit_bytes=vmem_limit),
        cost_estimate=pl.CostEstimate(flops=flops,
                                      transcendentals=transcendentals,
                                      bytes_accessed=bytes_accessed),
    )(x, emb_w, pe_tok, wqkv, bqkv, wo, bo, bn1s, bn1b,
      w1, b1, w2, b2, bn2s, bn2b, out_w, out_b)

    return out[..., :Fout]


# -----------------------------------------------------------------------------
# Deterministic "natural" parameter init (PyTorch-like shapes, all f32,
# no folds — folding/casting happens in the wrapper so real checkpoint weights
# with nonzero biases would also be handled correctly).
# -----------------------------------------------------------------------------
def init_params(key, input_dim, seq_len, d_model, n_heads, n_layers, ff_dim):
    def uni(k, shape, fan_in):
        bound = 1.0 / math.sqrt(fan_in)
        return jax.random.uniform(k, shape, jnp.float32, -bound, bound)

    keys = iter(jax.random.split(key, 4 + 6 * n_layers))
    eps = 1e-5
    bn_scale = jnp.full((1, d_model), 1.0 / math.sqrt(1.0 + eps), jnp.float32)
    bn_shift = jnp.zeros((1, d_model), jnp.float32)

    params = {
        "emb_w": uni(next(keys), (input_dim, d_model), input_dim),
        "emb_b": uni(next(keys), (1, d_model), input_dim),
        "pe": jax.random.normal(next(keys), (1, seq_len, d_model), jnp.float32),
        "out_w": uni(next(keys), (d_model, input_dim), d_model),
        "out_b": jnp.zeros((1, input_dim), jnp.float32),
    }

    stacks = {k: [] for k in ("wqkv", "bqkv", "wo", "bo", "bn1s", "bn1b",
                              "w1", "b1", "w2", "b2", "bn2s", "bn2b")}
    for _ in range(n_layers):
        stacks["wqkv"].append(uni(next(keys), (d_model, 3 * d_model), d_model))
        stacks["bqkv"].append(jnp.zeros((1, 3 * d_model), jnp.float32))
        stacks["wo"].append(uni(next(keys), (d_model, d_model), d_model))
        stacks["bo"].append(jnp.zeros((1, d_model), jnp.float32))
        stacks["bn1s"].append(bn_scale)
        stacks["bn1b"].append(bn_shift)
        stacks["w1"].append(uni(next(keys), (d_model, ff_dim), d_model))
        stacks["b1"].append(uni(next(keys), (1, ff_dim), d_model))
        stacks["w2"].append(uni(next(keys), (ff_dim, d_model), ff_dim))
        stacks["b2"].append(uni(next(keys), (1, d_model), ff_dim))
        stacks["bn2s"].append(bn_scale)
        stacks["bn2b"].append(bn_shift)

    for k, v in stacks.items():
        params[k] = jnp.stack(v)
    return params


# -----------------------------------------------------------------------------
# Pure-JAX reference (natural params, explicit 1/sqrt(hd) scale, no Pallas).
# matmul_dtype=bf16 mirrors the kernel's MXU convention; f32 = full precision.
# -----------------------------------------------------------------------------
def ref_model(x, params, n_heads, matmul_dtype=jnp.bfloat16):
    def mm(a, w):
        return jnp.dot(a.astype(matmul_dtype), w.astype(matmul_dtype),
                       preferred_element_type=jnp.float32)

    B, S, Fin = x.shape
    D = params["emb_w"].shape[1]
    H, hd = n_heads, D // n_heads
    L = params["wqkv"].shape[0]
    scale = 1.0 / math.sqrt(hd)

    h = mm(x.reshape(B * S, Fin), params["emb_w"]) + params["emb_b"]
    h = (h.reshape(B, S, D) + params["pe"][0]).reshape(B * S, D)
    for l in range(L):
        qkv = mm(h, params["wqkv"][l]) + params["bqkv"][l]
        q = (qkv[:, :D] * scale).reshape(B, S, H, hd).transpose(0, 2, 1, 3)
        k = qkv[:, D:2 * D].reshape(B, S, H, hd).transpose(0, 2, 1, 3)
        v = qkv[:, 2 * D:].reshape(B, S, H, hd).transpose(0, 2, 1, 3)
        s = jnp.einsum("bhqd,bhkd->bhqk", q.astype(matmul_dtype),
                       k.astype(matmul_dtype), preferred_element_type=jnp.float32)
        p = jax.nn.softmax(s, axis=-1)
        a = jnp.einsum("bhqk,bhkd->bhqd", p.astype(matmul_dtype),
                       v.astype(matmul_dtype), preferred_element_type=jnp.float32)
        attn = a.transpose(0, 2, 1, 3).reshape(B * S, D)
        attn = mm(attn, params["wo"][l]) + params["bo"][l]
        x1 = (h + attn) * params["bn1s"][l] + params["bn1b"][l]
        hid = jnp.maximum(mm(x1, params["w1"][l]) + params["b1"][l], 0.0)
        ff = mm(hid, params["w2"][l]) + params["b2"][l]
        h = (x1 + ff) * params["bn2s"][l] + params["bn2b"][l]
    out = mm(h, params["out_w"]) + params["out_b"]
    return out.reshape(B, S, -1)


# -----------------------------------------------------------------------------
if __name__ == "__main__":
    # module defaults d_model=128 / feedforward_dim=256 keep feature dims lane-dense
    INPUT_DIM, SEQ_LEN, D_MODEL, N_HEADS, N_LAYERS, FF_DIM = 8, 16, 128, 4, 2, 256
    BATCH = 32   # -> batch_block=16: 256 tokens per MXU pass, grid=(2, L) for v7x

    key = jax.random.PRNGKey(0)
    k_params, k_x = jax.random.split(key)
    params = init_params(k_params, INPUT_DIM, SEQ_LEN, D_MODEL, N_HEADS,
                         N_LAYERS, FF_DIM)
    x = jax.random.normal(k_x, (BATCH, SEQ_LEN, INPUT_DIM), jnp.float32)

    out = jax.block_until_ready(masked_prediction_model(x, params, N_HEADS))
    assert out.shape == (BATCH, SEQ_LEN, INPUT_DIM), out.shape

    # check vs. reference using the same bf16-MXU convention
    ref_bf16 = jax.block_until_ready(ref_model(x, params, N_HEADS,
                                               matmul_dtype=jnp.bfloat16))
    assert jnp.allclose(out, ref_bf16, atol=5e-2, rtol=5e-2), \
        float(jnp.max(jnp.abs(out - ref_bf16)))

    # loose sanity check vs. full-f32 forward pass (bf16 rounding tolerance)
    ref_f32 = jax.block_until_ready(ref_model(x, params, N_HEADS,
                                              matmul_dtype=jnp.float32))
    assert jnp.allclose(out, ref_f32, atol=1.5e-1, rtol=1.5e-1), \
        float(jnp.max(jnp.abs(out - ref_f32)))

    print("KERNEL_OK")
</pallas_src>

<mosaic_0001>
module attributes {stable_mosaic.version = 11 : i64} {
  func.func @kernel(%arg0: i32, %arg1: i32, %arg2: memref<16x16x8xf32, #tpu.memory_space<vmem>>, %arg3: memref<8x128xbf16, #tpu.memory_space<vmem>>, %arg4: memref<256x128xf32, #tpu.memory_space<vmem>>, %arg5: memref<1x128x384xbf16, #tpu.memory_space<vmem>>, %arg6: memref<1x1x384xf32, #tpu.memory_space<vmem>>, %arg7: memref<1x128x128xbf16, #tpu.memory_space<vmem>>, %arg8: memref<1x1x128xf32, #tpu.memory_space<vmem>>, %arg9: memref<1x1x128xf32, #tpu.memory_space<vmem>>, %arg10: memref<1x1x128xf32, #tpu.memory_space<vmem>>, %arg11: memref<1x128x256xbf16, #tpu.memory_space<vmem>>, %arg12: memref<1x1x256xf32, #tpu.memory_space<vmem>>, %arg13: memref<1x256x128xbf16, #tpu.memory_space<vmem>>, %arg14: memref<1x1x128xf32, #tpu.memory_space<vmem>>, %arg15: memref<1x1x128xf32, #tpu.memory_space<vmem>>, %arg16: memref<1x1x128xf32, #tpu.memory_space<vmem>>, %arg17: memref<128x128xbf16, #tpu.memory_space<vmem>>, %arg18: memref<1x128xf32, #tpu.memory_space<vmem>>, %arg19: memref<16x16x128xf32, #tpu.memory_space<vmem>>, %arg20: memref<256x128xf32, #tpu.memory_space<vmem>>) attributes {dimension_semantics = [#tpu.dimension_semantics<parallel>, #tpu.dimension_semantics<arbitrary>], iteration_bounds = array<i64: 2, 2>, scalar_prefetch = 0 : i64, scratch_operands = 1 : i64, tpu.core_type = #tpu.core_type<tc>, window_params = [{transform_indices = @transform_0, window_bounds = array<i64: 16, 16, 8>}, {pipeline_mode = #tpu.pipeline_mode<synchronous>, transform_indices = @transform_1, window_bounds = array<i64: 8, 128>}, {pipeline_mode = #tpu.pipeline_mode<synchronous>, transform_indices = @transform_2, window_bounds = array<i64: 256, 128>}, {transform_indices = @transform_3, window_bounds = array<i64: 1, 128, 384>}, {transform_indices = @transform_4, window_bounds = array<i64: 1, 1, 384>}, {transform_indices = @transform_5, window_bounds = array<i64: 1, 128, 128>}, {transform_indices = @transform_6, window_bounds = array<i64: 1, 1, 128>}, {transform_indices = @transform_7, window_bounds = array<i64: 1, 1, 128>}, {transform_indices = @transform_8, window_bounds = array<i64: 1, 1, 128>}, {transform_indices = @transform_9, window_bounds = array<i64: 1, 128, 256>}, {transform_indices = @transform_10, window_bounds = array<i64: 1, 1, 256>}, {transform_indices = @transform_11, window_bounds = array<i64: 1, 256, 128>}, {transform_indices = @transform_12, window_bounds = array<i64: 1, 1, 128>}, {transform_indices = @transform_13, window_bounds = array<i64: 1, 1, 128>}, {transform_indices = @transform_14, window_bounds = array<i64: 1, 1, 128>}, {pipeline_mode = #tpu.pipeline_mode<synchronous>, transform_indices = @transform_15, window_bounds = array<i64: 128, 128>}, {pipeline_mode = #tpu.pipeline_mode<synchronous>, transform_indices = @transform_16, window_bounds = array<i64: 1, 128>}, {transform_indices = @transform_17, window_bounds = array<i64: 16, 16, 128>}]} {
    %c0_i32 = arith.constant 0 : i32
    %0 = arith.cmpi eq, %arg1, %c0_i32 : i32
    %1 = arith.extui %0 : i1 to i32
    %c0_i32_0 = arith.constant 0 : i32
    %2 = arith.cmpi ne, %1, %c0_i32_0 : i32
    scf.if %2 {
      %c0_71 = arith.constant 0 : index
      %c0_72 = arith.constant 0 : index
      %c0_73 = arith.constant 0 : index
      %169 = vector.load %arg2[%c0_71, %c0_72, %c0_73] : memref<16x16x8xf32, #tpu.memory_space<vmem>>, vector<16x16x8xf32>
      %170 = vector.shape_cast %169 : vector<16x16x8xf32> to vector<256x8xf32>
      %c0_74 = arith.constant 0 : index
      %c0_75 = arith.constant 0 : index
      %171 = vector.load %arg3[%c0_74, %c0_75] : memref<8x128xbf16, #tpu.memory_space<vmem>>, vector<8x128xbf16>
      %172 = arith.truncf %170 : vector<256x8xf32> to vector<256x8xbf16>
      %cst_76 = arith.constant dense<0.000000e+00> : vector<256x128xf32>
      %173 = tpu.matmul %172, %171, %cst_76 {dimension_numbers = #tpu.dot_dimension_numbers<[1], [0], [0], [1], [0, 0, 1, 1], [], []>} : vector<256x8xbf16>, vector<8x128xbf16>, vector<256x128xf32> -> vector<256x128xf32>
      %c0_77 = arith.constant 0 : index
      %c0_78 = arith.constant 0 : index
      %174 = vector.load %arg4[%c0_77, %c0_78] : memref<256x128xf32, #tpu.memory_space<vmem>>, vector<256x128xf32>
      %175 = arith.addf %173, %174 : vector<256x128xf32>
      %c0_79 = arith.constant 0 : index
      %c0_80 = arith.constant 0 : index
      %176 = vector.load %arg20[%c0_79, %c0_80] : memref<256x128xf32, #tpu.memory_space<vmem>>, vector<256x128xf32>
      tpu.vector_store %arg20[%c0_79, %c0_80], %175 {strides = array<i32>} : memref<256x128xf32, #tpu.memory_space<vmem>>, vector<256x128xf32>,
    } else {
    }
    %c0 = arith.constant 0 : index
    %c0_1 = arith.constant 0 : index
    %3 = vector.load %arg20[%c0, %c0_1] : memref<256x128xf32, #tpu.memory_space<vmem>>, vector<256x128xf32>
    %c0_2 = arith.constant 0 : index
    %c0_3 = arith.constant 0 : index
    %c0_4 = arith.constant 0 : index
    %4 = vector.load %arg5[%c0_2, %c0_3, %c0_4] : memref<1x128x384xbf16, #tpu.memory_space<vmem>>, vector<1x128x384xbf16>
    %5 = vector.shape_cast %4 : vector<1x128x384xbf16> to vector<128x384xbf16>
    %6 = arith.truncf %3 : vector<256x128xf32> to vector<256x128xbf16>
    %cst = arith.constant dense<0.000000e+00> : vector<256x384xf32>
    %7 = tpu.matmul %6, %5, %cst {dimension_numbers = #tpu.dot_dimension_numbers<[1], [0], [0], [1], [0, 0, 1, 1], [], []>} : vector<256x128xbf16>, vector<128x384xbf16>, vector<256x384xf32> -> vector<256x384xf32>
    %c0_5 = arith.constant 0 : index
    %c0_6 = arith.constant 0 : index
    %c0_7 = arith.constant 0 : index
    %8 = vector.load %arg6[%c0_5, %c0_6, %c0_7] : memref<1x1x384xf32, #tpu.memory_space<vmem>>, vector<1x1x384xf32>
    %9 = vector.shape_cast %8 : vector<1x1x384xf32> to vector<1x384xf32>
    %10 = vector.broadcast %9 : vector<1x384xf32> to vector<256x384xf32>
    %11 = arith.addf %7, %10 : vector<256x384xf32>
    %cst_8 = arith.constant 0.000000e+00 : f32
    %12 = vector.broadcast %cst_8 : f32 to vector<256x128xf32>
    %13 = vector.extract_strided_slice %11 {offsets = [0, 0], sizes = [256, 32], strides = [1, 1]} : vector<256x384xf32> to vector<256x32xf32>
    %14 = vector.shape_cast %13 : vector<256x32xf32> to vector<16x16x32xf32>
    %15 = vector.extract_strided_slice %11 {offsets = [0, 128], sizes = [256, 32], strides = [1, 1]} : vector<256x384xf32> to vector<256x32xf32>
    %16 = vector.shape_cast %15 : vector<256x32xf32> to vector<16x16x32xf32>
    %17 = vector.extract_strided_slice %11 {offsets = [0, 256], sizes = [256, 32], strides = [1, 1]} : vector<256x384xf32> to vector<256x32xf32>
    %18 = vector.shape_cast %17 : vector<256x32xf32> to vector<16x16x32xf32>
    %19 = arith.truncf %14 : vector<16x16x32xf32> to vector<16x16x32xbf16>
    %20 = arith.truncf %16 : vector<16x16x32xf32> to vector<16x16x32xbf16>
    "tpu.trace_start"() <{level = 10 : i32, message = "bqd,bkd->bqk"}> : () -> ()
    %cst_9 = arith.constant dense<0.000000e+00> : vector<16x16x16xf32>
    %21 = tpu.matmul %19, %20, %cst_9 {dimension_numbers = #tpu.dot_dimension_numbers<[2], [2], [1], [1], [0, 0, 0, 1, 1, 1], [0], [0]>} : vector<16x16x32xbf16>, vector<16x16x32xbf16>, vector<16x16x16xf32> -> vector<16x16x16xf32>
    "tpu.trace_stop"() : () -> ()
    %cst_10 = arith.constant dense<0xFF800000> : vector<16x16xf32>
    %22 = vector.multi_reduction <maximumf>, %21, %cst_10 [2] : vector<16x16x16xf32> to vector<16x16xf32>
    %23 = vector.shape_cast %22 : vector<16x16xf32> to vector<16x16x1xf32>
    %24 = vector.broadcast %23 : vector<16x16x1xf32> to vector<16x16x16xf32>
    %25 = arith.subf %21, %24 : vector<16x16x16xf32>
    %26 = math.exp %25 : vector<16x16x16xf32>
    %cst_11 = arith.constant dense<0.000000e+00> : vector<16x16xf32>
    %27 = vector.multi_reduction <add>, %26, %cst_11 [2] : vector<16x16x16xf32> to vector<16x16xf32>
    %28 = vector.shape_cast %27 : vector<16x16xf32> to vector<16x16x1xf32>
    %29 = tpu.reciprocal %28 {approx = true} : vector<16x16x1xf32> -> vector<16x16x1xf32>
    %30 = vector.broadcast %29 : vector<16x16x1xf32> to vector<16x16x16xf32>
    %31 = arith.mulf %26, %30 : vector<16x16x16xf32>
    %32 = arith.truncf %31 : vector<16x16x16xf32> to vector<16x16x16xbf16>
    %33 = arith.truncf %18 : vector<16x16x32xf32> to vector<16x16x32xbf16>
    "tpu.trace_start"() <{level = 10 : i32, message = "bqk,bkd->bqd"}> : () -> ()
    %cst_12 = arith.constant dense<0.000000e+00> : vector<16x16x32xf32>
    %34 = tpu.matmul %32, %33, %cst_12 {dimension_numbers = #tpu.dot_dimension_numbers<[2], [1], [1], [2], [0, 0, 0, 1, 1, 2], [0], [0]>} : vector<16x16x16xbf16>, vector<16x16x32xbf16>, vector<16x16x32xf32> -> vector<16x16x32xf32>
    "tpu.trace_stop"() : () -> ()
    %35 = vector.shape_cast %34 : vector<16x16x32xf32> to vector<256x32xf32>
    %c0_13 = arith.constant 0 : index
    %c0_14 = arith.constant 0 : index
    %c0_15 = arith.constant 0 : index
    %36 = vector.load %arg7[%c0_13, %c0_14, %c0_15] : memref<1x128x128xbf16, #tpu.memory_space<vmem>>, vector<1x32x128xbf16>
    %37 = vector.shape_cast %36 : vector<1x32x128xbf16> to vector<32x128xbf16>
    %38 = arith.truncf %35 : vector<256x32xf32> to vector<256x32xbf16>
    %cst_16 = arith.constant dense<0.000000e+00> : vector<256x128xf32>
    %39 = tpu.matmul %38, %37, %cst_16 {dimension_numbers = #tpu.dot_dimension_numbers<[1], [0], [0], [1], [0, 0, 1, 1], [], []>} : vector<256x32xbf16>, vector<32x128xbf16>, vector<256x128xf32> -> vector<256x128xf32>
    %40 = arith.addf %12, %39 : vector<256x128xf32>
    %41 = vector.extract_strided_slice %11 {offsets = [0, 32], sizes = [256, 32], strides = [1, 1]} : vector<256x384xf32> to vector<256x32xf32>
    %42 = vector.shape_cast %41 : vector<256x32xf32> to vector<16x16x32xf32>
    %43 = vector.extract_strided_slice %11 {offsets = [0, 160], sizes = [256, 32], strides = [1, 1]} : vector<256x384xf32> to vector<256x32xf32>
    %44 = vector.shape_cast %43 : vector<256x32xf32> to vector<16x16x32xf32>
    %45 = vector.extract_strided_slice %11 {offsets = [0, 288], sizes = [256, 32], strides = [1, 1]} : vector<256x384xf32> to vector<256x32xf32>
    %46 = vector.shape_cast %45 : vector<256x32xf32> to vector<16x16x32xf32>
    %47 = arith.truncf %42 : vector<16x16x32xf32> to vector<16x16x32xbf16>
    %48 = arith.truncf %44 : vector<16x16x32xf32> to vector<16x16x32xbf16>
    "tpu.trace_start"() <{level = 10 : i32, message = "bqd,bkd->bqk"}> : () -> ()
    %cst_17 = arith.constant dense<0.000000e+00> : vector<16x16x16xf32>
    %49 = tpu.matmul %47, %48, %cst_17 {dimension_numbers = #tpu.dot_dimension_numbers<[2], [2], [1], [1], [0, 0, 0, 1, 1, 1], [0], [0]>} : vector<16x16x32xbf16>, vector<16x16x32xbf16>, vector<16x16x16xf32> -> vector<16x16x16xf32>
    "tpu.trace_stop"() : () -> ()
    %cst_18 = arith.constant dense<0xFF800000> : vector<16x16xf32>
    %50 = vector.multi_reduction <maximumf>, %49, %cst_18 [2] : vector<16x16x16xf32> to vector<16x16xf32>
    %51 = vector.shape_cast %50 : vector<16x16xf32> to vector<16x16x1xf32>
    %52 = vector.broadcast %51 : vector<16x16x1xf32> to vector<16x16x16xf32>
    %53 = arith.subf %49, %52 : vector<16x16x16xf32>
    %54 = math.exp %53 : vector<16x16x16xf32>
    %cst_19 = arith.constant dense<0.000000e+00> : vector<16x16xf32>
    %55 = vector.multi_reduction <add>, %54, %cst_19 [2] : vector<16x16x16xf32> to vector<16x16xf32>
    %56 = vector.shape_cast %55 : vector<16x16xf32> to vector<16x16x1xf32>
    %57 = tpu.reciprocal %56 {approx = true} : vector<16x16x1xf32> -> vector<16x16x1xf32>
    %58 = vector.broadcast %57 : vector<16x16x1xf32> to vector<16x16x16xf32>
    %59 = arith.mulf %54, %58 : vector<16x16x16xf32>
    %60 = arith.truncf %59 : vector<16x16x16xf32> to vector<16x16x16xbf16>
    %61 = arith.truncf %46 : vector<16x16x32xf32> to vector<16x16x32xbf16>
    "tpu.trace_start"() <{level = 10 : i32, message = "bqk,bkd->bqd"}> : () -> ()
    %cst_20 = arith.constant dense<0.000000e+00> : vector<16x16x32xf32>
    %62 = tpu.matmul %60, %61, %cst_20 {dimension_numbers = #tpu.dot_dimension_numbers<[2], [1], [1], [2], [0, 0, 0, 1, 1, 2], [0], [0]>} : vector<16x16x16xbf16>, vector<16x16x32xbf16>, vector<16x16x32xf32> -> vector<16x16x32xf32>
    "tpu.trace_stop"() : () -> ()
    %63 = vector.shape_cast %62 : vector<16x16x32xf32> to vector<256x32xf32>
    %c0_21 = arith.constant 0 : index
    %c32 = arith.constant 32 : index
    %c0_22 = arith.constant 0 : index
    %64 = vector.load %arg7[%c0_21, %c32, %c0_22] : memref<1x128x128xbf16, #tpu.memory_space<vmem>>, vector<1x32x128xbf16>
    %65 = vector.shape_cast %64 : vector<1x32x128xbf16> to vector<32x128xbf16>
    %66 = arith.truncf %63 : vector<256x32xf32> to vector<256x32xbf16>
    %cst_23 = arith.constant dense<0.000000e+00> : vector<256x128xf32>
    %67 = tpu.matmul %66, %65, %cst_23 {dimension_numbers = #tpu.dot_dimension_numbers<[1], [0], [0], [1], [0, 0, 1, 1], [], []>} : vector<256x32xbf16>, vector<32x128xbf16>, vector<256x128xf32> -> vector<256x128xf32>
    %68 = arith.addf %40, %67 : vector<256x128xf32>
    %69 = vector.extract_strided_slice %11 {offsets = [0, 64], sizes = [256, 32], strides = [1, 1]} : vector<256x384xf32> to vector<256x32xf32>
    %70 = vector.shape_cast %69 : vector<256x32xf32> to vector<16x16x32xf32>
    %71 = vector.extract_strided_slice %11 {offsets = [0, 192], sizes = [256, 32], strides = [1, 1]} : vector<256x384xf32> to vector<256x32xf32>
    %72 = vector.shape_cast %71 : vector<256x32xf32> to vector<16x16x32xf32>
    %73 = vector.extract_strided_slice %11 {offsets = [0, 320], sizes = [256, 32], strides = [1, 1]} : vector<256x384xf32> to vector<256x32xf32>
    %74 = vector.shape_cast %73 : vector<256x32xf32> to vector<16x16x32xf32>
    %75 = arith.truncf %70 : vector<16x16x32xf32> to vector<16x16x32xbf16>
    %76 = arith.truncf %72 : vector<16x16x32xf32> to vector<16x16x32xbf16>
    "tpu.trace_start"() <{level = 10 : i32, message = "bqd,bkd->bqk"}> : () -> ()
    %cst_24 = arith.constant dense<0.000000e+00> : vector<16x16x16xf32>
    %77 = tpu.matmul %75, %76, %cst_24 {dimension_numbers = #tpu.dot_dimension_numbers<[2], [2], [1], [1], [0, 0, 0, 1, 1, 1], [0], [0]>} : vector<16x16x32xbf16>, vector<16x16x32xbf16>, vector<16x16x16xf32> -> vector<16x16x16xf32>
    "tpu.trace_stop"() : () -> ()
    %cst_25 = arith.constant dense<0xFF800000> : vector<16x16xf32>
    %78 = vector.multi_reduction <maximumf>, %77, %cst_25 [2] : vector<16x16x16xf32> to vector<16x16xf32>
    %79 = vector.shape_cast %78 : vector<16x16xf32> to vector<16x16x1xf32>
    %80 = vector.broadcast %79 : vector<16x16x1xf32> to vector<16x16x16xf32>
    %81 = arith.subf %77, %80 : vector<16x16x16xf32>
    %82 = math.exp %81 : vector<16x16x16xf32>
    %cst_26 = arith.constant dense<0.000000e+00> : vector<16x16xf32>
    %83 = vector.multi_reduction <add>, %82, %cst_26 [2] : vector<16x16x16xf32> to vector<16x16xf32>
    %84 = vector.shape_cast %83 : vector<16x16xf32> to vector<16x16x1xf32>
    %85 = tpu.reciprocal %84 {approx = true} : vector<16x16x1xf32> -> vector<16x16x1xf32>
    %86 = vector.broadcast %85 : vector<16x16x1xf32> to vector<16x16x16xf32>
    %87 = arith.mulf %82, %86 : vector<16x16x16xf32>
    %88 = arith.truncf %87 : vector<16x16x16xf32> to vector<16x16x16xbf16>
    %89 = arith.truncf %74 : vector<16x16x32xf32> to vector<16x16x32xbf16>
    "tpu.trace_start"() <{level = 10 : i32, message = "bqk,bkd->bqd"}> : () -> ()
    %cst_27 = arith.constant dense<0.000000e+00> : vector<16x16x32xf32>
    %90 = tpu.matmul %88, %89, %cst_27 {dimension_numbers = #tpu.dot_dimension_numbers<[2], [1], [1], [2], [0, 0, 0, 1, 1, 2], [0], [0]>} : vector<16x16x16xbf16>, vector<16x16x32xbf16>, vector<16x16x32xf32> -> vector<16x16x32xf32>
    "tpu.trace_stop"() : () -> ()
    %91 = vector.shape_cast %90 : vector<16x16x32xf32> to vector<256x32xf32>
    %c0_28 = arith.constant 0 : index
    %c64 = arith.constant 64 : index
    %c0_29 = arith.constant 0 : index
    %92 = vector.load %arg7[%c0_28, %c64, %c0_29] : memref<1x128x128xbf16, #tpu.memory_space<vmem>>, vector<1x32x128xbf16>
    %93 = vector.shape_cast %92 : vector<1x32x128xbf16> to vector<32x128xbf16>
    %94 = arith.truncf %91 : vector<256x32xf32> to vector<256x32xbf16>
    %cst_30 = arith.constant dense<0.000000e+00> : vector<256x128xf32>
    %95 = tpu.matmul %94, %93, %cst_30 {dimension_numbers = #tpu.dot_dimension_numbers<[1], [0], [0], [1], [0, 0, 1, 1], [], []>} : vector<256x32xbf16>, vector<32x128xbf16>, vector<256x128xf32> -> vector<256x128xf32>
    %96 = arith.addf %68, %95 : vector<256x128xf32>
    %97 = vector.extract_strided_slice %11 {offsets = [0, 96], sizes = [256, 32], strides = [1, 1]} : vector<256x384xf32> to vector<256x32xf32>
    %98 = vector.shape_cast %97 : vector<256x32xf32> to vector<16x16x32xf32>
    %99 = vector.extract_strided_slice %11 {offsets = [0, 224], sizes = [256, 32], strides = [1, 1]} : vector<256x384xf32> to vector<256x32xf32>
    %100 = vector.shape_cast %99 : vector<256x32xf32> to vector<16x16x32xf32>
    %101 = vector.extract_strided_slice %11 {offsets = [0, 352], sizes = [256, 32], strides = [1, 1]} : vector<256x384xf32> to vector<256x32xf32>
    %102 = vector.shape_cast %101 : vector<256x32xf32> to vector<16x16x32xf32>
    %103 = arith.truncf %98 : vector<16x16x32xf32> to vector<16x16x32xbf16>
    %104 = arith.truncf %100 : vector<16x16x32xf32> to vector<16x16x32xbf16>
    "tpu.trace_start"() <{level = 10 : i32, message = "bqd,bkd->bqk"}> : () -> ()
    %cst_31 = arith.constant dense<0.000000e+00> : vector<16x16x16xf32>
    %105 = tpu.matmul %103, %104, %cst_31 {dimension_numbers = #tpu.dot_dimension_numbers<[2], [2], [1], [1], [0, 0, 0, 1, 1, 1], [0], [0]>} : vector<16x16x32xbf16>, vector<16x16x32xbf16>, vector<16x16x16xf32> -> vector<16x16x16xf32>
    "tpu.trace_stop"() : () -> ()
    %cst_32 = arith.constant dense<0xFF800000> : vector<16x16xf32>
    %106 = vector.multi_reduction <maximumf>, %105, %cst_32 [2] : vector<16x16x16xf32> to vector<16x16xf32>
    %107 = vector.shape_cast %106 : vector<16x16xf32> to vector<16x16x1xf32>
    %108 = vector.broadcast %107 : vector<16x16x1xf32> to vector<16x16x16xf32>
    %109 = arith.subf %105, %108 : vector<16x16x16xf32>
    %110 = math.exp %109 : vector<16x16x16xf32>
    %cst_33 = arith.constant dense<0.000000e+00> : vector<16x16xf32>
    %111 = vector.multi_reduction <add>, %110, %cst_33 [2] : vector<16x16x16xf32> to vector<16x16xf32>
    %112 = vector.shape_cast %111 : vector<16x16xf32> to vector<16x16x1xf32>
    %113 = tpu.reciprocal %112 {approx = true} : vector<16x16x1xf32> -> vector<16x16x1xf32>
    %114 = vector.broadcast %113 : vector<16x16x1xf32> to vector<16x16x16xf32>
    %115 = arith.mulf %110, %114 : vector<16x16x16xf32>
    %116 = arith.truncf %115 : vector<16x16x16xf32> to vector<16x16x16xbf16>
    %117 = arith.truncf %102 : vector<16x16x32xf32> to vector<16x16x32xbf16>
    "tpu.trace_start"() <{level = 10 : i32, message = "bqk,bkd->bqd"}> : () -> ()
    %cst_34 = arith.constant dense<0.000000e+00> : vector<16x16x32xf32>
    %118 = tpu.matmul %116, %117, %cst_34 {dimension_numbers = #tpu.dot_dimension_numbers<[2], [1], [1], [2], [0, 0, 0, 1, 1, 2], [0], [0]>} : vector<16x16x16xbf16>, vector<16x16x32xbf16>, vector<16x16x32xf32> -> vector<16x16x32xf32>
    "tpu.trace_stop"() : () -> ()
    %119 = vector.shape_cast %118 : vector<16x16x32xf32> to vector<256x32xf32>
    %c0_35 = arith.constant 0 : index
    %c96 = arith.constant 96 : index
    %c0_36 = arith.constant 0 : index
    %120 = vector.load %arg7[%c0_35, %c96, %c0_36] : memref<1x128x128xbf16, #tpu.memory_space<vmem>>, vector<1x32x128xbf16>
    %121 = vector.shape_cast %120 : vector<1x32x128xbf16> to vector<32x128xbf16>
    %122 = arith.truncf %119 : vector<256x32xf32> to vector<256x32xbf16>
    %cst_37 = arith.constant dense<0.000000e+00> : vector<256x128xf32>
    %123 = tpu.matmul %122, %121, %cst_37 {dimension_numbers = #tpu.dot_dimension_numbers<[1], [0], [0], [1], [0, 0, 1, 1], [], []>} : vector<256x32xbf16>, vector<32x128xbf16>, vector<256x128xf32> -> vector<256x128xf32>
    %124 = arith.addf %96, %123 : vector<256x128xf32>
    %c0_38 = arith.constant 0 : index
    %c0_39 = arith.constant 0 : index
    %c0_40 = arith.constant 0 : index
    %125 = vector.load %arg8[%c0_38, %c0_39, %c0_40] : memref<1x1x128xf32, #tpu.memory_space<vmem>>, vector<1x1x128xf32>
    %126 = vector.shape_cast %125 : vector<1x1x128xf32> to vector<1x128xf32>
    %127 = vector.broadcast %126 : vector<1x128xf32> to vector<256x128xf32>
    %128 = arith.addf %124, %127 : vector<256x128xf32>
    %129 = arith.addf %3, %128 : vector<256x128xf32>
    %c0_41 = arith.constant 0 : index
    %c0_42 = arith.constant 0 : index
    %c0_43 = arith.constant 0 : index
    %130 = vector.load %arg9[%c0_41, %c0_42, %c0_43] : memref<1x1x128xf32, #tpu.memory_space<vmem>>, vector<1x1x128xf32>
    %131 = vector.shape_cast %130 : vector<1x1x128xf32> to vector<1x128xf32>
    %132 = vector.broadcast %131 : vector<1x128xf32> to vector<256x128xf32>
    %133 = arith.mulf %129, %132 : vector<256x128xf32>
    %c0_44 = arith.constant 0 : index
    %c0_45 = arith.constant 0 : index
    %c0_46 = arith.constant 0 : index
    %134 = vector.load %arg10[%c0_44, %c0_45, %c0_46] : memref<1x1x128xf32, #tpu.memory_space<vmem>>, vector<1x1x128xf32>
    %135 = vector.shape_cast %134 : vector<1x1x128xf32> to vector<1x128xf32>
    %136 = vector.broadcast %135 : vector<1x128xf32> to vector<256x128xf32>
    %137 = arith.addf %133, %136 : vector<256x128xf32>
    %c0_47 = arith.constant 0 : index
    %c0_48 = arith.constant 0 : index
    %c0_49 = arith.constant 0 : index
    %138 = vector.load %arg11[%c0_47, %c0_48, %c0_49] : memref<1x128x256xbf16, #tpu.memory_space<vmem>>, vector<1x128x256xbf16>
    %139 = vector.shape_cast %138 : vector<1x128x256xbf16> to vector<128x256xbf16>
    %140 = arith.truncf %137 : vector<256x128xf32> to vector<256x128xbf16>
    %cst_50 = arith.constant dense<0.000000e+00> : vector<256x256xf32>
    %141 = tpu.matmul %140, %139, %cst_50 {dimension_numbers = #tpu.dot_dimension_numbers<[1], [0], [0], [1], [0, 0, 1, 1], [], []>} : vector<256x128xbf16>, vector<128x256xbf16>, vector<256x256xf32> -> vector<256x256xf32>
    %c0_51 = arith.constant 0 : index
    %c0_52 = arith.constant 0 : index
    %c0_53 = arith.constant 0 : index
    %142 = vector.load %arg12[%c0_51, %c0_52, %c0_53] : memref<1x1x256xf32, #tpu.memory_space<vmem>>, vector<1x1x256xf32>
    %143 = vector.shape_cast %142 : vector<1x1x256xf32> to vector<1x256xf32>
    %144 = vector.broadcast %143 : vector<1x256xf32> to vector<256x256xf32>
    %145 = arith.addf %141, %144 : vector<256x256xf32>
    %cst_54 = arith.constant 0.000000e+00 : f32
    %146 = vector.broadcast %cst_54 : f32 to vector<256x256xf32>
    %147 = arith.maximumf %145, %146 : vector<256x256xf32>
    %c0_55 = arith.constant 0 : index
    %c0_56 = arith.constant 0 : index
    %c0_57 = arith.constant 0 : index
    %148 = vector.load %arg13[%c0_55, %c0_56, %c0_57] : memref<1x256x128xbf16, #tpu.memory_space<vmem>>, vector<1x256x128xbf16>
    %149 = vector.shape_cast %148 : vector<1x256x128xbf16> to vector<256x128xbf16>
    %150 = arith.truncf %147 : vector<256x256xf32> to vector<256x256xbf16>
    %cst_58 = arith.constant dense<0.000000e+00> : vector<256x128xf32>
    %151 = tpu.matmul %150, %149, %cst_58 {dimension_numbers = #tpu.dot_dimension_numbers<[1], [0], [0], [1], [0, 0, 1, 1], [], []>} : vector<256x256xbf16>, vector<256x128xbf16>, vector<256x128xf32> -> vector<256x128xf32>
    %c0_59 = arith.constant 0 : index
    %c0_60 = arith.constant 0 : index
    %c0_61 = arith.constant 0 : index
    %152 = vector.load %arg14[%c0_59, %c0_60, %c0_61] : memref<1x1x128xf32, #tpu.memory_space<vmem>>, vector<1x1x128xf32>
    %153 = vector.shape_cast %152 : vector<1x1x128xf32> to vector<1x128xf32>
    %154 = vector.broadcast %153 : vector<1x128xf32> to vector<256x128xf32>
    %155 = arith.addf %151, %154 : vector<256x128xf32>
    %156 = arith.addf %137, %155 : vector<256x128xf32>
    %c0_62 = arith.constant 0 : index
    %c0_63 = arith.constant 0 : index
    %c0_64 = arith.constant 0 : index
    %157 = vector.load %arg15[%c0_62, %c0_63, %c0_64] : memref<1x1x128xf32, #tpu.memory_space<vmem>>, vector<1x1x128xf32>
    %158 = vector.shape_cast %157 : vector<1x1x128xf32> to vector<1x128xf32>
    %159 = vector.broadcast %158 : vector<1x128xf32> to vector<256x128xf32>
    %160 = arith.mulf %156, %159 : vector<256x128xf32>
    %c0_65 = arith.constant 0 : index
    %c0_66 = arith.constant 0 : index
    %c0_67 = arith.constant 0 : index
    %161 = vector.load %arg16[%c0_65, %c0_66, %c0_67] : memref<1x1x128xf32, #tpu.memory_space<vmem>>, vector<1x1x128xf32>
    %162 = vector.shape_cast %161 : vector<1x1x128xf32> to vector<1x128xf32>
    %163 = vector.broadcast %162 : vector<1x128xf32> to vector<256x128xf32>
    %164 = arith.addf %160, %163 : vector<256x128xf32>
    %c0_68 = arith.constant 0 : index
    %c0_69 = arith.constant 0 : index
    %165 = vector.load %arg20[%c0_68, %c0_69] : memref<256x128xf32, #tpu.memory_space<vmem>>, vector<256x128xf32>
    tpu.vector_store %arg20[%c0_68, %c0_69], %164 {strides = array<i32>} : memref<256x128xf32, #tpu.memory_space<vmem>>, vector<256x128xf32>,
    %c1_i32 = arith.constant 1 : i32
    %166 = arith.cmpi eq, %arg1, %c1_i32 : i32
    %167 = arith.extui %166 : i1 to i32
    %c0_i32_70 = arith.constant 0 : i32
    %168 = arith.cmpi ne, %167, %c0_i32_70 : i32
    scf.if %168 {
      %c0_71 = arith.constant 0 : index
      %c0_72 = arith.constant 0 : index
      %169 = vector.load %arg17[%c0_71, %c0_72] : memref<128x128xbf16, #tpu.memory_space<vmem>>, vector<128x128xbf16>
      %170 = arith.truncf %164 : vector<256x128xf32> to vector<256x128xbf16>
      %cst_73 = arith.constant dense<0.000000e+00> : vector<256x128xf32>
      %171 = tpu.matmul %170, %169, %cst_73 {dimension_numbers = #tpu.dot_dimension_numbers<[1], [0], [0], [1], [0, 0, 1, 1], [], []>} : vector<256x128xbf16>, vector<128x128xbf16>, vector<256x128xf32> -> vector<256x128xf32>
      %c0_74 = arith.constant 0 : index
      %c0_75 = arith.constant 0 : index
      %172 = vector.load %arg18[%c0_74, %c0_75] : memref<1x128xf32, #tpu.memory_space<vmem>>, vector<1x128xf32>
      %173 = vector.broadcast %172 : vector<1x128xf32> to vector<256x128xf32>
      %174 = arith.addf %171, %173 : vector<256x128xf32>
      %175 = vector.shape_cast %174 : vector<256x128xf32> to vector<16x16x128xf32>
      %c0_76 = arith.constant 0 : index
      %c0_77 = arith.constant 0 : index
      %c0_78 = arith.constant 0 : index
      %176 = vector.load %arg19[%c0_76, %c0_77, %c0_78] : memref<16x16x128xf32, #tpu.memory_space<vmem>>, vector<16x16x128xf32>
      tpu.vector_store %arg19[%c0_76, %c0_77, %c0_78], %175 {strides = array<i32>} : memref<16x16x128xf32, #tpu.memory_space<vmem>>, vector<16x16x128xf32>,
    } else {
    }
    return
  }
  func.func @transform_0(%arg0: i32, %arg1: i32) -> (i32, i32, i32) {
    %c0_i32 = arith.constant 0 : i32
    %c0_i32_0 = arith.constant 0 : i32
    %c0_i32_1 = arith.constant 0 : i32
    return %arg0, %c0_i32, %c0_i32_0 : i32, i32, i32
  }
  func.func @transform_1(%arg0: i32, %arg1: i32) -> (i32, i32) {
    %c0_i32 = arith.constant 0 : i32
    %c0_i32_0 = arith.constant 0 : i32
    %c0_i32_1 = arith.constant 0 : i32
    return %c0_i32, %c0_i32_0 : i32, i32
  }
  func.func @transform_2(%arg0: i32, %arg1: i32) -> (i32, i32) {
    %c0_i32 = arith.constant 0 : i32
    %c0_i32_0 = arith.constant 0 : i32
    %c0_i32_1 = arith.constant 0 : i32
    return %c0_i32, %c0_i32_0 : i32, i32
  }
  func.func @transform_3(%arg0: i32, %arg1: i32) -> (i32, i32, i32) {
    %c0_i32 = arith.constant 0 : i32
    %c0_i32_0 = arith.constant 0 : i32
    %c0_i32_1 = arith.constant 0 : i32
    return %arg1, %c0_i32, %c0_i32_0 : i32, i32, i32
  }
  func.func @transform_4(%arg0: i32, %arg1: i32) -> (i32, i32, i32) {
    %c0_i32 = arith.constant 0 : i32
    %c0_i32_0 = arith.constant 0 : i32
    %c0_i32_1 = arith.constant 0 : i32
    return %arg1, %c0_i32, %c0_i32_0 : i32, i32, i32
  }
  func.func @transform_5(%arg0: i32, %arg1: i32) -> (i32, i32, i32) {
    %c0_i32 = arith.constant 0 : i32
    %c0_i32_0 = arith.constant 0 : i32
    %c0_i32_1 = arith.constant 0 : i32
    return %arg1, %c0_i32, %c0_i32_0 : i32, i32, i32
  }
  func.func @transform_6(%arg0: i32, %arg1: i32) -> (i32, i32, i32) {
    %c0_i32 = arith.constant 0 : i32
    %c0_i32_0 = arith.constant 0 : i32
    %c0_i32_1 = arith.constant 0 : i32
    return %arg1, %c0_i32, %c0_i32_0 : i32, i32, i32
  }
  func.func @transform_7(%arg0: i32, %arg1: i32) -> (i32, i32, i32) {
    %c0_i32 = arith.constant 0 : i32
    %c0_i32_0 = arith.constant 0 : i32
    %c0_i32_1 = arith.constant 0 : i32
    return %arg1, %c0_i32, %c0_i32_0 : i32, i32, i32
  }
  func.func @transform_8(%arg0: i32, %arg1: i32) -> (i32, i32, i32) {
    %c0_i32 = arith.constant 0 : i32
    %c0_i32_0 = arith.constant 0 : i32
    %c0_i32_1 = arith.constant 0 : i32
    return %arg1, %c0_i32, %c0_i32_0 : i32, i32, i32
  }
  func.func @transform_9(%arg0: i32, %arg1: i32) -> (i32, i32, i32) {
    %c0_i32 = arith.constant 0 : i32
    %c0_i32_0 = arith.constant 0 : i32
    %c0_i32_1 = arith.constant 0 : i32
    return %arg1, %c0_i32, %c0_i32_0 : i32, i32, i32
  }
  func.func @transform_10(%arg0: i32, %arg1: i32) -> (i32, i32, i32) {
    %c0_i32 = arith.constant 0 : i32
    %c0_i32_0 = arith.constant 0 : i32
    %c0_i32_1 = arith.constant 0 : i32
    return %arg1, %c0_i32, %c0_i32_0 : i32, i32, i32
  }
  func.func @transform_11(%arg0: i32, %arg1: i32) -> (i32, i32, i32) {
    %c0_i32 = arith.constant 0 : i32
    %c0_i32_0 = arith.constant 0 : i32
    %c0_i32_1 = arith.constant 0 : i32
    return %arg1, %c0_i32, %c0_i32_0 : i32, i32, i32
  }
  func.func @transform_12(%arg0: i32, %arg1: i32) -> (i32, i32, i32) {
    %c0_i32 = arith.constant 0 : i32
    %c0_i32_0 = arith.constant 0 : i32
    %c0_i32_1 = arith.constant 0 : i32
    return %arg1, %c0_i32, %c0_i32_0 : i32, i32, i32
  }
  func.func @transform_13(%arg0: i32, %arg1: i32) -> (i32, i32, i32) {
    %c0_i32 = arith.constant 0 : i32
    %c0_i32_0 = arith.constant 0 : i32
    %c0_i32_1 = arith.constant 0 : i32
    return %arg1, %c0_i32, %c0_i32_0 : i32, i32, i32
  }
  func.func @transform_14(%arg0: i32, %arg1: i32) -> (i32, i32, i32) {
    %c0_i32 = arith.constant 0 : i32
    %c0_i32_0 = arith.constant 0 : i32
    %c0_i32_1 = arith.constant 0 : i32
    return %arg1, %c0_i32, %c0_i32_0 : i32, i32, i32
  }
  func.func @transform_15(%arg0: i32, %arg1: i32) -> (i32, i32) {
    %c0_i32 = arith.constant 0 : i32
    %c0_i32_0 = arith.constant 0 : i32
    %c0_i32_1 = arith.constant 0 : i32
    return %c0_i32, %c0_i32_0 : i32, i32
  }
  func.func @transform_16(%arg0: i32, %arg1: i32) -> (i32, i32) {
    %c0_i32 = arith.constant 0 : i32
    %c0_i32_0 = arith.constant 0 : i32
    %c0_i32_1 = arith.constant 0 : i32
    return %c0_i32, %c0_i32_0 : i32, i32
  }
  func.func @transform_17(%arg0: i32, %arg1: i32) -> (i32, i32, i32) {
    %c0_i32 = arith.constant 0 : i32
    %c0_i32_0 = arith.constant 0 : i32
    %c0_i32_1 = arith.constant 0 : i32
    return %arg0, %c0_i32, %c0_i32_0 : i32, i32, i32
  }
}

</mosaic_0001>

<bundles_post_ra>
// kernel: tpu_custom_call.1
= control target key start
LH: loop header
LB: loop body
LE: loop exit
PB: predicated region body
PF: predicated region fallthrough
CT: control target
= control target key end

     0   :  { %s19601_s0 = inlined_call_operand.vmem [shape: f32[32,16,8], index: 0, kind: input, shape index: {}]   ;;  %s19602_s1 = inlined_call_operand.vmem [shape: bf16[8,128], index: 1, kind: input, shape index: {}]   ;;  %s19603_s2 = inlined_call_operand.vmem [shape: f32[256,128], index: 2, kind: input, shape index: {}]   ;;  %s19604_s3 = inlined_call_operand.vmem [shape: bf16[2,128,384], index: 3, kind: input, shape index: {}]   ;;  %s19605_s4 = inlined_call_operand.vmem [shape: f32[2,1,384], index: 4, kind: input, shape index: {}]   ;;  %s19606_s5 = inlined_call_operand.hbm [shape: bf16[2,128,128], index: 5, kind: input, shape index: {}]   ;;  %s19607_s6 = inlined_call_operand.vmem [shape: f32[2,1,128], index: 6, kind: input, shape index: {}]   ;;  %s19608_s7 = inlined_call_operand.vmem [shape: f32[2,1,128], index: 7, kind: input, shape index: {}]   ;;  %s19609_s8 = inlined_call_operand.vmem [shape: f32[2,1,128], index: 8, kind: input, shape index: {}]   ;;  %s19610_s9 = inlined_call_operand.hbm [shape: bf16[2,128,256], index: 9, kind: input, shape index: {}]   ;;  %s19611_s10 = inlined_call_operand.vmem [shape: f32[2,1,256], index: 10, kind: input, shape index: {}]   ;;  %s19612_s11 = inlined_call_operand.hbm [shape: bf16[2,256,128], index: 11, kind: input, shape index: {}]   ;;  %s19613_s12 = inlined_call_operand.vmem [shape: f32[2,1,128], index: 12, kind: input, shape index: {}]   ;;  %s19614_s13 = inlined_call_operand.vmem [shape: f32[2,1,128], index: 13, kind: input, shape index: {}]   ;;  %s19615_s14 = inlined_call_operand.vmem [shape: f32[2,1,128], index: 14, kind: input, shape index: {}]   ;;  %s19616_s15 = inlined_call_operand.hbm [shape: bf16[128,128], index: 15, kind: input, shape index: {}]   ;;  %s19617_s16 = inlined_call_operand.vmem [shape: f32[1,128], index: 16, kind: input, shape index: {}]   ;;  %s19618_s17 = inlined_call_operand.hbm [shape: f32[32,16,128], index: 17, kind: output, shape index: {}]  }
   0x1   :  { %19799 = sst [smem:[#allocation142_spill]] %s19601_s0 }
   0x2   :  { %19800 = sst [smem:[#allocation143_spill]] %s19602_s1 }
   0x3   :  { %19801 = sst [smem:[#allocation144_spill]] %s19603_s2 }
   0x4   :  { %19802 = sst [smem:[#allocation145_spill]] %s19604_s3 }
   0x5   :  { %19803 = sst [smem:[#allocation146_spill]] %s19605_s4 }
   0x6   :  { %19804 = sst [smem:[#allocation147_spill]] %s19606_s5 }
   0x7   :  { %19805 = sst [smem:[#allocation148_spill]] %s19607_s6 }
   0x8   :  { %19806 = sst [smem:[#allocation149_spill]] %s19608_s7 }
   0x9   :  { %19807 = sst [smem:[#allocation150_spill]] %s19609_s8 }
   0xa   :  { %19808 = sst [smem:[#allocation151_spill]] %s19610_s9 }
   0xb   :  { %19809 = sst [smem:[#allocation152_spill]] %s19611_s10 }
   0xc   :  { %19810 = sst [smem:[#allocation153_spill]] %s19612_s11 }
   0xd   :  { %19811 = sst [smem:[#allocation154_spill]] %s19613_s12 }
   0xe   :  { %19812 = sst [smem:[#allocation155_spill]] %s19614_s13 }
   0xf   :  { %19813 = sst [smem:[#allocation156_spill]] %s19615_s14 }
  0x10   :  { %19814 = sst [smem:[#allocation157_spill]] %s19616_s15 }
  0x11   :  { %19815 = sst [smem:[#allocation158_spill]] %s19617_s16 }
  0x12   :  { %19816 = sst [smem:[#allocation159_spill]] %s19618_s17 }
  0x13   :  { %22 = vsyncpa [#allocation4], 0 }
  0x14   :  { %24 = vsyncpa [#allocation4 + $0x1], 0 }
  0x15   :  { %25 = vsyncpa [#allocation7], 0 }
  0x16   :  { %27 = vsyncpa [#allocation7 + $0x1], 0 }
  0x17   :  { %28 = vsyncpa [#allocation10], 0 }
  0x18   :  { %29 = vsyncpa [#allocation5], 0 }
  0x19   :  { %31 = vsyncpa [#allocation5 + $0x1], 0  ;;  %s15161_s24 = smov 0   ;;  %s15163_s25 = smov 0  }
  0x1a   :  { %s15165_s26 = smov 0   ;;  %s15167_s27 = smov 0  }
  0x1b   :  { %s15169_s28 = smov 0   ;;  %s15171_s29 = smov 0  }
  0x1c   :  { %s15173_s0 = smov 0   ;;  %s15175_s30 = smov 0  }
  0x1d   :  { %s15177_s18 = smov 0   ;;  %s15179_s19 = smov 0  }
  0x1e   :  { %s15181_s1 = smov 0  }
  0x1f LB: > { %19817 = sst [smem:[#allocation16_spill]] %s15012_s24  ;;  %s46_s20 = sadd.s32 1, %s15044_s18  ;;  %s15052_s1 = sphi %s15181_s1, %s37_s1   ;;  %s15048_s19 = sphi %s15179_s19, %s20234_s19   ;;  %s15044_s18 = sphi %s15177_s18, %s20233_s18   ;;  %s15040_s30 = sphi %s15175_s30, %s20232_s30   ;;  %s15036_s0 = sphi %s15173_s0, %s20231_s0   ;;  %s15032_s29 = sphi %s15171_s29, %s20230_s29   ;;  %s15028_s28 = sphi %s15169_s28, %s20229_s28   ;;  %s15024_s27 = sphi %s15167_s27, %s20228_s27   ;;  %s15020_s26 = sphi %s15165_s26, %s20227_s26   ;;  %s15016_s25 = sphi %s15163_s25, %s20226_s25   ;;  %s15012_s24 = sphi %s15161_s24, %s20225_s24  }
  0x20   : > { %19818 = sst [smem:[#allocation17_spill]] %s15016_s25  ;;  %s49_s21 = sadd.s32 1, %s15048_s19 }
  0x21   : > { %19819 = sst [smem:[#allocation18_spill]] %s15020_s26  ;;  %p47_p0 = scmp.ge.s32.totalorder %s46_s20, 2 }
  0x22   : > { %19820 = sst [smem:[#allocation19_spill]] %s15028_s28  ;;  %s176_s22 = sadd.s32 1, %s15032_s29 }
  0x23   : > { %19821 = sst [smem:[#allocation20_spill]] %s15032_s29  ;;  %p183_p1 = scmp.ne.s32.totalorder %s15032_s29, %s15028_s28 }
  0x24   : > { %19822 = sst [smem:[#allocation21_spill]] %s15036_s0  ;;  %p184_p2 = scmp.eq.s32.totalorder %s15052_s1, 0 }
  0x25   : > { %19823 = sst [smem:[#allocation22_spill]] %s15044_s18  ;;  %s20236_s20 = smov (%p47_p0, %s46_s20), 0 }
  0x26   : > { %19824 = sst [smem:[#allocation23_spill]] %s15048_s19  ;;  %s20238_s21 = smov (!%p47_p0, %s49_s21), %s15048_s19 }
  0x27   : > { %19825 = sst [smem:[#allocation24_spill]] %s15052_s1  ;;  %s173_s23 = ssub.s32 %s15044_s18, %s20236_s20 }
  0x28   : > { %19826 = sst [smem:[#allocation25_spill]] %s20236_s20  ;;  %p185_p3 = por %p184_p2, %p183_p1 }
  0x29   : > { %p51_p4 = scmp.ge.s32.totalorder %s20238_s21, 2  ;;  %p174_p5 = scmp.eq.s32.totalorder %s173_s23, 0 }
  0x2a   : > { %p14068_p6 = scmp.lt.s32.totalorder %s15052_s1, 4  ;;  %s15234_s16 = sand.u32 1, %s15032_s29  }
  0x2b   : > { %s20240_s21 = smov (%p51_p4, %s20238_s21), 0  ;;  %s601_s14 = sand.u32 1, %s15052_s1  }
  0x2c   : > { %19827 = sst [smem:[#allocation26_spill]] %s20240_s21  ;;  %p15236_p7 = pnand %p14068_p6, %p185_p3 }
  0x2d   : > { %s15231_s17 = scalar_select %p174_p5, %s15032_s29, %s176_s22  }
  0x2e   : > { %s19829_s2 = scalar_select %p15236_p7, 1, 0 }
  0x2f   : > { %19828 = sst [smem:[#allocation27_spill]] %s15231_s17  ;;  %s19623_s13 = sshll.u32 %s15234_s16, 7 }
  0x30   : > { %s19624_s20 = sshll.u32 %s15044_s18, 11  ;;  %s605_s10 = scalar_lea.vmem [#allocation6], %s19623_s13 }
  0x31   : > { %s612_s23 = sshll.u32 %s605_s10, 4  ;;  %s19830_s9 = sld [smem:[#allocation151_spill]]  ;;  %s15252_s23 = int_to_ptr.vmem [resolvable:$true] %s612_s23 }
  0x32   : > { %s15254_s17 = scalar_lea.sflag [#allocation7], %s601_s14  ;;  %p15260_p9 = pneg %p15236_p7 }
  0x34   : > { %s19831_s13 = scalar_select %p15260_p9, 1, 0 }
  0x37   : > { %s15250_s22 = scalar_lea.hbm %s19830_s9, %s19624_s20  ;;  %s14809_s12 = scalar_lea.hbm %s19830_s9, 4096 }
  0x38   : > { %s14804_s29 = scalar_lea.hbm %s15250_s22, 2048  ;;  %p14810_p12 = scmp.lt.u32.totalorder %s15250_s22, %s19830_s9 }
  0x39   : > { %p14805_p8 = scmp.ne.s32.totalorder %s15250_s22, %s14804_s29  ;;  %p14811_p13 = scmp.lt.u32.totalorder %s14809_s12, %s14804_s29 }
  0x3a   : > { %p14813_p1 = scmp.lt.u32.totalorder %s14804_s29, %s15250_s22 }
  0x3b   : > { %p14807_p10 = pnand %p15260_p9, %p14805_p8  ;;  %p14812_p0 = por %p14811_p13, %p14810_p12 }
  0x3d   : > { %p14808_p11 = pneg %p14807_p10  ;;  %p14814_p2 = por %p14813_p1, %p14812_p0 }
  0x3f   : > { %p14815_p3 = pnand %p14814_p2, %p14808_p11 }
  0x41   : > { %14818 = shalt.err (!%p14815_p3)
}
  0x42   : > { %s14819_s14 = scalar_lea.vmem %s15252_s23, 2048  ;;  %s15054_s8 = smov [#allocation6]  }
  0x43   : > { %p14820_p4 = scmp.ne.s32.totalorder %s15252_s23, %s14819_s14  ;;  %s14824_s10 = sshll.u32 %s15054_s8, 4  ;;  %s14825_s10 = int_to_ptr.vmem [resolvable:$false] %s14824_s10 }
  0x44   : > { %s14826_s4 = scalar_lea.vmem %s14825_s10, 4096  ;;  %p14827_p8 = scmp.lt.s32.totalorder %s15252_s23, %s14825_s10 }
  0x45   : > { %p14822_p5 = pnand %p14820_p4, %p15260_p9  ;;  %p14828_p10 = scmp.lt.s32.totalorder %s14826_s4, %s14819_s14 }
  0x47   : > { %p14823_p6 = pneg %p14822_p5  ;;  %p14829_p12 = por %p14828_p10, %p14827_p8 }
  0x49   : > { %p14830_p13 = pnand %p14829_p12, %p14823_p6 }
  0x4b   : > { %14833 = shalt.err (!%p14830_p13)
}
  0x4c   : > { %s15055_s29 = smov 128   ;;  %s15056_s20 = smov 8  }
  0x4d   : > { %14059 = dma.hbm_to_vmem [thread:$0]  (!%p15236_p7), %s15250_s22, 2048, %s15252_s23, %s15254_s17, %s15055_s29, %s15055_s29, %s15056_s20  }
  0x4e   : > { %s475_s12 = ssub.s32 %s15048_s19, %s20240_s21  ;;  %s19832_s14 = sshll.u32 %s15044_s18, 11 }
  0x4f   : > { %s19833_s11 = sld [smem:[#allocation153_spill]]  ;;  %s19834_s9 = sshll.u32 %s15234_s16, 7 }
  0x50   : > { %s15295_s7 = scalar_lea.vmem [#allocation8], %s19834_s9  ;;  %s15299_s6 = sadd.s32 4294967295, %s15052_s1  }
  0x51   : > { %s12043_s23 = sadd.s32 4294967294, %s15052_s1   ;;  %p189_p11 = scmp.ne.s32.totalorder %s15028_s28, %s15024_s27 }
  0x52   : > { %p19634_p0 = scmp.eq.s32.totalorder %s15299_s6, 0  ;;  %p476_p1 = scmp.eq.s32.totalorder %s475_s12, 0 }
  0x53   : > { %s478_s22 = sadd.s32 1, %s15020_s26  ;;  %p488_p3 = scmp.ne.s32.totalorder %s15020_s26, %s15016_s25 }
  0x54   : > { %p15308_p2 = por %p19634_p0, %p189_p11  ;;  %p489_p4 = scmp.eq.s32.totalorder %s15299_s6, 3 }
  0x55   : > { %s15291_s4 = scalar_lea.hbm %s19833_s11, %s19832_s14  ;;  %p494_p5 = scmp.ne.s32.totalorder %s15016_s25, %s15012_s24 }
  0x56   : > { %s19835_s29 = scalar_select %p15308_p2, 1, 0 }
  0x57   : > { %s15315_s9 = scalar_select %p476_p1, %s15020_s26, %s478_s22  }
  0x58   : > { %p495_p6 = scmp.eq.s32.totalorder %s12043_s23, 3  ;;  %p12044_p8 = scmp.ge.s32.totalorder %s15052_s1, 1 }
  0x59   : > { %19836 = sst [smem:[#allocation28_spill]] %s15315_s9  ;;  %p15321_p10 = por %p489_p4, %p488_p3 }
  0x5a   : > { %p502_p12 = scmp.lt.s32.totalorder %s15052_s1, 5  ;;  %p15326_p13 = por %p495_p6, %p494_p5 }
  0x5b   : > { %s19837_s27 = scalar_select %p15321_p10, 1, 0 }
  0x5c   : > { %s19839_s20 = scalar_select %p15326_p13, 1, 0 }
  0x5d   : > { %19838 = sst [smem:[#allocation29_spill]] %s19837_s27  ;;  %p15330_p11 = pnand %p12044_p8, %p502_p12 }
  0x5e   : > { %19840 = sst [smem:[#allocation30_spill]] %s19839_s20  ;;  %s15057_s14 = smov [#allocation9]  }
  0x5f   : > { %s19841_s12 = scalar_select %p15330_p11, 1, 0 }
  0x60   : > { %s520_s8 = sshll.u32 %s15057_s14, 4  ;;  %p14049_p1 = pneg %p15330_p11  ;;  %s521_s8 = int_to_ptr.vmem [resolvable:$true] %s520_s8 }
  0x61   : > { %s12047_s23 = sshll.u32 %s15234_s16, 6  ;;  %s12362_s22 = sshll.u32 %s15044_s18, 10 }
  0x62   : > { %p15338_p3 = pnand %p14049_p1, %p19634_p0  ;;  %s19843_s5 = sld [smem:[#allocation147_spill]] }
  0x63   : > { %s19844_s15 = sld [smem:[#allocation157_spill]] }
  0x64   : > { %p14836_p5 = pneg %p15338_p3 }
  0x68   : > { %s15347_s19 = scalar_lea.hbm %s19843_s5, %s12362_s22 }
  0x69   : > { %s14834_s14 = scalar_lea.hbm %s19844_s15, 1024 }
  0x6a   : > { %p14835_p4 = scmp.ne.s32.totalorder %s19844_s15, %s14834_s14  ;;  %p14841_p12 = scmp.lt.u32.totalorder %s14834_s14, %s19844_s15 }
  0x6c   : > { %p14837_p6 = pnand %p14836_p5, %p14835_p4 }
  0x6e   : > { %p14838_p8 = pneg %p14837_p6 }
  0x70   : > { %p14843_p1 = pnand %p14841_p12, %p14838_p8 }
  0x72   : > { %14846 = shalt.err (!%p14843_p1)
}
  0x73   : > { %s14847_s3 = scalar_lea.vmem %s521_s8, 1024  ;;  %p14855_p2 = scmp.lt.s32.totalorder %s521_s8, %s521_s8 }
  0x74   : > { %p14848_p0 = scmp.ne.s32.totalorder %s521_s8, %s14847_s3  ;;  %p14856_p11 = scmp.lt.s32.totalorder %s14847_s3, %s14847_s3 }
  0x76   : > { %p14850_p13 = pnand %p14848_p0, %p14836_p5  ;;  %p14857_p7 = por %p14856_p11, %p14855_p2 }
  0x78   : > { %p14851_p10 = pneg %p14850_p13 }
  0x7a   : > { %p14858_p9 = pnand %p14857_p7, %p14851_p10 }
  0x7c   : > { %14861 = shalt.err (!%p14858_p9)
}
  0x7d   : > { %s15058_s24 = smov 64   ;;  %s15059_s26 = smov 4  }
  0x7e   : > { %14052 = dma.hbm_to_vmem [thread:$0]  (!%p15338_p3), %s19844_s15, 1024, %s521_s8, [#allocation10], %s15058_s24, %s15058_s24, %s15059_s26  }
  0x7f   : > { %s19845_s9 = sshll.u32 %s15295_s7, 4  ;;  %s566_s27 = scalar_lea.vmem [#allocation3], %s12047_s23  ;;  %s15370_s9 = int_to_ptr.vmem [resolvable:$true] %s19845_s9 }
  0x80   : > { %s573_s20 = sshll.u32 %s566_s27, 4  ;;  %s563_s22 = scalar_lea.sflag [#allocation4], %s15234_s16  ;;  %s15372_s20 = int_to_ptr.vmem [resolvable:$true] %s573_s20 }
  0x81   : > { %s14862_s14 = scalar_lea.hbm %s15347_s19, 1024  ;;  %p19846_p9 = scmp.ne.s32.totalorder %s19831_s13, 0 }
  0x82   : > { %p14863_p7 = scmp.ne.s32.totalorder %s15347_s19, %s14862_s14  ;;  %s14867_s18 = scalar_lea.hbm %s19843_s5, 2048 }
  0x83   : > { %p14868_p10 = scmp.lt.u32.totalorder %s15347_s19, %s19843_s5  ;;  %p14869_p13 = scmp.lt.u32.totalorder %s14867_s18, %s14862_s14 }
  0x84   : > { %p14865_p0 = pnand %p14863_p7, %p19846_p9  ;;  %p14871_p3 = scmp.lt.u32.totalorder %s14862_s14, %s15347_s19 }
  0x85   : > { %p14870_p11 = por %p14869_p13, %p14868_p10 }
  0x86   : > { %p14866_p2 = pneg %p14865_p0 }
  0x87   : > { %p14872_p4 = por %p14871_p3, %p14870_p11 }
  0x89   : > { %p14873_p5 = pnand %p14872_p4, %p14866_p2 }
  0x8b   : > { %14876 = shalt.err (!%p14873_p5)
}
  0x8c   : > { %s14877_s7 = scalar_lea.vmem %s15372_s20, 1024  ;;  %s15060_s8 = smov [#allocation3]  }
  0x8d   : > { %p14878_p6 = scmp.ne.s32.totalorder %s15372_s20, %s14877_s7  ;;  %s14882_s23 = sshll.u32 %s15060_s8, 4  ;;  %s14883_s23 = int_to_ptr.vmem [resolvable:$false] %s14882_s23 }
  0x8e   : > { %s14884_s0 = scalar_lea.vmem %s14883_s23, 2048  ;;  %p14885_p1 = scmp.lt.s32.totalorder %s15372_s20, %s14883_s23 }
  0x8f   : > { %p14880_p8 = pnand %p14878_p6, %p19846_p9  ;;  %p14886_p7 = scmp.lt.s32.totalorder %s14884_s0, %s14877_s7 }
  0x91   : > { %p14881_p12 = pneg %p14880_p8  ;;  %p14887_p0 = por %p14886_p7, %p14885_p1 }
  0x93   : > { %p14888_p10 = pnand %p14887_p0, %p14881_p12 }
  0x95   : > { %14891 = shalt.err (!%p14888_p10)
}
  0x96   : > { %p19847_p2 = scmp.ne.s32.totalorder %s19829_s2, 0  ;;  %s14892_s18 = scalar_lea.hbm %s15291_s4, 2048 }
  0x97   : > { %p14893_p13 = scmp.ne.s32.totalorder %s15291_s4, %s14892_s18  ;;  %s14897_s14 = scalar_lea.hbm %s19833_s11, 4096 }
  0x98   : > { %14056 = dma.hbm_to_vmem [thread:$0]  (!%p19847_p2), %s15347_s19, 1024, %s15372_s20, %s563_s22, %s15058_s24, %s15058_s24, %s15059_s26  }
  0x99   : > { %p14895_p11 = pnand %p14893_p13, %p19846_p9  ;;  %p14898_p4 = scmp.lt.u32.totalorder %s15291_s4, %s19833_s11 }
  0x9a   : > { %p14899_p5 = scmp.lt.u32.totalorder %s14897_s14, %s14892_s18  ;;  %p14901_p8 = scmp.lt.u32.totalorder %s14892_s18, %s15291_s4 }
  0x9b   : > { %p14896_p3 = pneg %p14895_p11 }
  0x9c   : > { %p14900_p6 = por %p14899_p5, %p14898_p4 }
  0x9e   : > { %p14902_p12 = por %p14901_p8, %p14900_p6 }
  0xa0   : > { %p14903_p1 = pnand %p14902_p12, %p14896_p3 }
  0xa2   : > { %14906 = shalt.err (!%p14903_p1)
}
  0xa3   : > { %s14907_s16 = scalar_lea.vmem %s15370_s9, 2048  ;;  %s15061_s19 = smov [#allocation8]  }
  0xa4   : > { %p14908_p7 = scmp.ne.s32.totalorder %s15370_s9, %s14907_s16  ;;  %s14912_s20 = sshll.u32 %s15061_s19, 4  ;;  %s14913_s20 = int_to_ptr.vmem [resolvable:$false] %s14912_s20 }
  0xa5   : > { %s14914_s22 = scalar_lea.vmem %s14913_s20, 4096  ;;  %p14915_p13 = scmp.lt.s32.totalorder %s15370_s9, %s14913_s20 }
  0xa6   : > { %p14910_p0 = pnand %p14908_p7, %p19846_p9  ;;  %p14916_p11 = scmp.lt.s32.totalorder %s14914_s22, %s14907_s16 }
  0xa8   : > { %p14911_p10 = pneg %p14910_p0  ;;  %p14917_p4 = por %p14916_p11, %p14915_p13 }
  0xaa   : > { %p14918_p5 = pnand %p14917_p4, %p14911_p10 }
  0xac   : > { %14921 = shalt.err (!%p14918_p5)
}
  0xad   : > { %14062 = dma.hbm_to_vmem [thread:$0]  (!%p19847_p2), %s15291_s4, 2048, %s15370_s9, %s15254_s17, %s15058_s24, %s15058_s24, %s15059_s26  }
  0xae   : > { %p19848_p9 = scmp.ne.s32.totalorder %s19841_s12, 0 }
  0xb0   : > { %670 = sbr.rel (%p19848_p9) target bundleno = 4941 (0x134d), region = 88 }
  0xb7   : > { %s672_s13 = sand.u32 1, %s15028_s28   ;;  %p19849_p3 = scmp.ne.s32.totalorder %s19835_s29, 0 }
  0xb8   : > { %s12057_s1 = sshll.u32 %s672_s13, 6  ;;  %s673_s7 = scalar_lea.sflag [#allocation4], %s672_s13 }
  0xb9   : > { %s15429_s8 = scalar_lea.vmem [#allocation3], %s12057_s1 }
  0xba   : > { %14995 = dma.done.wait (%p19849_p3), %s673_s7, 1024  }
  0xbb   : > { %14997 = vsyncadd (%p19849_p3), %s673_s7, 4294966272  ;;  %s681_s2 = sand.u32 1, %s15299_s6   ;;  %s12058_s23 = sshll.u32 %s672_s13, 7 }
  0xbc   : > { %s682_s17 = scalar_lea.sflag [#allocation7], %s681_s2  ;;  %s15436_s4 = scalar_lea.vmem [#allocation6], %s12058_s23 }
  0xbd   : > { %14999 = dma.done.wait (%p19849_p3), %s682_s17, 4096  }
  0xbe   : > { %15001 = vsyncadd (%p19849_p3), %s682_s17, 4294963200  ;;  %s15442_s12 = scalar_lea.vmem [#allocation8], %s12058_s23  ;;  %p19850_p2 = scmp.eq.s32.totalorder %s15299_s6, 0 }
  0xc0   : > { %15003 = dma.done.wait (%p19850_p2), [#allocation10], 1024   ;;  %p19851_p6 = pmov %p19850_p2 }
  0xc1   : > { %s19852_s24 = sld [smem:[#allocation21_spill]]  ;;  %s19644_s26 = sand.u32 1, %s15016_s25  }
  0xc2   : > { %15005 = vsyncadd (%p19851_p6), [#allocation10], 4294966272  ;;  %s12062_s9 = sshll.u32 %s15040_s30, 4  ;;  %s12061_s0 = sshll.u32 %s19644_s26, 8 }
  0xc3   : > { %p797_p8 = scmp.lt.s32.totalorder %s12062_s9, 31  ;;  %s19853_s27 = sld [smem:[#allocation142_spill]] }
  0xc4   : > { %s19855_s7 = sld [smem:[#allocation145_spill]]  ;;  %s19857_s18 = sld [smem:[#allocation146_spill]] }
  0xc5   : > { %s20242_s9 = smov (!%p797_p8, %s12062_s9), 31  ;;  %s19858_s15 = sld [smem:[#allocation150_spill]] }
  0xc6   : > { %s12365_s6 = sshll.u32 %s20242_s9, 4  ;;  %s19859_s22 = sld [smem:[#allocation154_spill]] }
  0xc7   : > { %p803_p12 = scmp.lt.s32.totalorder %s19852_s24, 1  ;;  %s19861_s17 = sld [smem:[#allocation155_spill]] }
  0xc8   : > { %s15503_s21 = scalar_lea.vmem [#allocation11], %s12061_s0  ;;  %p12067_p1 = scmp.ne.s32.totalorder %s19852_s24, 0 }
  0xc9   : > { %s15454_s29 = scalar_select %p803_p12, %s19852_s24, 1 }
  0xca   : > { %s15459_s14 = scalar_lea.vmem %s19853_s27, %s12365_s6  ;;  %s19863_s27 = sld [smem:[#allocation143_spill]] (!%p12067_p1)  ;;  %vm970_vm0 = vcmask (!%p12067_p1), 1043456   ;;  %vm921_vm1 = vcmask (!%p12067_p1), 64512  }
  0xcb   : > { %s14035_s10 = smul.u32 192, %s15454_s29  ;;  %s820_s28 = scalar_lea.vmem %s19858_s15, %s15454_s29  ;;  %v840_v1 = vld [vmem:[%s15459_s14] sm:$0xff] (!%p12067_p1)  ;;  %v841_v2 = vld [vmem:[%s15459_s14 + $0x8] sm:$0xff] (!%p12067_p1)  ;;  %v842_v7 = vld [vmem:[%s15459_s14 + $0x10] sm:$0xff] (!%p12067_p1) }
  0xcc   : > { %s14036_s3 = smul.u32 3, %s15454_s29  ;;  %s12066_s16 = sshll.u32 %s15454_s29, 1  ;;  %v873_v4 = vpack.c.bf16 (!%p12067_p1), %v841_v2, %v840_v1  ;;  %v856_v5 = vld [vmem:[%s15459_s14 + $0x80] sm:$0xff] (!%p12067_p1)  ;;  %v857_v6 = vld [vmem:[%s15459_s14 + $0x88] sm:$0xff] (!%p12067_p1)  ;;  %v843_v9 = vld [vmem:[%s15459_s14 + $0x18] sm:$0xff] (!%p12067_p1) }
  0xcd   : > { %s15470_s2 = scalar_lea.vmem %s19855_s7, %s14035_s10  ;;  %s827_s13 = scalar_lea.vmem %s19859_s22, %s15454_s29  ;;  %v881_v8 = vpack.c.bf16 (!%p12067_p1), %v857_v6, %v856_v5  ;;  %v858_v10 = vld [vmem:[%s15459_s14 + $0x90] sm:$0xff] (!%p12067_p1)  ;;  %v859_v11 = vld [vmem:[%s15459_s14 + $0x98] sm:$0xff] (!%p12067_p1)  ;;  %v874_v12 = vpack.c.bf16 (!%p12067_p1), %v843_v9, %v842_v7  ;;  %v844_v14 = vld [vmem:[%s15459_s14 + $0x20] sm:$0xff] (!%p12067_p1) }
  0xce   : > { %s15479_s6 = scalar_lea.vmem %s19857_s18, %s14036_s3  ;;  %s19860_s7 = sld [smem:[#allocation152_spill]]  ;;  %12875 = vmatprep.mubr.msk.bf16.mxu0 (!%p12067_p1), %vm921_vm1, %v873_v4  ;;  %v882_v13 = vpack.c.bf16 (!%p12067_p1), %v859_v11, %v858_v10  ;;  %v845_v15 = vld [vmem:[%s15459_s14 + $0x28] sm:$0xff] (!%p12067_p1)  ;;  %v860_v16 = vld [vmem:[%s15459_s14 + $0xa0] sm:$0xff] (!%p12067_p1)  ;;  %v846_v20 = vld [vmem:[%s15459_s14 + $0x30] sm:$0xff] (!%p12067_p1) }
  0xcf   : > { %s830_s5 = scalar_lea.vmem %s19861_s17, %s15454_s29  ;;  %s19862_s18 = sld [smem:[#allocation156_spill]]  ;;  %12891 = vmatprep.mubr.msk.bf16.mxu1 (!%p12067_p1), %vm921_vm1, %v881_v8  ;;  %v875_v17 = vpack.c.bf16 (!%p12067_p1), %v845_v15, %v844_v14  ;;  %v861_v18 = vld [vmem:[%s15459_s14 + $0xa8] sm:$0xff] (!%p12067_p1)  ;;  %v847_v21 = vld [vmem:[%s15459_s14 + $0x38] sm:$0xff] (!%p12067_p1)  ;;  %v862_v22 = vld [vmem:[%s15459_s14 + $0xb0] sm:$0xff] (!%p12067_p1) }
  0xd0   : > { %839 = sbr.rel (%p12067_p1) target bundleno = 455 (0x1c7), region = 108  ;;  %v872_v0 = vld [vmem:[%s19863_s27] sm:$0xf] (!%p12067_p1)  ;;  %v883_v19 = vpack.c.bf16 (!%p12067_p1), %v861_v18, %v860_v16  ;;  %v863_v23 = vld [vmem:[%s15459_s14 + $0xb8] sm:$0xff] (!%p12067_p1)  ;;  %v849_v25 = vld [vmem:[%s15459_s14 + $0x48] sm:$0xff] (!%p12067_p1)  ;;  %v876_v28 = vpack.c.bf16 (!%p12067_p1), %v847_v21, %v846_v20 }
  0xd1   : > { %14033 = vmatprep.subr.msk.bf16.mxu0 (!%p12067_p1), %vm970_vm0, %v872_v0  ;;  %14034 = vmatprep.subr.msk.bf16.mxu1 (!%p12067_p1), %vm970_vm0, %v872_v0  ;;  %v972_v3 = vsel (!%p12067_p1), %vm970_vm0, %v872_v0, 0  ;;  %v848_v24 = vld [vmem:[%s15459_s14 + $0x40] sm:$0xff] (!%p12067_p1)  ;;  %v865_v27 = vld [vmem:[%s15459_s14 + $0xc8] sm:$0xff] (!%p12067_p1)  ;;  %v884_v29 = vpack.c.bf16 (!%p12067_p1), %v863_v23, %v862_v22  ;;  %v850_v32 = vld [vmem:[%s15459_s14 + $0x50] sm:$0xff] (!%p12067_p1) }
  0xd2   : > { %12874 = vmatpush3.bf16.msra.mxu0 (!%p12067_p1), %v972_v3  ;;  %13916 = vmatpush3.bf16.msra.mxu1 (!%p12067_p1), %v972_v3  ;;  %v864_v26 = vld [vmem:[%s15459_s14 + $0xc0] sm:$0xff] (!%p12067_p1)  ;;  %v877_v30 = vpack.c.bf16 (!%p12067_p1), %v849_v25, %v848_v24  ;;  %v851_v33 = vld [vmem:[%s15459_s14 + $0x58] sm:$0xff] (!%p12067_p1)  ;;  %v866_v34 = vld [vmem:[%s15459_s14 + $0xd0] sm:$0xff] (!%p12067_p1) }
  0xd3   : > { %v885_v31 = vpack.c.bf16 (!%p12067_p1), %v865_v27, %v864_v26  ;;  %v867_v35 = vld [vmem:[%s15459_s14 + $0xd8] sm:$0xff] (!%p12067_p1)  ;;  %v852_v36 = vld [vmem:[%s15459_s14 + $0x60] sm:$0xff] (!%p12067_p1)  ;;  %v853_v37 = vld [vmem:[%s15459_s14 + $0x68] sm:$0xff] (!%p12067_p1)  ;;  %v878_v40 = vpack.c.bf16 (!%p12067_p1), %v851_v33, %v850_v32 }
  0xd4   : > { %s15493_s25 = scalar_lea.vmem %s19860_s7, %s12066_s16  ;;  %v868_v38 = vld [vmem:[%s15459_s14 + $0xe0] sm:$0xff] (!%p12067_p1)  ;;  %v869_v39 = vld [vmem:[%s15459_s14 + $0xe8] sm:$0xff] (!%p12067_p1)  ;;  %v886_v41 = vpack.c.bf16 (!%p12067_p1), %v867_v35, %v866_v34  ;;  %v879_v42 = vpack.c.bf16 (!%p12067_p1), %v853_v37, %v852_v36  ;;  %v854_v44 = vld [vmem:[%s15459_s14 + $0x70] sm:$0xff] (!%p12067_p1)  ;;  %s19864_s16 = sld [smem:[#allocation144_spill]] (!%p12067_p1) }
  0xd5   : > { %s833_s9 = scalar_lea.vmem %s19862_s18, %s15454_s29  ;;  %12876 = vmatmul.mubr.msk.bf16.vlgmr.msra.gmra.mrb[0].mxu0 (!%p12067_p1), %vm921_vm1, %v874_v12  ;;  %12892 = vmatmul.mubr.msk.bf16.vlgmr.msra.gmra.mrb[0].mxu1 (!%p12067_p1), %vm921_vm1, %v882_v13  ;;  %v887_v43 = vpack.c.bf16 (!%p12067_p1), %v869_v39, %v868_v38  ;;  %v855_v45 = vld [vmem:[%s15459_s14 + $0x78] sm:$0xff] (!%p12067_p1)  ;;  %v870_v46 = vld [vmem:[%s15459_s14 + $0xf0] sm:$0xff] (!%p12067_p1) }
  0xd6   : > { %12879 = vmatprep.mubr.msk.bf16.mxu0 (!%p12067_p1), %vm921_vm1, %v875_v17  ;;  %12895 = vmatprep.mubr.msk.bf16.mxu1 (!%p12067_p1), %vm921_vm1, %v883_v19  ;;  %v871_v47 = vld [vmem:[%s15459_s14 + $0xf8] sm:$0xff] (!%p12067_p1)  ;;  %v880_v48 = vpack.c.bf16 (!%p12067_p1), %v855_v45, %v854_v44 }
  0xd7   : > { %v888_v49 = vpack.c.bf16 %v871_v47, %v870_v46 }
  0xda   : > { %v891_v50 = vld [vmem:[%s19864_s16 + $0x10] sm:$0xff]  ;;  %v889_v52 = vld [vmem:[%s19864_s16] sm:$0xff]  ;;  %v892_v56 = vld [vmem:[%s19864_s16 + $0x18] sm:$0xff] }
  0xdb   : > { %v907_v51 = vld [vmem:[%s19864_s16 + $0x90] sm:$0xff]  ;;  %v905_v53 = vld [vmem:[%s19864_s16 + $0x80] sm:$0xff]  ;;  %v908_v57 = vld [vmem:[%s19864_s16 + $0x98] sm:$0xff] }
  0xdc   : > { %v890_v62 = vld [vmem:[%s19864_s16 + $0x8] sm:$0xff]  ;;  %v895_v10 = vld [vmem:[%s19864_s16 + $0x30] sm:$0xff]  ;;  %v893_v12 = vld [vmem:[%s19864_s16 + $0x20] sm:$0xff] }
  0xdd   : > { %12880 = vmatmul.mubr.msk.bf16.gmra.mrb[4].mxu0 %vm921_vm1, %v876_v28  ;;  %12896 = vmatmul.mubr.msk.bf16.gmra.mrb[4].mxu1 %vm921_vm1, %v884_v29  ;;  %v906_v63 = vld [vmem:[%s19864_s16 + $0x88] sm:$0xff]  ;;  %v911_v11 = vld [vmem:[%s19864_s16 + $0xb0] sm:$0xff]  ;;  %v909_v13 = vld [vmem:[%s19864_s16 + $0xa0] sm:$0xff] }
  0xde   : > { %12883 = vmatprep.mubr.msk.bf16.mxu0 %vm921_vm1, %v877_v30  ;;  %12899 = vmatprep.mubr.msk.bf16.mxu1 %vm921_vm1, %v885_v31  ;;  %v896_v16 = vld [vmem:[%s19864_s16 + $0x38] sm:$0xff]  ;;  %v894_v22 = vld [vmem:[%s19864_s16 + $0x28] sm:$0xff]  ;;  %v899_v34 = vld [vmem:[%s19864_s16 + $0x50] sm:$0xff] }
  0xdf   : > { %v912_v17 = vld [vmem:[%s19864_s16 + $0xb8] sm:$0xff]  ;;  %v910_v23 = vld [vmem:[%s19864_s16 + $0xa8] sm:$0xff]  ;;  %v915_v35 = vld [vmem:[%s19864_s16 + $0xd0] sm:$0xff] }
  0xe0   : > { %v897_v36 = vld [vmem:[%s19864_s16 + $0x40] sm:$0xff]  ;;  %v898_v46 = vld [vmem:[%s19864_s16 + $0x48] sm:$0xff] }
  0xe1   : > { %v913_v37 = vld [vmem:[%s19864_s16 + $0xc0] sm:$0xff]  ;;  %v914_v47 = vld [vmem:[%s19864_s16 + $0xc8] sm:$0xff] }
  0xe5   : > { %12884 = vmatmul.mubr.msk.bf16.gmra.mrb[8].mxu0 %vm921_vm1, %v878_v40  ;;  %12900 = vmatmul.mubr.msk.bf16.gmra.mrb[8].mxu1 %vm921_vm1, %v886_v41  ;;  %v900_v40 = vld [vmem:[%s19864_s16 + $0x58] sm:$0xff] }
  0xe6   : > { %12887 = vmatprep.mubr.msk.bf16.mxu0 %vm921_vm1, %v879_v42  ;;  %12903 = vmatprep.mubr.msk.bf16.mxu1 %vm921_vm1, %v887_v43  ;;  %v916_v41 = vld [vmem:[%s19864_s16 + $0xd8] sm:$0xff] }
  0xed   : > { %12888 = vmatmul.mubr.msk.bf16.gmra.mrb[12].mxu0 %vm921_vm1, %v880_v48  ;;  %12904 = vmatmul.mubr.msk.bf16.gmra.mrb[12].mxu1 %vm921_vm1, %v888_v49 }
 0x1a8   : > { %v12877_v54 = vpop.f32.mrb[0].mxu0  ;;  %v12893_v55 = vpop.f32.mrb[0].mxu1 }
 0x1a9   : > { %v1017_v58 = vadd.f32 %v12877_v54, %v891_v50  ;;  %v1081_v59 = vadd.f32 %v12893_v55, %v907_v51  ;;  %v1008_v60 = vpop.f32.mrb[1].mxu0  ;;  %v1072_v61 = vpop.f32.mrb[1].mxu1 }
 0x1aa   : > { %v1009_v0 = vadd.f32 %v1008_v60, %v889_v52  ;;  %v1073_v1 = vadd.f32 %v1072_v61, %v905_v53  ;;  %v12878_v2 = vpop.f32.mrb[2].mxu0  ;;  %v12894_v3 = vpop.f32.mrb[2].mxu1  ;;  %v901_v60 = vld [vmem:[%s19864_s16 + $0x60] sm:$0xff] }
 0x1ab   : > { %1137 = vst [vmem:[#allocation2 + $0x10] sm:$0xff] %v1017_v58  ;;  %1153 = vst [vmem:[#allocation2 + $0x90] sm:$0xff] %v1081_v59  ;;  %v1020_v4 = vadd.f32 %v12878_v2, %v892_v56  ;;  %v1084_v5 = vadd.f32 %v12894_v3, %v908_v57  ;;  %v1011_v6 = vpop.f32.mrb[3].mxu0  ;;  %v1075_v7 = vpop.f32.mrb[3].mxu1  ;;  %v903_v58 = vld [vmem:[%s19864_s16 + $0x70] sm:$0xff]  ;;  %v917_v61 = vld [vmem:[%s19864_s16 + $0xe0] sm:$0xff] }
 0x1ac   : > { %1135 = vst [vmem:[#allocation2] sm:$0xff] %v1009_v0  ;;  %1151 = vst [vmem:[#allocation2 + $0x80] sm:$0xff] %v1073_v1  ;;  %v1012_v8 = vadd.f32 %v1011_v6, %v890_v62  ;;  %v1076_v9 = vadd.f32 %v1075_v7, %v906_v63  ;;  %v919_v59 = vld [vmem:[%s19864_s16 + $0xf0] sm:$0xff]  ;;  %v904_v0 = vld [vmem:[%s19864_s16 + $0x78] sm:$0xff] }
 0x1ad   : > { %1138 = vst [vmem:[#allocation2 + $0x18] sm:$0xff] %v1020_v4  ;;  %1154 = vst [vmem:[#allocation2 + $0x98] sm:$0xff] %v1084_v5  ;;  %v920_v1 = vld [vmem:[%s19864_s16 + $0xf8] sm:$0xff]  ;;  %v902_v6 = vld [vmem:[%s19864_s16 + $0x68] sm:$0xff] }
 0x1ae   : > { %1136 = vst [vmem:[#allocation2 + $0x8] sm:$0xff] %v1012_v8  ;;  %1152 = vst [vmem:[#allocation2 + $0x88] sm:$0xff] %v1076_v9  ;;  %v918_v7 = vld [vmem:[%s19864_s16 + $0xe8] sm:$0xff] }
 0x1b0   : > { %v12881_v14 = vpop.f32.mrb[4].mxu0  ;;  %v12897_v15 = vpop.f32.mrb[4].mxu1 }
 0x1b1   : > { %v1033_v18 = vadd.f32 %v12881_v14, %v895_v10  ;;  %v1097_v19 = vadd.f32 %v12897_v15, %v911_v11  ;;  %v1024_v20 = vpop.f32.mrb[5].mxu0  ;;  %v1088_v21 = vpop.f32.mrb[5].mxu1 }
 0x1b2   : > { %v1025_v24 = vadd.f32 %v1024_v20, %v893_v12  ;;  %v1089_v25 = vadd.f32 %v1088_v21, %v909_v13  ;;  %v12882_v26 = vpop.f32.mrb[6].mxu0  ;;  %v12898_v27 = vpop.f32.mrb[6].mxu1 }
 0x1b3   : > { %1141 = vst [vmem:[#allocation2 + $0x30] sm:$0xff] %v1033_v18  ;;  %1157 = vst [vmem:[#allocation2 + $0xb0] sm:$0xff] %v1097_v19  ;;  %v1036_v28 = vadd.f32 %v12882_v26, %v896_v16  ;;  %v1100_v29 = vadd.f32 %v12898_v27, %v912_v17  ;;  %v1027_v30 = vpop.f32.mrb[7].mxu0  ;;  %v1091_v31 = vpop.f32.mrb[7].mxu1 }
 0x1b4   : > { %1139 = vst [vmem:[#allocation2 + $0x20] sm:$0xff] %v1025_v24  ;;  %1155 = vst [vmem:[#allocation2 + $0xa0] sm:$0xff] %v1089_v25  ;;  %v1028_v32 = vadd.f32 %v1027_v30, %v894_v22  ;;  %v1092_v33 = vadd.f32 %v1091_v31, %v910_v23 }
 0x1b5   : > { %1142 = vst [vmem:[#allocation2 + $0x38] sm:$0xff] %v1036_v28  ;;  %1158 = vst [vmem:[#allocation2 + $0xb8] sm:$0xff] %v1100_v29 }
 0x1b6   : > { %1140 = vst [vmem:[#allocation2 + $0x28] sm:$0xff] %v1028_v32  ;;  %1156 = vst [vmem:[#allocation2 + $0xa8] sm:$0xff] %v1092_v33 }
 0x1b8   : > { %v12885_v38 = vpop.f32.mrb[8].mxu0  ;;  %v12901_v39 = vpop.f32.mrb[8].mxu1 }
 0x1b9   : > { %v1049_v42 = vadd.f32 %v12885_v38, %v899_v34  ;;  %v1113_v43 = vadd.f32 %v12901_v39, %v915_v35  ;;  %v1040_v44 = vpop.f32.mrb[9].mxu0  ;;  %v1104_v45 = vpop.f32.mrb[9].mxu1 }
 0x1ba   : > { %v1041_v48 = vadd.f32 %v1040_v44, %v897_v36  ;;  %v1105_v49 = vadd.f32 %v1104_v45, %v913_v37  ;;  %v12886_v50 = vpop.f32.mrb[10].mxu0  ;;  %v12902_v51 = vpop.f32.mrb[10].mxu1 }
 0x1bb   : > { %1145 = vst [vmem:[#allocation2 + $0x50] sm:$0xff] %v1049_v42  ;;  %1161 = vst [vmem:[#allocation2 + $0xd0] sm:$0xff] %v1113_v43  ;;  %v1052_v52 = vadd.f32 %v12886_v50, %v900_v40  ;;  %v1116_v53 = vadd.f32 %v12902_v51, %v916_v41  ;;  %v1043_v54 = vpop.f32.mrb[11].mxu0  ;;  %v1107_v55 = vpop.f32.mrb[11].mxu1 }
 0x1bc   : > { %1143 = vst [vmem:[#allocation2 + $0x40] sm:$0xff] %v1041_v48  ;;  %1159 = vst [vmem:[#allocation2 + $0xc0] sm:$0xff] %v1105_v49  ;;  %v1044_v56 = vadd.f32 %v1043_v54, %v898_v46  ;;  %v1108_v57 = vadd.f32 %v1107_v55, %v914_v47 }
 0x1bd   : > { %1146 = vst [vmem:[#allocation2 + $0x58] sm:$0xff] %v1052_v52  ;;  %1162 = vst [vmem:[#allocation2 + $0xd8] sm:$0xff] %v1116_v53 }
 0x1be   : > { %1144 = vst [vmem:[#allocation2 + $0x48] sm:$0xff] %v1044_v56  ;;  %1160 = vst [vmem:[#allocation2 + $0xc8] sm:$0xff] %v1108_v57 }
 0x1c0   : > { %v12889_v62 = vpop.f32.mrb[12].mxu0  ;;  %v12905_v63 = vpop.f32.mrb[12].mxu1 }
 0x1c1   : > { %v1065_v2 = vadd.f32 %v12889_v62, %v903_v58  ;;  %v1129_v3 = vadd.f32 %v12905_v63, %v919_v59  ;;  %v1056_v4 = vpop.f32.mrb[13].mxu0  ;;  %v1120_v5 = vpop.f32.mrb[13].mxu1 }
 0x1c2   : > { %v1057_v8 = vadd.f32 %v1056_v4, %v901_v60  ;;  %v1121_v9 = vadd.f32 %v1120_v5, %v917_v61  ;;  %v12890_v10 = vpop.f32.mrb[14].mxu0  ;;  %v12906_v11 = vpop.f32.mrb[14].mxu1 }
 0x1c3   : > { %1149 = vst [vmem:[#allocation2 + $0x70] sm:$0xff] %v1065_v2  ;;  %1165 = vst [vmem:[#allocation2 + $0xf0] sm:$0xff] %v1129_v3  ;;  %v1068_v12 = vadd.f32 %v12890_v10, %v904_v0  ;;  %v1132_v13 = vadd.f32 %v12906_v11, %v920_v1  ;;  %v1059_v14 = vpop.f32.mrb[15].mxu0  ;;  %v1123_v15 = vpop.f32.mrb[15].mxu1 }
 0x1c4   : > { %1147 = vst [vmem:[#allocation2 + $0x60] sm:$0xff] %v1057_v8  ;;  %1163 = vst [vmem:[#allocation2 + $0xe0] sm:$0xff] %v1121_v9  ;;  %v1060_v16 = vadd.f32 %v1059_v14, %v902_v6  ;;  %v1124_v17 = vadd.f32 %v1123_v15, %v918_v7 }
 0x1c5   : > { %1150 = vst [vmem:[#allocation2 + $0x78] sm:$0xff] %v1068_v12  ;;  %1166 = vst [vmem:[#allocation2 + $0xf8] sm:$0xff] %v1132_v13 }
 0x1c6   : > { %1148 = vst [vmem:[#allocation2 + $0x68] sm:$0xff] %v1060_v16  ;;  %1164 = vst [vmem:[#allocation2 + $0xe8] sm:$0xff] %v1124_v17 }
 0x1c7 PF: > { %v14172_v18 = vld [vmem:[%s15470_s2 + $0x4] ss:$12 sps:$4 sm:$0xff]   ;;  %v14174_v19 = vld [vmem:[%s15470_s2] ss:$12 sps:$4 sm:$0xff]   ;;  %v19649_v20 = vmov 0   ;;  %v1170_v43 = vld [vmem:[#allocation2 + $0x18] sm:$0xff] }
 0x1c8   : > { %1424 = vmatprep.mubr.bf16.mxu0 %v19649_v20  ;;  %1392 = vmatprep.subr.bf16.mxu0 %v14172_v18  ;;  %v14175_v21 = vld [vmem:[%s15470_s2 + $0x1c] ss:$12 sps:$4 sm:$0xff]   ;;  %v14177_v22 = vld [vmem:[%s15470_s2 + $0x18] ss:$12 sps:$4 sm:$0xff]   ;;  %v14178_v23 = vld [vmem:[%s15470_s2 + $0x34] ss:$12 sps:$4 sm:$0xff]  }
 0x1c9   : > { %1393 = vmatpush1.bf16.msra.mxu0 %v14174_v19  ;;  %v14180_v24 = vld [vmem:[%s15470_s2 + $0x30] ss:$12 sps:$4 sm:$0xff]   ;;  %v14181_v25 = vld [vmem:[%s15470_s2 + $0x4c] ss:$12 sps:$4 sm:$0xff]   ;;  %v1167_v26 = vld [vmem:[#allocation2] sm:$0xff]  ;;  %vm15064_vm2 = vmmov 0  }
 0x1ca   : > { %1394 = vmatprep.subr.bf16.mxu0 %v14175_v21  ;;  %v14183_v27 = vld [vmem:[%s15470_s2 + $0x48] ss:$12 sps:$4 sm:$0xff]   ;;  %v14184_v29 = vld [vmem:[%s15470_s2 + $0x64] ss:$12 sps:$4 sm:$0xff]   ;;  %v14186_v31 = vld [vmem:[%s15470_s2 + $0x60] ss:$12 sps:$4 sm:$0xff]  }
 0x1cb   : > { %v1168_v28 = vld [vmem:[#allocation2 + $0x8] sm:$0xff]  ;;  %v14189_v33 = vld [vmem:[%s15470_s2 + $0x78] ss:$12 sps:$4 sm:$0xff]   ;;  %v14190_v34 = vld [vmem:[%s15470_s2 + $0x94] ss:$12 sps:$4 sm:$0xff]   ;;  %vm1778_vm3 = vcmask 261120  }
 0x1cc   : > { %v1231_v30 = vpack.c.bf16 %v1168_v28, %v1167_v26  ;;  %v14187_v32 = vld [vmem:[%s15470_s2 + $0x7c] ss:$12 sps:$4 sm:$0xff]   ;;  %v14193_v36 = vld [vmem:[%s15470_s2 + $0xac] ss:$12 sps:$4 sm:$0xff]   ;;  %v1169_v42 = vld [vmem:[#allocation2 + $0x10] sm:$0xff]  ;;  %v19651_v28 = vmov 0.0  }
 0x1cd   : > { %1395 = vmatpush1.bf16.msra.mxu0 %v14177_v22  ;;  %v14192_v35 = vld [vmem:[%s15470_s2 + $0x90] ss:$12 sps:$4 sm:$0xff]   ;;  %v14196_v37 = vld [vmem:[%s15470_s2 + $0x8] ss:$12 sps:$4 sm:$0xff]   ;;  %v14197_v38 = vld [vmem:[%s15470_s2 + $0x20] ss:$12 sps:$4 sm:$0xff]   ;;  %v1232_v45 = vpack.c.bf16 %v1170_v43, %v1169_v42 }
 0x1ce   : > { %1396 = vmatprep.subr.bf16.mxu0 %v14178_v23  ;;  %12923 = vmatprep.mubr.bf16.mxu1 %v1231_v30  ;;  %v14195_v39 = vld [vmem:[%s15470_s2 + $0xa8] ss:$12 sps:$4 sm:$0xff]   ;;  %v14198_v40 = vld [vmem:[%s15470_s2 + $0x38] ss:$12 sps:$4 sm:$0xff]   ;;  %v14199_v41 = vld [vmem:[%s15470_s2 + $0x50] ss:$12 sps:$4 sm:$0xff]  }
 0x1cf   : > { %12907 = vmatprep.subr.bf16.mxu1 %v14196_v37  ;;  %v14200_v44 = vld [vmem:[%s15470_s2 + $0x68] ss:$12 sps:$4 sm:$0xff]   ;;  %v14201_v46 = vld [vmem:[%s15470_s2 + $0x80] ss:$12 sps:$4 sm:$0xff]   ;;  %v14202_v49 = vld [vmem:[%s15470_s2 + $0x98] ss:$12 sps:$4 sm:$0xff]  }
 0x1d0   : > { %12908 = vmatpush3.bf16.msra.mxu1 %v14196_v37  ;;  %v1171_v47 = vld [vmem:[#allocation2 + $0x20] sm:$0xff]  ;;  %v1172_v48 = vld [vmem:[#allocation2 + $0x28] sm:$0xff]  ;;  %v14203_v51 = vld [vmem:[%s15470_s2 + $0xb0] ss:$12 sps:$4 sm:$0xff]   ;;  %s15065_s2 = smov 96   ;;  %vm2531_vm4 = vcmask 130048  }
 0x1d1   : > { %1397 = vmatpush1.bf16.msra.mxu0 %v14180_v24  ;;  %12909 = vmatprep.subr.bf16.mxu1 %v14197_v38  ;;  %v1233_v50 = vpack.c.bf16 %v1172_v48, %v1171_v47  ;;  %v1173_v52 = vld [vmem:[#allocation2 + $0x30] sm:$0xff]  ;;  %v1174_v53 = vld [vmem:[#allocation2 + $0x38] sm:$0xff]  ;;  %v1175_v55 = vld [vmem:[#allocation2 + $0x40] sm:$0xff]  ;;  %s15067_s18 = smov 32   ;;  %s20196_s15 = sld [smem:[#allocation148_spill]] }
 0x1d2   : > { %1398 = vmatprep.subr.bf16.mxu0 %v14181_v25  ;;  %v1234_v54 = vpack.c.bf16 %v1174_v53, %v1173_v52  ;;  %v1176_v56 = vld [vmem:[#allocation2 + $0x48] sm:$0xff]  ;;  %v1177_v58 = vld [vmem:[#allocation2 + $0x50] sm:$0xff]  ;;  %v1178_v59 = vld [vmem:[#allocation2 + $0x58] sm:$0xff]  ;;  %s20199_s0 = sld [smem:[#allocation149_spill]] }
 0x1d3   : > { %v1235_v57 = vpack.c.bf16 %v1176_v56, %v1175_v55  ;;  %v1236_v60 = vpack.c.bf16 %v1178_v59, %v1177_v58  ;;  %v1179_v61 = vld [vmem:[#allocation2 + $0x60] sm:$0xff]  ;;  %v1180_v62 = vld [vmem:[#allocation2 + $0x68] sm:$0xff]  ;;  %v1181_v0 = vld [vmem:[#allocation2 + $0x70] sm:$0xff] }
 0x1d4   : > { %12910 = vmatpush3.bf16.msra.mxu1 %v14197_v38  ;;  %v1237_v63 = vpack.c.bf16 %v1180_v62, %v1179_v61  ;;  %v1182_v1 = vld [vmem:[#allocation2 + $0x78] sm:$0xff]  ;;  %v1183_v2 = vld [vmem:[#allocation2 + $0x80] sm:$0xff]  ;;  %v1184_v3 = vld [vmem:[#allocation2 + $0x88] sm:$0xff] }
 0x1d5   : > { %1399 = vmatpush1.bf16.msra.mxu0 %v14183_v27  ;;  %12911 = vmatprep.subr.bf16.mxu1 %v14198_v40  ;;  %v1238_v4 = vpack.c.bf16 %v1182_v1, %v1181_v0  ;;  %v1239_v5 = vpack.c.bf16 %v1184_v3, %v1183_v2  ;;  %v1185_v6 = vld [vmem:[#allocation2 + $0x90] sm:$0xff]  ;;  %v1186_v7 = vld [vmem:[#allocation2 + $0x98] sm:$0xff]  ;;  %v1187_v8 = vld [vmem:[#allocation2 + $0xa0] sm:$0xff] }
 0x1d6   : > { %1400 = vmatprep.subr.bf16.mxu0 %v14184_v29  ;;  %v1188_v9 = vld [vmem:[#allocation2 + $0xa8] sm:$0xff]  ;;  %v1240_v10 = vpack.c.bf16 %v1186_v7, %v1185_v6  ;;  %v1189_v12 = vld [vmem:[#allocation2 + $0xb0] sm:$0xff]  ;;  %v1190_v13 = vld [vmem:[#allocation2 + $0xb8] sm:$0xff]  ;;  %v1249_v29 = vlaneseq }
 0x1d7   : > { %v1241_v11 = vpack.c.bf16 %v1188_v9, %v1187_v8  ;;  %v1191_v14 = vld [vmem:[#allocation2 + $0xc0] sm:$0xff]  ;;  %v1192_v15 = vld [vmem:[#allocation2 + $0xc8] sm:$0xff]  ;;  %v1242_v16 = vpack.c.bf16 %v1190_v13, %v1189_v12  ;;  %v1193_v18 = vld [vmem:[#allocation2 + $0xd0] sm:$0xff]  ;;  %s20197_s22 = scalar_lea.vmem %s20196_s15, %s15454_s29 }
 0x1d8   : > { %12912 = vmatpush3.bf16.msra.mxu1 %v14198_v40  ;;  %v1243_v17 = vpack.c.bf16 %v1192_v15, %v1191_v14  ;;  %v1194_v19 = vld [vmem:[#allocation2 + $0xd8] sm:$0xff]  ;;  %v1195_v21 = vld [vmem:[#allocation2 + $0xe0] sm:$0xff]  ;;  %v1196_v22 = vld [vmem:[#allocation2 + $0xe8] sm:$0xff]  ;;  %s20200_s19 = scalar_lea.vmem %s20199_s0, %s15454_s29  ;;  %s20214_s29 = sld [smem:[#allocation21_spill]] }
 0x1d9   : > { %1401 = vmatpush1.bf16.msra.mxu0 %v14186_v31  ;;  %12913 = vmatprep.subr.bf16.mxu1 %v14199_v41  ;;  %v1244_v23 = vpack.c.bf16 %v1194_v19, %v1193_v18  ;;  %v1245_v24 = vpack.c.bf16 %v1196_v22, %v1195_v21  ;;  %v1197_v25 = vld [vmem:[#allocation2 + $0xf0] sm:$0xff]  ;;  %v1198_v26 = vld [vmem:[#allocation2 + $0xf8] sm:$0xff] }
 0x1da   : > { %1402 = vmatprep.subr.bf16.mxu0 %v14187_v32  ;;  %v1246_v27 = vpack.c.bf16 %v1198_v26, %v1197_v25  ;;  %v15703_v32 = vld [vmem:[%s15479_s6] sm:$0x7]  ;;  %s15066_s6 = smov 64  }
 0x1dc   : > { %12914 = vmatpush3.bf16.msra.mxu1 %v14199_v41 }
 0x1dd   : > { %1403 = vmatpush1.bf16.msra.mxu0 %v14189_v33  ;;  %12915 = vmatprep.subr.bf16.mxu1 %v14200_v44 }
 0x1de   : > { %1404 = vmatprep.subr.bf16.mxu0 %v14190_v34  ;;  %p12346_p7 = scmp.ne.s32.totalorder %s20214_s29, 1 }
 0x1df   : > { %s20215_s11 = sld [smem:[#allocation158_spill]] (!%p12346_p7) }
 0x1e0   : > { %12916 = vmatpush3.bf16.msra.mxu1 %v14200_v44 }
 0x1e1   : > { %1405 = vmatpush1.bf16.msra.mxu0 %v14192_v35  ;;  %12917 = vmatprep.subr.bf16.mxu1 %v14201_v46 }
 0x1e2   : > { %1406 = vmatprep.subr.bf16.mxu0 %v14193_v36 }
 0x1e4   : > { %12918 = vmatpush3.bf16.msra.mxu1 %v14201_v46 }
 0x1e5   : > { %1407 = vmatpush1.bf16.msra.mxu0 %v14195_v39  ;;  %12919 = vmatprep.subr.bf16.mxu1 %v14202_v49 }
 0x1e6   : > { %13003 = vmatprep.subr.bf16.mxu0 %v19651_v28 }
 0x1e8   : > { %1425 = vmatmul.mubr.bf16.vlgmr.msra.gmra.mrb[0].mxu0 %v1231_v30  ;;  %12920 = vmatpush3.bf16.msra.mxu1 %v14202_v49  ;;  %v15699_v30 = vshrl.u32 %v1249_v29, 7 }
 0x1e9   : > { %1434 = vmatprep.mubr.bf16.mxu0 %v19649_v20  ;;  %12921 = vmatprep.subr.bf16.mxu1 %v14203_v51 }
 0x1ea   : > { %19865 = vst [vmem:[#allocation31_spill] sm:$0xff] %v15699_v30  ;;  %v19648_v31 = vsub.s32 0, %v15699_v30  ;;  %v19647_v33 = vsub.s32 1, %v15699_v30 }
 0x1ec   : > { %12922 = vmatpush3.bf16.msra.mxu1 %v14203_v51  ;;  %v15709_v34 = vrot.slane %v15703_v32, %v19648_v31  ;;  %v15714_v36 = vrot.slane %v15703_v32, %v19647_v33 }
 0x1ed   : > { %12955 = vmatprep.subr.bf16.mxu1 %v19651_v28 }
 0x1ef   : > { %12924 = vmatmul.mubr.bf16.vlgmr.msra.gmra.mrb[0].mxu1 %v1232_v45 }
 0x1f0   : > { %1435 = vmatmul.mubr.bf16.gmra.mrb[4].mxu0 %v1232_v45  ;;  %12927 = vmatprep.mubr.bf16.mxu1 %v1233_v50 }
 0x1f1   : > { %1444 = vmatprep.mubr.bf16.mxu0 %v19649_v20 }
 0x1f7   : > { %12928 = vmatmul.mubr.bf16.gmra.mrb[4].mxu1 %v1234_v54 }
 0x1f8   : > { %1445 = vmatmul.mubr.bf16.gmra.mrb[8].mxu0 %v1233_v50  ;;  %12931 = vmatprep.mubr.bf16.mxu1 %v1235_v57 }
 0x1f9   : > { %1454 = vmatprep.mubr.bf16.mxu0 %v19649_v20 }
 0x1ff   : > { %12932 = vmatmul.mubr.bf16.gmra.mrb[8].mxu1 %v1236_v60 }
 0x200   : > { %1455 = vmatmul.mubr.bf16.gmra.mrb[12].mxu0 %v1234_v54  ;;  %12935 = vmatprep.mubr.bf16.mxu1 %v1237_v63 }
 0x201   : > { %1464 = vmatprep.mubr.bf16.mxu0 %v19649_v20 }
 0x207   : > { %12936 = vmatmul.mubr.bf16.gmra.mrb[12].mxu1 %v1238_v4 }
 0x208   : > { %1465 = vmatmul.mubr.bf16.gmra.mrb[16].mxu0 %v1235_v57  ;;  %12939 = vmatprep.mubr.bf16.mxu1 %v1239_v5 }
 0x209   : > { %1474 = vmatprep.mubr.bf16.mxu0 %v19649_v20 }
 0x20f   : > { %12940 = vmatmul.mubr.bf16.gmra.mrb[16].mxu1 %v1240_v10 }
 0x210   : > { %1475 = vmatmul.mubr.bf16.gmra.mrb[20].mxu0 %v1236_v60  ;;  %12943 = vmatprep.mubr.bf16.mxu1 %v1241_v11 }
 0x211   : > { %1484 = vmatprep.mubr.bf16.mxu0 %v19649_v20 }
 0x217   : > { %12944 = vmatmul.mubr.bf16.gmra.mrb[20].mxu1 %v1242_v16 }
 0x218   : > { %1485 = vmatmul.mubr.bf16.gmra.mrb[24].mxu0 %v1237_v63  ;;  %12947 = vmatprep.mubr.bf16.mxu1 %v1243_v17 }
 0x219   : > { %1494 = vmatprep.mubr.bf16.mxu0 %v19649_v20 }
 0x21f   : > { %12948 = vmatmul.mubr.bf16.gmra.mrb[24].mxu1 %v1244_v23 }
 0x220   : > { %1495 = vmatmul.mubr.bf16.gmra.mrb[28].mxu0 %v1238_v4  ;;  %12951 = vmatprep.mubr.bf16.mxu1 %v1245_v24 }
 0x221   : > { %1504 = vmatprep.mubr.bf16.mxu0 %v19649_v20 }
 0x227   : > { %12952 = vmatmul.mubr.bf16.gmra.mrb[28].mxu1 %v1246_v27 }
 0x228   : > { %1505 = vmatmul.mubr.bf16.gmra.mrb[32].mxu0 %v1239_v5  ;;  %12957 = vmatprep.mubr.msk.bf16.mxu1 %vm15064_vm2, %v19651_v28 }
 0x229   : > { %1514 = vmatprep.mubr.bf16.mxu0 %v19649_v20 }
 0x230   : > { %1515 = vmatmul.mubr.bf16.gmra.mrb[36].mxu0 %v1240_v10 }
 0x231   : > { %1524 = vmatprep.mubr.bf16.mxu0 %v19649_v20 }
 0x238   : > { %1525 = vmatmul.mubr.bf16.gmra.mrb[40].mxu0 %v1241_v11 }
 0x239   : > { %1534 = vmatprep.mubr.bf16.mxu0 %v19649_v20 }
 0x240   : > { %1535 = vmatmul.mubr.bf16.gmra.mrb[44].mxu0 %v1242_v16 }
 0x241   : > { %1544 = vmatprep.mubr.bf16.mxu0 %v19649_v20 }
 0x248   : > { %1545 = vmatmul.mubr.bf16.gmra.mrb[48].mxu0 %v1243_v17  ;;  %v1259_v17 = vsub.s32 2, %v15699_v30 }
 0x249   : > { %1554 = vmatprep.mubr.bf16.mxu0 %v19649_v20 }
 0x24a   : > { %v15782_v25 = vrot.slane %v15703_v32, %v1259_v17 }
 0x250   : > { %1555 = vmatmul.mubr.bf16.gmra.mrb[52].mxu0 %v1244_v23 }
 0x251   : > { %1564 = vmatprep.mubr.bf16.mxu0 %v19649_v20 }
 0x258   : > { %1565 = vmatmul.mubr.bf16.gmra.mrb[56].mxu0 %v1245_v24 }
 0x259   : > { %1574 = vmatprep.mubr.bf16.mxu0 %v19649_v20 }
 0x260   : > { %1575 = vmatmul.mubr.bf16.gmra.mrb[60].mxu0 %v1246_v27 }
 0x261   : > { %13005 = vmatprep.mubr.msk.bf16.mxu0 %vm15064_vm2, %v19651_v28 }
 0x2bb   : > { %v1426_v35 = vpop.f32.mrb[0].mxu0 }
 0x2bc   : > { %v1428_v37 = vpop.f32.mrb[1].mxu0  ;;  %v1427_v39 = vadd.f32 %v1426_v35, %v15709_v34 }
 0x2bd   : > { %v1430_v38 = vpop.f32.mrb[2].mxu0  ;;  %v1429_v42 = vadd.f32 %v1428_v37, %v15714_v36 }
 0x2be   : > { %v1431_v40 = vadd.f32 %v1430_v38, %v15709_v34  ;;  %v1432_v41 = vpop.f32.mrb[3].mxu0 }
 0x2bf   : > { %v1433_v43 = vadd.f32 %v1432_v41, %v15714_v36 }
 0x2c0   : > { %v15720_v44 = vpack.c.bf16 %v1431_v40, %v1427_v39 }
 0x2c1   : > { %v15722_v45 = vpack.c.bf16 %v1433_v43, %v1429_v42 }
 0x2c2   : > { %19866 = vst [vmem:[#allocation32_spill] sm:$0xff] %v15720_v44  ;;  %v12925_v18 = vpop.f32.mrb[0].mxu1 }
 0x2c3   : > { %19867 = vst [vmem:[#allocation33_spill] sm:$0xff] %v15722_v45  ;;  %v1436_v46 = vpop.f32.mrb[4].mxu0  ;;  %v1783_v47 = vsel %vm1778_vm3, %v15722_v45, 0  ;;  %v1619_v22 = vpop.f32.mrb[1].mxu1  ;;  %v1628_v38 = vadd.f32 %v12925_v18, %v15782_v25 }
 0x2c4   : > { %v1437_v48 = vadd.f32 %v1436_v46, %v15709_v34  ;;  %v1438_v49 = vpop.f32.mrb[5].mxu0  ;;  %12956 = vmatpush3.bf16.xpose.msra.mxu1 %v1783_v47  ;;  %v12926_v26 = vpop.f32.mrb[2].mxu1  ;;  %v1620_v39 = vadd.f32 %v1619_v22, %v15782_v25 }
 0x2c5   : > { %v1439_v50 = vadd.f32 %v1438_v49, %v15714_v36  ;;  %v1440_v51 = vpop.f32.mrb[6].mxu0  ;;  %12961 = vmatprep.subr.bf16.mxu1 %v19651_v28  ;;  %v1622_v35 = vpop.f32.mrb[3].mxu1  ;;  %v1631_v40 = vadd.f32 %v12926_v26, %v15782_v25 }
 0x2c6   : > { %v1441_v52 = vadd.f32 %v1440_v51, %v15709_v34  ;;  %v1442_v53 = vpop.f32.mrb[7].mxu0  ;;  %v1623_v32 = vadd.f32 %v1622_v35, %v15782_v25 }
 0x2c7   : > { %v1443_v54 = vadd.f32 %v1442_v53, %v15714_v36  ;;  %v15796_v43 = vpack.c.bf16 %v1631_v40, %v1628_v38 }
 0x2c8   : > { %v15731_v55 = vpack.c.bf16 %v1441_v52, %v1437_v48  ;;  %v15798_v46 = vpack.c.bf16 %v1623_v32, %v1620_v39 }
 0x2c9   : > { %v15733_v56 = vpack.c.bf16 %v1443_v54, %v1439_v50  ;;  %19876 = vst [vmem:[#allocation42_spill] sm:$0xff] %v15796_v43 }
 0x2ca   : > { %19868 = vst [vmem:[#allocation34_spill] sm:$0xff] %v15731_v55  ;;  %3694 = vrot.lane.b32.xlu1 %v15731_v55, %s15065_s2  ;;  %19877 = vst [vmem:[#allocation43_spill] sm:$0xff] %v15798_v46  ;;  %v12929_v49 = vpop.f32.mrb[4].mxu1 }
 0x2cb   : > { %19869 = vst [vmem:[#allocation35_spill] sm:$0xff] %v15733_v56  ;;  %v1446_v57 = vpop.f32.mrb[8].mxu0  ;;  %3697 = vrot.lane.b32.xlu0 %v15733_v56, %s15065_s2  ;;  %12958 = vmatmul.mubr.msk.bf16.vlgmr.msra.gmra.mrb[32].mxu1 %vm1778_vm3, %v15720_v44  ;;  %v1830_v58 = vsel %vm1778_vm3, %v15733_v56, 0  ;;  %v1635_v52 = vpop.f32.mrb[5].mxu1 }
 0x2cc   : > { %v1447_v59 = vadd.f32 %v1446_v57, %v15709_v34  ;;  %v1448_v60 = vpop.f32.mrb[9].mxu0  ;;  %12962 = vmatpush3.bf16.xpose.msra.mxu1 %v1830_v58  ;;  %12963 = vmatprep.mubr.msk.bf16.mxu1 %vm15064_vm2, %v19651_v28  ;;  %v12930_v57 = vpop.f32.mrb[6].mxu1 }
 0x2cd   : > { %v1449_v61 = vadd.f32 %v1448_v60, %v15714_v36  ;;  %v1450_v62 = vpop.f32.mrb[10].mxu0  ;;  %12967 = vmatprep.subr.bf16.mxu1 %v19651_v28  ;;  %v1638_v60 = vpop.f32.mrb[7].mxu1 }
 0x2ce   : > { %v1451_v63 = vadd.f32 %v1450_v62, %v15709_v34  ;;  %v1452_v0 = vpop.f32.mrb[11].mxu0  ;;  %v1644_v62 = vadd.f32 %v12929_v49, %v15782_v25 }
 0x2cf   : > { %v1453_v1 = vadd.f32 %v1452_v0, %v15714_v36  ;;  %v1647_v0 = vadd.f32 %v12930_v57, %v15782_v25 }
 0x2d0   : > { %v15750_v2 = vpack.c.bf16 %v1451_v63, %v1447_v59  ;;  %v1636_v63 = vadd.f32 %v1635_v52, %v15782_v25 }
 0x2d1   : > { %v15752_v3 = vpack.c.bf16 %v1453_v1, %v1449_v61 }
 0x2d2   : > { %19870 = vst [vmem:[#allocation36_spill] sm:$0xff] %v15750_v2 }
 0x2d3   : > { %19871 = vst [vmem:[#allocation37_spill] sm:$0xff] %v15752_v3  ;;  %v1456_v4 = vpop.f32.mrb[12].mxu0  ;;  %12964 = vmatmul.mubr.msk.bf16.vlgmr.msra.gmra.mrb[36].mxu1 %vm1778_vm3, %v15731_v55  ;;  %v1877_v5 = vsel %vm1778_vm3, %v15752_v3, 0 }
 0x2d4   : > { %v1457_v6 = vadd.f32 %v1456_v4, %v15709_v34  ;;  %v1458_v7 = vpop.f32.mrb[13].mxu0  ;;  %12968 = vmatpush3.bf16.xpose.msra.mxu1 %v1877_v5  ;;  %12969 = vmatprep.mubr.msk.bf16.mxu1 %vm15064_vm2, %v19651_v28  ;;  %v1639_v4 = vadd.f32 %v1638_v60, %v15782_v25 }
 0x2d5   : > { %v1459_v8 = vadd.f32 %v1458_v7, %v15714_v36  ;;  %v1460_v9 = vpop.f32.mrb[14].mxu0  ;;  %12973 = vmatprep.subr.bf16.mxu1 %v19651_v28 }
 0x2d6   : > { %v1461_v10 = vadd.f32 %v1460_v9, %v15709_v34  ;;  %v1462_v11 = vpop.f32.mrb[15].mxu0  ;;  %v15823_v7 = vpack.c.bf16 %v1639_v4, %v1636_v63 }
 0x2d7   : > { %v1463_v12 = vadd.f32 %v1462_v11, %v15714_v36 }
 0x2d8   : > { %v15765_v13 = vpack.c.bf16 %v1461_v10, %v1457_v6  ;;  %v15819_v6 = vpack.c.bf16 %v1647_v0, %v1644_v62  ;;  %19881 = vst [vmem:[#allocation47_spill] sm:$0xff] %v15823_v7  ;;  %v12933_v10 = vpop.f32.mrb[8].mxu1 }
 0x2d9   : > { %v15767_v14 = vpack.c.bf16 %v1463_v12, %v1459_v8  ;;  %v1660_v22 = vadd.f32 %v12933_v10, %v15782_v25 }
 0x2da   : > { %19872 = vst [vmem:[#allocation38_spill] sm:$0xff] %v15765_v13  ;;  %3800 = vrot.lane.b32.xlu0 %v15765_v13, %s15065_s2  ;;  %19880 = vst [vmem:[#allocation46_spill] sm:$0xff] %v15819_v6 }
 0x2db   : > { %19873 = vst [vmem:[#allocation39_spill] sm:$0xff] %v15767_v14  ;;  %v1466_v15 = vpop.f32.mrb[16].mxu0  ;;  %12970 = vmatmul.mubr.msk.bf16.vlgmr.msra.gmra.mrb[40].mxu1 %vm1778_vm3, %v15750_v2  ;;  %v1924_v16 = vsel %vm1778_vm3, %v15767_v14, 0 }
 0x2dc   : > { %v1467_v19 = vadd.f32 %v1466_v15, %v15709_v34  ;;  %v1468_v21 = vpop.f32.mrb[17].mxu0  ;;  %12974 = vmatpush3.bf16.xpose.msra.mxu1 %v1924_v16  ;;  %12975 = vmatprep.mubr.msk.bf16.mxu1 %vm15064_vm2, %v19651_v28  ;;  %v1651_v15 = vpop.f32.mrb[9].mxu1 }
 0x2dd   : > { %v1469_v23 = vadd.f32 %v1468_v21, %v15714_v36  ;;  %v1470_v24 = vpop.f32.mrb[18].mxu0  ;;  %12979 = vmatprep.subr.bf16.mxu1 %v19651_v28  ;;  %v12934_v18 = vpop.f32.mrb[10].mxu1 }
 0x2de   : > { %v1471_v27 = vadd.f32 %v1470_v24, %v15709_v34  ;;  %v1472_v29 = vpop.f32.mrb[19].mxu0  ;;  %3803 = vrot.lane.b32.xlu0 %v15767_v14, %s15065_s2  ;;  %v1663_v24 = vadd.f32 %v12934_v18, %v15782_v25  ;;  %v1654_v26 = vpop.f32.mrb[11].mxu1 }
 0x2df   : > { %v1473_v37 = vadd.f32 %v1472_v29, %v15714_v36  ;;  %v1655_v29 = vadd.f32 %v1654_v26, %v15782_v25  ;;  %v12937_v35 = vpop.f32.mrb[12].mxu1 }
 0x2e0   : > { %v15791_v41 = vpack.c.bf16 %v1471_v27, %v1467_v19  ;;  %v15844_v38 = vpack.c.bf16 %v1663_v24, %v1660_v22  ;;  %v1676_v39 = vadd.f32 %v12937_v35, %v15782_v25  ;;  %v1667_v40 = vpop.f32.mrb[13].mxu1 }
 0x2e1   : > { %v15794_v42 = vpack.c.bf16 %v1473_v37, %v1469_v23  ;;  %v1652_v23 = vadd.f32 %v1651_v15, %v15782_v25  ;;  %v12938_v49 = vpop.f32.mrb[14].mxu1 }
 0x2e2   : > { %19874 = vst [vmem:[#allocation40_spill] sm:$0xff] %v15791_v41  ;;  %19883 = vst [vmem:[#allocation49_spill] sm:$0xff] %v15844_v38 }
 0x2e3   : > { %19875 = vst [vmem:[#allocation41_spill] sm:$0xff] %v15794_v42  ;;  %v1476_v47 = vpop.f32.mrb[20].mxu0  ;;  %12976 = vmatmul.mubr.msk.bf16.vlgmr.msra.gmra.mrb[44].mxu1 %vm1778_vm3, %v15765_v13  ;;  %v1971_v48 = vsel %vm1778_vm3, %v15794_v42, 0 }
 0x2e4   : > { %v1477_v50 = vadd.f32 %v1476_v47, %v15709_v34  ;;  %v1478_v51 = vpop.f32.mrb[21].mxu0  ;;  %12980 = vmatpush3.bf16.xpose.msra.mxu1 %v1971_v48  ;;  %12981 = vmatprep.mubr.msk.bf16.mxu1 %vm15064_vm2, %v19651_v28  ;;  %v15849_v47 = vpack.c.bf16 %v1655_v29, %v1652_v23  ;;  %v1668_v48 = vadd.f32 %v1667_v40, %v15782_v25 }
 0x2e5   : > { %v1479_v53 = vadd.f32 %v1478_v51, %v15714_v36  ;;  %v1480_v54 = vpop.f32.mrb[22].mxu0  ;;  %12985 = vmatprep.subr.bf16.mxu1 %v19651_v28  ;;  %v1670_v51 = vpop.f32.mrb[15].mxu1 }
 0x2e6   : > { %v1481_v58 = vadd.f32 %v1480_v54, %v15709_v34  ;;  %v1482_v59 = vpop.f32.mrb[23].mxu0  ;;  %19885 = vst [vmem:[#allocation51_spill] sm:$0xff] %v15849_v47  ;;  %v1671_v54 = vadd.f32 %v1670_v51, %v15782_v25  ;;  %v12941_v63 = vpop.f32.mrb[16].mxu1 }
 0x2e7   : > { %v1483_v61 = vadd.f32 %v1482_v59, %v15714_v36 }
 0x2e8   : > { %v15814_v1 = vpack.c.bf16 %v1481_v58, %v1477_v50  ;;  %v1679_v50 = vadd.f32 %v12938_v49, %v15782_v25  ;;  %v15865_v62 = vpack.c.bf16 %v1671_v54, %v1668_v48 }
 0x2e9   : > { %v15817_v5 = vpack.c.bf16 %v1483_v61, %v1479_v53 }
 0x2ea   : > { %19878 = vst [vmem:[#allocation44_spill] sm:$0xff] %v15814_v1  ;;  %3906 = vrot.lane.b32.xlu0 %v15814_v1, %s15065_s2  ;;  %v15861_v59 = vpack.c.bf16 %v1679_v50, %v1676_v39  ;;  %19887 = vst [vmem:[#allocation53_spill] sm:$0xff] %v15865_v62 }
 0x2eb   : > { %19879 = vst [vmem:[#allocation45_spill] sm:$0xff] %v15817_v5  ;;  %v1486_v8 = vpop.f32.mrb[24].mxu0  ;;  %3909 = vrot.lane.b32.xlu1 %v15817_v5, %s15065_s2  ;;  %12982 = vmatmul.mubr.msk.bf16.vlgmr.msra.gmra.mrb[48].mxu1 %vm1778_vm3, %v15791_v41  ;;  %v2018_v9 = vsel %vm1778_vm3, %v15817_v5, 0 }
 0x2ec   : > { %v1487_v11 = vadd.f32 %v1486_v8, %v15709_v34  ;;  %v1488_v12 = vpop.f32.mrb[25].mxu0  ;;  %12986 = vmatpush3.bf16.xpose.msra.mxu1 %v2018_v9  ;;  %12987 = vmatprep.mubr.msk.bf16.mxu1 %vm15064_vm2, %v19651_v28  ;;  %19886 = vst [vmem:[#allocation52_spill] sm:$0xff] %v15861_v59  ;;  %v1692_v8 = vadd.f32 %v12941_v63, %v15782_v25  ;;  %v1683_v9 = vpop.f32.mrb[17].mxu1 }
 0x2ed   : > { %v1489_v16 = vadd.f32 %v1488_v12, %v15714_v36  ;;  %v1490_v17 = vpop.f32.mrb[26].mxu0  ;;  %12991 = vmatprep.subr.bf16.mxu1 %v19651_v28  ;;  %v12942_v12 = vpop.f32.mrb[18].mxu1 }
 0x2ee   : > { %v1491_v19 = vadd.f32 %v1490_v17, %v15709_v34  ;;  %v1492_v21 = vpop.f32.mrb[27].mxu0  ;;  %v1686_v17 = vpop.f32.mrb[19].mxu1 }
 0x2ef   : > { %v1493_v27 = vadd.f32 %v1492_v21, %v15714_v36  ;;  %v12945_v39 = vpop.f32.mrb[20].mxu1 }
 0x2f0   : > { %v15842_v37 = vpack.c.bf16 %v1491_v19, %v1487_v11  ;;  %v1684_v11 = vadd.f32 %v1683_v9, %v15782_v25  ;;  %v1687_v19 = vadd.f32 %v1686_v17, %v15782_v25  ;;  %v1708_v49 = vadd.f32 %v12945_v39, %v15782_v25  ;;  %v1699_v50 = vpop.f32.mrb[21].mxu1 }
 0x2f1   : > { %v15847_v32 = vpack.c.bf16 %v1493_v27, %v1489_v16  ;;  %v1695_v16 = vadd.f32 %v12942_v12, %v15782_v25 }
 0x2f2   : > { %19882 = vst [vmem:[#allocation48_spill] sm:$0xff] %v15842_v37  ;;  %v15885_v24 = vpack.c.bf16 %v1687_v19, %v1684_v11 }
 0x2f3   : > { %19884 = vst [vmem:[#allocation50_spill] sm:$0xff] %v15847_v32  ;;  %v1496_v52 = vpop.f32.mrb[28].mxu0  ;;  %12988 = vmatmul.mubr.msk.bf16.vlgmr.msra.gmra.mrb[52].mxu1 %vm1778_vm3, %v15814_v1  ;;  %v2065_v53 = vsel %vm1778_vm3, %v15847_v32, 0  ;;  %v15877_v21 = vpack.c.bf16 %v1695_v16, %v1692_v8 }
 0x2f4   : > { %v1497_v57 = vadd.f32 %v1496_v52, %v15709_v34  ;;  %v1498_v58 = vpop.f32.mrb[29].mxu0  ;;  %12992 = vmatpush3.bf16.xpose.msra.mxu1 %v2065_v53  ;;  %12993 = vmatprep.mubr.msk.bf16.mxu1 %vm15064_vm2, %v19651_v28  ;;  %19891 = vst [vmem:[#allocation57_spill] sm:$0xff] %v15885_v24  ;;  %v1700_v52 = vadd.f32 %v1699_v50, %v15782_v25  ;;  %v12946_v53 = vpop.f32.mrb[22].mxu1 }
 0x2f5   : > { %v1499_v60 = vadd.f32 %v1498_v58, %v15714_v36  ;;  %v1500_v61 = vpop.f32.mrb[30].mxu0  ;;  %12997 = vmatprep.subr.bf16.mxu1 %v19651_v28  ;;  %19890 = vst [vmem:[#allocation56_spill] sm:$0xff] %v15877_v21  ;;  %v1702_v58 = vpop.f32.mrb[23].mxu1 }
 0x2f6   : > { %v1501_v0 = vadd.f32 %v1500_v61, %v15709_v34  ;;  %v1502_v4 = vpop.f32.mrb[31].mxu0  ;;  %v1703_v61 = vadd.f32 %v1702_v58, %v15782_v25  ;;  %v12949_v16 = vpop.f32.mrb[24].mxu1 }
 0x2f7   : > { %v1503_v10 = vadd.f32 %v1502_v4, %v15714_v36 }
 0x2f8   : > { %v15871_v15 = vpack.c.bf16 %v1501_v0, %v1497_v57  ;;  %v1711_v57 = vadd.f32 %v12946_v53, %v15782_v25  ;;  %v15908_v8 = vpack.c.bf16 %v1703_v61, %v1700_v52 }
 0x2f9   : > { %v15874_v18 = vpack.c.bf16 %v1503_v10, %v1499_v60 }
 0x2fa   : > { %19888 = vst [vmem:[#allocation54_spill] sm:$0xff] %v15871_v15  ;;  %v15902_v63 = vpack.c.bf16 %v1711_v57, %v1708_v49  ;;  %19895 = vst [vmem:[#allocation61_spill] sm:$0xff] %v15908_v8 }
 0x2fb   : > { %19889 = vst [vmem:[#allocation55_spill] sm:$0xff] %v15874_v18  ;;  %v1506_v22 = vpop.f32.mrb[32].mxu0  ;;  %4015 = vrot.lane.b32.xlu1 %v15874_v18, %s15065_s2  ;;  %12994 = vmatmul.mubr.msk.bf16.vlgmr.msra.gmra.mrb[56].mxu1 %vm1778_vm3, %v15842_v37  ;;  %v2112_v23 = vsel %vm1778_vm3, %v15874_v18, 0 }
 0x2fc   : > { %v1507_v26 = vadd.f32 %v1506_v22, %v15709_v34  ;;  %v1508_v27 = vpop.f32.mrb[33].mxu0  ;;  %12998 = vmatpush3.bf16.xpose.msra.mxu1 %v2112_v23  ;;  %12999 = vmatprep.mubr.msk.bf16.mxu1 %vm15064_vm2, %v19651_v28  ;;  %19894 = vst [vmem:[#allocation60_spill] sm:$0xff] %v15902_v63  ;;  %v1724_v22 = vadd.f32 %v12949_v16, %v15782_v25  ;;  %v1715_v23 = vpop.f32.mrb[25].mxu1 }
 0x2fd   : > { %v1509_v29 = vadd.f32 %v1508_v27, %v15714_v36  ;;  %v1510_v35 = vpop.f32.mrb[34].mxu0  ;;  %13009 = vmatprep.subr.bf16.mxu1 %v19651_v28  ;;  %v1716_v27 = vadd.f32 %v1715_v23, %v15782_v25 }
 0x2fe   : > { %v1511_v40 = vadd.f32 %v1510_v35, %v15709_v34  ;;  %v1512_v48 = vpop.f32.mrb[35].mxu0 }
 0x2ff   : > { %v1513_v51 = vadd.f32 %v1512_v48, %v15714_v36 }
 0x300   : > { %v15896_v54 = vpack.c.bf16 %v1511_v40, %v1507_v26 }
 0x301   : > { %v15899_v60 = vpack.c.bf16 %v1513_v51, %v1509_v29  ;;  %v12950_v29 = vpop.f32.mrb[26].mxu1 }
 0x302   : > { %19892 = vst [vmem:[#allocation58_spill] sm:$0xff] %v15896_v54  ;;  %v1727_v39 = vadd.f32 %v12950_v29, %v15782_v25  ;;  %v1718_v40 = vpop.f32.mrb[27].mxu1 }
 0x303   : > { %19893 = vst [vmem:[#allocation59_spill] sm:$0xff] %v15899_v60  ;;  %13000 = vmatmul.mubr.msk.bf16.vlgmr.msra.gmra.mrb[60].mxu1 %vm1778_vm3, %v15871_v15  ;;  %v2159_v0 = vsel %vm1778_vm3, %v15899_v60, 0  ;;  %v1516_v4 = vpop.f32.mrb[36].mxu0  ;;  %v1719_v49 = vadd.f32 %v1718_v40, %v15782_v25 }
 0x304   : > { %13004 = vmatpush3.bf16.xpose.msra.mxu0 %v2159_v0  ;;  %v1517_v9 = vadd.f32 %v1516_v4, %v15709_v34  ;;  %v1518_v10 = vpop.f32.mrb[37].mxu0  ;;  %13011 = vmatprep.mubr.msk.bf16.mxu1 %vm15064_vm2, %v19651_v28  ;;  %v15925_v50 = vpack.c.bf16 %v1727_v39, %v1724_v22  ;;  %v12953_v4 = vpop.f32.mrb[28].mxu1 }
 0x305   : > { %v1519_v11 = vadd.f32 %v1518_v10, %v15714_v36  ;;  %v1520_v12 = vpop.f32.mrb[38].mxu0  ;;  %13015 = vmatprep.subr.bf16.mxu0 %v19651_v28  ;;  %v15931_v53 = vpack.c.bf16 %v1719_v49, %v1716_v27 }
 0x306   : > { %v1521_v17 = vadd.f32 %v1520_v12, %v15709_v34  ;;  %v1522_v19 = vpop.f32.mrb[39].mxu0  ;;  %19898 = vst [vmem:[#allocation64_spill] sm:$0xff] %v15925_v50  ;;  %v1731_v12 = vpop.f32.mrb[29].mxu1 }
 0x307   : > { %v1523_v26 = vadd.f32 %v1522_v19, %v15714_v36  ;;  %19899 = vst [vmem:[#allocation65_spill] sm:$0xff] %v15931_v53  ;;  %v12954_v19 = vpop.f32.mrb[30].mxu1 }
 0x308   : > { %v15919_v35 = vpack.c.bf16 %v1521_v17, %v1517_v9  ;;  %v1732_v17 = vadd.f32 %v1731_v12, %v15782_v25  ;;  %v1743_v23 = vadd.f32 %v12954_v19, %v15782_v25 }
 0x309   : > { %v15922_v48 = vpack.c.bf16 %v1523_v26, %v1519_v11  ;;  %v1740_v11 = vadd.f32 %v12953_v4, %v15782_v25  ;;  %v1734_v26 = vpop.f32.mrb[31].mxu1 }
 0x30a   : > { %19896 = vst [vmem:[#allocation62_spill] sm:$0xff] %v15919_v35  ;;  %v1735_v29 = vadd.f32 %v1734_v26, %v15782_v25 }
 0x30b   : > { %19897 = vst [vmem:[#allocation63_spill] sm:$0xff] %v15922_v48  ;;  %13006 = vmatmul.mubr.msk.bf16.vlgmr.msra.gmra.mrb[64].mxu0 %vm1778_vm3, %v15896_v54  ;;  %v1526_v51 = vpop.f32.mrb[40].mxu0  ;;  %v2206_v52 = vsel %vm1778_vm3, %v15922_v48, 0  ;;  %v15948_v39 = vpack.c.bf16 %v1743_v23, %v1740_v11 }
 0x30c   : > { %v1527_v57 = vadd.f32 %v1526_v51, %v15709_v34  ;;  %v1528_v58 = vpop.f32.mrb[41].mxu0  ;;  %13010 = vmatpush3.bf16.xpose.msra.mxu1 %v2206_v52  ;;  %13017 = vmatprep.mubr.msk.bf16.mxu0 %vm15064_vm2, %v19651_v28  ;;  %v15954_v51 = vpack.c.bf16 %v1735_v29, %v1732_v17 }
 0x30d   : > { %v1529_v61 = vadd.f32 %v1528_v58, %v15714_v36  ;;  %v1530_v0 = vpop.f32.mrb[42].mxu0  ;;  %13021 = vmatprep.subr.bf16.mxu1 %v19651_v28  ;;  %19902 = vst [vmem:[#allocation68_spill] sm:$0xff] %v15948_v39 }
 0x30e   : > { %v1531_v9 = vadd.f32 %v1530_v0, %v15709_v34  ;;  %v1532_v10 = vpop.f32.mrb[43].mxu0  ;;  %19903 = vst [vmem:[#allocation69_spill] sm:$0xff] %v15954_v51 }
 0x30f   : > { %v1533_v16 = vadd.f32 %v1532_v10, %v15714_v36 }
 0x310   : > { %v15942_v22 = vpack.c.bf16 %v1531_v9, %v1527_v57 }
 0x311   : > { %v15945_v27 = vpack.c.bf16 %v1533_v16, %v1529_v61 }
 0x312   : > { %19900 = vst [vmem:[#allocation66_spill] sm:$0xff] %v15942_v22 }
 0x313   : > { %19901 = vst [vmem:[#allocation67_spill] sm:$0xff] %v15945_v27  ;;  %v1536_v40 = vpop.f32.mrb[44].mxu0  ;;  %v2253_v49 = vsel %vm1778_vm3, %v15945_v27, 0  ;;  %13012 = vmatmul.mubr.msk.bf16.vlgmr.msra.gmra.mrb[64].mxu1 %vm1778_vm3, %v15919_v35 }
 0x314   : > { %v1537_v52 = vadd.f32 %v1536_v40, %v15709_v34  ;;  %v1538_v57 = vpop.f32.mrb[45].mxu0  ;;  %13016 = vmatpush3.bf16.xpose.msra.mxu0 %v2253_v49  ;;  %13023 = vmatprep.mubr.msk.bf16.mxu1 %vm15064_vm2, %v19651_v28 }
 0x315   : > { %v1539_v25 = vadd.f32 %v1538_v57, %v15714_v36  ;;  %v1540_v58 = vpop.f32.mrb[46].mxu0  ;;  %13027 = vmatprep.subr.bf16.mxu0 %v19651_v28 }
 0x316   : > { %v1541_v61 = vadd.f32 %v1540_v58, %v15709_v34  ;;  %v1542_v0 = vpop.f32.mrb[47].mxu0 }
 0x317   : > { %v1543_v4 = vadd.f32 %v1542_v0, %v15714_v36 }
 0x318   : > { %v15963_v9 = vpack.c.bf16 %v1541_v61, %v1537_v52 }
 0x319   : > { %v15965_v10 = vpack.c.bf16 %v1543_v4, %v1539_v25 }
 0x31a   : > { %19904 = vst [vmem:[#allocation70_spill] sm:$0xff] %v15963_v9 }
 0x31b   : > { %19905 = vst [vmem:[#allocation71_spill] sm:$0xff] %v15965_v10  ;;  %v1546_v11 = vpop.f32.mrb[48].mxu0  ;;  %v2300_v12 = vsel %vm1778_vm3, %v15965_v10, 0  ;;  %13018 = vmatmul.mubr.msk.bf16.vlgmr.msra.gmra.mrb[68].mxu0 %vm1778_vm3, %v15942_v22 }
 0x31c   : > { %v1547_v16 = vadd.f32 %v1546_v11, %v15709_v34  ;;  %v1548_v17 = vpop.f32.mrb[49].mxu0  ;;  %13022 = vmatpush3.bf16.xpose.msra.mxu1 %v2300_v12  ;;  %13029 = vmatprep.mubr.msk.bf16.mxu0 %vm15064_vm2, %v19651_v28 }
 0x31d   : > { %v1549_v19 = vadd.f32 %v1548_v17, %v15714_v36  ;;  %v1550_v23 = vpop.f32.mrb[50].mxu0  ;;  %13033 = vmatprep.subr.bf16.mxu1 %v19651_v28 }
 0x31e   : > { %v1551_v26 = vadd.f32 %v1550_v23, %v15709_v34  ;;  %v1552_v29 = vpop.f32.mrb[51].mxu0 }
 0x31f   : > { %v1553_v40 = vadd.f32 %v1552_v29, %v15714_v36 }
 0x320   : > { %v15978_v49 = vpack.c.bf16 %v1551_v26, %v1547_v16 }
 0x321   : > { %v15980_v52 = vpack.c.bf16 %v1553_v40, %v1549_v19 }
 0x322   : > { %19906 = vst [vmem:[#allocation72_spill] sm:$0xff] %v15978_v49 }
 0x323   : > { %19907 = vst [vmem:[#allocation73_spill] sm:$0xff] %v15980_v52  ;;  %v1556_v57 = vpop.f32.mrb[52].mxu0  ;;  %13024 = vmatmul.mubr.msk.bf16.vlgmr.msra.gmra.mrb[68].mxu1 %vm1778_vm3, %v15963_v9  ;;  %v2347_v25 = vsel %vm1778_vm3, %v15980_v52, 0 }
 0x324   : > { %v1557_v58 = vadd.f32 %v1556_v57, %v15709_v34  ;;  %v1558_v61 = vpop.f32.mrb[53].mxu0  ;;  %13035 = vmatprep.mubr.msk.bf16.mxu1 %vm15064_vm2, %v19651_v28  ;;  %13028 = vmatpush3.bf16.xpose.msra.mxu0 %v2347_v25 }
 0x325   : > { %v1559_v0 = vadd.f32 %v1558_v61, %v15714_v36  ;;  %v1560_v4 = vpop.f32.mrb[54].mxu0  ;;  %13039 = vmatprep.subr.bf16.mxu0 %v19651_v28 }
 0x326   : > { %v1561_v11 = vadd.f32 %v1560_v4, %v15709_v34  ;;  %v1562_v12 = vpop.f32.mrb[55].mxu0 }
 0x327   : > { %v1563_v16 = vadd.f32 %v1562_v12, %v15714_v36 }
 0x328   : > { %v15993_v17 = vpack.c.bf16 %v1561_v11, %v1557_v58 }
 0x329   : > { %v15995_v19 = vpack.c.bf16 %v1563_v16, %v1559_v0 }
 0x32a   : > { %19908 = vst [vmem:[#allocation74_spill] sm:$0xff] %v15993_v17 }
 0x32b   : > { %19909 = vst [vmem:[#allocation75_spill] sm:$0xff] %v15995_v19  ;;  %v2394_v23 = vsel %vm1778_vm3, %v15995_v19, 0  ;;  %v1566_v26 = vpop.f32.mrb[56].mxu0  ;;  %13030 = vmatmul.mubr.msk.bf16.vlgmr.msra.gmra.mrb[72].mxu0 %vm1778_vm3, %v15978_v49 }
 0x32c   : > { %13034 = vmatpush3.bf16.xpose.msra.mxu1 %v2394_v23  ;;  %v1567_v29 = vadd.f32 %v1566_v26, %v15709_v34  ;;  %v1568_v40 = vpop.f32.mrb[57].mxu0  ;;  %13041 = vmatprep.mubr.msk.bf16.mxu0 %vm15064_vm2, %v19651_v28 }
 0x32d   : > { %v1569_v57 = vadd.f32 %v1568_v40, %v15714_v36  ;;  %v1570_v25 = vpop.f32.mrb[58].mxu0  ;;  %13045 = vmatprep.subr.bf16.mxu1 %v19651_v28 }
 0x32e   : > { %v1571_v58 = vadd.f32 %v1570_v25, %v15709_v34  ;;  %v1572_v61 = vpop.f32.mrb[59].mxu0 }
 0x32f   : > { %v1573_v0 = vadd.f32 %v1572_v61, %v15714_v36 }
 0x330   : > { %v16008_v4 = vpack.c.bf16 %v1571_v58, %v1567_v29 }
 0x331   : > { %v16010_v11 = vpack.c.bf16 %v1573_v0, %v1569_v57 }
 0x332   : > { %19910 = vst [vmem:[#allocation76_spill] sm:$0xff] %v16008_v4 }
 0x333   : > { %19911 = vst [vmem:[#allocation77_spill] sm:$0xff] %v16010_v11  ;;  %v1576_v12 = vpop.f32.mrb[60].mxu0  ;;  %13036 = vmatmul.mubr.msk.bf16.vlgmr.msra.gmra.mrb[72].mxu1 %vm1778_vm3, %v15993_v17  ;;  %v2441_v16 = vsel %vm1778_vm3, %v16010_v11, 0 }
 0x334   : > { %v1577_v23 = vadd.f32 %v1576_v12, %v15709_v34  ;;  %v1578_v26 = vpop.f32.mrb[61].mxu0  ;;  %13047 = vmatprep.mubr.msk.bf16.mxu1 %vm15064_vm2, %v19651_v28  ;;  %13040 = vmatpush3.bf16.xpose.msra.mxu0 %v2441_v16 }
 0x335   : > { %v1579_v40 = vadd.f32 %v1578_v26, %v15714_v36  ;;  %v1580_v29 = vpop.f32.mrb[62].mxu0  ;;  %13051 = vmatprep.subr.bf16.mxu0 %v19651_v28 }
 0x336   : > { %v1581_v57 = vadd.f32 %v1580_v29, %v15709_v34  ;;  %v1582_v25 = vpop.f32.mrb[63].mxu0 }
 0x337   : > { %v1583_v58 = vadd.f32 %v1582_v25, %v15714_v36 }
 0x338   : > { %v16023_v61 = vpack.c.bf16 %v1581_v57, %v1577_v23 }
 0x339   : > { %v16025_v0 = vpack.c.bf16 %v1583_v58, %v1579_v40 }
 0x33a   : > { %19912 = vst [vmem:[#allocation78_spill] sm:$0xff] %v16023_v61 }
 0x33b   : > { %v2488_v12 = vsel %vm1778_vm3, %v16025_v0, 0  ;;  %13042 = vmatmul.mubr.msk.bf16.vlgmr.msra.gmra.mrb[76].mxu0 %vm1778_vm3, %v16008_v4 }
 0x33c   : > { %13046 = vmatpush3.bf16.xpose.msra.mxu1 %v2488_v12  ;;  %13052 = vmatpush3.bf16.msra.mxu0 %v15798_v46 }
 0x33d   : > { %13057 = vmatprep.subr.bf16.mxu1 %v19651_v28  ;;  %13053 = vmatprep.mubr.msk.bf16.mxu0 %vm15064_vm2, %v19651_v28 }
 0x33e   : > { %13063 = vmatprep.subr.bf16.mxu0 %v19651_v28 }
 0x343   : > { %13048 = vmatmul.mubr.msk.bf16.vlgmr.msra.gmra.mrb[76].mxu1 %vm1778_vm3, %v16023_v61 }
 0x344   : > { %13058 = vmatpush3.bf16.msra.mxu1 %v15796_v43  ;;  %13059 = vmatprep.mubr.msk.bf16.mxu1 %vm15064_vm2, %v19651_v28 }
 0x345   : > { %13069 = vmatprep.subr.bf16.mxu1 %v19651_v28 }
 0x39e   : > { %v16042_v34 = vpop.f32.mrb[32].mxu1 }
 0x39f   : > { %v12959_v36 = vpop.f32.mrb[33].mxu1  ;;  %v2532_v16 = vsel %vm2531_vm4, %v16042_v34, -inf }
 0x3a0   : > { %2533 = vmax.xlane.f32.xlu0 %v2532_v16  ;;  %v16046_v23 = vpop.f32.mrb[34].mxu1 }
 0x3a1   : > { %v12960_v26 = vpop.f32.mrb[35].mxu1  ;;  %v2535_v40 = vsel %vm2531_vm4, %v16046_v23, -inf }
 0x3a2   : > { %2536 = vmax.xlane.f32.xlu1 %v2535_v40 }
 0x3a6   : > { %v16050_v29 = vpop.f32.mrb[36].mxu1 }
 0x3a7   : > { %v12965_v57 = vpop.f32.mrb[37].mxu1  ;;  %v2538_v25 = vsel %vm2531_vm4, %v16050_v29, -inf }
 0x3a8   : > { %2539 = vmax.xlane.f32.xlu0 %v2538_v25  ;;  %v16054_v58 = vpop.f32.mrb[38].mxu1 }
 0x3a9   : > { %v12966_v12 = vpop.f32.mrb[39].mxu1  ;;  %v2541_v36 = vsel %vm2531_vm4, %v16054_v58, -inf }
 0x3ac   : > { %2542 = vmax.xlane.f32.xlu0 %v2541_v36 }
 0x3ae   : > { %v16058_v16 = vpop.f32.mrb[40].mxu1 }
 0x3af   : > { %v12971_v26 = vpop.f32.mrb[41].mxu1 }
 0x3b0   : > { %v16060_v33 = vpop.f32.mrb[42].mxu1 }
 0x3b1   : > { %v12972_v40 = vpop.f32.mrb[43].mxu1 }
 0x3b3   : > { %4121 = vrot.lane.b32.xlu1 %v15922_v48, %s15065_s2 }
 0x3b6   : > { %v16064_v57 = vpop.f32.mrb[44].mxu1 }
 0x3b7   : > { %v12977_v31 = vpop.f32.mrb[45].mxu1 }
 0x3b8   : > { %v16066_v25 = vpop.f32.mrb[46].mxu1 }
 0x3b9   : > { %v12978_v20 = vpop.f32.mrb[47].mxu1 }
 0x3be   : > { %v16068_v12 = vpop.f32.mrb[48].mxu1 }
 0x3bf   : > { %v12983_v28 = vpop.f32.mrb[49].mxu1  ;;  %v2556_v7 = vsel %vm2531_vm4, %v16068_v12, -inf }
 0x3c0   : > { %v16070_v30 = vpop.f32.mrb[50].mxu1  ;;  %v2544_v28 = vsel %vm2531_vm4, %v16058_v16, -inf }
 0x3c1   : > { %v12984_v36 = vpop.f32.mrb[51].mxu1 }
 0x3c2   : > { %4012 = vrot.lane.b32.xlu0 %v15871_v15, %s15065_s2 }
 0x3c6   : > { %v16074_v26 = vpop.f32.mrb[52].mxu1 }
 0x3c7   : > { %v12989_v40 = vpop.f32.mrb[53].mxu1 }
 0x3c8   : > { %v16076_v46 = vpop.f32.mrb[54].mxu1  ;;  %v2547_v40 = vsel %vm2531_vm4, %v16060_v33, -inf }
 0x3c9   : > { %v12990_v51 = vpop.f32.mrb[55].mxu1 }
 0x3ce   : > { %v16078_v53 = vpop.f32.mrb[56].mxu1 }
 0x3cf   : > { %v12995_v31 = vpop.f32.mrb[57].mxu1  ;;  %v2568_v1 = vsel %vm2531_vm4, %v16078_v53, -inf }
 0x3d0   : > { %v16080_v8 = vpop.f32.mrb[58].mxu1  ;;  %v2550_v31 = vsel %vm2531_vm4, %v16064_v57, -inf }
 0x3d1   : > { %v12996_v20 = vpop.f32.mrb[59].mxu1  ;;  %v2571_v15 = vsel %vm2531_vm4, %v16080_v8, -inf }
 0x3d6   : > { %v16082_v24 = vpop.f32.mrb[60].mxu1 }
 0x3d7   : > { %2545 = vmax.xlane.f32.xlu1 %v2544_v28  ;;  %v13001_v36 = vpop.f32.mrb[61].mxu1  ;;  %v2559_v28 = vsel %vm2531_vm4, %v16070_v30, -inf }
 0x3d8   : > { %v16086_v62 = vpop.f32.mrb[62].mxu1 }
 0x3d9   : > { %v13002_v47 = vpop.f32.mrb[63].mxu1 }
 0x3da   : > { %v2553_v47 = vsel %vm2531_vm4, %v16066_v25, -inf }
 0x3db   : > { %2548 = vmax.xlane.f32.xlu1 %v2547_v40  ;;  %v2562_v40 = vsel %vm2531_vm4, %v16074_v26, -inf }
 0x3de   : > { %v16090_v51 = vpop.f32.mrb[64].mxu0 }
 0x3df   : > { %v13007_v20 = vpop.f32.mrb[65].mxu0  ;;  %2551 = vmax.xlane.f32.xlu1 %v2550_v31  ;;  %v2580_v13 = vsel %vm2531_vm4, %v16090_v51, -inf }
 0x3e0   : > { %v16094_v48 = vpop.f32.mrb[66].mxu0 }
 0x3e1   : > { %19913 = vst [vmem:[#allocation79_spill] sm:$0xff] %v16094_v48  ;;  %v13008_v36 = vpop.f32.mrb[67].mxu0  ;;  %2560 = vmax.xlane.f32.xlu0 %v2559_v28  ;;  %v2583_v18 = vsel %vm2531_vm4, %v16094_v48, -inf }
 0x3e3   : > { %2554 = vmax.xlane.f32.xlu1 %v2553_v47  ;;  %v2565_v47 = vsel %vm2531_vm4, %v16076_v46, -inf }
 0x3e5   : > { %2563 = vmax.xlane.f32.xlu0 %v2562_v40  ;;  %v2574_v40 = vsel %vm2531_vm4, %v16082_v24, -inf }
 0x3e6   : > { %v16104_v20 = vpop.f32.mrb[64].mxu1 }
 0x3e7   : > { %2557 = vmax.xlane.f32.xlu1 %v2556_v7  ;;  %v13013_v31 = vpop.f32.mrb[65].mxu1 }
 0x3e8   : > { %v16108_v36 = vpop.f32.mrb[66].mxu1 }
 0x3e9   : > { %2572 = vmax.xlane.f32.xlu0 %v2571_v15  ;;  %v13014_v28 = vpop.f32.mrb[67].mxu1  ;;  %v2589_v55 = vsel %vm2531_vm4, %v16108_v36, -inf }
 0x3eb   : > { %2566 = vmax.xlane.f32.xlu1 %v2565_v47  ;;  %v2577_v47 = vsel %vm2531_vm4, %v16086_v62, -inf }
 0x3ed   : > { %2575 = vmax.xlane.f32.xlu0 %v2574_v40  ;;  %v2586_v40 = vsel %vm2531_vm4, %v16104_v20, -inf }
 0x3ee   : > { %v16116_v7 = vpop.f32.mrb[68].mxu0 }
 0x3ef   : > { %2569 = vmax.xlane.f32.xlu1 %v2568_v1  ;;  %v13019_v31 = vpop.f32.mrb[69].mxu0 }
 0x3f0   : > { %v16120_v15 = vpop.f32.mrb[70].mxu0 }
 0x3f1   : > { %19914 = vst [vmem:[#allocation80_spill] sm:$0xff] %v16120_v15  ;;  %2584 = vmax.xlane.f32.xlu0 %v2583_v18  ;;  %v13020_v28 = vpop.f32.mrb[71].mxu0  ;;  %v2595_v1 = vsel %vm2531_vm4, %v16120_v15, -inf }
 0x3f3   : > { %2578 = vmax.xlane.f32.xlu1 %v2577_v47 }
 0x3f5   : > { %2587 = vmax.xlane.f32.xlu0 %v2586_v40  ;;  %v2592_v40 = vsel %vm2531_vm4, %v16116_v7, -inf }
 0x3f6   : > { %v16130_v31 = vpop.f32.mrb[68].mxu1 }
 0x3f7   : > { %2581 = vmax.xlane.f32.xlu1 %v2580_v13  ;;  %v13025_v5 = vpop.f32.mrb[69].mxu1  ;;  %v2598_v47 = vsel %vm2531_vm4, %v16130_v31, -inf }
 0x3f8   : > { %v16132_v18 = vpop.f32.mrb[70].mxu1 }
 0x3f9   : > { %2596 = vmax.xlane.f32.xlu0 %v2595_v1  ;;  %v13026_v28 = vpop.f32.mrb[71].mxu1  ;;  %v2601_v5 = vsel %vm2531_vm4, %v16132_v18, -inf }
 0x3fb   : > { %2590 = vmax.xlane.f32.xlu1 %v2589_v55 }
 0x3fd   : > { %2599 = vmax.xlane.f32.xlu0 %v2598_v47 }
 0x3fe   : > { %v16140_v14 = vpop.f32.mrb[72].mxu0 }
 0x3ff   : > { %2593 = vmax.xlane.f32.xlu1 %v2592_v40  ;;  %v13031_v13 = vpop.f32.mrb[73].mxu0 }
 0x400   : > { %v16144_v1 = vpop.f32.mrb[74].mxu0 }
 0x401   : > { %v13032_v28 = vpop.f32.mrb[75].mxu0 }
 0x403   : > { %2602 = vmax.xlane.f32.xlu1 %v2601_v5 }
 0x406   : > { %v16146_v56 = vpop.f32.mrb[72].mxu1 }
 0x407   : > { %v13037_v4 = vpop.f32.mrb[73].mxu1  ;;  %v2610_v55 = vsel %vm2531_vm4, %v16146_v56, -inf }
 0x408   : > { %2611 = vmax.xlane.f32.xlu0 %v2610_v55  ;;  %v16150_v47 = vpop.f32.mrb[74].mxu1 }
 0x409   : > { %v2613_v40 = vsel %vm2531_vm4, %v16150_v47, -inf  ;;  %v13038_v13 = vpop.f32.mrb[75].mxu1 }
 0x40a   : > { %2614 = vmax.xlane.f32.xlu1 %v2613_v40  ;;  %v16166_v40 = vpop.permute.xlu0 %3697 }
 0x40b   : > { %19915 = vst [vmem:[#allocation81_spill] sm:$0xff] %v16166_v40 }
 0x40e   : > { %v16154_v43 = vpop.f32.mrb[76].mxu0 }
 0x40f   : > { %v13043_v49 = vpop.f32.mrb[77].mxu0 }
 0x410   : > { %v16156_v11 = vpop.f32.mrb[78].mxu0  ;;  %v16168_v49 = vpop.permute.xlu0 %3800 }
 0x411   : > { %v13044_v5 = vpop.f32.mrb[79].mxu0  ;;  %19916 = vst [vmem:[#allocation82_spill] sm:$0xff] %v16168_v49 }
 0x414   : > { %v16170_v54 = vpop.permute.xlu0 %3803 }
 0x415   : > { %19917 = vst [vmem:[#allocation83_spill] sm:$0xff] %v16170_v54 }
 0x416   : > { %v16158_v28 = vpop.f32.mrb[76].mxu1 }
 0x417   : > { %v13049_v4 = vpop.f32.mrb[77].mxu1  ;;  %v2622_v22 = vsel %vm2531_vm4, %v16158_v28, -inf }
 0x418   : > { %2623 = vmax.xlane.f32.xlu0 %v2622_v22  ;;  %v16162_v55 = vpop.f32.mrb[78].mxu1  ;;  %v16172_v5 = vpop.permute.xlu0 %3906 }
 0x419   : > { %v2625_v52 = vsel %vm2531_vm4, %v16162_v55, -inf  ;;  %v13050_v13 = vpop.f32.mrb[79].mxu1  ;;  %19918 = vst [vmem:[#allocation84_spill] sm:$0xff] %v16172_v5 }
 0x41a   : > { %2626 = vmax.xlane.f32.xlu1 %v2625_v52 }
 0x42d   : > { %v16174_v4 = vpop.xlane.xlu0 %2533 }
 0x435   : > { %v2540_v27 = vpop.xlane.xlu0 %2539 }
 0x436   : > { %v2630_v22 = vsub.f32 %v16050_v29, %v2540_v27  ;;  %v16186_v27 = vpop.permute.xlu1 %3694 }
 0x437   : > { %19919 = vst [vmem:[#allocation85_spill] sm:$0xff] %v16186_v27 }
 0x438   : > { %v2664_v37 = vmul.f32 1.442695, %v2630_v22 }
 0x439   : > { %v2543_v60 = vpop.xlane.xlu0 %2542 }
 0x43a   : > { %14252 = vpow2.f32 %v2664_v37  ;;  %v2631_v41 = vsub.f32 %v16054_v58, %v2543_v60  ;;  %v16188_v29 = vpop.permute.xlu1 %3909 }
 0x43b   : > { %19920 = vst [vmem:[#allocation86_spill] sm:$0xff] %v16188_v29 }
 0x43c   : > { %v2666_v13 = vmul.f32 1.442695, %v2631_v41 }
 0x43e   : > { %14254 = vpow2.f32 %v2666_v13  ;;  %v16190_v37 = vpop.permute.xlu1 %4015 }
 0x43f   : > { %19921 = vst [vmem:[#allocation87_spill] sm:$0xff] %v16190_v37 }
 0x442   : > { %v16192_v41 = vpop.xlane.xlu1 %2536 }
 0x444   : > { %v16178_v52 = vpop.eup %14252 }
 0x445   : > { %v2730_v49 = vsel %vm2531_vm4, %v16178_v52, 0.0 }
 0x446   : > { %2731 = vadd.xlane.f32.xlu0 %v2730_v49  ;;  %v16194_v60 = vpop.permute.xlu1 %4121  ;;  %v16200_v49 = vpop.permute.xlu0 %4012 }
 0x447   : > { %19922 = vst [vmem:[#allocation88_spill] sm:$0xff] %v16194_v60  ;;  %19923 = vst [vmem:[#allocation89_spill] sm:$0xff] %v16200_v49 }
 0x448   : > { %v16182_v54 = vpop.eup %14254 }
 0x449   : > { %v2733_v5 = vsel %vm2531_vm4, %v16182_v54, 0.0 }
 0x44a   : > { %2734 = vadd.xlane.f32.xlu1 %v2733_v5 }
 0x464   : > { %v16196_v58 = vpop.xlane.xlu1 %2545 }
 0x468   : > { %v16198_v22 = vpop.xlane.xlu1 %2548 }
 0x46c   : > { %v2552_v13 = vpop.xlane.xlu1 %2551 }
 0x46d   : > { %v2634_v40 = vsub.f32 %v16064_v57, %v2552_v13 }
 0x46e   : > { %v16203_v5 = vpop.xlane.xlu0 %2560 }
 0x46f   : > { %v2672_v27 = vmul.f32 1.442695, %v2634_v40 }
 0x470   : > { %v2555_v32 = vpop.xlane.xlu1 %2554 }
 0x471   : > { %14256 = vpow2.f32 %v2672_v27  ;;  %v2635_v37 = vsub.f32 %v16066_v25, %v2555_v32 }
 0x472   : > { %v2564_v29 = vpop.xlane.xlu0 %2563 }
 0x473   : > { %v2674_v2 = vmul.f32 1.442695, %v2635_v37  ;;  %v2638_v60 = vsub.f32 %v16074_v26, %v2564_v29 }
 0x475   : > { %14258 = vpow2.f32 %v2674_v2  ;;  %v2680_v42 = vmul.f32 1.442695, %v2638_v60  ;;  %v16219_v2 = vpop.xlane.xlu1 %2557 }
 0x476   : > { %v16221_v25 = vpop.xlane.xlu0 %2572 }
 0x477   : > { %14260 = vpow2.f32 %v2680_v42 }
 0x479   : > { %v2567_v42 = vpop.xlane.xlu1 %2566 }
 0x47a   : > { %v2576_v29 = vpop.xlane.xlu0 %2575  ;;  %v2639_v45 = vsub.f32 %v16076_v46, %v2567_v42 }
 0x47b   : > { %v16207_v3 = vpop.eup %14256 }
 0x47c   : > { %v2742_v49 = vsel %vm2531_vm4, %v16207_v3, 0.0 }
 0x47d   : > { %2743 = vadd.xlane.f32.xlu0 %v2742_v49  ;;  %v16223_v26 = vpop.xlane.xlu1 %2569 }
 0x47e   : > { %v16227_v60 = vpop.xlane.xlu0 %2584 }
 0x47f   : > { %v16211_v57 = vpop.eup %14258  ;;  %19924 = vst [vmem:[#allocation90_spill] sm:$0xff] %v16227_v60 }
 0x480   : > { %v2745_v40 = vsel %vm2531_vm4, %v16211_v57, 0.0 }
 0x481   : > { %v16215_v27 = vpop.eup %14260  ;;  %2746 = vadd.xlane.f32.xlu1 %v2745_v40  ;;  %v2579_v37 = vpop.xlane.xlu1 %2578 }
 0x482   : > { %v2754_v32 = vsel %vm2531_vm4, %v16215_v27, 0.0  ;;  %v2588_v13 = vpop.xlane.xlu0 %2587  ;;  %v2643_v63 = vsub.f32 %v16086_v62, %v2579_v37 }
 0x483   : > { %2755 = vadd.xlane.f32.xlu0 %v2754_v32  ;;  %v2642_v32 = vsub.f32 %v16082_v24, %v2576_v29  ;;  %v2646_v15 = vsub.f32 %v16104_v20, %v2588_v13 }
 0x484   : > { %v2690_v21 = vmul.f32 1.442695, %v2643_v63 }
 0x485   : > { %v16231_v49 = vpop.xlane.xlu1 %2581  ;;  %v2688_v39 = vmul.f32 1.442695, %v2642_v32  ;;  %v2696_v24 = vmul.f32 1.442695, %v2646_v15 }
 0x486   : > { %v16235_v44 = vpop.xlane.xlu0 %2596 }
 0x487   : > { %14262 = vpow2.f32 %v2688_v39 }
 0x489   : > { %v2591_v40 = vpop.xlane.xlu1 %2590 }
 0x48a   : > { %v2647_v48 = vsub.f32 %v16108_v36, %v2591_v40 }
 0x48c   : > { %v2698_v29 = vmul.f32 1.442695, %v2647_v48 }
 0x48d   : > { %v16237_v50 = vpop.xlane.xlu1 %2593 }
 0x491   : > { %v2603_v60 = vpop.xlane.xlu1 %2602  ;;  %v16245_v37 = vpop.eup %14262 }
 0x492   : > { %4227 = vrot.lane.b32.xlu1 %v15965_v10, %s15065_s2  ;;  %v2682_v10 = vmul.f32 1.442695, %v2639_v45  ;;  %v2651_v32 = vsub.f32 %v16132_v18, %v2603_v60  ;;  %v2607_v60 = vsel %vm2531_vm4, %v16144_v1, -inf }
 0x494   : > { %14264 = vpow2.f32 %v2682_v10  ;;  %v2706_v63 = vmul.f32 1.442695, %v2651_v32 }
 0x495   : > { %14266 = vpow2.f32 %v2690_v21 }
 0x496   : > { %14268 = vpow2.f32 %v2696_v24 }
 0x497   : > { %v2615_v45 = vpop.xlane.xlu1 %2614  ;;  %14270 = vpow2.f32 %v2698_v29 }
 0x498   : > { %v2655_v10 = vsub.f32 %v16150_v47, %v2615_v45 }
 0x499   : > { %4118 = vrot.lane.b32.xlu0 %v15919_v35, %s15065_s2  ;;  %v2600_v35 = vpop.xlane.xlu0 %2599 }
 0x49a   : > { %v2650_v46 = vsub.f32 %v16130_v31, %v2600_v35  ;;  %v2604_v35 = vsel %vm2531_vm4, %v16140_v14, -inf  ;;  %v2714_v15 = vmul.f32 1.442695, %v2655_v10 }
 0x49c   : > { %v2704_v62 = vmul.f32 1.442695, %v2650_v46 }
 0x49d   : > { %v2612_v42 = vpop.xlane.xlu0 %2611 }
 0x49e   : > { %v2654_v39 = vsub.f32 %v16146_v56, %v2612_v42  ;;  %v16250_v36 = vpop.eup %14264  ;;  %14272 = vpow2.f32 %v2704_v62  ;;  %v2766_v56 = vsel %vm2531_vm4, %v16245_v37, 0.0 }
 0x49f   : > { %14274 = vpow2.f32 %v2706_v63  ;;  %v2757_v31 = vsel %vm2531_vm4, %v16250_v36, 0.0  ;;  %v16257_v18 = vpop.eup %14266 }
 0x4a0   : > { %v2712_v21 = vmul.f32 1.442695, %v2654_v39  ;;  %v16261_v13 = vpop.eup %14268 }
 0x4a1   : > { %v16265_v40 = vpop.eup %14270  ;;  %v2778_v24 = vsel %vm2531_vm4, %v16261_v13, 0.0 }
 0x4a2   : > { %14276 = vpow2.f32 %v2712_v21  ;;  %v2781_v42 = vsel %vm2531_vm4, %v16265_v40, 0.0 }
 0x4a3   : > { %14278 = vpow2.f32 %v2714_v15 }
 0x4a5   : > { %v2624_v20 = vpop.xlane.xlu0 %2623 }
 0x4a6   : > { %v2658_v48 = vsub.f32 %v16158_v28, %v2624_v20  ;;  %v2769_v28 = vsel %vm2531_vm4, %v16257_v18, 0.0 }
 0x4a7   : > { %v2627_v21 = vpop.xlane.xlu1 %2626 }
 0x4a8   : > { %v2720_v47 = vmul.f32 1.442695, %v2658_v48  ;;  %v16269_v46 = vpop.eup %14272 }
 0x4a9   : > { %v16273_v29 = vpop.eup %14274  ;;  %v2790_v32 = vsel %vm2531_vm4, %v16269_v46, 0.0 }
 0x4aa   : > { %14280 = vpow2.f32 %v2720_v47  ;;  %v2793_v62 = vsel %vm2531_vm4, %v16273_v29, 0.0 }
 0x4ac   : > { %v16277_v45 = vpop.eup %14276 }
 0x4ad   : > { %v16281_v39 = vpop.eup %14278  ;;  %v2802_v20 = vsel %vm2531_vm4, %v16277_v45, 0.0 }
 0x4ae   : > { %v2805_v10 = vsel %vm2531_vm4, %v16281_v39, 0.0 }
 0x4b4   : > { %v16285_v63 = vpop.eup %14280 }
 0x4b6   : > { %2605 = vmax.xlane.f32.xlu1 %v2604_v35  ;;  %v2814_v35 = vsel %vm2531_vm4, %v16285_v63, 0.0 }
 0x4b8   : > { %2767 = vadd.xlane.f32.xlu0 %v2766_v56 }
 0x4ba   : > { %2758 = vadd.xlane.f32.xlu1 %v2757_v31 }
 0x4bc   : > { %2608 = vmax.xlane.f32.xlu0 %v2607_v60 }
 0x4be   : > { %2770 = vadd.xlane.f32.xlu1 %v2769_v28 }
 0x4c0   : > { %2779 = vadd.xlane.f32.xlu0 %v2778_v24  ;;  %v19925_v24 = vmov 0.0  }
 0x4c2   : > { %2782 = vadd.xlane.f32.xlu1 %v2781_v42  ;;  %v2616_v42 = vsel %vm2531_vm4, %v16154_v43, -inf }
 0x4c4   : > { %2791 = vadd.xlane.f32.xlu0 %v2790_v32  ;;  %v2619_v32 = vsel %vm2531_vm4, %v16156_v11, -inf }
 0x4c6   : > { %2794 = vadd.xlane.f32.xlu1 %v2793_v62 }
 0x4c8   : > { %2803 = vadd.xlane.f32.xlu0 %v2802_v20 }
 0x4ca   : > { %2806 = vadd.xlane.f32.xlu1 %v2805_v10 }
 0x4cc   : > { %2815 = vadd.xlane.f32.xlu0 %v2814_v35 }
 0x4d3   : > { %v2732_v48 = vpop.xlane.xlu0 %2731 }
 0x4d4   : > { %14282 = vrcp.f32 %v2732_v48 }
 0x4d7   : > { %v2735_v56 = vpop.xlane.xlu1 %2734 }
 0x4d8   : > { %14284 = vrcp.f32 %v2735_v56  ;;  %v2659_v56 = vsub.f32 %v16162_v55, %v2627_v21 }
 0x4db   : > { %4333 = vrot.lane.b32.xlu1 %v15995_v19, %s15065_s2 }
 0x4de   : > { %v14283_v15 = vpop.eup %14282 }
 0x4df   : > { %v2854_v47 = vmul.f32 %v14283_v15, %v16178_v52  ;;  %v2628_v15 = vsub.f32 %v16042_v34, %v16174_v4  ;;  %v2640_v4 = vsub.f32 %v16078_v53, %v16223_v26  ;;  %v2648_v53 = vsub.f32 %v16116_v7, %v16237_v50 }
 0x4e2   : > { %v14285_v31 = vpop.eup %14284  ;;  %4224 = vrot.lane.b32.xlu0 %v15963_v9, %s15065_s2 }
 0x4e3   : > { %v2855_v60 = vmul.f32 %v14285_v31, %v16182_v54  ;;  %v2722_v31 = vmul.f32 1.442695, %v2659_v56 }
 0x4e5   : > { %v2885_v28 = vpack.c.bf16 %v2855_v60, %v2854_v47  ;;  %v2660_v47 = vmul.f32 1.442695, %v2628_v15  ;;  %v2636_v60 = vsub.f32 %v16068_v12, %v16219_v2 }
 0x4e7   : > { %13060 = vmatmul.mubr.msk.bf16.vlgmr.msra.gmra.mrb[80].mxu1 %vm2531_vm4, %v2885_v28  ;;  %v2676_v34 = vmul.f32 1.442695, %v2636_v60 }
 0x4e8   : > { %13070 = vmatpush3.bf16.msra.mxu1 %v15819_v6  ;;  %13071 = vmatprep.mubr.msk.bf16.mxu1 %vm15064_vm2, %v19925_v24 }
 0x4e9   : > { %13081 = vmatprep.subr.bf16.mxu1 %v19925_v24 }
 0x4ff   : > { %2617 = vmax.xlane.f32.xlu1 %v2616_v42 }
 0x501   : > { %2620 = vmax.xlane.f32.xlu0 %v2619_v32 }
 0x50a   : > { %v2744_v52 = vpop.xlane.xlu0 %2743 }
 0x50b   : > { %14286 = vrcp.f32 %v2744_v52 }
 0x50e   : > { %v2747_v54 = vpop.xlane.xlu1 %2746 }
 0x50f   : > { %14288 = vrcp.f32 %v2747_v54 }
 0x510   : > { %4439 = vrot.lane.b32.xlu1 %v16025_v0, %s15065_s2  ;;  %14290 = vpow2.f32 %v2722_v31  ;;  %v2756_v54 = vpop.xlane.xlu0 %2755 }
 0x511   : > { %14292 = vpow2.f32 %v2660_v47 }
 0x515   : > { %v14287_v62 = vpop.eup %14286 }
 0x516   : > { %v2858_v10 = vmul.f32 %v14287_v62, %v16207_v3  ;;  %v2632_v3 = vsub.f32 %v16058_v16, %v16196_v58  ;;  %v2684_v58 = vmul.f32 1.442695, %v2640_v4  ;;  %v16350_v62 = vpop.permute.xlu1 %4227 }
 0x517   : > { %4330 = vrot.lane.b32.xlu0 %v15993_v17, %s15065_s2 }
 0x518   : > { %v2668_v55 = vmul.f32 1.442695, %v2632_v3 }
 0x519   : > { %v14289_v20 = vpop.eup %14288 }
 0x51a   : > { %v2859_v35 = vmul.f32 %v14289_v20, %v16211_v57  ;;  %v2633_v57 = vsub.f32 %v16060_v33, %v16198_v22  ;;  %14294 = vpow2.f32 %v2668_v55  ;;  %v16326_v28 = vpop.eup %14290  ;;  %v2644_v33 = vsub.f32 %v16090_v51, %v16231_v49 }
 0x51b   : > { %v16330_v42 = vpop.eup %14292  ;;  %v2817_v16 = vsel %vm2531_vm4, %v16326_v28, 0.0  ;;  %v2700_v51 = vmul.f32 1.442695, %v2648_v53 }
 0x51c   : > { %v2887_v48 = vpack.c.bf16 %v2859_v35, %v2858_v10  ;;  %v2670_v21 = vmul.f32 1.442695, %v2633_v57  ;;  %v2724_v12 = vsel %vm2531_vm4, %v16330_v42, 0.0  ;;  %v2692_v2 = vmul.f32 1.442695, %v2644_v33  ;;  %v16356_v10 = vpop.permute.xlu0 %4118 }
 0x51e   : > { %13072 = vmatmul.mubr.msk.bf16.vlgmr.msra.gmra.mrb[84].mxu1 %vm2531_vm4, %v2887_v48  ;;  %14296 = vpow2.f32 %v2670_v21 }
 0x51f   : > { %13082 = vmatpush3.bf16.msra.mxu1 %v15844_v38  ;;  %13083 = vmatprep.mubr.msk.bf16.mxu1 %vm15064_vm2, %v19925_v24  ;;  %14298 = vpow2.f32 %v2676_v34 }
 0x520   : > { %13093 = vmatprep.subr.bf16.mxu1 %v19925_v24  ;;  %14300 = vpow2.f32 %v2684_v58  ;;  %v2629_v58 = vsub.f32 %v16046_v23, %v16192_v41 }
 0x521   : > { %14302 = vpow2.f32 %v2692_v2 }
 0x522   : > { %14304 = vpow2.f32 %v2700_v51 }
 0x523   : > { %14306 = vrcp.f32 %v2756_v54  ;;  %v2662_v54 = vmul.f32 1.442695, %v2629_v58 }
 0x524   : > { %v16338_v22 = vpop.eup %14294 }
 0x525   : > { %v2736_v26 = vsel %vm2531_vm4, %v16338_v22, 0.0 }
 0x528   : > { %v16344_v32 = vpop.eup %14296 }
 0x529   : > { %v2739_v49 = vsel %vm2531_vm4, %v16344_v32, 0.0  ;;  %v16348_v52 = vpop.eup %14298 }
 0x52a   : > { %v2748_v50 = vsel %vm2531_vm4, %v16348_v52, 0.0  ;;  %v16354_v7 = vpop.eup %14300 }
 0x52b   : > { %v2760_v48 = vsel %vm2531_vm4, %v16354_v7, 0.0  ;;  %v16363_v56 = vpop.eup %14302 }
 0x52c   : > { %v2772_v3 = vsel %vm2531_vm4, %v16363_v56, 0.0  ;;  %v16367_v55 = vpop.eup %14304 }
 0x52d   : > { %v2784_v57 = vsel %vm2531_vm4, %v16367_v55, 0.0  ;;  %v14307_v60 = vpop.eup %14306 }
 0x534   : > { %2818 = vadd.xlane.f32.xlu1 %v2817_v16 }
 0x536   : > { %2725 = vadd.xlane.f32.xlu0 %v2724_v12  ;;  %v2862_v12 = vmul.f32 %v14307_v60, %v16215_v27 }
 0x53a   : > { %2737 = vadd.xlane.f32.xlu0 %v2736_v26  ;;  %v2637_v26 = vsub.f32 %v16070_v30, %v16203_v5  ;;  %v2641_v30 = vsub.f32 %v16080_v8, %v16221_v25 }
 0x53c   : > { %v2678_v41 = vmul.f32 1.442695, %v2637_v26 }
 0x53e   : > { %2740 = vadd.xlane.f32.xlu0 %v2739_v49 }
 0x542   : > { %2749 = vadd.xlane.f32.xlu0 %v2748_v50 }
 0x543   : > { %v2606_v20 = vpop.xlane.xlu1 %2605 }
 0x544   : > { %v2652_v35 = vsub.f32 %v16140_v14, %v2606_v20  ;;  %v19926_v20 = vld [vmem:[#allocation90_spill] sm:$0xff] }
 0x545   : > { %4436 = vrot.lane.b32.xlu1 %v16023_v61, %s15065_s2  ;;  %v2768_v47 = vpop.xlane.xlu0 %2767 }
 0x546   : > { %v2708_v15 = vmul.f32 1.442695, %v2652_v35  ;;  %2761 = vadd.xlane.f32.xlu0 %v2760_v48  ;;  %v19927_v35 = vld [vmem:[#allocation79_spill] sm:$0xff] }
 0x547   : > { %v2759_v31 = vpop.xlane.xlu1 %2758  ;;  %v2645_v48 = vsub.f32 %v19927_v35, %v19926_v20 }
 0x548   : > { %14308 = vpow2.f32 %v2708_v15 }
 0x549   : > { %14310 = vrcp.f32 %v2759_v31  ;;  %v16371_v21 = vpop.xlane.xlu0 %2608  ;;  %v2694_v8 = vmul.f32 1.442695, %v2645_v48  ;;  %v19932_v48 = vld [vmem:[#allocation68_spill] sm:$0xff] }
 0x54a   : > { %2773 = vadd.xlane.f32.xlu0 %v2772_v3  ;;  %v19928_v3 = vld [vmem:[#allocation56_spill] sm:$0xff] }
 0x54b   : > { %v2771_v14 = vpop.xlane.xlu1 %2770 }
 0x54c   : > { %14312 = vrcp.f32 %v2771_v14  ;;  %v19929_v14 = vld [vmem:[#allocation80_spill] sm:$0xff] }
 0x54d   : > { %14314 = vrcp.f32 %v2768_v47  ;;  %v2780_v53 = vpop.xlane.xlu0 %2779  ;;  %v2686_v47 = vmul.f32 1.442695, %v2641_v30 }
 0x54e   : > { %2785 = vadd.xlane.f32.xlu0 %v2784_v57  ;;  %v2649_v57 = vsub.f32 %v19929_v14, %v16235_v44 }
 0x54f   : > { %v2783_v4 = vpop.xlane.xlu1 %2782 }
 0x550   : > { %14316 = vrcp.f32 %v2783_v4 }
 0x551   : > { %14318 = vrcp.f32 %v2780_v53  ;;  %v2792_v50 = vpop.xlane.xlu0 %2791  ;;  %v19930_v53 = vld [vmem:[#allocation60_spill] sm:$0xff] }
 0x552   : > { %v16373_v34 = vpop.eup %14308  ;;  %14320 = vpow2.f32 %v2662_v54 }
 0x553   : > { %v14311_v16 = vpop.eup %14310  ;;  %v2796_v33 = vsel %vm2531_vm4, %v16373_v34, 0.0 }
 0x554   : > { %v2863_v2 = vmul.f32 %v14311_v16, %v16250_v36  ;;  %2797 = vadd.xlane.f32.xlu0 %v2796_v33  ;;  %v2795_v36 = vpop.xlane.xlu1 %2794 }
 0x555   : > { %14322 = vrcp.f32 %v2795_v36  ;;  %v2804_v4 = vpop.xlane.xlu0 %2803  ;;  %v19931_v36 = vld [vmem:[#allocation64_spill] sm:$0xff] }
 0x556   : > { %v2889_v51 = vpack.c.bf16 %v2863_v2, %v2862_v12  ;;  %v14313_v49 = vpop.eup %14312  ;;  %14324 = vpow2.f32 %v2678_v41  ;;  %v2702_v12 = vmul.f32 1.442695, %v2649_v57 }
 0x557   : > { %v14315_v23 = vpop.eup %14314  ;;  %v2867_v27 = vmul.f32 %v14313_v49, %v16257_v18  ;;  %14326 = vrcp.f32 %v2792_v50 }
 0x558   : > { %13084 = vmatmul.mubr.msk.bf16.vlgmr.msra.gmra.mrb[88].mxu1 %vm2531_vm4, %v2889_v51  ;;  %v2866_v5 = vmul.f32 %v14315_v23, %v16245_v37  ;;  %v2807_v37 = vpop.xlane.xlu1 %2806  ;;  %14328 = vpow2.f32 %v2686_v47 }
 0x559   : > { %13094 = vmatpush3.bf16.msra.mxu1 %v15861_v59  ;;  %13095 = vmatprep.mubr.msk.bf16.mxu1 %vm15064_vm2, %v19925_v24  ;;  %14330 = vrcp.f32 %v2807_v37 }
 0x55a   : > { %13105 = vmatprep.subr.bf16.mxu1 %v19925_v24  ;;  %v2891_v15 = vpack.c.bf16 %v2867_v27, %v2866_v5  ;;  %v14317_v31 = vpop.eup %14316  ;;  %14332 = vpow2.f32 %v2694_v8 }
 0x55b   : > { %v14319_v18 = vpop.eup %14318  ;;  %v2871_v25 = vmul.f32 %v14317_v31, %v16265_v40  ;;  %v2653_v40 = vsub.f32 %v16144_v1, %v16371_v21  ;;  %14334 = vrcp.f32 %v2804_v4 }
 0x55c   : > { %v2870_v60 = vmul.f32 %v14319_v18, %v16261_v13  ;;  %v16403_v16 = vpop.eup %14320  ;;  %14336 = vpow2.f32 %v2702_v12  ;;  %v16448_v31 = vpop.permute.xlu1 %4333  ;;  %v19935_v12 = vld [vmem:[#allocation37_spill] sm:$0xff] }
 0x55d   : > { %v2727_v44 = vsel %vm2531_vm4, %v16403_v16, 0.0  ;;  %v2710_v1 = vmul.f32 1.442695, %v2653_v40  ;;  %v19936_v40 = vld [vmem:[#allocation41_spill] sm:$0xff] }
 0x55e   : > { %v2893_v58 = vpack.c.bf16 %v2871_v25, %v2870_v60 }
 0x55f   : > { %v14323_v33 = vpop.eup %14322  ;;  %14338 = vpow2.f32 %v2710_v1 }
 0x560   : > { %13096 = vmatmul.mubr.msk.bf16.vlgmr.msra.gmra.mrb[92].mxu1 %vm2531_vm4, %v2891_v15  ;;  %v16407_v2 = vpop.eup %14324  ;;  %v2875_v26 = vmul.f32 %v14323_v33, %v16273_v29  ;;  %v2816_v15 = vpop.xlane.xlu0 %2815 }
 0x561   : > { %13106 = vmatpush3.bf16.msra.mxu1 %v19928_v3  ;;  %13107 = vmatprep.mubr.msk.bf16.mxu1 %vm15064_vm2, %v19925_v24  ;;  %v14327_v13 = vpop.eup %14326  ;;  %v2751_v51 = vsel %vm2531_vm4, %v16407_v2, 0.0 }
 0x562   : > { %13117 = vmatprep.subr.bf16.mxu1 %v19925_v24  ;;  %v2874_v21 = vmul.f32 %v14327_v13, %v16269_v46  ;;  %v16420_v49 = vpop.eup %14328 }
 0x563   : > { %v14331_v23 = vpop.eup %14330  ;;  %v2763_v29 = vsel %vm2531_vm4, %v16420_v49, 0.0 }
 0x564   : > { %v2895_v54 = vpack.c.bf16 %v2875_v26, %v2874_v21  ;;  %v16422_v41 = vpop.eup %14332  ;;  %v2879_v46 = vmul.f32 %v14331_v23, %v16281_v39  ;;  %v16450_v47 = vpop.permute.xlu0 %4224  ;;  %v19939_v26 = vld [vmem:[#allocation50_spill] sm:$0xff]  ;;  %v19940_v21 = vld [vmem:[#allocation40_spill] sm:$0xff]  ;;  %v19965_v23 = vld [vmem:[#allocation89_spill] sm:$0xff] }
 0x565   : > { %v14335_v27 = vpop.eup %14334  ;;  %v2775_v5 = vsel %vm2531_vm4, %v16422_v41, 0.0 }
 0x566   : > { %v2878_v30 = vmul.f32 %v14335_v27, %v16277_v45  ;;  %v16435_v50 = vpop.eup %14336  ;;  %v19942_v27 = vld [vmem:[#allocation59_spill] sm:$0xff] }
 0x567   : > { %v2787_v35 = vsel %vm2531_vm4, %v16435_v50, 0.0 }
 0x568   : > { %13108 = vmatmul.mubr.msk.bf16.vlgmr.msra.gmra.mrb[96].mxu1 %vm2531_vm4, %v2893_v58  ;;  %v2897_v20 = vpack.c.bf16 %v2879_v46, %v2878_v30  ;;  %v19943_v46 = vld [vmem:[#allocation48_spill] sm:$0xff] }
 0x569   : > { %13118 = vmatpush3.bf16.msra.mxu1 %v19930_v53  ;;  %2728 = vadd.xlane.f32.xlu1 %v2727_v44  ;;  %v16440_v39 = vpop.eup %14338  ;;  %v19937_v44 = vld [vmem:[#allocation36_spill] sm:$0xff] }
 0x56a   : > { %13119 = vmatprep.mubr.msk.bf16.mxu1 %vm15064_vm2, %v19925_v24  ;;  %13129 = vmatprep.subr.bf16.mxu1 %v19925_v24  ;;  %v2799_v45 = vsel %vm2531_vm4, %v16440_v39, 0.0 }
 0x56d   : > { %2752 = vadd.xlane.f32.xlu1 %v2751_v51 }
 0x570   : > { %13120 = vmatmul.mubr.msk.bf16.vlgmr.msra.gmra.mrb[100].mxu1 %vm2531_vm4, %v2895_v54 }
 0x571   : > { %13130 = vmatpush3.bf16.msra.mxu1 %v19931_v36  ;;  %2764 = vadd.xlane.f32.xlu1 %v2763_v29 }
 0x572   : > { %13131 = vmatprep.mubr.msk.bf16.mxu1 %vm15064_vm2, %v19925_v24  ;;  %13141 = vmatprep.subr.bf16.mxu1 %v19925_v24 }
 0x575   : > { %2776 = vadd.xlane.f32.xlu1 %v2775_v5  ;;  %v19944_v5 = vld [vmem:[#allocation67_spill] sm:$0xff] }
 0x578   : > { %13132 = vmatmul.mubr.msk.bf16.vlgmr.msra.gmra.mrb[104].mxu1 %vm2531_vm4, %v2897_v20  ;;  %v19945_v20 = vld [vmem:[#allocation58_spill] sm:$0xff] }
 0x579   : > { %13142 = vmatpush3.bf16.msra.mxu1 %v19932_v48  ;;  %2788 = vadd.xlane.f32.xlu1 %v2787_v35  ;;  %v19946_v35 = vld [vmem:[#allocation73_spill] sm:$0xff] }
 0x57a   : > { %13143 = vmatprep.mubr.msk.bf16.mxu1 %vm15064_vm2, %v19925_v24  ;;  %13153 = vmatprep.subr.bf16.mxu1 %v19925_v24 }
 0x57d   : > { %2800 = vadd.xlane.f32.xlu1 %v2799_v45  ;;  %v19947_v45 = vld [vmem:[#allocation66_spill] sm:$0xff] }
 0x58c   : > { %v2618_v18 = vpop.xlane.xlu1 %2617 }
 0x58d   : > { %v2656_v8 = vsub.f32 %v16154_v43, %v2618_v18  ;;  %v19933_v43 = vld [vmem:[#allocation32_spill] sm:$0xff] }
 0x58e   : > { %v2621_v25 = vpop.xlane.xlu0 %2620 }
 0x58f   : > { %v2716_v37 = vmul.f32 1.442695, %v2656_v8  ;;  %v2657_v14 = vsub.f32 %v16156_v11, %v2621_v25  ;;  %v19934_v11 = vld [vmem:[#allocation33_spill] sm:$0xff]  ;;  %v19949_v25 = vld [vmem:[#allocation72_spill] sm:$0xff] }
 0x590   : > { %v16480_v54 = vpop.permute.xlu1 %4439 }
 0x591   : > { %14340 = vpow2.f32 %v2716_v37  ;;  %v2718_v57 = vmul.f32 1.442695, %v2657_v14 }
 0x593   : > { %14342 = vpow2.f32 %v2718_v57  ;;  %v19950_v57 = vld [vmem:[#allocation42_spill] sm:$0xff] }
 0x594   : > { %14344 = vrcp.f32 %v2816_v15  ;;  %v19948_v15 = vld [vmem:[#allocation77_spill] sm:$0xff] }
 0x59b   : > { %v16454_v60 = vpop.eup %14340 }
 0x59c   : > { %v2808_v4 = vsel %vm2531_vm4, %v16454_v60, 0.0 }
 0x59d   : > { %v16458_v58 = vpop.eup %14342  ;;  %2809 = vadd.xlane.f32.xlu0 %v2808_v4 }
 0x59e   : > { %v2811_v33 = vsel %vm2531_vm4, %v16458_v58, 0.0  ;;  %v14345_v18 = vpop.eup %14344 }
 0x59f   : > { %2812 = vadd.xlane.f32.xlu1 %v2811_v33  ;;  %v2882_v37 = vmul.f32 %v14345_v18, %v16285_v63  ;;  %v19951_v33 = vld [vmem:[#allocation76_spill] sm:$0xff]  ;;  %v19953_v63 = vld [vmem:[#allocation83_spill] sm:$0xff]  ;;  %v19955_v18 = vld [vmem:[#allocation86_spill] sm:$0xff] }
 0x5b0   : > { %3641 = vrot.lane.b32.xlu1 %v19933_v43, %s15065_s2 }
 0x5b3   : > { %3644 = vrot.lane.b32.xlu0 %v19934_v11, %s15065_s2 }
 0x5b4   : > { %3750 = vrot.lane.b32.xlu1 %v19935_v12, %s15065_s2 }
 0x5b7   : > { %3856 = vrot.lane.b32.xlu0 %v19936_v40, %s15065_s2 }
 0x5b8   : > { %3747 = vrot.lane.b32.xlu1 %v19937_v44, %s15065_s2 }
 0x5ba   : > { %v16472_v13 = vpop.f32.mrb[80].mxu1 }
 0x5bb   : > { %19938 = vst [vmem:[#allocation90_spill] sm:$0xff] %v16472_v13  ;;  %3962 = vrot.lane.b32.xlu0 %v19939_v26, %s15065_s2  ;;  %v13061_v1 = vpop.f32.mrb[81].mxu1 }
 0x5bc   : > { %3853 = vrot.lane.b32.xlu1 %v19940_v21, %s15065_s2  ;;  %v16478_v51 = vpop.f32.mrb[82].mxu1  ;;  %v19952_v1 = vld [vmem:[#allocation81_spill] sm:$0xff] }
 0x5bd   : > { %19941 = vst [vmem:[#allocation79_spill] sm:$0xff] %v16478_v51  ;;  %v13062_v29 = vpop.f32.mrb[83].mxu1 }
 0x5be   : > { %v3703_v29 = vsel %vm1778_vm3, %v19952_v1, 0  ;;  %v19958_v1 = vld [vmem:[#allocation39_spill] sm:$0xff] }
 0x5bf   : > { %4068 = vrot.lane.b32.xlu0 %v19942_v27, %s15065_s2 }
 0x5c0   : > { %3959 = vrot.lane.b32.xlu1 %v19943_v46, %s15065_s2 }
 0x5c1   : > { %v2819_v30 = vpop.xlane.xlu1 %2818 }
 0x5c2   : > { %14346 = vrcp.f32 %v2819_v30  ;;  %v19954_v30 = vld [vmem:[#allocation85_spill] sm:$0xff] }
 0x5c3   : > { %4174 = vrot.lane.b32.xlu0 %v19944_v5, %s15065_s2 }
 0x5c4   : > { %4065 = vrot.lane.b32.xlu1 %v19945_v20, %s15065_s2 }
 0x5c7   : > { %4280 = vrot.lane.b32.xlu0 %v19946_v35, %s15065_s2 }
 0x5c8   : > { %4171 = vrot.lane.b32.xlu1 %v19947_v45, %s15065_s2 }
 0x5cb   : > { %4386 = vrot.lane.b32.xlu0 %v19948_v15, %s15065_s2 }
 0x5cc   : > { %v14347_v8 = vpop.eup %14346  ;;  %4277 = vrot.lane.b32.xlu1 %v19949_v25, %s15065_s2 }
 0x5cd   : > { %v2883_v14 = vmul.f32 %v14347_v8, %v16326_v28  ;;  %v3809_v28 = vsel %vm1778_vm3, %v19953_v63, 0  ;;  %v3915_v8 = vsel %vm1778_vm3, %v19955_v18, 0 }
 0x5cf   : > { %4905 = vrot.lane.b32.xlu0 %v19950_v57, %s15065_s2  ;;  %v2899_v4 = vpack.c.bf16 %v2883_v14, %v2882_v37  ;;  %v19956_v37 = vld [vmem:[#allocation82_spill] sm:$0xff]  ;;  %v19957_v14 = vld [vmem:[#allocation35_spill] sm:$0xff] }
 0x5d0   : > { %4383 = vrot.lane.b32.xlu1 %v19951_v33, %s15065_s2 }
 0x5d1   : > { %13144 = vmatmul.mubr.msk.bf16.vlgmr.msra.gmra.mrb[108].mxu1 %vm2531_vm4, %v2899_v4  ;;  %v16548_v4 = vpop.permute.xlu0 %4330 }
 0x5d2   : > { %13154 = vmatpush3.bf16.xpose.msra.mxu1 %v3703_v29  ;;  %13155 = vmatprep.mubr.msk.bf16.mxu1 %vm15064_vm2, %v19925_v24  ;;  %v19959_v29 = vld [vmem:[#allocation87_spill] sm:$0xff] }
 0x5d3   : > { %5097 = vrot.lane.b32.xlu0 %v15844_v38, %s15065_s2  ;;  %13165 = vmatprep.subr.bf16.mxu1 %v19925_v24  ;;  %v4021_v63 = vsel %vm1778_vm3, %v19959_v29, 0 }
 0x5d4   : > { %5001 = vrot.lane.b32.xlu1 %v15819_v6, %s15065_s2 }
 0x5d5   : > { %v2726_v18 = vpop.xlane.xlu0 %2725 }
 0x5d6   : > { %14348 = vrcp.f32 %v2726_v18  ;;  %v19969_v18 = vld [vmem:[#allocation44_spill] sm:$0xff] }
 0x5d7   : > { %5289 = vrot.lane.b32.xlu0 %v19928_v3, %s15065_s2 }
 0x5d8   : > { %5193 = vrot.lane.b32.xlu1 %v15861_v59, %s15065_s2 }
 0x5d9   : > { %13156 = vmatmul.mubr.msk.bf16.vlgmr.msra.gmra.mrb[112].mxu1 %vm1778_vm3, %v19954_v30  ;;  %v19961_v30 = vld [vmem:[#allocation34_spill] sm:$0xff] }
 0x5da   : > { %13166 = vmatpush3.bf16.xpose.msra.mxu1 %v3809_v28  ;;  %13167 = vmatprep.mubr.msk.bf16.mxu1 %vm15064_vm2, %v19925_v24  ;;  %v19960_v28 = vld [vmem:[#allocation84_spill] sm:$0xff] }
 0x5db   : > { %5481 = vrot.lane.b32.xlu0 %v19931_v36, %s15065_s2  ;;  %13177 = vmatprep.subr.bf16.mxu1 %v19925_v24 }
 0x5dc   : > { %5385 = vrot.lane.b32.xlu1 %v19930_v53, %s15065_s2 }
 0x5df   : > { %5577 = vrot.lane.b32.xlu0 %v19932_v48, %s15065_s2 }
 0x5e0   : > { %6086 = vrot.lane.b32.xlu1 %v19933_v43, %s15066_s6 }
 0x5e1   : > { %13168 = vmatmul.mubr.msk.bf16.vlgmr.msra.gmra.mrb[116].mxu1 %vm1778_vm3, %v19956_v37  ;;  %v19963_v37 = vld [vmem:[#allocation88_spill] sm:$0xff] }
 0x5e2   : > { %13178 = vmatpush3.bf16.xpose.msra.mxu1 %v3915_v8  ;;  %13179 = vmatprep.mubr.msk.bf16.mxu1 %vm15064_vm2, %v19925_v24  ;;  %v19962_v8 = vld [vmem:[#allocation45_spill] sm:$0xff]  ;;  %v4127_v29 = vsel %vm1778_vm3, %v19963_v37, 0 }
 0x5e3   : > { %6088 = vrot.lane.b32.xlu0 %v19934_v11, %s15066_s6  ;;  %13189 = vmatprep.subr.bf16.mxu1 %v19925_v24 }
 0x5e4   : > { %6190 = vrot.lane.b32.xlu1 %v19935_v12, %s15066_s6 }
 0x5e7   : > { %6139 = vrot.lane.b32.xlu0 %v19957_v14, %s15066_s6 }
 0x5e8   : > { %6241 = vrot.lane.b32.xlu1 %v19958_v1, %s15066_s6  ;;  %v2738_v1 = vpop.xlane.xlu0 %2737 }
 0x5e9   : > { %13180 = vmatmul.mubr.msk.bf16.vlgmr.msra.gmra.mrb[120].mxu1 %vm1778_vm3, %v19960_v28 }
 0x5ea   : > { %13190 = vmatpush3.bf16.xpose.msra.mxu1 %v4021_v63  ;;  %13191 = vmatprep.mubr.msk.bf16.mxu1 %vm15064_vm2, %v19925_v24  ;;  %v16569_v63 = vpop.permute.xlu1 %4436 }
 0x5eb   : > { %6137 = vrot.lane.b32.xlu0 %v19961_v30, %s15066_s6  ;;  %13201 = vmatprep.subr.bf16.mxu1 %v19925_v24 }
 0x5ec   : > { %6292 = vrot.lane.b32.xlu1 %v19936_v40, %s15066_s6  ;;  %v19966_v40 = vld [vmem:[#allocation38_spill] sm:$0xff] }
 0x5ef   : > { %6188 = vrot.lane.b32.xlu0 %v19937_v44, %s15066_s6  ;;  %v4233_v44 = vsel %vm1778_vm3, %v16350_v62, 0 }
 0x5f0   : > { %6343 = vrot.lane.b32.xlu1 %v19962_v8, %s15066_s6 }
 0x5f1   : > { %v16571_v28 = vpop.f32.mrb[84].mxu1  ;;  %13192 = vmatmul.mubr.msk.bf16.vlgmr.msra.gmra.mrb[124].mxu1 %vm1778_vm3, %v19965_v23 }
 0x5f2   : > { %19964 = vst [vmem:[#allocation80_spill] sm:$0xff] %v16571_v28  ;;  %13202 = vmatpush3.bf16.xpose.msra.mxu1 %v4127_v29  ;;  %v13073_v12 = vpop.f32.mrb[85].mxu1  ;;  %13203 = vmatprep.mubr.msk.bf16.mxu1 %vm15064_vm2, %v19925_v24 }
 0x5f3   : > { %6239 = vrot.lane.b32.xlu0 %v19966_v40, %s15066_s6  ;;  %v16579_v8 = vpop.f32.mrb[86].mxu1  ;;  %13213 = vmatprep.subr.bf16.mxu1 %v19925_v24  ;;  %v2741_v12 = vpop.xlane.xlu0 %2740  ;;  %v19968_v40 = vld [vmem:[#allocation55_spill] sm:$0xff] }
 0x5f4   : > { %19967 = vst [vmem:[#allocation81_spill] sm:$0xff] %v16579_v8  ;;  %6394 = vrot.lane.b32.xlu1 %v19939_v26, %s15066_s6  ;;  %v13074_v23 = vpop.f32.mrb[87].mxu1 }
 0x5f5   : > { %v14349_v23 = vpop.eup %14348 }
 0x5f6   : > { %v2729_v29 = vpop.xlane.xlu1 %2728 }
 0x5f7   : > { %14350 = vrcp.f32 %v2729_v29  ;;  %6290 = vrot.lane.b32.xlu0 %v19940_v21, %s15066_s6  ;;  %v4339_v29 = vsel %vm1778_vm3, %v16448_v31, 0  ;;  %v2750_v37 = vpop.xlane.xlu0 %2749  ;;  %v19972_v31 = vld [vmem:[#allocation71_spill] sm:$0xff] }
 0x5f8   : > { %6445 = vrot.lane.b32.xlu1 %v19968_v40, %s15066_s6  ;;  %14352 = vrcp.f32 %v2741_v12  ;;  %v2852_v12 = vmul.f32 %v14349_v23, %v16330_v42 }
 0x5f9   : > { %13204 = vmatmul.mubr.msk.bf16.vlgmr.msra.gmra.mrb[128].mxu1 %vm1778_vm3, %v16356_v10  ;;  %14354 = vrcp.f32 %v2738_v1  ;;  %v19970_v10 = vld [vmem:[#allocation62_spill] sm:$0xff] }
 0x5fa   : > { %13214 = vmatpush3.bf16.xpose.msra.mxu1 %v4233_v44  ;;  %13215 = vmatprep.mubr.msk.bf16.mxu1 %vm15064_vm2, %v19925_v24  ;;  %v2753_v62 = vpop.xlane.xlu1 %2752 }
 0x5fb   : > { %6341 = vrot.lane.b32.xlu0 %v19969_v18, %s15066_s6  ;;  %13225 = vmatprep.subr.bf16.mxu1 %v19925_v24  ;;  %14356 = vrcp.f32 %v2753_v62 }
 0x5fc   : > { %6494 = vrot.lane.b32.xlu1 %v19945_v20, %s15066_s6  ;;  %v19971_v20 = vld [vmem:[#allocation54_spill] sm:$0xff]  ;;  %14358 = vrcp.f32 %v2750_v37  ;;  %v4445_v37 = vsel %vm1778_vm3, %v16480_v54, 0 }
 0x5fe   : > { %v2765_v62 = vpop.xlane.xlu1 %2764 }
 0x5ff   : > { %6392 = vrot.lane.b32.xlu0 %v19943_v46, %s15066_s6  ;;  %14360 = vrcp.f32 %v2765_v62 }
 0x600   : > { %6545 = vrot.lane.b32.xlu1 %v19970_v10, %s15066_s6 }
 0x601   : > { %v14351_v44 = vpop.eup %14350  ;;  %13216 = vmatmul.mubr.msk.bf16.vlgmr.msra.gmra.mrb[132].mxu1 %vm1778_vm3, %v16450_v47 }
 0x602   : > { %v2853_v1 = vmul.f32 %v14351_v44, %v16403_v16  ;;  %13226 = vmatpush3.bf16.xpose.msra.mxu1 %v4339_v29  ;;  %13227 = vmatprep.mubr.msk.bf16.mxu1 %vm15064_vm2, %v19925_v24  ;;  %v14353_v47 = vpop.eup %14352  ;;  %v19973_v16 = vld [vmem:[#allocation47_spill] sm:$0xff]  ;;  %v2762_v44 = vpop.xlane.xlu0 %2761 }
 0x603   : > { %6443 = vrot.lane.b32.xlu0 %v19971_v20, %s15066_s6  ;;  %13237 = vmatprep.subr.bf16.mxu1 %v19925_v24  ;;  %v14355_v42 = vpop.eup %14354  ;;  %v2857_v23 = vmul.f32 %v14353_v47, %v16344_v32  ;;  %v19974_v32 = vld [vmem:[#allocation63_spill] sm:$0xff]  ;;  %14362 = vrcp.f32 %v2762_v44 }
 0x604   : > { %6649 = vrot.lane.b32.xlu1 %v19972_v31, %s15066_s6  ;;  %v2884_v10 = vpack.c.bf16 %v2853_v1, %v2852_v12  ;;  %v19975_v12 = vld [vmem:[#allocation51_spill] sm:$0xff]  ;;  %v2777_v1 = vpop.xlane.xlu1 %2776 }
 0x605   : > { %v14357_v54 = vpop.eup %14356  ;;  %14364 = vrcp.f32 %v2777_v1 }
 0x606   : > { %13054 = vmatmul.mubr.msk.bf16.vlgmr.msra.gmra.mrb[80].mxu0 %vm2531_vm4, %v2884_v10  ;;  %v2856_v10 = vmul.f32 %v14355_v42, %v16338_v22  ;;  %v2861_v22 = vmul.f32 %v14357_v54, %v16407_v2  ;;  %v2774_v42 = vpop.xlane.xlu0 %2773 }
 0x607   : > { %13064 = vmatpush3.bf16.msra.mxu0 %v19973_v16  ;;  %6496 = vrot.lane.b32.xlu0 %v19942_v27, %s15066_s6  ;;  %14366 = vrcp.f32 %v2774_v42 }
 0x608   : > { %6700 = vrot.lane.b32.xlu1 %v19946_v35, %s15066_s6  ;;  %13065 = vmatprep.mubr.msk.bf16.mxu0 %vm15064_vm2, %v19925_v24  ;;  %v2886_v29 = vpack.c.bf16 %v2857_v23, %v2856_v10 }
 0x609   : > { %13228 = vmatmul.mubr.msk.bf16.vlgmr.msra.gmra.mrb[136].mxu1 %vm1778_vm3, %v16548_v4  ;;  %13075 = vmatprep.subr.bf16.mxu0 %v19925_v24  ;;  %v14359_v4 = vpop.eup %14358 }
 0x60a   : > { %13238 = vmatpush3.bf16.xpose.msra.mxu1 %v4445_v37  ;;  %13239 = vmatprep.mubr.msk.bf16.mxu1 %vm15064_vm2, %v19925_v24  ;;  %v2860_v47 = vmul.f32 %v14359_v4, %v16348_v52  ;;  %v14361_v23 = vpop.eup %14360  ;;  %v19976_v37 = vld [vmem:[#allocation53_spill] sm:$0xff]  ;;  %v2786_v44 = vpop.xlane.xlu0 %2785 }
 0x60b   : > { %6547 = vrot.lane.b32.xlu0 %v19974_v32, %s15066_s6  ;;  %13249 = vmatprep.subr.bf16.mxu1 %v19925_v24  ;;  %v2865_v52 = vmul.f32 %v14361_v23, %v16420_v49 }
 0x60c   : > { %v2888_v2 = vpack.c.bf16 %v2861_v22, %v2860_v47  ;;  %v19977_v22 = vld [vmem:[#allocation57_spill] sm:$0xff] }
 0x60d   : > { %v14363_v62 = vpop.eup %14362 }
 0x60e   : > { %13066 = vmatmul.mubr.msk.bf16.vlgmr.msra.gmra.mrb[84].mxu0 %vm2531_vm4, %v2886_v29  ;;  %v2864_v10 = vmul.f32 %v14363_v62, %v16354_v7  ;;  %v2798_v47 = vpop.xlane.xlu0 %2797  ;;  %v19978_v62 = vld [vmem:[#allocation61_spill] sm:$0xff] }
 0x60f   : > { %13076 = vmatpush3.bf16.msra.mxu0 %v19975_v12  ;;  %6598 = vrot.lane.b32.xlu0 %v19944_v5, %s15066_s6  ;;  %v14365_v54 = vpop.eup %14364 }
 0x610   : > { %13077 = vmatprep.mubr.msk.bf16.mxu0 %vm15064_vm2, %v19925_v24  ;;  %13087 = vmatprep.subr.bf16.mxu0 %v19925_v24  ;;  %v2890_v29 = vpack.c.bf16 %v2865_v52, %v2864_v10  ;;  %v2869_v49 = vmul.f32 %v14365_v54, %v16422_v41 }
 0x611   : > { %13240 = vmatmul.mubr.msk.bf16.vlgmr.msra.gmra.mrb[140].mxu1 %vm1778_vm3, %v16569_v63  ;;  %v2789_v63 = vpop.xlane.xlu1 %2788  ;;  %v14367_v4 = vpop.eup %14366 }
 0x612   : > { %13251 = vmatprep.mubr.msk.bf16.mxu1 %vm15064_vm2, %v19925_v24  ;;  %14368 = vrcp.f32 %v2789_v63  ;;  %v2868_v7 = vmul.f32 %v14367_v4, %v16363_v56 }
 0x613   : > { %6596 = vrot.lane.b32.xlu0 %v19947_v45, %s15066_s6  ;;  %14370 = vrcp.f32 %v2786_v44 }
 0x614   : > { %v2892_v42 = vpack.c.bf16 %v2869_v49, %v2868_v7 }
 0x615   : > { %v2801_v1 = vpop.xlane.xlu1 %2800 }
 0x616   : > { %13078 = vmatmul.mubr.msk.bf16.vlgmr.msra.gmra.mrb[88].mxu0 %vm2531_vm4, %v2888_v2  ;;  %14372 = vrcp.f32 %v2801_v1 }
 0x617   : > { %13088 = vmatpush3.bf16.msra.mxu0 %v19976_v37  ;;  %6647 = vrot.lane.b32.xlu0 %v15963_v9, %s15066_s6  ;;  %14374 = vrcp.f32 %v2798_v47 }
 0x618   : > { %13089 = vmatprep.mubr.msk.bf16.mxu0 %vm15064_vm2, %v19925_v24  ;;  %13099 = vmatprep.subr.bf16.mxu0 %v19925_v24 }
 0x61c   : > { %v14369_v2 = vpop.eup %14368 }
 0x61d   : > { %v14371_v23 = vpop.eup %14370  ;;  %v2873_v41 = vmul.f32 %v14369_v2, %v16435_v50 }
 0x61e   : > { %13090 = vmatmul.mubr.msk.bf16.vlgmr.msra.gmra.mrb[92].mxu0 %vm2531_vm4, %v2890_v29  ;;  %v2872_v52 = vmul.f32 %v14371_v23, %v16367_v55  ;;  %v19981_v55 = vld [vmem:[#allocation65_spill] sm:$0xff] }
 0x61f   : > { %13100 = vmatpush3.bf16.msra.mxu0 %v19977_v22  ;;  %13101 = vmatprep.mubr.msk.bf16.mxu0 %vm15064_vm2, %v19925_v24 }
 0x620   : > { %13111 = vmatprep.subr.bf16.mxu0 %v19925_v24  ;;  %v2894_v29 = vpack.c.bf16 %v2873_v41, %v2872_v52  ;;  %v14373_v54 = vpop.eup %14372 }
 0x621   : > { %v14375_v7 = vpop.eup %14374  ;;  %v2877_v47 = vmul.f32 %v14373_v54, %v16440_v39  ;;  %v19984_v54 = vld [vmem:[#allocation69_spill] sm:$0xff] }
 0x626   : > { %13102 = vmatmul.mubr.msk.bf16.vlgmr.msra.gmra.mrb[96].mxu0 %vm2531_vm4, %v2892_v42  ;;  %v2876_v42 = vmul.f32 %v14375_v7, %v16373_v34 }
 0x627   : > { %13112 = vmatpush3.bf16.msra.mxu0 %v19978_v62  ;;  %13113 = vmatprep.mubr.msk.bf16.mxu0 %vm15064_vm2, %v19925_v24 }
 0x628   : > { %13123 = vmatprep.subr.bf16.mxu0 %v19925_v24  ;;  %v2896_v52 = vpack.c.bf16 %v2877_v47, %v2876_v42 }
 0x62a   : > { %v2810_v56 = vpop.xlane.xlu0 %2809 }
 0x62b   : > { %v16676_v63 = vpop.f32.mrb[88].mxu1  ;;  %14376 = vrcp.f32 %v2810_v56 }
 0x62c   : > { %19979 = vst [vmem:[#allocation83_spill] sm:$0xff] %v16676_v63  ;;  %v13085_v10 = vpop.f32.mrb[89].mxu1  ;;  %v2813_v44 = vpop.xlane.xlu1 %2812 }
 0x62d   : > { %14378 = vrcp.f32 %v2813_v44  ;;  %v16678_v4 = vpop.f32.mrb[90].mxu1 }
 0x62e   : > { %19980 = vst [vmem:[#allocation85_spill] sm:$0xff] %v16678_v4  ;;  %v13086_v1 = vpop.f32.mrb[91].mxu1  ;;  %v3645_v50 = vpop.permute.xlu0 %3644  ;;  %13114 = vmatmul.mubr.msk.bf16.vlgmr.msra.gmra.mrb[100].mxu0 %vm2531_vm4, %v2894_v29 }
 0x62f   : > { %13124 = vmatpush3.bf16.msra.mxu0 %v19981_v55  ;;  %13125 = vmatprep.mubr.msk.bf16.mxu0 %vm15064_vm2, %v19925_v24 }
 0x630   : > { %13135 = vmatprep.subr.bf16.mxu0 %v19925_v24  ;;  %v3642_v44 = vpop.permute.xlu1 %3641 }
 0x632   : > { %v3857_v2 = vpop.permute.xlu0 %3856 }
 0x633   : > { %v16689_v23 = vpop.f32.mrb[92].mxu1 }
 0x634   : > { %19982 = vst [vmem:[#allocation86_spill] sm:$0xff] %v16689_v23  ;;  %v13097_v41 = vpop.f32.mrb[93].mxu1 }
 0x635   : > { %v16691_v56 = vpop.f32.mrb[94].mxu1  ;;  %v14377_v10 = vpop.eup %14376 }
 0x636   : > { %19983 = vst [vmem:[#allocation82_spill] sm:$0xff] %v16691_v56  ;;  %v13098_v29 = vpop.f32.mrb[95].mxu1  ;;  %v3963_v1 = vpop.permute.xlu0 %3962  ;;  %13126 = vmatmul.mubr.msk.bf16.vlgmr.msra.gmra.mrb[104].mxu0 %vm2531_vm4, %v2896_v52  ;;  %v2880_v7 = vmul.f32 %v14377_v10, %v16454_v60 }
 0x637   : > { %v14379_v39 = vpop.eup %14378  ;;  %13136 = vmatpush3.bf16.msra.mxu0 %v19984_v54  ;;  %13137 = vmatprep.mubr.msk.bf16.mxu0 %vm15064_vm2, %v19925_v24 }
 0x638   : > { %v2881_v34 = vmul.f32 %v14379_v39, %v16458_v58  ;;  %13147 = vmatprep.subr.bf16.mxu0 %v19925_v24  ;;  %v3650_v58 = vsel %vm1778_vm3, %v3645_v50, 0  ;;  %v3751_v39 = vpop.permute.xlu1 %3750 }
 0x639   : > { %v3756_v50 = vsel %vm1778_vm3, %v3751_v39, 0 }
 0x63a   : > { %v4069_v47 = vpop.permute.xlu0 %4068  ;;  %v2898_v29 = vpack.c.bf16 %v2881_v34, %v2880_v7 }
 0x63b   : > { %v16702_v42 = vpop.f32.mrb[96].mxu1 }
 0x63c   : > { %19985 = vst [vmem:[#allocation87_spill] sm:$0xff] %v16702_v42  ;;  %v13109_v41 = vpop.f32.mrb[97].mxu1 }
 0x63d   : > { %v16704_v49 = vpop.f32.mrb[98].mxu1 }
 0x63e   : > { %19986 = vst [vmem:[#allocation84_spill] sm:$0xff] %v16704_v49  ;;  %v13110_v35 = vpop.f32.mrb[99].mxu1  ;;  %v4175_v45 = vpop.permute.xlu0 %4174  ;;  %13138 = vmatmul.mubr.msk.bf16.vlgmr.msra.gmra.mrb[108].mxu0 %vm2531_vm4, %v2898_v29 }
 0x63f   : > { %13149 = vmatprep.mubr.msk.bf16.mxu0 %vm15064_vm2, %v19925_v24 }
 0x640   : > { %13148 = vmatpush3.bf16.xpose.msra.mxu0 %v3650_v58 }
 0x641   : > { %13159 = vmatprep.subr.bf16.mxu0 %v19925_v24 }
 0x642   : > { %v4281_v60 = vpop.permute.xlu0 %4280 }
 0x643   : > { %v16713_v10 = vpop.f32.mrb[100].mxu1 }
 0x644   : > { %19987 = vst [vmem:[#allocation88_spill] sm:$0xff] %v16713_v10  ;;  %v13121_v34 = vpop.f32.mrb[101].mxu1 }
 0x645   : > { %v16715_v7 = vpop.f32.mrb[102].mxu1 }
 0x646   : > { %19988 = vst [vmem:[#allocation89_spill] sm:$0xff] %v16715_v7  ;;  %v13122_v41 = vpop.f32.mrb[103].mxu1  ;;  %v4387_v29 = vpop.permute.xlu0 %4386 }
 0x647   : > { %13150 = vmatmul.mubr.msk.bf16.vlgmr.msra.gmra.mrb[112].mxu0 %vm1778_vm3, %v3642_v44  ;;  %v3748_v41 = vpop.permute.xlu1 %3747 }
 0x648   : > { %13160 = vmatpush3.bf16.xpose.msra.mxu0 %v3756_v50  ;;  %13161 = vmatprep.mubr.msk.bf16.mxu0 %vm15064_vm2, %v19925_v24  ;;  %v3862_v50 = vsel %vm1778_vm3, %v3857_v2, 0 }
 0x649   : > { %13171 = vmatprep.subr.bf16.mxu0 %v19925_v24 }
 0x64a   : > { %v4906_v58 = vpop.permute.xlu0 %4905 }
 0x64b   : > { %v16724_v52 = vpop.f32.mrb[104].mxu1  ;;  %13250 = vmatpush3.bf16.msra.mxu1 %v4906_v58  ;;  %v3854_v58 = vpop.permute.xlu1 %3853 }
 0x64c   : > { %19989 = vst [vmem:[#allocation91_spill] sm:$0xff] %v16724_v52  ;;  %v13133_v34 = vpop.f32.mrb[105].mxu1  ;;  %13261 = vmatprep.subr.bf16.mxu1 %v19925_v24 }
 0x64d   : > { %v16727_v35 = vpop.f32.mrb[106].mxu1  ;;  %v3968_v34 = vsel %vm1778_vm3, %v3963_v1, 0 }
 0x64e   : > { %19990 = vst [vmem:[#allocation92_spill] sm:$0xff] %v16727_v35  ;;  %v13134_v44 = vpop.f32.mrb[107].mxu1 }
 0x64f   : > { %13162 = vmatmul.mubr.msk.bf16.vlgmr.msra.gmra.mrb[116].mxu0 %vm1778_vm3, %v3748_v41  ;;  %v3960_v2 = vpop.permute.xlu1 %3959  ;;  %v4074_v41 = vsel %vm1778_vm3, %v4069_v47, 0  ;;  %v4180_v44 = vsel %vm1778_vm3, %v4175_v45, 0 }
 0x650   : > { %13172 = vmatpush3.bf16.xpose.msra.mxu0 %v3862_v50  ;;  %13173 = vmatprep.mubr.msk.bf16.mxu0 %vm15064_vm2, %v19925_v24  ;;  %v4286_v50 = vsel %vm1778_vm3, %v4281_v60, 0 }
 0x651   : > { %13183 = vmatprep.subr.bf16.mxu0 %v19925_v24 }
 0x653   : > { %v4066_v1 = vpop.permute.xlu1 %4065 }
 0x657   : > { %13174 = vmatmul.mubr.msk.bf16.vlgmr.msra.gmra.mrb[120].mxu0 %vm1778_vm3, %v3854_v58  ;;  %v4172_v47 = vpop.permute.xlu1 %4171  ;;  %v4392_v58 = vsel %vm1778_vm3, %v4387_v29, 0 }
 0x658   : > { %13184 = vmatpush3.bf16.xpose.msra.mxu0 %v3968_v34  ;;  %13185 = vmatprep.mubr.msk.bf16.mxu0 %vm15064_vm2, %v19925_v24 }
 0x659   : > { %13195 = vmatprep.subr.bf16.mxu0 %v19925_v24 }
 0x65b   : > { %v4278_v45 = vpop.permute.xlu1 %4277 }
 0x65f   : > { %13186 = vmatmul.mubr.msk.bf16.vlgmr.msra.gmra.mrb[124].mxu0 %vm1778_vm3, %v3960_v2  ;;  %v4384_v60 = vpop.permute.xlu1 %4383 }
 0x660   : > { %13196 = vmatpush3.bf16.xpose.msra.mxu0 %v4074_v41  ;;  %13197 = vmatprep.mubr.msk.bf16.mxu0 %vm15064_vm2, %v19925_v24 }
 0x661   : > { %13207 = vmatprep.subr.bf16.mxu0 %v19925_v24 }
 0x667   : > { %13198 = vmatmul.mubr.msk.bf16.vlgmr.msra.gmra.mrb[128].mxu0 %vm1778_vm3, %v4066_v1 }
 0x668   : > { %13208 = vmatpush3.bf16.xpose.msra.mxu0 %v4180_v44  ;;  %13209 = vmatprep.mubr.msk.bf16.mxu0 %vm15064_vm2, %v19925_v24 }
 0x669   : > { %13219 = vmatprep.subr.bf16.mxu0 %v19925_v24 }
 0x66f   : > { %13210 = vmatmul.mubr.msk.bf16.vlgmr.msra.gmra.mrb[132].mxu0 %vm1778_vm3, %v4172_v47 }
 0x670   : > { %13220 = vmatpush3.bf16.xpose.msra.mxu0 %v4286_v50  ;;  %13221 = vmatprep.mubr.msk.bf16.mxu0 %vm15064_vm2, %v19925_v24 }
 0x671   : > { %13231 = vmatprep.subr.bf16.mxu0 %v19925_v24 }
 0x677   : > { %13222 = vmatmul.mubr.msk.bf16.vlgmr.msra.gmra.mrb[136].mxu0 %vm1778_vm3, %v4278_v45 }
 0x678   : > { %13232 = vmatpush3.bf16.xpose.msra.mxu0 %v4392_v58  ;;  %13233 = vmatprep.mubr.msk.bf16.mxu0 %vm15064_vm2, %v19925_v24 }
 0x679   : > { %13243 = vmatprep.subr.bf16.mxu0 %v19925_v24 }
 0x67f   : > { %13234 = vmatmul.mubr.msk.bf16.vlgmr.msra.gmra.mrb[140].mxu0 %vm1778_vm3, %v4384_v60 }
 0x680   : > { %13245 = vmatprep.mubr.msk.bf16.mxu0 %vm15064_vm2, %v19925_v24 }
 0x6a4   : > { %v16764_v34 = vpop.f32.mrb[108].mxu1 }
 0x6a5   : > { %19991 = vst [vmem:[#allocation93_spill] sm:$0xff] %v16764_v34  ;;  %v13145_v2 = vpop.f32.mrb[109].mxu1 }
 0x6a6   : > { %v16766_v41 = vpop.f32.mrb[110].mxu1 }
 0x6a7   : > { %19992 = vst [vmem:[#allocation94_spill] sm:$0xff] %v16766_v41  ;;  %v13146_v1 = vpop.f32.mrb[111].mxu1 }
 0x6ac   : > { %v16770_v44 = vpop.f32.mrb[112].mxu1 }
 0x6ad   : > { %v13157_v47 = vpop.f32.mrb[113].mxu1 }
 0x6ae   : > { %v16772_v50 = vpop.f32.mrb[114].mxu1 }
 0x6af   : > { %v13158_v45 = vpop.f32.mrb[115].mxu1 }
 0x6b4   : > { %v16774_v58 = vpop.f32.mrb[116].mxu1 }
 0x6b5   : > { %v13169_v60 = vpop.f32.mrb[117].mxu1 }
 0x6b6   : > { %v16776_v39 = vpop.f32.mrb[118].mxu1 }
 0x6b7   : > { %v13170_v9 = vpop.f32.mrb[119].mxu1 }
 0x6bc   : > { %v16778_v5 = vpop.f32.mrb[120].mxu1 }
 0x6bd   : > { %v13181_v2 = vpop.f32.mrb[121].mxu1 }
 0x6be   : > { %v16780_v31 = vpop.f32.mrb[122].mxu1 }
 0x6bf   : > { %v13182_v27 = vpop.f32.mrb[123].mxu1  ;;  %v4521_v63 = vsel %vm2531_vm4, %v16780_v31, -inf }
 0x6c4   : > { %v16782_v29 = vpop.f32.mrb[124].mxu1 }
 0x6c5   : > { %v13193_v1 = vpop.f32.mrb[125].mxu1  ;;  %v4530_v4 = vsel %vm2531_vm4, %v16782_v29, -inf }
 0x6c6   : > { %v16784_v32 = vpop.f32.mrb[126].mxu1 }
 0x6c7   : > { %v13194_v47 = vpop.f32.mrb[127].mxu1 }
 0x6cc   : > { %v16786_v40 = vpop.f32.mrb[128].mxu1 }
 0x6cd   : > { %v13205_v45 = vpop.f32.mrb[129].mxu1  ;;  %v4542_v28 = vsel %vm2531_vm4, %v16786_v40, -inf }
 0x6ce   : > { %v16788_v20 = vpop.f32.mrb[130].mxu1 }
 0x6cf   : > { %v13206_v60 = vpop.f32.mrb[131].mxu1 }
 0x6d4   : > { %v16790_v26 = vpop.f32.mrb[132].mxu1 }
 0x6d5   : > { %v13217_v9 = vpop.f32.mrb[133].mxu1 }
 0x6d6   : > { %v16792_v46 = vpop.f32.mrb[134].mxu1 }
 0x6d7   : > { %v13218_v2 = vpop.f32.mrb[135].mxu1 }
 0x6d9   : > { %v16794_v18 = vpop.f32.mrb[80].mxu0 }
 0x6da   : > { %19993 = vst [vmem:[#allocation95_spill] sm:$0xff] %v16794_v18  ;;  %v13055_v27 = vpop.f32.mrb[81].mxu0 }
 0x6db   : > { %v16796_v21 = vpop.f32.mrb[82].mxu0 }
 0x6dc   : > { %19994 = vst [vmem:[#allocation96_spill] sm:$0xff] %v16796_v21  ;;  %v13056_v47 = vpop.f32.mrb[83].mxu0  ;;  %v16800_v14 = vpop.f32.mrb[136].mxu1 }
 0x6dd   : > { %v13229_v45 = vpop.f32.mrb[137].mxu1  ;;  %v4566_v21 = vsel %vm2531_vm4, %v16800_v14, -inf }
 0x6de   : > { %v16802_v30 = vpop.f32.mrb[138].mxu1 }
 0x6df   : > { %v13230_v60 = vpop.f32.mrb[139].mxu1 }
 0x6e1   : > { %v16804_v11 = vpop.f32.mrb[84].mxu0 }
 0x6e2   : > { %19995 = vst [vmem:[#allocation97_spill] sm:$0xff] %v16804_v11  ;;  %v13067_v9 = vpop.f32.mrb[85].mxu0 }
 0x6e3   : > { %v16806_v43 = vpop.f32.mrb[86].mxu0 }
 0x6e4   : > { %19996 = vst [vmem:[#allocation98_spill] sm:$0xff] %v16806_v43  ;;  %v13068_v27 = vpop.f32.mrb[87].mxu0  ;;  %v16810_v48 = vpop.f32.mrb[140].mxu1 }
 0x6e5   : > { %v13241_v34 = vpop.f32.mrb[141].mxu1  ;;  %v4578_v53 = vsel %vm2531_vm4, %v16810_v48, -inf }
 0x6e6   : > { %v16812_v1 = vpop.f32.mrb[142].mxu1 }
 0x6e7   : > { %v13242_v47 = vpop.f32.mrb[143].mxu1 }
 0x6e9   : > { %v16814_v41 = vpop.f32.mrb[88].mxu0 }
 0x6ea   : > { %19997 = vst [vmem:[#allocation99_spill] sm:$0xff] %v16814_v41  ;;  %v13079_v45 = vpop.f32.mrb[89].mxu0  ;;  %v4533_v41 = vsel %vm2531_vm4, %v16784_v32, -inf }
 0x6eb   : > { %v16816_v52 = vpop.f32.mrb[90].mxu0 }
 0x6ec   : > { %19998 = vst [vmem:[#allocation100_spill] sm:$0xff] %v16816_v52  ;;  %v13080_v9 = vpop.f32.mrb[91].mxu0 }
 0x6f1   : > { %v16820_v35 = vpop.f32.mrb[92].mxu0 }
 0x6f2   : > { %19999 = vst [vmem:[#allocation101_spill] sm:$0xff] %v16820_v35  ;;  %v13091_v10 = vpop.f32.mrb[93].mxu0 }
 0x6f3   : > { %v16822_v2 = vpop.f32.mrb[94].mxu0 }
 0x6f4   : > { %20000 = vst [vmem:[#allocation102_spill] sm:$0xff] %v16822_v2  ;;  %v13092_v27 = vpop.f32.mrb[95].mxu0 }
 0x6f9   : > { %v16826_v7 = vpop.f32.mrb[96].mxu0 }
 0x6fa   : > { %20001 = vst [vmem:[#allocation103_spill] sm:$0xff] %v16826_v7  ;;  %v13103_v47 = vpop.f32.mrb[97].mxu0 }
 0x6fb   : > { %v16828_v42 = vpop.f32.mrb[98].mxu0 }
 0x6fc   : > { %20002 = vst [vmem:[#allocation104_spill] sm:$0xff] %v16828_v42  ;;  %v13104_v49 = vpop.f32.mrb[99].mxu0 }
 0x701   : > { %v16832_v60 = vpop.f32.mrb[100].mxu0 }
 0x702   : > { %20003 = vst [vmem:[#allocation105_spill] sm:$0xff] %v16832_v60  ;;  %v13115_v9 = vpop.f32.mrb[101].mxu0 }
 0x703   : > { %v16834_v23 = vpop.f32.mrb[102].mxu0 }
 0x704   : > { %20004 = vst [vmem:[#allocation106_spill] sm:$0xff] %v16834_v23  ;;  %v13116_v56 = vpop.f32.mrb[103].mxu0  ;;  %v4518_v23 = vsel %vm2531_vm4, %v16778_v5, -inf }
 0x709   : > { %v16838_v34 = vpop.f32.mrb[104].mxu0 }
 0x70a   : > { %20005 = vst [vmem:[#allocation107_spill] sm:$0xff] %v16838_v34  ;;  %v13127_v27 = vpop.f32.mrb[105].mxu0 }
 0x70b   : > { %v16840_v35 = vpop.f32.mrb[106].mxu0 }
 0x70c   : > { %20006 = vst [vmem:[#allocation108_spill] sm:$0xff] %v16840_v35  ;;  %v13128_v2 = vpop.f32.mrb[107].mxu0 }
 0x711   : > { %v16844_v45 = vpop.f32.mrb[108].mxu0 }
 0x712   : > { %20007 = vst [vmem:[#allocation109_spill] sm:$0xff] %v16844_v45  ;;  %v13139_v49 = vpop.f32.mrb[109].mxu0 }
 0x713   : > { %v16846_v7 = vpop.f32.mrb[110].mxu0  ;;  %v4494_v49 = vsel %vm2531_vm4, %v16770_v44, -inf }
 0x714   : > { %20008 = vst [vmem:[#allocation110_spill] sm:$0xff] %v16846_v7  ;;  %v13140_v42 = vpop.f32.mrb[111].mxu0 }
 0x71a   : > { %v16850_v10 = vpop.f32.mrb[112].mxu0 }
 0x71b   : > { %v13151_v56 = vpop.f32.mrb[113].mxu0  ;;  %v4488_v27 = vsel %vm2531_vm4, %v16850_v10, -inf }
 0x71c   : > { %4489 = vmax.xlane.f32.xlu0 %v4488_v27  ;;  %v16854_v60 = vpop.f32.mrb[114].mxu0  ;;  %v4506_v27 = vsel %vm2531_vm4, %v16774_v58, -inf }
 0x71d   : > { %v13152_v47 = vpop.f32.mrb[115].mxu0  ;;  %v4491_v2 = vsel %vm2531_vm4, %v16854_v60, -inf }
 0x71e   : > { %4492 = vmax.xlane.f32.xlu1 %v4491_v2  ;;  %v4497_v2 = vsel %vm2531_vm4, %v16772_v50, -inf }
 0x720   : > { %4495 = vmax.xlane.f32.xlu0 %v4494_v49 }
 0x722   : > { %v16860_v9 = vpop.f32.mrb[116].mxu0 }
 0x723   : > { %v13163_v42 = vpop.f32.mrb[117].mxu0  ;;  %v4500_v56 = vsel %vm2531_vm4, %v16860_v9, -inf }
 0x724   : > { %4501 = vmax.xlane.f32.xlu1 %v4500_v56  ;;  %v16866_v45 = vpop.f32.mrb[118].mxu0  ;;  %4507 = vmax.xlane.f32.xlu0 %v4506_v27 }
 0x725   : > { %v13164_v47 = vpop.f32.mrb[119].mxu0  ;;  %v4503_v42 = vsel %vm2531_vm4, %v16866_v45, -inf }
 0x726   : > { %v4509_v47 = vsel %vm2531_vm4, %v16776_v39, -inf }
 0x728   : > { %4498 = vmax.xlane.f32.xlu1 %v4497_v2 }
 0x72a   : > { %v16870_v7 = vpop.f32.mrb[120].mxu0 }
 0x72b   : > { %v13175_v49 = vpop.f32.mrb[121].mxu0  ;;  %v4512_v34 = vsel %vm2531_vm4, %v16870_v7, -inf }
 0x72c   : > { %v16876_v35 = vpop.f32.mrb[122].mxu0  ;;  %4504 = vmax.xlane.f32.xlu1 %v4503_v42  ;;  %4513 = vmax.xlane.f32.xlu0 %v4512_v34 }
 0x72d   : > { %v13176_v56 = vpop.f32.mrb[123].mxu0  ;;  %v4515_v27 = vsel %vm2531_vm4, %v16876_v35, -inf }
 0x730   : > { %4516 = vmax.xlane.f32.xlu1 %v4515_v27  ;;  %4510 = vmax.xlane.f32.xlu0 %v4509_v47 }
 0x732   : > { %v16882_v2 = vpop.f32.mrb[124].mxu0 }
 0x733   : > { %v13187_v49 = vpop.f32.mrb[125].mxu0  ;;  %v4524_v56 = vsel %vm2531_vm4, %v16882_v2, -inf }
 0x734   : > { %v16888_v42 = vpop.f32.mrb[126].mxu0  ;;  %4519 = vmax.xlane.f32.xlu0 %v4518_v23  ;;  %4522 = vmax.xlane.f32.xlu1 %v4521_v63 }
 0x735   : > { %v13188_v34 = vpop.f32.mrb[127].mxu0  ;;  %v4527_v27 = vsel %vm2531_vm4, %v16888_v42, -inf }
 0x736   : > { %v16902_v34 = vpop.permute.xlu0 %5097 }
 0x738   : > { %4525 = vmax.xlane.f32.xlu0 %v4524_v56  ;;  %4528 = vmax.xlane.f32.xlu1 %v4527_v27 }
 0x73a   : > { %v16894_v47 = vpop.f32.mrb[128].mxu0 }
 0x73b   : > { %v13199_v49 = vpop.f32.mrb[129].mxu0  ;;  %v4536_v56 = vsel %vm2531_vm4, %v16894_v47, -inf }
 0x73c   : > { %v16900_v23 = vpop.f32.mrb[130].mxu0  ;;  %4531 = vmax.xlane.f32.xlu0 %v4530_v4  ;;  %4534 = vmax.xlane.f32.xlu1 %v4533_v41  ;;  %v4545_v4 = vsel %vm2531_vm4, %v16788_v20, -inf }
 0x73d   : > { %v13200_v63 = vpop.f32.mrb[131].mxu0  ;;  %v4539_v27 = vsel %vm2531_vm4, %v16900_v23, -inf }
 0x73e   : > { %v16916_v63 = vpop.permute.xlu0 %5289 }
 0x740   : > { %4537 = vmax.xlane.f32.xlu0 %v4536_v56  ;;  %4540 = vmax.xlane.f32.xlu1 %v4539_v27 }
 0x742   : > { %v16908_v49 = vpop.f32.mrb[132].mxu0  ;;  %v16924_v11 = vpop.permute.xlu0 %5481 }
 0x743   : > { %v13211_v52 = vpop.f32.mrb[133].mxu0  ;;  %v4548_v56 = vsel %vm2531_vm4, %v16908_v49, -inf }
 0x744   : > { %v16914_v41 = vpop.f32.mrb[134].mxu0  ;;  %4543 = vmax.xlane.f32.xlu0 %v4542_v28  ;;  %4546 = vmax.xlane.f32.xlu1 %v4545_v4  ;;  %v4554_v28 = vsel %vm2531_vm4, %v16790_v26, -inf  ;;  %v4557_v4 = vsel %vm2531_vm4, %v16792_v46, -inf }
 0x745   : > { %v13212_v8 = vpop.f32.mrb[135].mxu0  ;;  %v4551_v27 = vsel %vm2531_vm4, %v16914_v41, -inf }
 0x748   : > { %4549 = vmax.xlane.f32.xlu0 %v4548_v56  ;;  %4552 = vmax.xlane.f32.xlu1 %v4551_v27 }
 0x74a   : > { %v16922_v52 = vpop.f32.mrb[136].mxu0 }
 0x74b   : > { %v13223_v43 = vpop.f32.mrb[137].mxu0  ;;  %v4560_v56 = vsel %vm2531_vm4, %v16922_v52, -inf }
 0x74c   : > { %v16930_v8 = vpop.f32.mrb[138].mxu0  ;;  %4555 = vmax.xlane.f32.xlu0 %v4554_v28  ;;  %4558 = vmax.xlane.f32.xlu1 %v4557_v4  ;;  %v16936_v43 = vpop.permute.xlu0 %5577  ;;  %v4569_v28 = vsel %vm2531_vm4, %v16802_v30, -inf }
 0x74d   : > { %v13224_v13 = vpop.f32.mrb[139].mxu0  ;;  %v4563_v27 = vsel %vm2531_vm4, %v16930_v8, -inf }
 0x750   : > { %4561 = vmax.xlane.f32.xlu0 %v4560_v56  ;;  %4564 = vmax.xlane.f32.xlu1 %v4563_v27  ;;  %v16946_v36 = vpop.permute.xlu0 %6088 }
 0x751   : > { %20009 = vst [vmem:[#allocation111_spill] sm:$0xff] %v16946_v36 }
 0x752   : > { %v16938_v51 = vpop.f32.mrb[140].mxu0 }
 0x753   : > { %v13235_v18 = vpop.f32.mrb[141].mxu0  ;;  %v4572_v56 = vsel %vm2531_vm4, %v16938_v51, -inf }
 0x754   : > { %v16944_v13 = vpop.f32.mrb[142].mxu0  ;;  %4567 = vmax.xlane.f32.xlu0 %v4566_v21  ;;  %4570 = vmax.xlane.f32.xlu1 %v4569_v28  ;;  %v16952_v18 = vpop.permute.xlu1 %5001 }
 0x755   : > { %v13236_v4 = vpop.f32.mrb[143].mxu0  ;;  %v4575_v27 = vsel %vm2531_vm4, %v16944_v13, -inf  ;;  %v16956_v3 = vpop.permute.xlu0 %6139 }
 0x756   : > { %20010 = vst [vmem:[#allocation112_spill] sm:$0xff] %v16956_v3 }
 0x758   : > { %4573 = vmax.xlane.f32.xlu0 %v4572_v56  ;;  %4576 = vmax.xlane.f32.xlu1 %v4575_v27  ;;  %v16958_v21 = vpop.permute.xlu1 %5193 }
 0x759   : > { %v16960_v28 = vpop.permute.xlu0 %6137 }
 0x75a   : > { %20011 = vst [vmem:[#allocation113_spill] sm:$0xff] %v16960_v28 }
 0x75c   : > { %4579 = vmax.xlane.f32.xlu0 %v4578_v53  ;;  %v16962_v4 = vpop.permute.xlu1 %5385 }
 0x75d   : > { %v16964_v59 = vpop.permute.xlu0 %6188 }
 0x75e   : > { %20012 = vst [vmem:[#allocation114_spill] sm:$0xff] %v16964_v59 }
 0x760   : > { %v16968_v56 = vpop.permute.xlu1 %6086 }
 0x761   : > { %20013 = vst [vmem:[#allocation115_spill] sm:$0xff] %v16968_v56  ;;  %v16970_v27 = vpop.permute.xlu0 %6239 }
 0x762   : > { %20014 = vst [vmem:[#allocation116_spill] sm:$0xff] %v16970_v27 }
 0x764   : > { %v16972_v38 = vpop.permute.xlu1 %6190 }
 0x765   : > { %20015 = vst [vmem:[#allocation117_spill] sm:$0xff] %v16972_v38  ;;  %v16976_v53 = vpop.permute.xlu0 %6290  ;;  %v4581_v38 = vsel %vm2531_vm4, %v16812_v1, -inf }
 0x766   : > { %20016 = vst [vmem:[#allocation118_spill] sm:$0xff] %v16976_v53 }
 0x768   : > { %v16978_v6 = vpop.permute.xlu1 %6241 }
 0x769   : > { %6751 = vrot.lane.b32.xlu1 %v15995_v19, %s15066_s6  ;;  %20017 = vst [vmem:[#allocation119_spill] sm:$0xff] %v16978_v6  ;;  %v16980_v57 = vpop.permute.xlu0 %6341 }
 0x76a   : > { %20018 = vst [vmem:[#allocation120_spill] sm:$0xff] %v16980_v57 }
 0x76c   : > { %v16982_v54 = vpop.permute.xlu1 %6292 }
 0x76d   : > { %20019 = vst [vmem:[#allocation121_spill] sm:$0xff] %v16982_v54  ;;  %v16984_v59 = vpop.permute.xlu0 %6392 }
 0x76e   : > { %20020 = vst [vmem:[#allocation122_spill] sm:$0xff] %v16984_v59 }
 0x770   : > { %v16986_v19 = vpop.permute.xlu1 %6343 }
 0x771   : > { %20021 = vst [vmem:[#allocation123_spill] sm:$0xff] %v16986_v19  ;;  %v16988_v28 = vpop.permute.xlu0 %6443 }
 0x772   : > { %6698 = vrot.lane.b32.xlu0 %v19949_v25, %s15066_s6  ;;  %20022 = vst [vmem:[#allocation124_spill] sm:$0xff] %v16988_v28 }
 0x774   : > { %v16990_v27 = vpop.permute.xlu1 %6394 }
 0x775   : > { %20023 = vst [vmem:[#allocation125_spill] sm:$0xff] %v16990_v27  ;;  %v16994_v25 = vpop.permute.xlu0 %6496 }
 0x776   : > { %20024 = vst [vmem:[#allocation126_spill] sm:$0xff] %v16994_v25 }
 0x778   : > { %v16996_v53 = vpop.permute.xlu1 %6445 }
 0x779   : > { %20025 = vst [vmem:[#allocation127_spill] sm:$0xff] %v16996_v53  ;;  %v16998_v6 = vpop.permute.xlu0 %6547 }
 0x77a   : > { %20026 = vst [vmem:[#allocation128_spill] sm:$0xff] %v16998_v6 }
 0x77c   : > { %v17000_v57 = vpop.permute.xlu1 %6494 }
 0x77d   : > { %20027 = vst [vmem:[#allocation129_spill] sm:$0xff] %v17000_v57  ;;  %v17002_v54 = vpop.permute.xlu0 %6598 }
 0x77e   : > { %20028 = vst [vmem:[#allocation130_spill] sm:$0xff] %v17002_v54 }
 0x780   : > { %v17004_v59 = vpop.permute.xlu1 %6545 }
 0x781   : > { %20029 = vst [vmem:[#allocation131_spill] sm:$0xff] %v17004_v59  ;;  %v17006_v19 = vpop.permute.xlu0 %6596 }
 0x782   : > { %20030 = vst [vmem:[#allocation132_spill] sm:$0xff] %v17006_v19 }
 0x784   : > { %v17008_v28 = vpop.permute.xlu1 %6649 }
 0x785   : > { %20031 = vst [vmem:[#allocation133_spill] sm:$0xff] %v17008_v28  ;;  %v17010_v27 = vpop.permute.xlu0 %6647 }
 0x786   : > { %20032 = vst [vmem:[#allocation134_spill] sm:$0xff] %v17010_v27 }
 0x788   : > { %v17012_v56 = vpop.permute.xlu1 %6700 }
 0x789   : > { %20033 = vst [vmem:[#allocation135_spill] sm:$0xff] %v17012_v56 }
 0x78d   : > { %4582 = vmax.xlane.f32.xlu1 %v4581_v38 }
 0x7a9   : > { %v4490_v25 = vpop.xlane.xlu0 %4489 }
 0x7aa   : > { %v4584_v38 = vsub.f32 %v16850_v10, %v4490_v25 }
 0x7ab   : > { %v4493_v53 = vpop.xlane.xlu1 %4492 }
 0x7ac   : > { %v4616_v3 = vmul.f32 1.442695, %v4584_v38  ;;  %v4585_v6 = vsub.f32 %v16854_v60, %v4493_v53 }
 0x7ad   : > { %v4496_v57 = vpop.xlane.xlu0 %4495 }
 0x7ae   : > { %14380 = vpow2.f32 %v4616_v3  ;;  %v4618_v54 = vmul.f32 1.442695, %v4585_v6  ;;  %v4586_v59 = vsub.f32 %v16770_v44, %v4496_v57 }
 0x7b0   : > { %14382 = vpow2.f32 %v4618_v54  ;;  %v4620_v19 = vmul.f32 1.442695, %v4586_v59 }
 0x7b1   : > { %v4502_v22 = vpop.xlane.xlu1 %4501  ;;  %v4508_v56 = vpop.xlane.xlu0 %4507 }
 0x7b2   : > { %14384 = vpow2.f32 %v4620_v19  ;;  %v4588_v27 = vsub.f32 %v16860_v9, %v4502_v22  ;;  %v4590_v60 = vsub.f32 %v16774_v58, %v4508_v56 }
 0x7b4   : > { %v4624_v28 = vmul.f32 1.442695, %v4588_v27  ;;  %v4628_v44 = vmul.f32 1.442695, %v4590_v60 }
 0x7b5   : > { %v4499_v36 = vpop.xlane.xlu1 %4498 }
 0x7b6   : > { %14386 = vpow2.f32 %v4624_v28  ;;  %v4587_v25 = vsub.f32 %v16772_v50, %v4499_v36 }
 0x7b8   : > { %v17019_v10 = vpop.eup %14380  ;;  %v4622_v3 = vmul.f32 1.442695, %v4587_v25 }
 0x7b9   : > { %v4505_v6 = vpop.xlane.xlu1 %4504  ;;  %v4514_v53 = vpop.xlane.xlu0 %4513  ;;  %v4680_v59 = vsel %vm2531_vm4, %v17019_v10, 0.0 }
 0x7ba   : > { %v17024_v57 = vpop.eup %14382  ;;  %14388 = vpow2.f32 %v4622_v3  ;;  %v4589_v19 = vsub.f32 %v16866_v45, %v4505_v6  ;;  %v4592_v22 = vsub.f32 %v16870_v7, %v4514_v53  ;;  %4681 = vadd.xlane.f32.xlu1 %v4680_v59 }
 0x7bb   : > { %v4683_v36 = vsel %vm2531_vm4, %v17024_v57, 0.0 }
 0x7bc   : > { %v17030_v54 = vpop.eup %14384  ;;  %v4626_v50 = vmul.f32 1.442695, %v4589_v19  ;;  %v4632_v58 = vmul.f32 1.442695, %v4592_v22  ;;  %4684 = vadd.xlane.f32.xlu0 %v4683_v36 }
 0x7bd   : > { %v4517_v9 = vpop.xlane.xlu1 %4516  ;;  %v4511_v28 = vpop.xlane.xlu0 %4510  ;;  %v4686_v7 = vsel %vm2531_vm4, %v17030_v54, 0.0 }
 0x7be   : > { %14390 = vpow2.f32 %v4626_v50  ;;  %v4593_v56 = vsub.f32 %v16876_v35, %v4517_v9  ;;  %v4591_v27 = vsub.f32 %v16776_v39, %v4511_v28 }
 0x7bf   : > { %14392 = vpow2.f32 %v4632_v58 }
 0x7c0   : > { %v17036_v45 = vpop.eup %14386  ;;  %14394 = vpow2.f32 %v4628_v44  ;;  %v4634_v38 = vmul.f32 1.442695, %v4593_v56  ;;  %v4630_v25 = vmul.f32 1.442695, %v4591_v27  ;;  %4687 = vadd.xlane.f32.xlu0 %v4686_v7 }
 0x7c1   : > { %v4520_v60 = vpop.xlane.xlu0 %4519  ;;  %v4523_v3 = vpop.xlane.xlu1 %4522  ;;  %v4692_v6 = vsel %vm2531_vm4, %v17036_v45, 0.0 }
 0x7c2   : > { %v4594_v53 = vsub.f32 %v16778_v5, %v4520_v60  ;;  %4693 = vadd.xlane.f32.xlu1 %v4692_v6  ;;  %14396 = vpow2.f32 %v4630_v25  ;;  %v4595_v35 = vsub.f32 %v16780_v31, %v4523_v3 }
 0x7c3   : > { %14398 = vpow2.f32 %v4634_v38 }
 0x7c4   : > { %v17042_v39 = vpop.eup %14388  ;;  %v4636_v59 = vmul.f32 1.442695, %v4594_v53  ;;  %v4638_v58 = vmul.f32 1.442695, %v4595_v35 }
 0x7c5   : > { %v4526_v19 = vpop.xlane.xlu0 %4525  ;;  %v4529_v22 = vpop.xlane.xlu1 %4528  ;;  %v4689_v36 = vsel %vm2531_vm4, %v17042_v39, 0.0 }
 0x7c6   : > { %v4596_v44 = vsub.f32 %v16882_v2, %v4526_v19  ;;  %v4597_v50 = vsub.f32 %v16888_v42, %v4529_v22  ;;  %4690 = vadd.xlane.f32.xlu1 %v4689_v36  ;;  %14400 = vpow2.f32 %v4636_v59 }
 0x7c8   : > { %v17048_v5 = vpop.eup %14390  ;;  %v4640_v9 = vmul.f32 1.442695, %v4596_v44  ;;  %v4642_v31 = vmul.f32 1.442695, %v4597_v50 }
 0x7c9   : > { %v17050_v28 = vpop.eup %14392  ;;  %v4532_v56 = vpop.xlane.xlu0 %4531  ;;  %v4695_v7 = vsel %vm2531_vm4, %v17048_v5, 0.0 }
 0x7ca   : > { %20034 = vst [vmem:[#allocation136_spill] sm:$0xff] %v17050_v28  ;;  %v4535_v27 = vpop.xlane.xlu1 %4534  ;;  %v17054_v38 = vpop.eup %14394  ;;  %14402 = vpow2.f32 %v4640_v9  ;;  %v4598_v2 = vsub.f32 %v16782_v29, %v4532_v56  ;;  %4696 = vadd.xlane.f32.xlu0 %v4695_v7  ;;  %v4704_v25 = vsel %vm2531_vm4, %v17050_v28, 0.0 }
 0x7cb   : > { %v4599_v42 = vsub.f32 %v16784_v32, %v4535_v27  ;;  %14404 = vpow2.f32 %v4638_v58  ;;  %4705 = vadd.xlane.f32.xlu1 %v4704_v25  ;;  %v4698_v29 = vsel %vm2531_vm4, %v17054_v38, 0.0 }
 0x7cc   : > { %14406 = vpow2.f32 %v4642_v31  ;;  %v4644_v60 = vmul.f32 1.442695, %v4598_v2  ;;  %v17060_v6 = vpop.eup %14396 }
 0x7cd   : > { %v4646_v3 = vmul.f32 1.442695, %v4599_v42  ;;  %v17062_v53 = vpop.xlane.xlu0 %4537  ;;  %v17068_v59 = vpop.eup %14398  ;;  %v4701_v32 = vsel %vm2531_vm4, %v17060_v6, 0.0 }
 0x7ce   : > { %v17064_v35 = vpop.xlane.xlu1 %4540  ;;  %4699 = vadd.xlane.f32.xlu0 %v4698_v29  ;;  %14408 = vpow2.f32 %v4644_v60  ;;  %v4707_v36 = vsel %vm2531_vm4, %v17068_v59, 0.0 }
 0x7cf   : > { %4702 = vadd.xlane.f32.xlu1 %v4701_v32  ;;  %14410 = vpow2.f32 %v4646_v3 }
 0x7d0   : > { %v17074_v44 = vpop.eup %14400 }
 0x7d1   : > { %v4544_v19 = vpop.xlane.xlu0 %4543  ;;  %v4710_v42 = vsel %vm2531_vm4, %v17074_v44, 0.0 }
 0x7d2   : > { %v4547_v22 = vpop.xlane.xlu1 %4546  ;;  %v4602_v50 = vsub.f32 %v16786_v40, %v4544_v19  ;;  %4708 = vadd.xlane.f32.xlu0 %v4707_v36 }
 0x7d3   : > { %v4603_v58 = vsub.f32 %v16788_v20, %v4547_v22 }
 0x7d4   : > { %v17078_v9 = vpop.eup %14402  ;;  %v4652_v31 = vmul.f32 1.442695, %v4602_v50 }
 0x7d5   : > { %20035 = vst [vmem:[#allocation137_spill] sm:$0xff] %v17078_v9  ;;  %v4654_v56 = vmul.f32 1.442695, %v4603_v58  ;;  %v17080_v27 = vpop.eup %14404  ;;  %v17082_v7 = vpop.xlane.xlu0 %4549  ;;  %v4716_v25 = vsel %vm2531_vm4, %v17078_v9, 0.0 }
 0x7d6   : > { %v17084_v2 = vpop.xlane.xlu1 %4552  ;;  %v17090_v40 = vpop.eup %14406  ;;  %14412 = vpow2.f32 %v4652_v31  ;;  %4711 = vadd.xlane.f32.xlu0 %v4710_v42  ;;  %4717 = vadd.xlane.f32.xlu1 %v4716_v25  ;;  %v4713_v32 = vsel %vm2531_vm4, %v17080_v27, 0.0 }
 0x7d7   : > { %20036 = vst [vmem:[#allocation138_spill] sm:$0xff] %v17090_v40  ;;  %14414 = vpow2.f32 %v4654_v56  ;;  %v4719_v29 = vsel %vm2531_vm4, %v17090_v40, 0.0 }
 0x7d8   : > { %v17092_v20 = vpop.eup %14408 }
 0x7d9   : > { %v4556_v60 = vpop.xlane.xlu0 %4555  ;;  %v17098_v19 = vpop.eup %14410  ;;  %v4722_v42 = vsel %vm2531_vm4, %v17092_v20, 0.0 }
 0x7da   : > { %v4559_v3 = vpop.xlane.xlu1 %4558  ;;  %v4606_v22 = vsub.f32 %v16790_v26, %v4556_v60  ;;  %4720 = vadd.xlane.f32.xlu0 %v4719_v29  ;;  %4714 = vadd.xlane.f32.xlu1 %v4713_v32  ;;  %v4725_v25 = vsel %vm2531_vm4, %v17098_v19, 0.0 }
 0x7db   : > { %v4607_v36 = vsub.f32 %v16792_v46, %v4559_v3 }
 0x7dc   : > { %v4660_v50 = vmul.f32 1.442695, %v4606_v22 }
 0x7dd   : > { %v4662_v58 = vmul.f32 1.442695, %v4607_v36  ;;  %v17102_v31 = vpop.xlane.xlu0 %4561 }
 0x7de   : > { %v17104_v56 = vpop.xlane.xlu1 %4564  ;;  %14416 = vpow2.f32 %v4660_v50  ;;  %4723 = vadd.xlane.f32.xlu0 %v4722_v42  ;;  %4726 = vadd.xlane.f32.xlu1 %v4725_v25 }
 0x7df   : > { %14418 = vpow2.f32 %v4662_v58 }
 0x7e0   : > { %v17110_v26 = vpop.eup %14412 }
 0x7e1   : > { %v4568_v46 = vpop.xlane.xlu0 %4567  ;;  %v4734_v3 = vsel %vm2531_vm4, %v17110_v26, 0.0  ;;  %v17114_v29 = vpop.eup %14414 }
 0x7e2   : > { %v4571_v60 = vpop.xlane.xlu1 %4570  ;;  %v4610_v32 = vsub.f32 %v16800_v14, %v4568_v46  ;;  %4735 = vadd.xlane.f32.xlu1 %v4734_v3  ;;  %v4737_v58 = vsel %vm2531_vm4, %v17114_v29, 0.0 }
 0x7e3   : > { %v4611_v22 = vsub.f32 %v16802_v30, %v4571_v60 }
 0x7e4   : > { %v4668_v36 = vmul.f32 1.442695, %v4610_v32 }
 0x7e5   : > { %v4670_v9 = vmul.f32 1.442695, %v4611_v22  ;;  %v17118_v50 = vpop.xlane.xlu0 %4573 }
 0x7e6   : > { %14420 = vpow2.f32 %v4668_v36  ;;  %4738 = vadd.xlane.f32.xlu1 %v4737_v58  ;;  %v17145_v36 = vpop.xlane.xlu1 %4576 }
 0x7e7   : > { %14422 = vpow2.f32 %v4670_v9 }
 0x7e8   : > { %v17122_v42 = vpop.eup %14416 }
 0x7e9   : > { %v17124_v25 = vpop.eup %14418  ;;  %v4580_v40 = vpop.xlane.xlu0 %4579  ;;  %v4746_v14 = vsel %vm2531_vm4, %v17122_v42, 0.0 }
 0x7ea   : > { %v4614_v30 = vsub.f32 %v16810_v48, %v4580_v40  ;;  %4747 = vadd.xlane.f32.xlu0 %v4746_v14  ;;  %v4749_v46 = vsel %vm2531_vm4, %v17124_v25, 0.0  ;;  %v17149_v58 = vpop.permute.xlu1 %6751  ;;  %v4600_v14 = vsub.f32 %v16894_v47, %v17062_v53  ;;  %v20039_v47 = vld [vmem:[#allocation43_spill] sm:$0xff]  ;;  %v4601_v53 = vsub.f32 %v16900_v23, %v17064_v35 }
 0x7eb   : > { %4750 = vadd.xlane.f32.xlu1 %v4749_v46  ;;  %20037 = vst [vmem:[#allocation139_spill] sm:$0xff] %v17149_v58 }
 0x7ec   : > { %v4676_v60 = vmul.f32 1.442695, %v4614_v30 }
 0x7ee   : > { %14424 = vpow2.f32 %v4676_v60  ;;  %v4648_v60 = vmul.f32 1.442695, %v4600_v14 }
 0x7f0   : > { %v17131_v3 = vpop.eup %14420 }
 0x7f1   : > { %v4758_v9 = vsel %vm2531_vm4, %v17131_v3, 0.0  ;;  %v17135_v32 = vpop.eup %14422 }
 0x7f2   : > { %4759 = vadd.xlane.f32.xlu1 %v4758_v9  ;;  %v4761_v22 = vsel %vm2531_vm4, %v17135_v32, 0.0 }
 0x7f6   : > { %4762 = vadd.xlane.f32.xlu1 %v4761_v22 }
 0x7f8   : > { %v17139_v48 = vpop.eup %14424 }
 0x7f9   : > { %v4770_v40 = vsel %vm2531_vm4, %v17139_v48, 0.0 }
 0x7fa   : > { %4771 = vadd.xlane.f32.xlu0 %v4770_v40 }
 0x807   : > { %6802 = vrot.lane.b32.xlu1 %v19948_v15, %s15066_s6 }
 0x810   : > { %6749 = vrot.lane.b32.xlu0 %v15993_v17, %s15066_s6 }
 0x81a   : > { %v4583_v30 = vpop.xlane.xlu1 %4582 }
 0x81b   : > { %v4615_v46 = vsub.f32 %v16812_v1, %v4583_v30  ;;  %v17164_v1 = vpop.permute.xlu0 %6698 }
 0x81c   : > { %20040 = vst [vmem:[#allocation141_spill] sm:$0xff] %v17164_v1 }
 0x81d   : > { %v4678_v9 = vmul.f32 1.442695, %v4615_v46  ;;  %v4650_v46 = vmul.f32 1.442695, %v4601_v53 }
 0x81f   : > { %14426 = vpow2.f32 %v4678_v9  ;;  %v4605_v9 = vsub.f32 %v16914_v41, %v17084_v2 }
 0x820   : > { %14428 = vpow2.f32 %v4648_v60 }
 0x821   : > { %14430 = vpow2.f32 %v4650_v46 }
 0x829   : > { %v17154_v22 = vpop.eup %14426 }
 0x82a   : > { %v4773_v40 = vsel %vm2531_vm4, %v17154_v22, 0.0  ;;  %v17158_v15 = vpop.eup %14428 }
 0x82b   : > { %20038 = vst [vmem:[#allocation140_spill] sm:$0xff] %v17158_v15  ;;  %4774 = vadd.xlane.f32.xlu1 %v4773_v40  ;;  %v4728_v17 = vsel %vm2531_vm4, %v17158_v15, 0.0  ;;  %v17184_v15 = vpop.eup %14430 }
 0x82f   : > { %4729 = vadd.xlane.f32.xlu0 %v4728_v17 }
 0x83c   : > { %4857 = vrot.lane.b32.xlu1 %v20039_v47, %s15065_s2 }
 0x845   : > { %6800 = vrot.lane.b32.xlu0 %v19951_v33, %s15066_s6  ;;  %v4658_v33 = vmul.f32 1.442695, %v4605_v9 }
 0x847   : > { %v17174_v30 = vpop.xlane.xlu1 %4681 }
 0x849   : > { %4953 = vrot.lane.b32.xlu0 %v19973_v16, %s15065_s2  ;;  %v17172_v14 = vpop.xlane.xlu0 %4684 }
 0x84d   : > { %v4688_v17 = vpop.xlane.xlu0 %4687 }
 0x84e   : > { %14432 = vrcp.f32 %v4688_v17  ;;  %v4731_v17 = vsel %vm2531_vm4, %v17184_v15, 0.0 }
 0x84f   : > { %v17176_v60 = vpop.xlane.xlu1 %4693 }
 0x853   : > { %v4691_v40 = vpop.xlane.xlu1 %4690 }
 0x854   : > { %14434 = vrcp.f32 %v4691_v40 }
 0x855   : > { %14436 = vpow2.f32 %v4658_v33 }
 0x857   : > { %v17180_v23 = vpop.xlane.xlu0 %4696 }
 0x858   : > { %v17182_v35 = vpop.xlane.xlu1 %4705  ;;  %v14433_v53 = vpop.eup %14432 }
 0x859   : > { %v4810_v28 = vmul.f32 %v14433_v53, %v17030_v54 }
 0x85b   : > { %v4700_v1 = vpop.xlane.xlu0 %4699 }
 0x85c   : > { %14438 = vrcp.f32 %v4700_v1  ;;  %v4703_v58 = vpop.xlane.xlu1 %4702 }
 0x85d   : > { %14440 = vrcp.f32 %v4703_v58 }
 0x85e   : > { %v14435_v46 = vpop.eup %14434 }
 0x85f   : > { %v4811_v41 = vmul.f32 %v14435_v46, %v17042_v39  ;;  %v17188_v2 = vpop.xlane.xlu0 %4708  ;;  %v17195_v1 = vpop.eup %14436 }
 0x860   : > { %4732 = vadd.xlane.f32.xlu1 %v4731_v17  ;;  %v4743_v46 = vsel %vm2531_vm4, %v17195_v1, 0.0 }
 0x861   : > { %v4841_v9 = vpack.c.bf16 %v4811_v41, %v4810_v28 }
 0x863   : > { %v4712_v33 = vpop.xlane.xlu0 %4711  ;;  %13252 = vmatmul.mubr.msk.bf16.vlgmr.msra.gmra.mrb[144].mxu1 %vm2531_vm4, %v4841_v9  ;;  %v17193_v40 = vpop.xlane.xlu1 %4717 }
 0x864   : > { %13262 = vmatpush3.bf16.msra.mxu1 %v16952_v18  ;;  %13263 = vmatprep.mubr.msk.bf16.mxu1 %vm15064_vm2, %v19925_v24  ;;  %14442 = vrcp.f32 %v4712_v33 }
 0x865   : > { %13273 = vmatprep.subr.bf16.mxu1 %v19925_v24 }
 0x866   : > { %v14439_v54 = vpop.eup %14438 }
 0x867   : > { %v14441_v39 = vpop.eup %14440  ;;  %v4814_v58 = vmul.f32 %v14439_v54, %v17054_v38  ;;  %v17202_v28 = vpop.xlane.xlu0 %4720 }
 0x868   : > { %v4715_v53 = vpop.xlane.xlu1 %4714  ;;  %v4815_v41 = vmul.f32 %v14441_v39, %v17060_v6  ;;  %4744 = vadd.xlane.f32.xlu0 %v4743_v46 }
 0x869   : > { %14444 = vrcp.f32 %v4715_v53 }
 0x86a   : > { %v4843_v18 = vpack.c.bf16 %v4815_v41, %v4814_v58 }
 0x86b   : > { %v4724_v17 = vpop.xlane.xlu0 %4723 }
 0x86c   : > { %v4727_v9 = vpop.xlane.xlu1 %4726  ;;  %14446 = vrcp.f32 %v4724_v17  ;;  %13264 = vmatmul.mubr.msk.bf16.vlgmr.msra.gmra.mrb[148].mxu1 %vm2531_vm4, %v4843_v18 }
 0x86d   : > { %13274 = vmatpush3.bf16.msra.mxu1 %v16902_v34  ;;  %14448 = vrcp.f32 %v4727_v9  ;;  %13275 = vmatprep.mubr.msk.bf16.mxu1 %vm15064_vm2, %v19925_v24 }
 0x86e   : > { %13285 = vmatprep.subr.bf16.mxu1 %v19925_v24  ;;  %v14443_v33 = vpop.eup %14442 }
 0x86f   : > { %v4818_v39 = vmul.f32 %v14443_v33, %v17074_v44 }
 0x870   : > { %v4736_v38 = vpop.xlane.xlu1 %4735 }
 0x871   : > { %6853 = vrot.lane.b32.xlu1 %v16025_v0, %s15066_s6 }
 0x873   : > { %v14445_v6 = vpop.eup %14444 }
 0x874   : > { %v4739_v54 = vpop.xlane.xlu1 %4738  ;;  %v4819_v58 = vmul.f32 %v14445_v6, %v17080_v27  ;;  %v4604_v27 = vsub.f32 %v16908_v49, %v17082_v7 }
 0x875   : > { %14450 = vrcp.f32 %v4739_v54 }
 0x876   : > { %v14447_v53 = vpop.eup %14446  ;;  %v4845_v34 = vpack.c.bf16 %v4819_v58, %v4818_v39  ;;  %14452 = vrcp.f32 %v4736_v38  ;;  %v4609_v58 = vsub.f32 %v16930_v8, %v17104_v56 }
 0x877   : > { %v14449_v46 = vpop.eup %14448  ;;  %v4748_v41 = vpop.xlane.xlu0 %4747  ;;  %v4822_v18 = vmul.f32 %v14447_v53, %v17092_v20  ;;  %v4656_v20 = vmul.f32 1.442695, %v4604_v27 }
 0x878   : > { %13276 = vmatmul.mubr.msk.bf16.vlgmr.msra.gmra.mrb[152].mxu1 %vm2531_vm4, %v4845_v34  ;;  %v4823_v17 = vmul.f32 %v14449_v46, %v17098_v19  ;;  %v4751_v44 = vpop.xlane.xlu1 %4750  ;;  %14454 = vrcp.f32 %v4748_v41 }
 0x879   : > { %13286 = vmatpush3.bf16.msra.mxu1 %v16958_v21  ;;  %13287 = vmatprep.mubr.msk.bf16.mxu1 %vm15064_vm2, %v19925_v24  ;;  %14456 = vrcp.f32 %v4751_v44 }
 0x87a   : > { %13297 = vmatprep.subr.bf16.mxu1 %v19925_v24  ;;  %v4847_v9 = vpack.c.bf16 %v4823_v17, %v4822_v18 }
 0x87e   : > { %6851 = vrot.lane.b32.xlu0 %v16023_v61, %s15066_s6 }
 0x87f   : > { %v14451_v21 = vpop.eup %14450  ;;  %v4760_v38 = vpop.xlane.xlu1 %4759 }
 0x880   : > { %13288 = vmatmul.mubr.msk.bf16.vlgmr.msra.gmra.mrb[156].mxu1 %vm2531_vm4, %v4847_v9  ;;  %v14453_v33 = vpop.eup %14452  ;;  %v4827_v19 = vmul.f32 %v14451_v21, %v17114_v29  ;;  %v4666_v29 = vmul.f32 1.442695, %v4609_v58 }
 0x881   : > { %13298 = vmatpush3.bf16.msra.mxu1 %v16916_v63  ;;  %13299 = vmatprep.mubr.msk.bf16.mxu1 %vm15064_vm2, %v19925_v24  ;;  %v4826_v7 = vmul.f32 %v14453_v33, %v17110_v26 }
 0x882   : > { %13309 = vmatprep.subr.bf16.mxu1 %v19925_v24  ;;  %v14455_v6 = vpop.eup %14454 }
 0x883   : > { %v4763_v49 = vpop.xlane.xlu1 %4762  ;;  %v4849_v54 = vpack.c.bf16 %v4827_v19, %v4826_v7  ;;  %v14457_v39 = vpop.eup %14456  ;;  %v4830_v63 = vmul.f32 %v14455_v6, %v17122_v42 }
 0x884   : > { %14458 = vrcp.f32 %v4763_v49  ;;  %v4831_v26 = vmul.f32 %v14457_v39, %v17124_v25 }
 0x885   : > { %14460 = vpow2.f32 %v4656_v20 }
 0x886   : > { %14462 = vrcp.f32 %v4760_v38  ;;  %v4851_v53 = vpack.c.bf16 %v4831_v26, %v4830_v63  ;;  %v20042_v26 = vld [vmem:[#allocation57_spill] sm:$0xff] }
 0x887   : > { %14464 = vpow2.f32 %v4666_v29  ;;  %v20043_v29 = vld [vmem:[#allocation112_spill] sm:$0xff] }
 0x888   : > { %13300 = vmatmul.mubr.msk.bf16.vlgmr.msra.gmra.mrb[160].mxu1 %vm2531_vm4, %v4849_v54  ;;  %14466 = vrcp.f32 %v17172_v14 }
 0x889   : > { %13310 = vmatpush3.bf16.msra.mxu1 %v16962_v4  ;;  %13311 = vmatprep.mubr.msk.bf16.mxu1 %vm15064_vm2, %v19925_v24  ;;  %14468 = vrcp.f32 %v17174_v30  ;;  %v4612_v30 = vsub.f32 %v16938_v51, %v17118_v50 }
 0x88a   : > { %13321 = vmatprep.subr.bf16.mxu1 %v19925_v24  ;;  %14470 = vrcp.f32 %v17180_v23 }
 0x88b   : > { %14472 = vrcp.f32 %v17176_v60  ;;  %v4613_v60 = vsub.f32 %v16944_v13, %v17145_v36 }
 0x88d   : > { %v4674_v38 = vmul.f32 1.442695, %v4613_v60  ;;  %v20055_v60 = vld [vmem:[#allocation118_spill] sm:$0xff] }
 0x88e   : > { %v14459_v34 = vpop.eup %14458 }
 0x88f   : > { %v17243_v46 = vpop.eup %14460  ;;  %v4835_v4 = vmul.f32 %v14459_v34, %v17135_v32  ;;  %v17271_v32 = vpop.permute.xlu1 %6802  ;;  %v20044_v34 = vld [vmem:[#allocation115_spill] sm:$0xff] }
 0x890   : > { %13312 = vmatmul.mubr.msk.bf16.vlgmr.msra.gmra.mrb[164].mxu1 %vm2531_vm4, %v4851_v53  ;;  %v14463_v8 = vpop.eup %14462  ;;  %v4740_v42 = vsel %vm2531_vm4, %v17243_v46, 0.0  ;;  %v6145_v53 = vsel %vm1778_vm3, %v20043_v29, 0  ;;  %v20069_v29 = vld [vmem:[#allocation131_spill] sm:$0xff] }
 0x891   : > { %13322 = vmatpush3.bf16.msra.mxu1 %v16924_v11  ;;  %13323 = vmatprep.mubr.msk.bf16.mxu1 %vm15064_vm2, %v19925_v24  ;;  %v4834_v56 = vmul.f32 %v14463_v8, %v17131_v3  ;;  %v17255_v41 = vpop.eup %14464  ;;  %v4772_v3 = vpop.xlane.xlu0 %4771 }
 0x892   : > { %13333 = vmatprep.subr.bf16.mxu1 %v19925_v24  ;;  %v4755_v11 = vsel %vm2531_vm4, %v17255_v41, 0.0  ;;  %v14467_v18 = vpop.eup %14466  ;;  %14474 = vrcp.f32 %v4772_v3  ;;  %v20048_v3 = vld [vmem:[#allocation114_spill] sm:$0xff] }
 0x893   : > { %v4853_v25 = vpack.c.bf16 %v4835_v4, %v4834_v56  ;;  %v14469_v27 = vpop.eup %14468  ;;  %v20045_v4 = vld [vmem:[#allocation117_spill] sm:$0xff] }
 0x894   : > { %v4808_v23 = vmul.f32 %v14469_v27, %v17019_v10  ;;  %v14471_v21 = vpop.eup %14470  ;;  %v6196_v56 = vsel %vm1778_vm3, %v20045_v4, 0  ;;  %v20053_v27 = vld [vmem:[#allocation46_spill] sm:$0xff]  ;;  %v20071_v4 = vld [vmem:[#allocation132_spill] sm:$0xff] }
 0x895   : > { %4741 = vadd.xlane.f32.xlu1 %v4740_v42  ;;  %v17279_v17 = vpop.permute.xlu0 %6749  ;;  %v4813_v10 = vmul.f32 %v14471_v21, %v17048_v5  ;;  %v20041_v5 = vld [vmem:[#allocation111_spill] sm:$0xff]  ;;  %v20046_v42 = vld [vmem:[#allocation113_spill] sm:$0xff] }
 0x896   : > { %v6094_v58 = vsel %vm1778_vm3, %v20041_v5, 0  ;;  %v20067_v5 = vld [vmem:[#allocation129_spill] sm:$0xff] }
 0x898   : > { %13324 = vmatmul.mubr.msk.bf16.vlgmr.msra.gmra.mrb[168].mxu1 %vm2531_vm4, %v4853_v25  ;;  %v20047_v25 = vld [vmem:[#allocation119_spill] sm:$0xff] }
 0x899   : > { %13334 = vmatpush3.bf16.msra.mxu1 %v16936_v43  ;;  %13335 = vmatprep.mubr.msk.bf16.mxu1 %vm15064_vm2, %v19925_v24  ;;  %v4608_v43 = vsub.f32 %v16922_v52, %v17102_v31  ;;  %v4809_v52 = vmul.f32 %v14467_v18, %v17024_v57  ;;  %v4672_v31 = vmul.f32 1.442695, %v4612_v30  ;;  %v14473_v57 = vpop.eup %14472  ;;  %v20050_v18 = vld [vmem:[#allocation121_spill] sm:$0xff]  ;;  %v20051_v30 = vld [vmem:[#allocation116_spill] sm:$0xff] }
 0x89a   : > { %13411 = vmatprep.subr.bf16.mxu1 %v19925_v24  ;;  %v4812_v20 = vmul.f32 %v14473_v57, %v17036_v45  ;;  %v20059_v57 = vld [vmem:[#allocation120_spill] sm:$0xff] }
 0x89b   : > { %v4664_v14 = vmul.f32 1.442695, %v4608_v43  ;;  %v4840_v50 = vpack.c.bf16 %v4809_v52, %v4808_v23  ;;  %v20049_v43 = vld [vmem:[#allocation69_spill] sm:$0xff]  ;;  %v20054_v52 = vld [vmem:[#allocation123_spill] sm:$0xff] }
 0x89c   : > { %v14475_v13 = vpop.eup %14474  ;;  %v4842_v54 = vpack.c.bf16 %v4813_v10, %v4812_v20  ;;  %v20056_v23 = vld [vmem:[#allocation49_spill] sm:$0xff]  ;;  %v20063_v20 = vld [vmem:[#allocation60_spill] sm:$0xff] }
 0x89d   : > { %4756 = vadd.xlane.f32.xlu0 %v4755_v11  ;;  %v4838_v19 = vmul.f32 %v14475_v13, %v17139_v48  ;;  %v6247_v11 = vsel %vm1778_vm3, %v20047_v25, 0  ;;  %v20061_v13 = vld [vmem:[#allocation127_spill] sm:$0xff]  ;;  %v20072_v25 = vld [vmem:[#allocation136_spill] sm:$0xff] }
 0x89e   : > { %v6451_v10 = vsel %vm1778_vm3, %v20061_v13, 0 }
 0x8a6   : > { %5049 = vrot.lane.b32.xlu1 %v19975_v12, %s15065_s2 }
 0x8b3   : > { %5145 = vrot.lane.b32.xlu0 %v19976_v37, %s15065_s2 }
 0x8b7   : > { %5337 = vrot.lane.b32.xlu0 %v19978_v62, %s15065_s2 }
 0x8b8   : > { %v4775_v44 = vpop.xlane.xlu1 %4774 }
 0x8b9   : > { %14476 = vrcp.f32 %v4775_v44  ;;  %v20052_v44 = vld [vmem:[#allocation42_spill] sm:$0xff] }
 0x8ba   : > { %14478 = vpow2.f32 %v4664_v14  ;;  %v6298_v14 = vsel %vm1778_vm3, %v20050_v18, 0 }
 0x8bb   : > { %5433 = vrot.lane.b32.xlu0 %v19981_v55, %s15065_s2  ;;  %14480 = vpow2.f32 %v4672_v31  ;;  %v6349_v31 = vsel %vm1778_vm3, %v20054_v52, 0 }
 0x8bc   : > { %v17287_v9 = vpop.xlane.xlu0 %4729  ;;  %v4858_v51 = vpop.permute.xlu1 %4857  ;;  %14482 = vpow2.f32 %v4674_v38  ;;  %v20060_v38 = vld [vmem:[#allocation56_spill] sm:$0xff] }
 0x8bd   : > { %13244 = vmatpush3.bf16.msra.mxu0 %v4858_v51  ;;  %v20057_v51 = vld [vmem:[#allocation52_spill] sm:$0xff]  ;;  %14484 = vrcp.f32 %v17188_v2  ;;  %v20070_v2 = vld [vmem:[#allocation133_spill] sm:$0xff] }
 0x8be   : > { %13255 = vmatprep.subr.bf16.mxu0 %v19925_v24  ;;  %14486 = vrcp.f32 %v17182_v35 }
 0x8bf   : > { %7270 = vrot.lane.b32.xlu0 %v20039_v47, %s15066_s6  ;;  %14488 = vrcp.f32 %v17202_v28 }
 0x8c0   : > { %v17292_v33 = vpop.permute.xlu0 %6800  ;;  %13246 = vmatmul.mubr.msk.bf16.vlgmr.msra.gmra.mrb[144].mxu0 %vm2531_vm4, %v4840_v50  ;;  %v20058_v50 = vld [vmem:[#allocation125_spill] sm:$0xff]  ;;  %14490 = vrcp.f32 %v17193_v40  ;;  %v20074_v40 = vld [vmem:[#allocation134_spill] sm:$0xff] }
 0x8c1   : > { %13257 = vmatprep.mubr.msk.bf16.mxu0 %vm15064_vm2, %v19925_v24  ;;  %v6400_v21 = vsel %vm1778_vm3, %v20058_v50, 0  ;;  %v20075_v50 = vld [vmem:[#allocation138_spill] sm:$0xff] }
 0x8c3   : > { %v14477_v36 = vpop.eup %14476  ;;  %7364 = vrot.lane.b32.xlu0 %v19973_v16, %s15066_s6 }
 0x8c4   : > { %v4839_v49 = vmul.f32 %v14477_v36, %v17154_v22  ;;  %v4954_v7 = vpop.permute.xlu0 %4953  ;;  %v17303_v6 = vpop.eup %14478  ;;  %v20062_v36 = vld [vmem:[#allocation122_spill] sm:$0xff] }
 0x8c5   : > { %13256 = vmatpush3.bf16.msra.mxu0 %v4954_v7  ;;  %v4752_v45 = vsel %vm2531_vm4, %v17303_v6, 0.0  ;;  %v17316_v48 = vpop.eup %14480  ;;  %v20065_v7 = vld [vmem:[#allocation124_spill] sm:$0xff] }
 0x8c6   : > { %v4855_v39 = vpack.c.bf16 %v4839_v49, %v4838_v19  ;;  %13267 = vmatprep.subr.bf16.mxu0 %v19925_v24  ;;  %v4764_v22 = vsel %vm2531_vm4, %v17316_v48, 0.0  ;;  %v17325_v63 = vpop.eup %14482  ;;  %v20064_v19 = vld [vmem:[#allocation126_spill] sm:$0xff] }
 0x8c7   : > { %7458 = vrot.lane.b32.xlu0 %v19975_v12, %s15066_s6  ;;  %v4767_v8 = vsel %vm2531_vm4, %v17325_v63, 0.0  ;;  %v6502_v49 = vsel %vm1778_vm3, %v20064_v19, 0 }
 0x8c8   : > { %13258 = vmatmul.mubr.msk.bf16.vlgmr.msra.gmra.mrb[148].mxu0 %vm2531_vm4, %v4842_v54  ;;  %13336 = vmatmul.mubr.msk.bf16.vlgmr.msra.gmra.mrb[172].mxu1 %vm2531_vm4, %v4855_v39  ;;  %v20066_v54 = vld [vmem:[#allocation128_spill] sm:$0xff] }
 0x8c9   : > { %13412 = vmatpush3.bf16.xpose.msra.mxu1 %v6094_v58  ;;  %13413 = vmatprep.mubr.msk.bf16.mxu1 %vm15064_vm2, %v19925_v24  ;;  %v6553_v39 = vsel %vm1778_vm3, %v20066_v54, 0  ;;  %v20068_v58 = vld [vmem:[#allocation130_spill] sm:$0xff] }
 0x8ca   : > { %4753 = vadd.xlane.f32.xlu1 %v4752_v45  ;;  %13417 = vmatprep.subr.bf16.mxu1 %v19925_v24  ;;  %v6604_v45 = vsel %vm1778_vm3, %v20068_v58, 0 }
 0x8cb   : > { %7552 = vrot.lane.b32.xlu0 %v19976_v37, %s15066_s6  ;;  %13269 = vmatprep.mubr.msk.bf16.mxu0 %vm15064_vm2, %v19925_v24 }
 0x8ce   : > { %4765 = vadd.xlane.f32.xlu1 %v4764_v22 }
 0x8cf   : > { %7646 = vrot.lane.b32.xlu0 %v20042_v26, %s15066_s6 }
 0x8d0   : > { %13414 = vmatmul.mubr.msk.bf16.vlgmr.msra.gmra.mrb[176].mxu1 %vm1778_vm3, %v20044_v34  ;;  %v6655_v34 = vsel %vm1778_vm3, %v20070_v2, 0 }
 0x8d1   : > { %13418 = vmatpush3.bf16.xpose.msra.mxu1 %v6145_v53  ;;  %13419 = vmatprep.mubr.msk.bf16.mxu1 %vm15064_vm2, %v19925_v24 }
 0x8d2   : > { %4768 = vadd.xlane.f32.xlu1 %v4767_v8  ;;  %13423 = vmatprep.subr.bf16.mxu1 %v19925_v24 }
 0x8d8   : > { %13420 = vmatmul.mubr.msk.bf16.vlgmr.msra.gmra.mrb[180].mxu1 %vm1778_vm3, %v20046_v42 }
 0x8d9   : > { %13424 = vmatpush3.bf16.xpose.msra.mxu1 %v6196_v56  ;;  %13425 = vmatprep.mubr.msk.bf16.mxu1 %vm15064_vm2, %v19925_v24  ;;  %v14485_v56 = vpop.eup %14484 }
 0x8da   : > { %13429 = vmatprep.subr.bf16.mxu1 %v19925_v24  ;;  %v14487_v28 = vpop.eup %14486  ;;  %v4817_v42 = vmul.f32 %v14485_v56, %v17068_v59 }
 0x8e0   : > { %13426 = vmatmul.mubr.msk.bf16.vlgmr.msra.gmra.mrb[184].mxu1 %vm1778_vm3, %v20048_v3 }
 0x8e1   : > { %13430 = vmatpush3.bf16.xpose.msra.mxu1 %v6247_v11  ;;  %13431 = vmatprep.mubr.msk.bf16.mxu1 %vm15064_vm2, %v19925_v24  ;;  %v4816_v11 = vmul.f32 %v14487_v28, %v20072_v25 }
 0x8e2   : > { %13435 = vmatprep.subr.bf16.mxu1 %v19925_v24 }
 0x8e3   : > { %5241 = vrot.lane.b32.xlu1 %v20042_v26, %s15065_s2  ;;  %v4844_v52 = vpack.c.bf16 %v4817_v42, %v4816_v11 }
 0x8e7   : > { %5529 = vrot.lane.b32.xlu1 %v20049_v43, %s15065_s2 }
 0x8e8   : > { %13432 = vmatmul.mubr.msk.bf16.vlgmr.msra.gmra.mrb[188].mxu1 %vm1778_vm3, %v20051_v30 }
 0x8e9   : > { %13436 = vmatpush3.bf16.xpose.msra.mxu1 %v6298_v14  ;;  %13437 = vmatprep.mubr.msk.bf16.mxu1 %vm15064_vm2, %v19925_v24  ;;  %v20073_v14 = vld [vmem:[#allocation135_spill] sm:$0xff] }
 0x8ea   : > { %13441 = vmatprep.subr.bf16.mxu1 %v19925_v24  ;;  %v6706_v30 = vsel %vm1778_vm3, %v20073_v14, 0 }
 0x8eb   : > { %7317 = vrot.lane.b32.xlu1 %v20052_v44, %s15066_s6 }
 0x8ed   : > { %v17415_v22 = vpop.xlane.xlu1 %4732 }
 0x8ee   : > { %14492 = vrcp.f32 %v17415_v22 }
 0x8ef   : > { %7411 = vrot.lane.b32.xlu1 %v20053_v27, %s15066_s6  ;;  %14494 = vrcp.f32 %v17287_v9 }
 0x8f0   : > { %13438 = vmatmul.mubr.msk.bf16.vlgmr.msra.gmra.mrb[192].mxu1 %vm1778_vm3, %v20055_v60 }
 0x8f1   : > { %13442 = vmatpush3.bf16.xpose.msra.mxu1 %v6349_v31  ;;  %13443 = vmatprep.mubr.msk.bf16.mxu1 %vm15064_vm2, %v19925_v24  ;;  %v6854_v53 = vpop.permute.xlu1 %6853  ;;  %v14489_v31 = vpop.eup %14488 }
 0x8f2   : > { %13447 = vmatprep.subr.bf16.mxu1 %v19925_v24  ;;  %v14491_v60 = vpop.eup %14490 }
 0x8f3   : > { %7505 = vrot.lane.b32.xlu1 %v20056_v23, %s15066_s6 }
 0x8f5   : > { %v17426_v8 = vpop.xlane.xlu0 %4744 }
 0x8f7   : > { %7599 = vrot.lane.b32.xlu1 %v20057_v51, %s15066_s6 }
 0x8f8   : > { %13444 = vmatmul.mubr.msk.bf16.vlgmr.msra.gmra.mrb[196].mxu1 %vm1778_vm3, %v20059_v57  ;;  %v20076_v57 = vld [vmem:[#allocation137_spill] sm:$0xff] }
 0x8f9   : > { %13448 = vmatpush3.bf16.xpose.msra.mxu1 %v6400_v21  ;;  %13449 = vmatprep.mubr.msk.bf16.mxu1 %vm15064_vm2, %v19925_v24  ;;  %v6852_v3 = vpop.permute.xlu0 %6851  ;;  %v4821_v21 = vmul.f32 %v14489_v31, %v20075_v50  ;;  %v4820_v13 = vmul.f32 %v14491_v60, %v20076_v57 }
 0x8fa   : > { %13453 = vmatprep.subr.bf16.mxu1 %v19925_v24 }
 0x8fb   : > { %7693 = vrot.lane.b32.xlu1 %v20060_v38, %s15066_s6 }
 0x8ff   : > { %7740 = vrot.lane.b32.xlu1 %v19978_v62, %s15066_s6 }
 0x900   : > { %13450 = vmatmul.mubr.msk.bf16.vlgmr.msra.gmra.mrb[200].mxu1 %vm1778_vm3, %v20062_v36  ;;  %v20077_v36 = vld [vmem:[#allocation139_spill] sm:$0xff] }
 0x901   : > { %13454 = vmatpush3.bf16.xpose.msra.mxu1 %v6451_v10  ;;  %13455 = vmatprep.mubr.msk.bf16.mxu1 %vm15064_vm2, %v19925_v24  ;;  %v6757_v19 = vsel %vm1778_vm3, %v20077_v36, 0  ;;  %v20079_v36 = vld [vmem:[#allocation140_spill] sm:$0xff] }
 0x902   : > { %13459 = vmatprep.subr.bf16.mxu1 %v19925_v24 }
 0x903   : > { %7787 = vrot.lane.b32.xlu1 %v20063_v20, %s15066_s6 }
 0x908   : > { %13456 = vmatmul.mubr.msk.bf16.vlgmr.msra.gmra.mrb[204].mxu1 %vm1778_vm3, %v20065_v7  ;;  %v4846_v7 = vpack.c.bf16 %v4821_v21, %v4820_v13  ;;  %v14493_v21 = vpop.eup %14492 }
 0x909   : > { %13460 = vmatpush3.bf16.xpose.msra.mxu1 %v6502_v49  ;;  %13461 = vmatprep.mubr.msk.bf16.mxu1 %vm15064_vm2, %v19925_v24  ;;  %v20078_v49 = vld [vmem:[#allocation141_spill] sm:$0xff]  ;;  %v14495_v13 = vpop.eup %14494 }
 0x90a   : > { %13465 = vmatprep.subr.bf16.mxu1 %v19925_v24 }
 0x910   : > { %13462 = vmatmul.mubr.msk.bf16.vlgmr.msra.gmra.mrb[208].mxu1 %vm1778_vm3, %v20067_v5  ;;  %v6808_v5 = vsel %vm1778_vm3, %v17271_v32, 0 }
 0x911   : > { %13466 = vmatpush3.bf16.xpose.msra.mxu1 %v6553_v39  ;;  %13467 = vmatprep.mubr.msk.bf16.mxu1 %vm15064_vm2, %v19925_v24 }
 0x912   : > { %13471 = vmatprep.subr.bf16.mxu1 %v19925_v24 }
 0x918   : > { %13468 = vmatmul.mubr.msk.bf16.vlgmr.msra.gmra.mrb[212].mxu1 %vm1778_vm3, %v20069_v29 }
 0x919   : > { %13472 = vmatpush3.bf16.xpose.msra.mxu1 %v6604_v45  ;;  %13473 = vmatprep.mubr.msk.bf16.mxu1 %vm15064_vm2, %v19925_v24 }
 0x91a   : > { %13477 = vmatprep.subr.bf16.mxu1 %v19925_v24 }
 0x920   : > { %13474 = vmatmul.mubr.msk.bf16.vlgmr.msra.gmra.mrb[216].mxu1 %vm1778_vm3, %v20071_v4 }
 0x921   : > { %13478 = vmatpush3.bf16.xpose.msra.mxu1 %v6655_v34  ;;  %13479 = vmatprep.mubr.msk.bf16.mxu1 %vm15064_vm2, %v19925_v24  ;;  %v6859_v34 = vsel %vm1778_vm3, %v6854_v53, 0 }
 0x922   : > { %v17433_v35 = vpop.xlane.xlu1 %4741  ;;  %13483 = vmatprep.subr.bf16.mxu1 %v19925_v24 }
 0x923   : > { %14496 = vrcp.f32 %v17433_v35 }
 0x924   : > { %14498 = vrcp.f32 %v17426_v8 }
 0x926   : > { %v5050_v18 = vpop.permute.xlu1 %5049 }
 0x927   : > { %13268 = vmatpush3.bf16.msra.mxu0 %v5050_v18 }
 0x928   : > { %13480 = vmatmul.mubr.msk.bf16.vlgmr.msra.gmra.mrb[220].mxu1 %vm1778_vm3, %v20074_v40  ;;  %13279 = vmatprep.subr.bf16.mxu0 %v19925_v24 }
 0x929   : > { %13484 = vmatpush3.bf16.xpose.msra.mxu1 %v6706_v30  ;;  %13485 = vmatprep.mubr.msk.bf16.mxu1 %vm15064_vm2, %v19925_v24 }
 0x92a   : > { %v17445_v59 = vpop.xlane.xlu0 %4756  ;;  %13270 = vmatmul.mubr.msk.bf16.vlgmr.msra.gmra.mrb[152].mxu0 %vm2531_vm4, %v4844_v52  ;;  %13489 = vmatprep.subr.bf16.mxu1 %v19925_v24 }
 0x92b   : > { %13281 = vmatprep.mubr.msk.bf16.mxu0 %vm15064_vm2, %v19925_v24 }
 0x92d   : > { %v14497_v8 = vpop.eup %14496 }
 0x92e   : > { %v5146_v10 = vpop.permute.xlu0 %5145 }
 0x92f   : > { %13280 = vmatpush3.bf16.msra.mxu0 %v5146_v10  ;;  %v4825_v10 = vmul.f32 %v14493_v21, %v17184_v15 }
 0x930   : > { %13486 = vmatmul.mubr.msk.bf16.vlgmr.msra.gmra.mrb[224].mxu1 %vm1778_vm3, %v20078_v49  ;;  %13291 = vmatprep.subr.bf16.mxu0 %v19925_v24 }
 0x931   : > { %13490 = vmatpush3.bf16.xpose.msra.mxu1 %v6757_v19  ;;  %13491 = vmatprep.mubr.msk.bf16.mxu1 %vm15064_vm2, %v19925_v24  ;;  %v4824_v19 = vmul.f32 %v14495_v13, %v20079_v36  ;;  %v14204_v36 = vld [vmem:[%s15429_s8 + $0x10] sm:$0xff]  }
 0x932   : > { %13282 = vmatmul.mubr.msk.bf16.vlgmr.msra.gmra.mrb[156].mxu0 %vm2531_vm4, %v4846_v7  ;;  %13495 = vmatprep.subr.bf16.mxu1 %v19925_v24 }
 0x933   : > { %13293 = vmatprep.mubr.msk.bf16.mxu0 %vm15064_vm2, %v19925_v24 }
 0x936   : > { %v17464_v54 = vpop.f32.mrb[144].mxu1 }
 0x937   : > { %v13253_v39 = vpop.f32.mrb[145].mxu1 }
 0x938   : > { %v17468_v58 = vpop.f32.mrb[146].mxu1  ;;  %13492 = vmatmul.mubr.msk.bf16.vlgmr.msra.gmra.mrb[228].mxu1 %vm1778_vm3, %v17279_v17 }
 0x939   : > { %v5629_v45 = vpack.c.bf16 %v17468_v58, %v17464_v54  ;;  %13496 = vmatpush3.bf16.xpose.msra.mxu1 %v6808_v5  ;;  %v13254_v29 = vpop.f32.mrb[147].mxu1  ;;  %13497 = vmatprep.mubr.msk.bf16.mxu1 %vm15064_vm2, %v19925_v24  ;;  %v4848_v5 = vpack.c.bf16 %v4825_v10, %v4824_v19 }
 0x93a   : > { %13501 = vmatprep.subr.bf16.mxu1 %v19925_v24 }
 0x93f   : > { %v17477_v2 = vpop.f32.mrb[148].mxu1 }
 0x940   : > { %v13265_v32 = vpop.f32.mrb[149].mxu1  ;;  %13498 = vmatmul.mubr.msk.bf16.vlgmr.msra.gmra.mrb[232].mxu1 %vm1778_vm3, %v17292_v33 }
 0x941   : > { %v17482_v4 = vpop.f32.mrb[150].mxu1  ;;  %13502 = vmatpush3.bf16.xpose.msra.mxu1 %v6859_v34  ;;  %13503 = vmatprep.mubr.msk.bf16.mxu1 %vm15064_vm2, %v19925_v24  ;;  %v5338_v34 = vpop.permute.xlu0 %5337 }
 0x942   : > { %v5631_v17 = vpack.c.bf16 %v17482_v4, %v17477_v2  ;;  %v13266_v56 = vpop.f32.mrb[151].mxu1  ;;  %13513 = vmatprep.subr.bf16.mxu1 %v19925_v24 }
 0x943   : > { %v14499_v56 = vpop.eup %14498 }
 0x945   : > { %v5434_v13 = vpop.permute.xlu0 %5433 }
 0x948   : > { %13504 = vmatmul.mubr.msk.bf16.vlgmr.msra.gmra.mrb[236].mxu1 %vm1778_vm3, %v6852_v3 }
 0x949   : > { %13515 = vmatprep.mubr.msk.bf16.mxu1 %vm15064_vm2, %v19925_v24 }
 0x94b   : > { %v17492_v53 = vpop.f32.mrb[152].mxu1 }
 0x94c   : > { %v13277_v33 = vpop.f32.mrb[153].mxu1 }
 0x94d   : > { %v17494_v28 = vpop.f32.mrb[154].mxu1  ;;  %v4828_v33 = vmul.f32 %v14497_v8, %v17243_v46  ;;  %v14205_v8 = vld [vmem:[%s15429_s8 + $0x18] sm:$0xff]  }
 0x94e   : > { %v5633_v42 = vpack.c.bf16 %v17494_v28, %v17492_v53  ;;  %v13278_v25 = vpop.f32.mrb[155].mxu1 }
 0x94f   : > { %v4829_v25 = vmul.f32 %v14499_v56, %v17195_v1 }
 0x953   : > { %v17498_v11 = vpop.f32.mrb[156].mxu1 }
 0x954   : > { %v13289_v18 = vpop.f32.mrb[157].mxu1 }
 0x955   : > { %v17501_v14 = vpop.f32.mrb[158].mxu1 }
 0x956   : > { %v13290_v30 = vpop.f32.mrb[159].mxu1 }
 0x957   : > { %v4754_v40 = vpop.xlane.xlu1 %4753 }
 0x958   : > { %14500 = vrcp.f32 %v4754_v40 }
 0x959   : > { %14502 = vrcp.f32 %v17445_v59 }
 0x95b   : > { %v17506_v52 = vpop.f32.mrb[160].mxu1  ;;  %v4766_v31 = vpop.xlane.xlu1 %4765 }
 0x95c   : > { %v13301_v60 = vpop.f32.mrb[161].mxu1 }
 0x95d   : > { %v17509_v50 = vpop.f32.mrb[162].mxu1  ;;  %v4850_v60 = vpack.c.bf16 %v4829_v25, %v4828_v33 }
 0x95e   : > { %v13302_v9 = vpop.f32.mrb[163].mxu1 }
 0x95f   : > { %v4769_v57 = vpop.xlane.xlu1 %4768 }
 0x960   : > { %14504 = vrcp.f32 %v4769_v57 }
 0x961   : > { %14506 = vrcp.f32 %v4766_v31 }
 0x962   : > { %v14501_v21 = vpop.eup %14500 }
 0x963   : > { %v17516_v49 = vpop.f32.mrb[164].mxu1  ;;  %v5242_v7 = vpop.permute.xlu1 %5241  ;;  %v4832_v57 = vmul.f32 %v14501_v21, %v17303_v6 }
 0x964   : > { %v13313_v35 = vpop.f32.mrb[165].mxu1  ;;  %13292 = vmatpush3.bf16.msra.mxu0 %v5242_v7  ;;  %v14503_v1 = vpop.eup %14502 }
 0x965   : > { %v17518_v39 = vpop.f32.mrb[166].mxu1  ;;  %13303 = vmatprep.subr.bf16.mxu0 %v19925_v24  ;;  %v4833_v10 = vmul.f32 %v14503_v1, %v17255_v41 }
 0x966   : > { %v13314_v15 = vpop.f32.mrb[167].mxu1 }
 0x967   : > { %13294 = vmatmul.mubr.msk.bf16.vlgmr.msra.gmra.mrb[160].mxu0 %vm2531_vm4, %v4848_v5  ;;  %v5530_v32 = vpop.permute.xlu1 %5529  ;;  %v4852_v31 = vpack.c.bf16 %v4833_v10, %v4832_v57 }
 0x968   : > { %13304 = vmatpush3.bf16.msra.mxu0 %v5338_v34  ;;  %13305 = vmatprep.mubr.msk.bf16.mxu0 %vm15064_vm2, %v19925_v24 }
 0x969   : > { %13315 = vmatprep.subr.bf16.mxu0 %v19925_v24 }
 0x96a   : > { %v14505_v19 = vpop.eup %14504 }
 0x96b   : > { %v17530_v59 = vpop.f32.mrb[168].mxu1  ;;  %v7318_v18 = vpop.permute.xlu1 %7317  ;;  %v4837_v35 = vmul.f32 %v14505_v19, %v17325_v63 }
 0x96c   : > { %v13325_v30 = vpop.f32.mrb[169].mxu1  ;;  %13514 = vmatpush3.bf16.msra.mxu1 %v7318_v18  ;;  %v14507_v7 = vpop.eup %14506 }
 0x96d   : > { %v17532_v40 = vpop.f32.mrb[170].mxu1  ;;  %13525 = vmatprep.subr.bf16.mxu1 %v19925_v24  ;;  %v4836_v5 = vmul.f32 %v14507_v7, %v17316_v48 }
 0x96e   : > { %v13326_v9 = vpop.f32.mrb[171].mxu1 }
 0x96f   : > { %13306 = vmatmul.mubr.msk.bf16.vlgmr.msra.gmra.mrb[164].mxu0 %vm2531_vm4, %v4850_v60  ;;  %v4854_v6 = vpack.c.bf16 %v4837_v35, %v4836_v5 }
 0x970   : > { %13316 = vmatpush3.bf16.msra.mxu0 %v5434_v13  ;;  %13317 = vmatprep.mubr.msk.bf16.mxu0 %vm15064_vm2, %v19925_v24 }
 0x971   : > { %13327 = vmatprep.subr.bf16.mxu0 %v19925_v24 }
 0x977   : > { %13318 = vmatmul.mubr.msk.bf16.vlgmr.msra.gmra.mrb[168].mxu0 %vm2531_vm4, %v4852_v31 }
 0x978   : > { %13328 = vmatpush3.bf16.msra.mxu0 %v5530_v32  ;;  %13329 = vmatprep.mubr.msk.bf16.mxu0 %vm15064_vm2, %v19925_v24 }
 0x979   : > { %13339 = vmatprep.subr.bf16.mxu0 %v14204_v36 }
 0x97f   : > { %13330 = vmatmul.mubr.msk.bf16.vlgmr.msra.gmra.mrb[172].mxu0 %vm2531_vm4, %v4854_v6 }
 0x980   : > { %13340 = vmatpush3.bf16.msra.mxu0 %v14204_v36 }
 0x981   : > { %13341 = vmatprep.subr.bf16.mxu0 %v14205_v8 }
 0x984   : > { %13342 = vmatpush3.bf16.msra.mxu0 %v14205_v8 }
 0x993   : > { %v4897_v41 = vpop.f32.mrb[144].mxu0 }
 0x994   : > { %v13247_v15 = vpop.f32.mrb[145].mxu0 }
 0x995   : > { %v4900_v34 = vpop.f32.mrb[146].mxu0 }
 0x996   : > { %v5628_v56 = vpack.c.bf16 %v4900_v34, %v4897_v41  ;;  %v13248_v32 = vpop.f32.mrb[147].mxu0 }
 0x998   : > { %13343 = vmatprep.mubr.msk.bf16.mxu0 %vm1778_vm3, %v5628_v56 }
 0x999   : > { %13344 = vmatmul.mubr.msk.bf16.vlgmr.msra.gmra.mrb[176].mxu0 %vm1778_vm3, %v5629_v45 }
 0x99b   : > { %v4993_v48 = vpop.f32.mrb[148].mxu0  ;;  %v17556_v63 = vpop.f32.mrb[172].mxu1 }
 0x99c   : > { %v13259_v33 = vpop.f32.mrb[149].mxu0  ;;  %v13337_v25 = vpop.f32.mrb[173].mxu1 }
 0x99d   : > { %v4996_v18 = vpop.f32.mrb[150].mxu0  ;;  %v17558_v30 = vpop.f32.mrb[174].mxu1 }
 0x99e   : > { %v5630_v60 = vpack.c.bf16 %v4996_v18, %v4993_v48  ;;  %v13260_v9 = vpop.f32.mrb[151].mxu0  ;;  %v13338_v13 = vpop.f32.mrb[175].mxu1 }
 0x9a0   : > { %13347 = vmatprep.mubr.msk.bf16.mxu0 %vm1778_vm3, %v5630_v60 }
 0x9a1   : > { %13348 = vmatmul.mubr.msk.bf16.gmra.mrb[180].mxu0 %vm1778_vm3, %v5631_v17 }
 0x9a3   : > { %v17567_v54 = vpop.f32.mrb[176].mxu1 }
 0x9a4   : > { %v13415_v58 = vpop.f32.mrb[177].mxu1  ;;  %v6902_v45 = vsel %vm2531_vm4, %v17567_v54, -inf }
 0x9a5   : > { %6903 = vmax.xlane.f32.xlu0 %v6902_v45  ;;  %v17571_v1 = vpop.f32.mrb[178].mxu1 }
 0x9a6   : > { %v13416_v57 = vpop.f32.mrb[179].mxu1  ;;  %v6905_v10 = vsel %vm2531_vm4, %v17571_v1, -inf }
 0x9a7   : > { %6906 = vmax.xlane.f32.xlu1 %v6905_v10 }
 0x9ab   : > { %v17575_v31 = vpop.f32.mrb[180].mxu1 }
 0x9ac   : > { %v13421_v36 = vpop.f32.mrb[181].mxu1  ;;  %v6908_v2 = vsel %vm2531_vm4, %v17575_v31, -inf }
 0x9ad   : > { %6909 = vmax.xlane.f32.xlu0 %v6908_v2  ;;  %v17579_v4 = vpop.f32.mrb[182].mxu1 }
 0x9ae   : > { %v13422_v17 = vpop.f32.mrb[183].mxu1  ;;  %v6911_v19 = vsel %vm2531_vm4, %v17579_v4, -inf }
 0x9b1   : > { %6912 = vmax.xlane.f32.xlu0 %v6911_v19 }
 0x9b3   : > { %v17583_v7 = vpop.f32.mrb[184].mxu1 }
 0x9b4   : > { %v13427_v35 = vpop.f32.mrb[185].mxu1  ;;  %v6914_v5 = vsel %vm2531_vm4, %v17583_v7, -inf }
 0x9b5   : > { %6915 = vmax.xlane.f32.xlu0 %v6914_v5  ;;  %v17587_v6 = vpop.f32.mrb[186].mxu1 }
 0x9b6   : > { %v13428_v8 = vpop.f32.mrb[187].mxu1  ;;  %v6917_v41 = vsel %vm2531_vm4, %v17587_v6, -inf }
 0x9b7   : > { %6918 = vmax.xlane.f32.xlu1 %v6917_v41 }
 0x9bb   : > { %v17591_v15 = vpop.f32.mrb[188].mxu1 }
 0x9bc   : > { %v13433_v34 = vpop.f32.mrb[189].mxu1  ;;  %v6920_v56 = vsel %vm2531_vm4, %v17591_v15, -inf }
 0x9bd   : > { %6921 = vmax.xlane.f32.xlu0 %v6920_v56  ;;  %v17595_v32 = vpop.f32.mrb[190].mxu1  ;;  %v14206_v56 = vld [vmem:[%s15429_s8] sm:$0xff]  }
 0x9be   : > { %v13434_v48 = vpop.f32.mrb[191].mxu1  ;;  %v6923_v33 = vsel %vm2531_vm4, %v17595_v32, -inf  ;;  %13375 = vmatprep.subr.bf16.mxu0 %v14206_v56 }
 0x9bf   : > { %6924 = vmax.xlane.f32.xlu1 %v6923_v33  ;;  %13376 = vmatpush3.bf16.msra.mxu0 %v14206_v56  ;;  %v14207_v33 = vld [vmem:[%s15429_s8 + $0x8] sm:$0xff]  }
 0x9c0   : > { %13377 = vmatprep.subr.bf16.mxu0 %v14207_v33 }
 0x9c3   : > { %v17599_v25 = vpop.f32.mrb[192].mxu1  ;;  %13378 = vmatpush3.bf16.msra.mxu0 %v14207_v33 }
 0x9c4   : > { %v13439_v18 = vpop.f32.mrb[193].mxu1  ;;  %v6926_v60 = vsel %vm2531_vm4, %v17599_v25, -inf  ;;  %13507 = vmatprep.subr.bf16.mxu0 %v19925_v24 }
 0x9c5   : > { %6927 = vmax.xlane.f32.xlu0 %v6926_v60  ;;  %v17603_v9 = vpop.f32.mrb[194].mxu1 }
 0x9c6   : > { %v13440_v13 = vpop.f32.mrb[195].mxu1  ;;  %v6929_v58 = vsel %vm2531_vm4, %v17603_v9, -inf }
 0x9c7   : > { %6930 = vmax.xlane.f32.xlu1 %v6929_v58 }
 0x9cb   : > { %v17607_v45 = vpop.f32.mrb[196].mxu1 }
 0x9cc   : > { %v13445_v57 = vpop.f32.mrb[197].mxu1  ;;  %v6932_v10 = vsel %vm2531_vm4, %v17607_v45, -inf }
 0x9cd   : > { %6933 = vmax.xlane.f32.xlu0 %v6932_v10  ;;  %v17611_v36 = vpop.f32.mrb[198].mxu1 }
 0x9ce   : > { %v13446_v2 = vpop.f32.mrb[199].mxu1  ;;  %v6935_v17 = vsel %vm2531_vm4, %v17611_v36, -inf }
 0x9cf   : > { %6936 = vmax.xlane.f32.xlu1 %v6935_v17 }
 0x9d3   : > { %v17615_v19 = vpop.f32.mrb[200].mxu1 }
 0x9d4   : > { %v13451_v35 = vpop.f32.mrb[201].mxu1  ;;  %v6938_v5 = vsel %vm2531_vm4, %v17615_v19, -inf }
 0x9d5   : > { %6939 = vmax.xlane.f32.xlu0 %v6938_v5  ;;  %v17619_v8 = vpop.f32.mrb[202].mxu1 }
 0x9d6   : > { %v13452_v41 = vpop.f32.mrb[203].mxu1  ;;  %v6941_v34 = vsel %vm2531_vm4, %v17619_v8, -inf }
 0x9d7   : > { %6942 = vmax.xlane.f32.xlu1 %v6941_v34 }
 0x9db   : > { %v17624_v48 = vpop.f32.mrb[204].mxu1 }
 0x9dc   : > { %v13457_v18 = vpop.f32.mrb[205].mxu1  ;;  %v6944_v60 = vsel %vm2531_vm4, %v17624_v48, -inf }
 0x9dd   : > { %6945 = vmax.xlane.f32.xlu0 %v6944_v60  ;;  %v17629_v13 = vpop.f32.mrb[206].mxu1 }
 0x9de   : > { %v13458_v58 = vpop.f32.mrb[207].mxu1  ;;  %v6947_v57 = vsel %vm2531_vm4, %v17629_v13, -inf }
 0x9df   : > { %6948 = vmax.xlane.f32.xlu1 %v6947_v57 }
 0x9e3   : > { %v17634_v10 = vpop.f32.mrb[208].mxu1 }
 0x9e4   : > { %v13463_v2 = vpop.f32.mrb[209].mxu1  ;;  %v6950_v17 = vsel %vm2531_vm4, %v17634_v10, -inf }
 0x9e5   : > { %6951 = vmax.xlane.f32.xlu0 %v6950_v17  ;;  %v17638_v35 = vpop.f32.mrb[210].mxu1 }
 0x9e6   : > { %v13464_v5 = vpop.f32.mrb[211].mxu1  ;;  %v6953_v41 = vsel %vm2531_vm4, %v17638_v35, -inf }
 0x9e7   : > { %6954 = vmax.xlane.f32.xlu1 %v6953_v41 }
 0x9eb   : > { %v17642_v34 = vpop.f32.mrb[212].mxu1 }
 0x9ec   : > { %v13469_v56 = vpop.f32.mrb[213].mxu1  ;;  %v6956_v33 = vsel %vm2531_vm4, %v17642_v34, -inf }
 0x9ed   : > { %6957 = vmax.xlane.f32.xlu0 %v6956_v33  ;;  %v17646_v18 = vpop.f32.mrb[214].mxu1 }
 0x9ee   : > { %v13470_v60 = vpop.f32.mrb[215].mxu1  ;;  %v6959_v58 = vsel %vm2531_vm4, %v17646_v18, -inf }
 0x9ef   : > { %6960 = vmax.xlane.f32.xlu1 %v6959_v58 }
 0x9f3   : > { %v17650_v57 = vpop.f32.mrb[216].mxu1 }
 0x9f4   : > { %v13475_v2 = vpop.f32.mrb[217].mxu1  ;;  %v6962_v17 = vsel %vm2531_vm4, %v17650_v57, -inf }
 0x9f5   : > { %6963 = vmax.xlane.f32.xlu0 %v6962_v17  ;;  %v17654_v5 = vpop.f32.mrb[218].mxu1 }
 0x9f6   : > { %v13476_v41 = vpop.f32.mrb[219].mxu1  ;;  %v6965_v56 = vsel %vm2531_vm4, %v17654_v5, -inf }
 0x9f7   : > { %6966 = vmax.xlane.f32.xlu1 %v6965_v56 }
 0x9fb   : > { %v17658_v33 = vpop.f32.mrb[220].mxu1 }
 0x9fc   : > { %v13481_v60 = vpop.f32.mrb[221].mxu1  ;;  %v6968_v58 = vsel %vm2531_vm4, %v17658_v33, -inf }
 0x9fd   : > { %v5089_v21 = vpop.f32.mrb[152].mxu0  ;;  %6969 = vmax.xlane.f32.xlu0 %v6968_v58  ;;  %v17662_v2 = vpop.f32.mrb[222].mxu1 }
 0x9fe   : > { %v13271_v46 = vpop.f32.mrb[153].mxu0  ;;  %v13482_v29 = vpop.f32.mrb[223].mxu1  ;;  %v6971_v17 = vsel %vm2531_vm4, %v17662_v2, -inf }
 0x9ff   : > { %v5092_v41 = vpop.f32.mrb[154].mxu0  ;;  %6972 = vmax.xlane.f32.xlu1 %v6971_v17 }
 0xa00   : > { %v5632_v22 = vpack.c.bf16 %v5092_v41, %v5089_v21  ;;  %v13272_v3 = vpop.f32.mrb[155].mxu0 }
 0xa02   : > { %13351 = vmatprep.mubr.msk.bf16.mxu0 %vm1778_vm3, %v5632_v22 }
 0xa03   : > { %13352 = vmatmul.mubr.msk.bf16.gmra.mrb[184].mxu0 %vm1778_vm3, %v5633_v42  ;;  %v17671_v56 = vpop.f32.mrb[224].mxu1  ;;  %v20080_v42 = vpack.c.bf16 %v17501_v14, %v17498_v11 }
 0xa04   : > { %v13487_v60 = vpop.f32.mrb[225].mxu1  ;;  %v6974_v29 = vsel %vm2531_vm4, %v17671_v56, -inf }
 0xa05   : > { %v5185_v46 = vpop.f32.mrb[156].mxu0  ;;  %6975 = vmax.xlane.f32.xlu0 %v6974_v29  ;;  %v17675_v58 = vpop.f32.mrb[226].mxu1 }
 0xa06   : > { %v13283_v17 = vpop.f32.mrb[157].mxu0  ;;  %v13488_v21 = vpop.f32.mrb[227].mxu1  ;;  %v6977_v3 = vsel %vm2531_vm4, %v17675_v58, -inf }
 0xa07   : > { %v5188_v22 = vpop.f32.mrb[158].mxu0  ;;  %6978 = vmax.xlane.f32.xlu1 %v6977_v3 }
 0xa08   : > { %v5634_v53 = vpack.c.bf16 %v5188_v22, %v5185_v46  ;;  %v13284_v28 = vpop.f32.mrb[159].mxu0 }
 0xa0a   : > { %13355 = vmatprep.mubr.msk.bf16.mxu0 %vm1778_vm3, %v5634_v53 }
 0xa0b   : > { %13356 = vmatmul.mubr.msk.bf16.gmra.mrb[188].mxu0 %vm1778_vm3, %v20080_v42  ;;  %v17684_v41 = vpop.f32.mrb[228].mxu1  ;;  %v17700_v42 = vpop.permute.xlu1 %7411 }
 0xa0c   : > { %v13493_v60 = vpop.f32.mrb[229].mxu1  ;;  %v6980_v29 = vsel %vm2531_vm4, %v17684_v41, -inf }
 0xa0d   : > { %6981 = vmax.xlane.f32.xlu0 %v6980_v29  ;;  %v17688_v17 = vpop.f32.mrb[230].mxu1  ;;  %v17702_v60 = vpop.permute.xlu0 %7270 }
 0xa0e   : > { %v13494_v21 = vpop.f32.mrb[231].mxu1  ;;  %v6983_v46 = vsel %vm2531_vm4, %v17688_v17, -inf }
 0xa0f   : > { %6984 = vmax.xlane.f32.xlu1 %v6983_v46  ;;  %v17712_v62 = vpop.permute.xlu1 %7505 }
 0xa13   : > { %v17692_v3 = vpop.f32.mrb[232].mxu1  ;;  %v17716_v20 = vpop.permute.xlu1 %7599 }
 0xa14   : > { %v13499_v22 = vpop.f32.mrb[233].mxu1  ;;  %v6986_v11 = vsel %vm2531_vm4, %v17692_v3, -inf  ;;  %20081 = vst [vmem:[#allocation111_spill] sm:$0xff] %v17716_v20 }
 0xa15   : > { %6987 = vmax.xlane.f32.xlu0 %v6986_v11  ;;  %v17696_v14 = vpop.f32.mrb[234].mxu1 }
 0xa16   : > { %v13500_v53 = vpop.f32.mrb[235].mxu1  ;;  %v6989_v28 = vsel %vm2531_vm4, %v17696_v14, -inf }
 0xa17   : > { %6990 = vmax.xlane.f32.xlu1 %v6989_v28  ;;  %v17714_v28 = vpop.permute.xlu0 %7364 }
 0xa1b   : > { %v17704_v29 = vpop.f32.mrb[236].mxu1  ;;  %v17718_v26 = vpop.permute.xlu0 %7458 }
 0xa1c   : > { %v13505_v21 = vpop.f32.mrb[237].mxu1  ;;  %v6992_v46 = vsel %vm2531_vm4, %v17704_v29, -inf }
 0xa1d   : > { %6993 = vmax.xlane.f32.xlu0 %v6992_v46  ;;  %v17708_v22 = vpop.f32.mrb[238].mxu1  ;;  %v17720_v21 = vpop.permute.xlu1 %7693  ;;  %v20083_v46 = vld [vmem:[#allocation64_spill] sm:$0xff] }
 0xa1e   : > { %v13506_v11 = vpop.f32.mrb[239].mxu1  ;;  %v6995_v53 = vsel %vm2531_vm4, %v17708_v22, -inf  ;;  %20082 = vst [vmem:[#allocation112_spill] sm:$0xff] %v17720_v21 }
 0xa1f   : > { %6996 = vmax.xlane.f32.xlu1 %v6995_v53  ;;  %v17722_v38 = vpop.permute.xlu0 %7552 }
 0xa21   : > { %v17726_v11 = vpop.permute.xlu1 %7740 }
 0xa22   : > { %20084 = vst [vmem:[#allocation115_spill] sm:$0xff] %v17726_v11 }
 0xa23   : > { %v17728_v37 = vpop.permute.xlu0 %7646 }
 0xa24   : > { %20085 = vst [vmem:[#allocation117_spill] sm:$0xff] %v17728_v37 }
 0xa25   : > { %v17732_v51 = vpop.permute.xlu1 %7787 }
 0xa26   : > { %20086 = vst [vmem:[#allocation113_spill] sm:$0xff] %v17732_v51  ;;  %v20087_v51 = vpack.c.bf16 %v17509_v50, %v17506_v52  ;;  %v20088_v50 = vpack.c.bf16 %v17518_v39, %v17516_v49 }
 0xa30   : > { %7881 = vrot.lane.b32.xlu1 %v20083_v46, %s15066_s6 }
 0xa32   : > { %v6904_v53 = vpop.xlane.xlu0 %6903 }
 0xa33   : > { %7834 = vrot.lane.b32.xlu0 %v19981_v55, %s15066_s6  ;;  %v6998_v21 = vsub.f32 %v17567_v54, %v6904_v53 }
 0xa34   : > { %v6907_v16 = vpop.xlane.xlu1 %6906 }
 0xa35   : > { %v6999_v46 = vsub.f32 %v17571_v1, %v6907_v16  ;;  %v7030_v37 = vmul.f32 1.442695, %v6998_v21 }
 0xa37   : > { %v7032_v20 = vmul.f32 1.442695, %v6999_v46  ;;  %14508 = vpow2.f32 %v7030_v37 }
 0xa39   : > { %14510 = vpow2.f32 %v7032_v20 }
 0xa3a   : > { %v5281_v12 = vpop.f32.mrb[160].mxu0  ;;  %v6910_v23 = vpop.xlane.xlu0 %6909 }
 0xa3b   : > { %v13295_v27 = vpop.f32.mrb[161].mxu0  ;;  %v7000_v55 = vsub.f32 %v17575_v31, %v6910_v23 }
 0xa3c   : > { %v5284_v47 = vpop.f32.mrb[162].mxu0 }
 0xa3d   : > { %v5636_v44 = vpack.c.bf16 %v5284_v47, %v5281_v12  ;;  %v13296_v61 = vpop.f32.mrb[163].mxu0 }
 0xa3e   : > { %v6913_v11 = vpop.xlane.xlu0 %6912  ;;  %v7034_v61 = vmul.f32 1.442695, %v7000_v55 }
 0xa3f   : > { %13359 = vmatprep.mubr.msk.bf16.mxu0 %vm1778_vm3, %v5636_v44  ;;  %v7001_v27 = vsub.f32 %v17579_v4, %v6913_v11 }
 0xa40   : > { %13360 = vmatmul.mubr.msk.bf16.gmra.mrb[192].mxu0 %vm1778_vm3, %v20087_v51  ;;  %14512 = vpow2.f32 %v7034_v61 }
 0xa41   : > { %v7036_v23 = vmul.f32 1.442695, %v7001_v27 }
 0xa42   : > { %v5377_v54 = vpop.f32.mrb[164].mxu0  ;;  %v6916_v53 = vpop.xlane.xlu0 %6915 }
 0xa43   : > { %v13307_v12 = vpop.f32.mrb[165].mxu0  ;;  %v7002_v16 = vsub.f32 %v17583_v7, %v6916_v53  ;;  %14514 = vpow2.f32 %v7036_v23  ;;  %v17752_v53 = vpop.eup %14508 }
 0xa44   : > { %v5380_v47 = vpop.f32.mrb[166].mxu0  ;;  %v6919_v44 = vpop.xlane.xlu1 %6918  ;;  %v7094_v12 = vsel %vm2531_vm4, %v17752_v53, 0.0 }
 0xa45   : > { %v5638_v1 = vpack.c.bf16 %v5380_v47, %v5377_v54  ;;  %v13308_v21 = vpop.f32.mrb[167].mxu0  ;;  %v7003_v52 = vsub.f32 %v17587_v6, %v6919_v44  ;;  %v7038_v51 = vmul.f32 1.442695, %v7002_v16  ;;  %v17755_v39 = vpop.eup %14510 }
 0xa47   : > { %13363 = vmatprep.mubr.msk.bf16.mxu0 %vm1778_vm3, %v5638_v1  ;;  %v7040_v37 = vmul.f32 1.442695, %v7003_v52  ;;  %14516 = vpow2.f32 %v7038_v51  ;;  %v7097_v1 = vsel %vm2531_vm4, %v17755_v39, 0.0 }
 0xa48   : > { %13364 = vmatmul.mubr.msk.bf16.gmra.mrb[196].mxu0 %vm1778_vm3, %v20088_v50 }
 0xa49   : > { %14518 = vpow2.f32 %v7040_v37 }
 0xa4a   : > { %v5473_v55 = vpop.f32.mrb[168].mxu0  ;;  %v6922_v31 = vpop.xlane.xlu0 %6921 }
 0xa4b   : > { %v7004_v4 = vsub.f32 %v17591_v15, %v6922_v31  ;;  %v13319_v7 = vpop.f32.mrb[169].mxu0  ;;  %v20089_v15 = vpack.c.bf16 %v17532_v40, %v17530_v59  ;;  %v17763_v61 = vpop.eup %14512 }
 0xa4c   : > { %v5476_v20 = vpop.f32.mrb[170].mxu0  ;;  %v6925_v46 = vpop.xlane.xlu1 %6924  ;;  %v7100_v37 = vsel %vm2531_vm4, %v17763_v61, 0.0  ;;  %v20090_v7 = vpack.c.bf16 %v17558_v30, %v17556_v63 }
 0xa4d   : > { %v7042_v6 = vmul.f32 1.442695, %v7004_v4  ;;  %v5640_v11 = vpack.c.bf16 %v5476_v20, %v5473_v55  ;;  %v7005_v27 = vsub.f32 %v17595_v32, %v6925_v46  ;;  %v13320_v54 = vpop.f32.mrb[171].mxu0  ;;  %v17768_v21 = vpop.eup %14514  ;;  %v20092_v20 = vld [vmem:[#allocation95_spill] sm:$0xff] }
 0xa4e   : > { %v7103_v31 = vsel %vm2531_vm4, %v17768_v21, 0.0 }
 0xa4f   : > { %v7044_v49 = vmul.f32 1.442695, %v7005_v27  ;;  %13367 = vmatprep.mubr.msk.bf16.mxu0 %vm1778_vm3, %v5640_v11  ;;  %14520 = vpow2.f32 %v7042_v6 }
 0xa50   : > { %13368 = vmatmul.mubr.msk.bf16.gmra.mrb[200].mxu0 %vm1778_vm3, %v20089_v15 }
 0xa51   : > { %14522 = vpow2.f32 %v7044_v49  ;;  %v17773_v55 = vpop.eup %14516 }
 0xa52   : > { %v5569_v32 = vpop.f32.mrb[172].mxu0  ;;  %v6928_v16 = vpop.xlane.xlu0 %6927  ;;  %7095 = vadd.xlane.f32.xlu0 %v7094_v12  ;;  %v7106_v6 = vsel %vm2531_vm4, %v17773_v55, 0.0 }
 0xa53   : > { %v7006_v47 = vsub.f32 %v17599_v25, %v6928_v16  ;;  %v13331_v44 = vpop.f32.mrb[173].mxu0  ;;  %v17778_v4 = vpop.eup %14518 }
 0xa54   : > { %v5572_v59 = vpop.f32.mrb[174].mxu0  ;;  %v6931_v40 = vpop.xlane.xlu1 %6930  ;;  %7098 = vadd.xlane.f32.xlu1 %v7097_v1  ;;  %v7109_v63 = vsel %vm2531_vm4, %v17778_v4, 0.0  ;;  %v20095_v44 = vld [vmem:[#allocation90_spill] sm:$0xff] }
 0xa55   : > { %v7046_v23 = vmul.f32 1.442695, %v7006_v47  ;;  %v5642_v52 = vpack.c.bf16 %v5572_v59, %v5569_v32  ;;  %v7007_v51 = vsub.f32 %v17603_v9, %v6931_v40  ;;  %v13332_v50 = vpop.f32.mrb[175].mxu0  ;;  %v20091_v9 = vld [vmem:[#allocation96_spill] sm:$0xff]  ;;  %v20098_v40 = vld [vmem:[#allocation97_spill] sm:$0xff] }
 0xa56   : > { %7101 = vadd.xlane.f32.xlu0 %v7100_v37  ;;  %v20093_v46 = vpack.c.bf16 %v20091_v9, %v20092_v20  ;;  %v20100_v20 = vld [vmem:[#allocation81_spill] sm:$0xff] }
 0xa57   : > { %14524 = vpow2.f32 %v7046_v23  ;;  %v7048_v25 = vmul.f32 1.442695, %v7007_v51  ;;  %13371 = vmatprep.mubr.msk.bf16.mxu0 %vm1778_vm3, %v5642_v52 }
 0xa58   : > { %13372 = vmatmul.mubr.msk.bf16.gmra.mrb[204].mxu0 %vm1778_vm3, %v20090_v7  ;;  %7104 = vadd.xlane.f32.xlu1 %v7103_v31 }
 0xa59   : > { %14526 = vpow2.f32 %v7048_v25  ;;  %13379 = vmatprep.mubr.msk.bf16.mxu0 %vm1778_vm3, %v20093_v46  ;;  %v17790_v11 = vpop.eup %14520  ;;  %v20101_v46 = vld [vmem:[#allocation80_spill] sm:$0xff] }
 0xa5a   : > { %v6934_v27 = vpop.xlane.xlu0 %6933  ;;  %7107 = vadd.xlane.f32.xlu0 %v7106_v6  ;;  %v7112_v32 = vsel %vm2531_vm4, %v17790_v11, 0.0  ;;  %v20102_v6 = vpack.c.bf16 %v20100_v20, %v20101_v46 }
 0xa5b   : > { %v7008_v54 = vsub.f32 %v17607_v45, %v6934_v27  ;;  %v17795_v30 = vpop.eup %14522  ;;  %v20094_v45 = vld [vmem:[#allocation79_spill] sm:$0xff] }
 0xa5c   : > { %v6937_v49 = vpop.xlane.xlu1 %6936  ;;  %7110 = vadd.xlane.f32.xlu1 %v7109_v63  ;;  %v7115_v47 = vsel %vm2531_vm4, %v17795_v30, 0.0  ;;  %v20096_v1 = vpack.c.bf16 %v20094_v45, %v20095_v44 }
 0xa5d   : > { %v7050_v15 = vmul.f32 1.442695, %v7008_v54  ;;  %v7009_v12 = vsub.f32 %v17611_v36, %v6937_v49  ;;  %v20097_v36 = vld [vmem:[#allocation98_spill] sm:$0xff]  ;;  %v20104_v54 = vld [vmem:[#allocation99_spill] sm:$0xff] }
 0xa5e   : > { %7113 = vadd.xlane.f32.xlu0 %v7112_v32  ;;  %v20099_v23 = vpack.c.bf16 %v20097_v36, %v20098_v40  ;;  %v20107_v36 = vld [vmem:[#allocation83_spill] sm:$0xff] }
 0xa5f   : > { %14528 = vpow2.f32 %v7050_v15  ;;  %v7052_v16 = vmul.f32 1.442695, %v7009_v12 }
 0xa60   : > { %13380 = vmatmul.mubr.msk.bf16.vlgmr.msra.gmra.mrb[176].mxu0 %vm1778_vm3, %v20096_v1  ;;  %7116 = vadd.xlane.f32.xlu1 %v7115_v47  ;;  %v20106_v1 = vld [vmem:[#allocation85_spill] sm:$0xff] }
 0xa61   : > { %v17806_v59 = vpop.eup %14524  ;;  %14530 = vpow2.f32 %v7052_v16  ;;  %13508 = vmatpush3.bf16.msra.mxu0 %v17702_v60  ;;  %13383 = vmatprep.mubr.msk.bf16.mxu0 %vm1778_vm3, %v20099_v23  ;;  %v20108_v40 = vpack.c.bf16 %v20106_v1, %v20107_v36 }
 0xa62   : > { %v6940_v52 = vpop.xlane.xlu0 %6939  ;;  %v7118_v51 = vsel %vm2531_vm4, %v17806_v59, 0.0  ;;  %13519 = vmatprep.subr.bf16.mxu0 %v19925_v24 }
 0xa63   : > { %v17816_v50 = vpop.eup %14526  ;;  %v7010_v37 = vsub.f32 %v17615_v19, %v6940_v52  ;;  %7119 = vadd.xlane.f32.xlu0 %v7118_v51  ;;  %v20103_v19 = vld [vmem:[#allocation100_spill] sm:$0xff]  ;;  %v20110_v52 = vld [vmem:[#allocation101_spill] sm:$0xff] }
 0xa64   : > { %v6943_v25 = vpop.xlane.xlu1 %6942  ;;  %v7121_v60 = vsel %vm2531_vm4, %v17816_v50, 0.0  ;;  %v20105_v63 = vpack.c.bf16 %v20103_v19, %v20104_v54  ;;  %v20113_v19 = vld [vmem:[#allocation86_spill] sm:$0xff] }
 0xa65   : > { %v7054_v31 = vmul.f32 1.442695, %v7010_v37  ;;  %v7011_v7 = vsub.f32 %v17619_v8, %v6943_v25  ;;  %7122 = vadd.xlane.f32.xlu1 %v7121_v60 }
 0xa67   : > { %14532 = vpow2.f32 %v7054_v31  ;;  %v7056_v9 = vmul.f32 1.442695, %v7011_v7 }
 0xa68   : > { %13384 = vmatmul.mubr.msk.bf16.gmra.mrb[180].mxu0 %vm1778_vm3, %v20102_v6  ;;  %v20112_v6 = vld [vmem:[#allocation82_spill] sm:$0xff] }
 0xa69   : > { %v17826_v27 = vpop.eup %14528  ;;  %14534 = vpow2.f32 %v7056_v9  ;;  %13387 = vmatprep.mubr.msk.bf16.mxu0 %vm1778_vm3, %v20105_v63  ;;  %v20114_v54 = vpack.c.bf16 %v20112_v6, %v20113_v19 }
 0xa6a   : > { %v6946_v49 = vpop.xlane.xlu0 %6945  ;;  %v7124_v8 = vsel %vm2531_vm4, %v17826_v27, 0.0 }
 0xa6b   : > { %v17834_v15 = vpop.eup %14530  ;;  %v7012_v12 = vsub.f32 %v17624_v48, %v6946_v49  ;;  %7125 = vadd.xlane.f32.xlu0 %v7124_v8  ;;  %v20109_v48 = vld [vmem:[#allocation102_spill] sm:$0xff]  ;;  %v20116_v49 = vld [vmem:[#allocation103_spill] sm:$0xff] }
 0xa6c   : > { %v6949_v32 = vpop.xlane.xlu1 %6948  ;;  %v7127_v16 = vsel %vm2531_vm4, %v17834_v15, 0.0  ;;  %v20111_v51 = vpack.c.bf16 %v20109_v48, %v20110_v52  ;;  %v20119_v48 = vld [vmem:[#allocation87_spill] sm:$0xff] }
 0xa6d   : > { %v7058_v47 = vmul.f32 1.442695, %v7012_v12  ;;  %v7013_v45 = vsub.f32 %v17629_v13, %v6949_v32  ;;  %7128 = vadd.xlane.f32.xlu1 %v7127_v16 }
 0xa6f   : > { %14536 = vpow2.f32 %v7058_v47  ;;  %v7060_v44 = vmul.f32 1.442695, %v7013_v45 }
 0xa70   : > { %13388 = vmatmul.mubr.msk.bf16.gmra.mrb[184].mxu0 %vm1778_vm3, %v20108_v40  ;;  %v20118_v40 = vld [vmem:[#allocation84_spill] sm:$0xff] }
 0xa71   : > { %v17844_v23 = vpop.eup %14532  ;;  %14538 = vpow2.f32 %v7060_v44  ;;  %13391 = vmatprep.mubr.msk.bf16.mxu0 %vm1778_vm3, %v20111_v51  ;;  %v20120_v52 = vpack.c.bf16 %v20118_v40, %v20119_v48 }
 0xa72   : > { %v6952_v37 = vpop.xlane.xlu0 %6951  ;;  %v7130_v13 = vsel %vm2531_vm4, %v17844_v23, 0.0 }
 0xa73   : > { %v17852_v25 = vpop.eup %14534  ;;  %v7014_v60 = vsub.f32 %v17634_v10, %v6952_v37  ;;  %7131 = vadd.xlane.f32.xlu0 %v7130_v13  ;;  %v20115_v10 = vld [vmem:[#allocation104_spill] sm:$0xff]  ;;  %v20122_v37 = vld [vmem:[#allocation105_spill] sm:$0xff] }
 0xa74   : > { %v6955_v31 = vpop.xlane.xlu1 %6954  ;;  %v7133_v7 = vsel %vm2531_vm4, %v17852_v25, 0.0  ;;  %v20117_v8 = vpack.c.bf16 %v20115_v10, %v20116_v49  ;;  %v20125_v10 = vld [vmem:[#allocation88_spill] sm:$0xff] }
 0xa75   : > { %v7062_v9 = vmul.f32 1.442695, %v7014_v60  ;;  %v7015_v20 = vsub.f32 %v17638_v35, %v6955_v31  ;;  %7134 = vadd.xlane.f32.xlu1 %v7133_v7 }
 0xa77   : > { %14540 = vpow2.f32 %v7062_v9  ;;  %v7064_v46 = vmul.f32 1.442695, %v7015_v20 }
 0xa78   : > { %13392 = vmatmul.mubr.msk.bf16.gmra.mrb[188].mxu0 %vm1778_vm3, %v20114_v54  ;;  %v20124_v54 = vld [vmem:[#allocation89_spill] sm:$0xff] }
 0xa79   : > { %v17862_v63 = vpop.eup %14536  ;;  %14542 = vpow2.f32 %v7064_v46  ;;  %13395 = vmatprep.mubr.msk.bf16.mxu0 %vm1778_vm3, %v20117_v8  ;;  %v20126_v49 = vpack.c.bf16 %v20124_v54, %v20125_v10 }
 0xa7a   : > { %v6958_v12 = vpop.xlane.xlu0 %6957  ;;  %v7136_v35 = vsel %vm2531_vm4, %v17862_v63, 0.0 }
 0xa7b   : > { %v17870_v32 = vpop.eup %14538  ;;  %v7016_v16 = vsub.f32 %v17642_v34, %v6958_v12  ;;  %7137 = vadd.xlane.f32.xlu0 %v7136_v35  ;;  %v20121_v34 = vld [vmem:[#allocation106_spill] sm:$0xff]  ;;  %v20128_v12 = vld [vmem:[#allocation107_spill] sm:$0xff] }
 0xa7c   : > { %v6961_v47 = vpop.xlane.xlu1 %6960  ;;  %v7139_v45 = vsel %vm2531_vm4, %v17870_v32, 0.0  ;;  %v20123_v13 = vpack.c.bf16 %v20121_v34, %v20122_v37  ;;  %v20131_v34 = vld [vmem:[#allocation91_spill] sm:$0xff] }
 0xa7d   : > { %v7066_v44 = vmul.f32 1.442695, %v7016_v16  ;;  %v7017_v1 = vsub.f32 %v17646_v18, %v6961_v47  ;;  %7140 = vadd.xlane.f32.xlu1 %v7139_v45 }
 0xa7f   : > { %14544 = vpow2.f32 %v7066_v44  ;;  %v7068_v36 = vmul.f32 1.442695, %v7017_v1 }
 0xa80   : > { %13396 = vmatmul.mubr.msk.bf16.gmra.mrb[192].mxu0 %vm1778_vm3, %v20120_v52  ;;  %v20130_v52 = vld [vmem:[#allocation92_spill] sm:$0xff] }
 0xa81   : > { %v17880_v51 = vpop.eup %14540  ;;  %14546 = vpow2.f32 %v7068_v36  ;;  %13399 = vmatprep.mubr.msk.bf16.mxu0 %vm1778_vm3, %v20123_v13  ;;  %v20132_v37 = vpack.c.bf16 %v20130_v52, %v20131_v34 }
 0xa82   : > { %v6964_v60 = vpop.xlane.xlu0 %6963  ;;  %v7142_v18 = vsel %vm2531_vm4, %v17880_v51, 0.0 }
 0xa83   : > { %v17888_v31 = vpop.eup %14542  ;;  %v7018_v7 = vsub.f32 %v17650_v57, %v6964_v60  ;;  %7143 = vadd.xlane.f32.xlu1 %v7142_v18  ;;  %v20127_v57 = vld [vmem:[#allocation108_spill] sm:$0xff]  ;;  %v20134_v60 = vld [vmem:[#allocation109_spill] sm:$0xff] }
 0xa84   : > { %v6967_v9 = vpop.xlane.xlu1 %6966  ;;  %v7145_v20 = vsel %vm2531_vm4, %v17888_v31, 0.0  ;;  %v20129_v35 = vpack.c.bf16 %v20127_v57, %v20128_v12  ;;  %v20137_v57 = vld [vmem:[#allocation93_spill] sm:$0xff] }
 0xa85   : > { %v7070_v46 = vmul.f32 1.442695, %v7018_v7  ;;  %v7019_v6 = vsub.f32 %v17654_v5, %v6967_v9  ;;  %7146 = vadd.xlane.f32.xlu0 %v7145_v20 }
 0xa87   : > { %14548 = vpow2.f32 %v7070_v46  ;;  %v7072_v19 = vmul.f32 1.442695, %v7019_v6 }
 0xa88   : > { %13400 = vmatmul.mubr.msk.bf16.gmra.mrb[196].mxu0 %vm1778_vm3, %v20126_v49  ;;  %v20136_v49 = vld [vmem:[#allocation94_spill] sm:$0xff] }
 0xa89   : > { %v17898_v8 = vpop.eup %14544  ;;  %14550 = vpow2.f32 %v7072_v19  ;;  %13403 = vmatprep.mubr.msk.bf16.mxu0 %vm1778_vm3, %v20129_v35  ;;  %v20138_v12 = vpack.c.bf16 %v20136_v49, %v20137_v57 }
 0xa8a   : > { %v6970_v16 = vpop.xlane.xlu0 %6969  ;;  %v7148_v5 = vsel %vm2531_vm4, %v17898_v8, 0.0 }
 0xa8b   : > { %v17906_v47 = vpop.eup %14546  ;;  %v7020_v45 = vsub.f32 %v17658_v33, %v6970_v16  ;;  %7149 = vadd.xlane.f32.xlu0 %v7148_v5  ;;  %v20133_v33 = vld [vmem:[#allocation110_spill] sm:$0xff] }
 0xa8c   : > { %v6973_v44 = vpop.xlane.xlu1 %6972  ;;  %v7151_v1 = vsel %vm2531_vm4, %v17906_v47, 0.0  ;;  %v20135_v18 = vpack.c.bf16 %v20133_v33, %v20134_v60 }
 0xa8d   : > { %v7074_v36 = vmul.f32 1.442695, %v7020_v45  ;;  %v7021_v40 = vsub.f32 %v17662_v2, %v6973_v44  ;;  %7152 = vadd.xlane.f32.xlu1 %v7151_v1 }
 0xa8f   : > { %14552 = vpow2.f32 %v7074_v36  ;;  %v7076_v48 = vmul.f32 1.442695, %v7021_v40 }
 0xa90   : > { %13404 = vmatmul.mubr.msk.bf16.gmra.mrb[200].mxu0 %vm1778_vm3, %v20132_v37 }
 0xa91   : > { %v17916_v13 = vpop.eup %14548  ;;  %14554 = vpow2.f32 %v7076_v48  ;;  %13407 = vmatprep.mubr.msk.bf16.mxu0 %vm1778_vm3, %v20135_v18 }
 0xa92   : > { %v6976_v7 = vpop.xlane.xlu0 %6975  ;;  %v7154_v2 = vsel %vm2531_vm4, %v17916_v13, 0.0 }
 0xa93   : > { %v17924_v9 = vpop.eup %14550  ;;  %v7022_v20 = vsub.f32 %v17671_v56, %v6976_v7  ;;  %7155 = vadd.xlane.f32.xlu1 %v7154_v2 }
 0xa94   : > { %v6979_v46 = vpop.xlane.xlu1 %6978  ;;  %v7157_v6 = vsel %vm2531_vm4, %v17924_v9, 0.0 }
 0xa95   : > { %v7078_v19 = vmul.f32 1.442695, %v7022_v20  ;;  %v7023_v54 = vsub.f32 %v17675_v58, %v6979_v46  ;;  %7158 = vadd.xlane.f32.xlu0 %v7157_v6 }
 0xa97   : > { %14556 = vpow2.f32 %v7078_v19  ;;  %v7080_v10 = vmul.f32 1.442695, %v7023_v54 }
 0xa98   : > { %13408 = vmatmul.mubr.msk.bf16.gmra.mrb[204].mxu0 %vm1778_vm3, %v20138_v12 }
 0xa99   : > { %v17934_v35 = vpop.eup %14552  ;;  %14558 = vpow2.f32 %v7080_v10  ;;  %13509 = vmatprep.mubr.msk.bf16.mxu0 %vm15064_vm2, %v19925_v24 }
 0xa9a   : > { %v6982_v56 = vpop.xlane.xlu0 %6981  ;;  %v7160_v16 = vsel %vm2531_vm4, %v17934_v35, 0.0 }
 0xa9b   : > { %v17940_v5 = vpop.eup %14554  ;;  %v7024_v58 = vsub.f32 %v17684_v41, %v6982_v56  ;;  %7161 = vadd.xlane.f32.xlu0 %v7160_v16 }
 0xa9c   : > { %v6985_v45 = vpop.xlane.xlu1 %6984  ;;  %v7163_v44 = vsel %vm2531_vm4, %v17940_v5, 0.0 }
 0xa9d   : > { %v7082_v1 = vmul.f32 1.442695, %v7024_v58  ;;  %v7025_v36 = vsub.f32 %v17688_v17, %v6985_v45  ;;  %7164 = vadd.xlane.f32.xlu1 %v7163_v44  ;;  %v20139_v44 = vld [vmem:[#allocation68_spill] sm:$0xff] }
 0xa9f   : > { %14560 = vpow2.f32 %v7082_v1  ;;  %v7084_v40 = vmul.f32 1.442695, %v7025_v36  ;;  %v20140_v1 = vld [vmem:[#allocation32_spill] sm:$0xff]  ;;  %v20141_v36 = vld [vmem:[#allocation33_spill] sm:$0xff] }
 0xaa1   : > { %v17946_v48 = vpop.eup %14556  ;;  %14562 = vpow2.f32 %v7084_v40  ;;  %v20142_v40 = vld [vmem:[#allocation34_spill] sm:$0xff] }
 0xaa2   : > { %v6988_v52 = vpop.xlane.xlu0 %6987  ;;  %v7166_v34 = vsel %vm2531_vm4, %v17946_v48, 0.0 }
 0xaa3   : > { %v17950_v37 = vpop.eup %14558  ;;  %v7026_v41 = vsub.f32 %v17692_v3, %v6988_v52  ;;  %7167 = vadd.xlane.f32.xlu1 %v7166_v34  ;;  %v20143_v52 = vld [vmem:[#allocation35_spill] sm:$0xff]  ;;  %v20144_v34 = vld [vmem:[#allocation36_spill] sm:$0xff] }
 0xaa4   : > { %v6991_v33 = vpop.xlane.xlu1 %6990  ;;  %v7169_v60 = vsel %vm2531_vm4, %v17950_v37, 0.0 }
 0xaa5   : > { %v7086_v17 = vmul.f32 1.442695, %v7026_v41  ;;  %v7027_v18 = vsub.f32 %v17696_v14, %v6991_v33  ;;  %7170 = vadd.xlane.f32.xlu0 %v7169_v60  ;;  %v20145_v60 = vld [vmem:[#allocation37_spill] sm:$0xff] }
 0xaa7   : > { %14564 = vpow2.f32 %v7086_v17  ;;  %v7088_v7 = vmul.f32 1.442695, %v7027_v18  ;;  %v20146_v17 = vld [vmem:[#allocation38_spill] sm:$0xff] }
 0xaa9   : > { %v17956_v2 = vpop.eup %14560  ;;  %14566 = vpow2.f32 %v7088_v7  ;;  %v20147_v7 = vld [vmem:[#allocation39_spill] sm:$0xff] }
 0xaaa   : > { %v6994_v20 = vpop.xlane.xlu0 %6993  ;;  %v7172_v46 = vsel %vm2531_vm4, %v17956_v2, 0.0 }
 0xaab   : > { %v17960_v6 = vpop.eup %14562  ;;  %v7028_v3 = vsub.f32 %v17704_v29, %v6994_v20  ;;  %7173 = vadd.xlane.f32.xlu0 %v7172_v46  ;;  %v20148_v46 = vld [vmem:[#allocation40_spill] sm:$0xff] }
 0xaac   : > { %v6997_v19 = vpop.xlane.xlu1 %6996  ;;  %v7175_v54 = vsel %vm2531_vm4, %v17960_v6, 0.0 }
 0xaad   : > { %v7090_v14 = vmul.f32 1.442695, %v7028_v3  ;;  %v7029_v10 = vsub.f32 %v17708_v22, %v6997_v19  ;;  %7176 = vadd.xlane.f32.xlu1 %v7175_v54  ;;  %v20149_v19 = vld [vmem:[#allocation41_spill] sm:$0xff] }
 0xaae   : > { %v17996_v41 = vpop.permute.xlu0 %7834 }
 0xaaf   : > { %14568 = vpow2.f32 %v7090_v14  ;;  %v7092_v49 = vmul.f32 1.442695, %v7029_v10  ;;  %v20150_v14 = vld [vmem:[#allocation44_spill] sm:$0xff] }
 0xab0   : > { %v17998_v33 = vpop.permute.xlu1 %7881 }
 0xab1   : > { %v17966_v57 = vpop.eup %14564  ;;  %14570 = vpow2.f32 %v7092_v49  ;;  %v20151_v49 = vld [vmem:[#allocation45_spill] sm:$0xff] }
 0xab2   : > { %v7178_v12 = vsel %vm2531_vm4, %v17966_v57, 0.0 }
 0xab3   : > { %v17970_v56 = vpop.eup %14566  ;;  %7179 = vadd.xlane.f32.xlu1 %v7178_v12 }
 0xab4   : > { %v7181_v29 = vsel %vm2531_vm4, %v17970_v56, 0.0 }
 0xab5   : > { %7182 = vadd.xlane.f32.xlu0 %v7181_v29 }
 0xab9   : > { %v17974_v16 = vpop.eup %14568 }
 0xaba   : > { %v7184_v22 = vsel %vm2531_vm4, %v17974_v16, 0.0 }
 0xabb   : > { %v17978_v58 = vpop.eup %14570  ;;  %7185 = vadd.xlane.f32.xlu0 %v7184_v22  ;;  %v20152_v22 = vld [vmem:[#allocation48_spill] sm:$0xff] }
 0xabc   : > { %v7187_v45 = vsel %vm2531_vm4, %v17978_v58, 0.0 }
 0xabd   : > { %7188 = vadd.xlane.f32.xlu1 %v7187_v45 }
 0xace   : > { %7975 = vrot.lane.b32.xlu1 %v20139_v44, %s15066_s6 }
 0xad1   : > { %7928 = vrot.lane.b32.xlu0 %v20049_v43, %s15066_s6 }
 0xad2   : > { %8295 = vrot.lane.b32.xlu1 %v20140_v1, %s15067_s18 }
 0xad5   : > { %8297 = vrot.lane.b32.xlu0 %v20141_v36, %s15067_s18 }
 0xad6   : > { %8346 = vrot.lane.b32.xlu1 %v20142_v40, %s15067_s18 }
 0xad9   : > { %8348 = vrot.lane.b32.xlu0 %v20143_v52, %s15067_s18  ;;  %v20153_v52 = vld [vmem:[#allocation50_spill] sm:$0xff] }
 0xada   : > { %8397 = vrot.lane.b32.xlu1 %v20144_v34, %s15067_s18 }
 0xadd   : > { %8399 = vrot.lane.b32.xlu0 %v20145_v60, %s15067_s18 }
 0xade   : > { %8448 = vrot.lane.b32.xlu1 %v20146_v17, %s15067_s18  ;;  %v20154_v17 = vld [vmem:[#allocation54_spill] sm:$0xff] }
 0xadf   : > { %v7096_v18 = vpop.xlane.xlu0 %7095 }
 0xae0   : > { %14572 = vrcp.f32 %v7096_v18 }
 0xae1   : > { %8450 = vrot.lane.b32.xlu0 %v20147_v7, %s15067_s18  ;;  %v7099_v20 = vpop.xlane.xlu1 %7098 }
 0xae2   : > { %14574 = vrcp.f32 %v7099_v20  ;;  %8499 = vrot.lane.b32.xlu1 %v20148_v46, %s15067_s18 }
 0xae3   : > { %v7102_v3 = vpop.xlane.xlu0 %7101 }
 0xae4   : > { %14576 = vrcp.f32 %v7102_v3 }
 0xae5   : > { %8501 = vrot.lane.b32.xlu0 %v20149_v19, %s15067_s18  ;;  %v7105_v54 = vpop.xlane.xlu1 %7104  ;;  %v20156_v19 = vld [vmem:[#allocation63_spill] sm:$0xff] }
 0xae6   : > { %14578 = vrcp.f32 %v7105_v54  ;;  %8550 = vrot.lane.b32.xlu1 %v20150_v14, %s15067_s18 }
 0xae7   : > { %v7108_v10 = vpop.xlane.xlu0 %7107 }
 0xae8   : > { %14580 = vrcp.f32 %v7108_v10 }
 0xae9   : > { %8552 = vrot.lane.b32.xlu0 %v20151_v49, %s15067_s18  ;;  %v7111_v12 = vpop.xlane.xlu1 %7110  ;;  %v20157_v49 = vld [vmem:[#allocation59_spill] sm:$0xff] }
 0xaea   : > { %v14573_v29 = vpop.eup %14572  ;;  %14582 = vrcp.f32 %v7111_v12  ;;  %8601 = vrot.lane.b32.xlu1 %v20152_v22, %s15067_s18  ;;  %v20158_v12 = vld [vmem:[#allocation62_spill] sm:$0xff] }
 0xaeb   : > { %v7114_v45 = vpop.xlane.xlu0 %7113  ;;  %v7222_v36 = vmul.f32 %v14573_v29, %v17752_v53  ;;  %v20155_v53 = vld [vmem:[#allocation55_spill] sm:$0xff] }
 0xaec   : > { %v14575_v1 = vpop.eup %14574  ;;  %14584 = vrcp.f32 %v7114_v45 }
 0xaed   : > { %v7223_v40 = vmul.f32 %v14575_v1, %v17755_v39  ;;  %8603 = vrot.lane.b32.xlu0 %v20153_v52, %s15067_s18  ;;  %v7117_v34 = vpop.xlane.xlu1 %7116  ;;  %v20159_v1 = vld [vmem:[#allocation58_spill] sm:$0xff] }
 0xaee   : > { %v14577_v60 = vpop.eup %14576  ;;  %14586 = vrcp.f32 %v7117_v34  ;;  %8652 = vrot.lane.b32.xlu1 %v20154_v17, %s15067_s18 }
 0xaef   : > { %v7254_v18 = vpack.c.bf16 %v7223_v40, %v7222_v36  ;;  %v7224_v46 = vmul.f32 %v14577_v60, %v17763_v61  ;;  %v20162_v60 = vld [vmem:[#allocation70_spill] sm:$0xff] }
 0xaf0   : > { %v14579_v7 = vpop.eup %14578  ;;  %v7120_v20 = vpop.xlane.xlu0 %7119 }
 0xaf1   : > { %v7225_v3 = vmul.f32 %v14579_v7, %v17768_v21  ;;  %14588 = vrcp.f32 %v7120_v20  ;;  %8654 = vrot.lane.b32.xlu0 %v20155_v53, %s15067_s18  ;;  %13510 = vmatmul.mubr.msk.bf16.vlgmr.msra.gmra.mrb[208].mxu0 %vm2531_vm4, %v7254_v18  ;;  %v20163_v7 = vld [vmem:[#allocation66_spill] sm:$0xff] }
 0xaf2   : > { %v14581_v39 = vpop.eup %14580  ;;  %13520 = vmatpush3.bf16.msra.mxu0 %v17714_v28  ;;  %8756 = vrot.lane.b32.xlu1 %v20156_v19, %s15067_s18  ;;  %v7123_v54 = vpop.xlane.xlu1 %7122 }
 0xaf3   : > { %14590 = vrcp.f32 %v7123_v54  ;;  %v7255_v14 = vpack.c.bf16 %v7225_v3, %v7224_v46  ;;  %13521 = vmatprep.mubr.msk.bf16.mxu0 %vm15064_vm2, %v19925_v24  ;;  %13531 = vmatprep.subr.bf16.mxu0 %v19925_v24  ;;  %v7226_v21 = vmul.f32 %v14581_v39, %v17773_v55  ;;  %v20165_v46 = vld [vmem:[#allocation73_spill] sm:$0xff]  ;;  %v20166_v39 = vld [vmem:[#allocation74_spill] sm:$0xff] }
 0xaf4   : > { %v14583_v61 = vpop.eup %14582 }
 0xaf5   : > { %v7227_v10 = vmul.f32 %v14583_v61, %v17778_v4  ;;  %8705 = vrot.lane.b32.xlu0 %v20157_v49, %s15067_s18  ;;  %13516 = vmatmul.mubr.msk.bf16.vlgmr.msra.gmra.mrb[240].mxu1 %vm2531_vm4, %v7255_v14  ;;  %v20170_v49 = vld [vmem:[#allocation78_spill] sm:$0xff] }
 0xaf6   : > { %v14585_v28 = vpop.eup %14584  ;;  %13526 = vmatpush3.bf16.msra.mxu1 %v17700_v42  ;;  %8754 = vrot.lane.b32.xlu1 %v20158_v12, %s15067_s18  ;;  %v20160_v42 = vld [vmem:[#allocation71_spill] sm:$0xff] }
 0xaf7   : > { %v7256_v29 = vpack.c.bf16 %v7227_v10, %v7226_v21  ;;  %13527 = vmatprep.mubr.msk.bf16.mxu1 %vm15064_vm2, %v19925_v24  ;;  %13537 = vmatprep.subr.bf16.mxu1 %v19925_v24  ;;  %v7228_v4 = vmul.f32 %v14585_v28, %v17790_v11  ;;  %v20168_v21 = vld [vmem:[#allocation111_spill] sm:$0xff] }
 0xaf8   : > { %v14587_v55 = vpop.eup %14586  ;;  %v7126_v22 = vpop.xlane.xlu0 %7125 }
 0xaf9   : > { %v7229_v45 = vmul.f32 %v14587_v55, %v17795_v30  ;;  %14592 = vrcp.f32 %v7126_v22  ;;  %8703 = vrot.lane.b32.xlu0 %v20159_v1, %s15067_s18  ;;  %13522 = vmatmul.mubr.msk.bf16.vlgmr.msra.gmra.mrb[212].mxu0 %vm2531_vm4, %v7256_v29  ;;  %v20161_v30 = vld [vmem:[#allocation67_spill] sm:$0xff]  ;;  %v20171_v29 = vld [vmem:[#allocation76_spill] sm:$0xff]  ;;  %v20172_v22 = vld [vmem:[#allocation42_spill] sm:$0xff] }
 0xafa   : > { %13532 = vmatpush3.bf16.msra.mxu0 %v17718_v26  ;;  %8858 = vrot.lane.b32.xlu1 %v20160_v42, %s15067_s18  ;;  %v7129_v36 = vpop.xlane.xlu1 %7128 }
 0xafb   : > { %v14589_v40 = vpop.eup %14588  ;;  %14594 = vrcp.f32 %v7129_v36  ;;  %v7257_v52 = vpack.c.bf16 %v7229_v45, %v7228_v4  ;;  %13533 = vmatprep.mubr.msk.bf16.mxu0 %vm15064_vm2, %v19925_v24  ;;  %13543 = vmatprep.subr.bf16.mxu0 %v19925_v24  ;;  %v20174_v45 = vld [vmem:[#allocation43_spill] sm:$0xff]  ;;  %v20175_v36 = vld [vmem:[#allocation46_spill] sm:$0xff] }
 0xafc   : > { %v7230_v26 = vmul.f32 %v14589_v40, %v17806_v59  ;;  %v20164_v59 = vld [vmem:[#allocation75_spill] sm:$0xff] }
 0xafd   : > { %v14591_v11 = vpop.eup %14590  ;;  %8807 = vrot.lane.b32.xlu0 %v20161_v30, %s15067_s18  ;;  %13528 = vmatmul.mubr.msk.bf16.vlgmr.msra.gmra.mrb[244].mxu1 %vm2531_vm4, %v7257_v52  ;;  %v20177_v30 = vld [vmem:[#allocation49_spill] sm:$0xff] }
 0xafe   : > { %v7231_v34 = vmul.f32 %v14591_v11, %v17816_v50  ;;  %13538 = vmatpush3.bf16.msra.mxu1 %v17712_v62  ;;  %8856 = vrot.lane.b32.xlu1 %v20162_v60, %s15067_s18  ;;  %v20176_v11 = vld [vmem:[#allocation47_spill] sm:$0xff]  ;;  %v20178_v60 = vld [vmem:[#allocation112_spill] sm:$0xff] }
 0xaff   : > { %13539 = vmatprep.mubr.msk.bf16.mxu1 %vm15064_vm2, %v19925_v24  ;;  %13549 = vmatprep.subr.bf16.mxu1 %v19925_v24 }
 0xb00   : > { %v7132_v17 = vpop.xlane.xlu0 %7131  ;;  %v7258_v18 = vpack.c.bf16 %v7231_v34, %v7230_v26 }
 0xb01   : > { %14596 = vrcp.f32 %v7132_v17  ;;  %8805 = vrot.lane.b32.xlu0 %v20163_v7, %s15067_s18  ;;  %v20180_v7 = vld [vmem:[#allocation52_spill] sm:$0xff] }
 0xb02   : > { %8960 = vrot.lane.b32.xlu1 %v20164_v59, %s15067_s18  ;;  %13534 = vmatmul.mubr.msk.bf16.vlgmr.msra.gmra.mrb[216].mxu0 %vm2531_vm4, %v7258_v18  ;;  %v7135_v62 = vpop.xlane.xlu1 %7134 }
 0xb03   : > { %v14593_v50 = vpop.eup %14592  ;;  %13544 = vmatpush3.bf16.msra.mxu0 %v17722_v38  ;;  %14598 = vrcp.f32 %v7135_v62  ;;  %13545 = vmatprep.mubr.msk.bf16.mxu0 %vm15064_vm2, %v19925_v24  ;;  %v20167_v38 = vld [vmem:[#allocation72_spill] sm:$0xff] }
 0xb04   : > { %13555 = vmatprep.subr.bf16.mxu0 %v19925_v24  ;;  %v7232_v3 = vmul.f32 %v14593_v50, %v17826_v27  ;;  %v20181_v50 = vld [vmem:[#allocation53_spill] sm:$0xff] }
 0xb05   : > { %v14595_v20 = vpop.eup %14594  ;;  %8909 = vrot.lane.b32.xlu0 %v20165_v46, %s15067_s18 }
 0xb06   : > { %v7233_v53 = vmul.f32 %v14595_v20, %v17834_v15  ;;  %8958 = vrot.lane.b32.xlu1 %v20166_v39, %s15067_s18  ;;  %v20169_v15 = vld [vmem:[#allocation77_spill] sm:$0xff] }
 0xb08   : > { %v7138_v19 = vpop.xlane.xlu0 %7137  ;;  %v7259_v54 = vpack.c.bf16 %v7233_v53, %v7232_v3  ;;  %v20182_v3 = vld [vmem:[#allocation115_spill] sm:$0xff] }
 0xb09   : > { %14600 = vrcp.f32 %v7138_v19  ;;  %8907 = vrot.lane.b32.xlu0 %v20167_v38, %s15067_s18 }
 0xb0a   : > { %9062 = vrot.lane.b32.xlu1 %v16025_v0, %s15067_s18  ;;  %13540 = vmatmul.mubr.msk.bf16.vlgmr.msra.gmra.mrb[248].mxu1 %vm2531_vm4, %v7259_v54  ;;  %v7141_v14 = vpop.xlane.xlu1 %7140 }
 0xb0b   : > { %v14597_v61 = vpop.eup %14596  ;;  %13550 = vmatpush3.bf16.msra.mxu1 %v20168_v21  ;;  %14602 = vrcp.f32 %v7141_v14  ;;  %13551 = vmatprep.mubr.msk.bf16.mxu1 %vm15064_vm2, %v19925_v24  ;;  %v20183_v14 = vld [vmem:[#allocation113_spill] sm:$0xff] }
 0xb0c   : > { %13561 = vmatprep.subr.bf16.mxu1 %v19925_v24  ;;  %v7234_v10 = vmul.f32 %v14597_v61, %v17844_v23  ;;  %v20173_v23 = vld [vmem:[#allocation117_spill] sm:$0xff] }
 0xb0d   : > { %v14599_v27 = vpop.eup %14598  ;;  %9011 = vrot.lane.b32.xlu0 %v20169_v15, %s15067_s18 }
 0xb0e   : > { %v7235_v0 = vmul.f32 %v14599_v27, %v17852_v25  ;;  %9060 = vrot.lane.b32.xlu1 %v20170_v49, %s15067_s18 }
 0xb10   : > { %v7144_v28 = vpop.xlane.xlu1 %7143  ;;  %v7260_v12 = vpack.c.bf16 %v7235_v0, %v7234_v10 }
 0xb11   : > { %14604 = vrcp.f32 %v7144_v28  ;;  %9009 = vrot.lane.b32.xlu0 %v20171_v29, %s15067_s18 }
 0xb12   : > { %v7147_v55 = vpop.xlane.xlu0 %7146  ;;  %9526 = vrot.lane.b32.xlu1 %v20172_v22, %s15067_s18  ;;  %13546 = vmatmul.mubr.msk.bf16.vlgmr.msra.gmra.mrb[220].mxu0 %vm2531_vm4, %v7260_v12 }
 0xb13   : > { %v14601_v4 = vpop.eup %14600  ;;  %14606 = vrcp.f32 %v7147_v55  ;;  %13556 = vmatpush3.bf16.msra.mxu0 %v20173_v23  ;;  %13557 = vmatprep.mubr.msk.bf16.mxu0 %vm15064_vm2, %v19925_v24 }
 0xb14   : > { %13567 = vmatprep.subr.bf16.mxu0 %v19925_v24  ;;  %v7236_v1 = vmul.f32 %v14601_v4, %v17862_v63 }
 0xb15   : > { %v14603_v25 = vpop.eup %14602  ;;  %9479 = vrot.lane.b32.xlu0 %v20174_v45, %s15067_s18 }
 0xb16   : > { %v7237_v42 = vmul.f32 %v14603_v25, %v17870_v32  ;;  %9620 = vrot.lane.b32.xlu1 %v20175_v36, %s15067_s18  ;;  %v20179_v32 = vld [vmem:[#allocation51_spill] sm:$0xff] }
 0xb18   : > { %v7150_v40 = vpop.xlane.xlu0 %7149  ;;  %v7261_v52 = vpack.c.bf16 %v7237_v42, %v7236_v1  ;;  %v14208_v42 = vld [vmem:[%s15429_s8 + $0x20] sm:$0xff]  }
 0xb19   : > { %14608 = vrcp.f32 %v7150_v40  ;;  %9573 = vrot.lane.b32.xlu0 %v20176_v11, %s15067_s18 }
 0xb1a   : > { %9714 = vrot.lane.b32.xlu1 %v20177_v30, %s15067_s18  ;;  %13552 = vmatmul.mubr.msk.bf16.vlgmr.msra.gmra.mrb[252].mxu1 %vm2531_vm4, %v7261_v52  ;;  %v7153_v26 = vpop.xlane.xlu1 %7152 }
 0xb1b   : > { %v14605_v34 = vpop.eup %14604  ;;  %13562 = vmatpush3.bf16.msra.mxu1 %v20178_v60  ;;  %14610 = vrcp.f32 %v7153_v26  ;;  %13563 = vmatprep.mubr.msk.bf16.mxu1 %vm15064_vm2, %v19925_v24  ;;  %v14209_v26 = vld [vmem:[%s15429_s8 + $0x28] sm:$0xff]  }
 0xb1c   : > { %13573 = vmatprep.subr.bf16.mxu1 %v19925_v24  ;;  %v7238_v17 = vmul.f32 %v14605_v34, %v17880_v51 }
 0xb1d   : > { %v14607_v63 = vpop.eup %14606  ;;  %9667 = vrot.lane.b32.xlu0 %v20179_v32, %s15067_s18 }
 0xb1e   : > { %v7239_v18 = vmul.f32 %v14607_v63, %v17888_v31  ;;  %9808 = vrot.lane.b32.xlu1 %v20180_v7, %s15067_s18 }
 0xb20   : > { %v7156_v59 = vpop.xlane.xlu1 %7155  ;;  %v7262_v62 = vpack.c.bf16 %v7239_v18, %v7238_v17 }
 0xb21   : > { %14612 = vrcp.f32 %v7156_v59  ;;  %9761 = vrot.lane.b32.xlu0 %v20181_v50, %s15067_s18 }
 0xb22   : > { %v7159_v20 = vpop.xlane.xlu0 %7158  ;;  %13558 = vmatmul.mubr.msk.bf16.vlgmr.msra.gmra.mrb[224].mxu0 %vm2531_vm4, %v7262_v62 }
 0xb23   : > { %v14609_v46 = vpop.eup %14608  ;;  %14614 = vrcp.f32 %v7159_v20  ;;  %13568 = vmatpush3.bf16.msra.mxu0 %v20182_v3  ;;  %13569 = vmatprep.mubr.msk.bf16.mxu0 %vm15064_vm2, %v19925_v24 }
 0xb24   : > { %13579 = vmatprep.subr.bf16.mxu0 %v19925_v24  ;;  %v7240_v31 = vmul.f32 %v14609_v46, %v17898_v8 }
 0xb25   : > { %v14611_v51 = vpop.eup %14610 }
 0xb26   : > { %v7241_v53 = vmul.f32 %v14611_v51, %v17906_v47 }
 0xb28   : > { %v7263_v39 = vpack.c.bf16 %v7241_v53, %v7240_v31  ;;  %v7162_v19 = vpop.xlane.xlu0 %7161 }
 0xb29   : > { %14616 = vrcp.f32 %v7162_v19 }
 0xb2a   : > { %13564 = vmatmul.mubr.msk.bf16.vlgmr.msra.gmra.mrb[0].mxu1 %vm2531_vm4, %v7263_v39  ;;  %v7165_v54 = vpop.xlane.xlu1 %7164 }
 0xb2b   : > { %v14613_v38 = vpop.eup %14612  ;;  %13574 = vmatpush3.bf16.msra.mxu1 %v20183_v14  ;;  %14618 = vrcp.f32 %v7165_v54  ;;  %13575 = vmatprep.mubr.msk.bf16.mxu1 %vm15064_vm2, %v19925_v24 }
 0xb2c   : > { %13585 = vmatprep.subr.bf16.mxu1 %v19925_v24  ;;  %v7242_v8 = vmul.f32 %v14613_v38, %v17916_v13 }
 0xb2d   : > { %v14615_v61 = vpop.eup %14614 }
 0xb2e   : > { %v7243_v47 = vmul.f32 %v14615_v61, %v17924_v9 }
 0xb30   : > { %v7168_v21 = vpop.xlane.xlu1 %7167  ;;  %v7264_v27 = vpack.c.bf16 %v7243_v47, %v7242_v8 }
 0xb31   : > { %14620 = vrcp.f32 %v7168_v21 }
 0xb32   : > { %v7171_v15 = vpop.xlane.xlu0 %7170  ;;  %13570 = vmatmul.mubr.msk.bf16.vlgmr.msra.gmra.mrb[228].mxu0 %vm2531_vm4, %v7264_v27 }
 0xb33   : > { %v14617_v10 = vpop.eup %14616  ;;  %14622 = vrcp.f32 %v7171_v15  ;;  %13580 = vmatpush3.bf16.msra.mxu0 %v17996_v41  ;;  %13581 = vmatprep.mubr.msk.bf16.mxu0 %vm15064_vm2, %v19925_v24 }
 0xb34   : > { %13591 = vmatprep.subr.bf16.mxu0 %v19925_v24  ;;  %v7244_v13 = vmul.f32 %v14617_v10, %v17934_v35 }
 0xb35   : > { %v14619_v0 = vpop.eup %14618 }
 0xb36   : > { %v7245_v9 = vmul.f32 %v14619_v0, %v17940_v5 }
 0xb38   : > { %v7265_v49 = vpack.c.bf16 %v7245_v9, %v7244_v13  ;;  %v7174_v28 = vpop.xlane.xlu0 %7173 }
 0xb39   : > { %14624 = vrcp.f32 %v7174_v28 }
 0xb3a   : > { %13576 = vmatmul.mubr.msk.bf16.vlgmr.msra.gmra.mrb[4].mxu1 %vm2531_vm4, %v7265_v49  ;;  %v7177_v12 = vpop.xlane.xlu1 %7176 }
 0xb3b   : > { %v14621_v29 = vpop.eup %14620  ;;  %13586 = vmatpush3.bf16.msra.mxu1 %v17998_v33  ;;  %14626 = vrcp.f32 %v7177_v12  ;;  %13587 = vmatprep.mubr.msk.bf16.mxu1 %vm15064_vm2, %v19925_v24 }
 0xb3c   : > { %13597 = vmatprep.subr.bf16.mxu1 %v19925_v24  ;;  %v7246_v35 = vmul.f32 %v14621_v29, %v17946_v48 }
 0xb3d   : > { %v14623_v41 = vpop.eup %14622 }
 0xb3e   : > { %v7247_v5 = vmul.f32 %v14623_v41, %v17950_v37 }
 0xb40   : > { %v7180_v55 = vpop.xlane.xlu1 %7179  ;;  %v7266_v22 = vpack.c.bf16 %v7247_v5, %v7246_v35 }
 0xb41   : > { %14628 = vrcp.f32 %v7180_v55 }
 0xb42   : > { %v7183_v4 = vpop.xlane.xlu0 %7182  ;;  %13582 = vmatmul.mubr.msk.bf16.vlgmr.msra.gmra.mrb[232].mxu0 %vm2531_vm4, %v7266_v22 }
 0xb43   : > { %v14625_v23 = vpop.eup %14624  ;;  %14630 = vrcp.f32 %v7183_v4  ;;  %13593 = vmatprep.mubr.msk.bf16.mxu0 %vm15064_vm2, %v19925_v24 }
 0xb44   : > { %v7248_v25 = vmul.f32 %v14625_v23, %v17956_v2 }
 0xb45   : > { %v14627_v33 = vpop.eup %14626 }
 0xb46   : > { %v7249_v45 = vmul.f32 %v14627_v33, %v17960_v6 }
 0xb48   : > { %v7267_v48 = vpack.c.bf16 %v7249_v45, %v7248_v25  ;;  %v7186_v1 = vpop.xlane.xlu0 %7185 }
 0xb49   : > { %14632 = vrcp.f32 %v7186_v1 }
 0xb4a   : > { %13588 = vmatmul.mubr.msk.bf16.vlgmr.msra.gmra.mrb[8].mxu1 %vm2531_vm4, %v7267_v48  ;;  %v7189_v37 = vpop.xlane.xlu1 %7188 }
 0xb4b   : > { %v14629_v36 = vpop.eup %14628  ;;  %14634 = vrcp.f32 %v7189_v37  ;;  %13599 = vmatprep.mubr.msk.bf16.mxu1 %vm15064_vm2, %v19925_v24 }
 0xb4c   : > { %v7929_v40 = vpop.permute.xlu0 %7928  ;;  %v7250_v2 = vmul.f32 %v14629_v36, %v17966_v57 }
 0xb4d   : > { %v14631_v52 = vpop.eup %14630  ;;  %13592 = vmatpush3.bf16.msra.mxu0 %v7929_v40 }
 0xb4e   : > { %v7251_v6 = vmul.f32 %v14631_v52, %v17970_v56  ;;  %v7976_v11 = vpop.permute.xlu1 %7975  ;;  %13603 = vmatprep.subr.bf16.mxu0 %v14208_v42 }
 0xb4f   : > { %13598 = vmatpush3.bf16.msra.mxu1 %v7976_v11 }
 0xb50   : > { %v7268_v30 = vpack.c.bf16 %v7251_v6, %v7250_v2  ;;  %13639 = vmatprep.subr.bf16.mxu1 %v19925_v24  ;;  %v8298_v57 = vpop.permute.xlu0 %8297 }
 0xb51   : > { %v8303_v17 = vsel %vm1778_vm3, %v8298_v57, 0 }
 0xb52   : > { %13594 = vmatmul.mubr.msk.bf16.vlgmr.msra.gmra.mrb[236].mxu0 %vm2531_vm4, %v7268_v30  ;;  %v8296_v18 = vpop.permute.xlu1 %8295 }
 0xb53   : > { %v14633_v34 = vpop.eup %14632  ;;  %13604 = vmatpush3.bf16.msra.mxu0 %v14208_v42 }
 0xb54   : > { %13605 = vmatprep.subr.bf16.mxu0 %v14209_v26  ;;  %v7252_v63 = vmul.f32 %v14633_v34, %v17974_v16  ;;  %v8349_v7 = vpop.permute.xlu0 %8348 }
 0xb55   : > { %v14635_v60 = vpop.eup %14634 }
 0xb56   : > { %v7253_v32 = vmul.f32 %v14635_v60, %v17978_v58  ;;  %v8347_v16 = vpop.permute.xlu1 %8346  ;;  %v8354_v58 = vsel %vm1778_vm3, %v8349_v7, 0 }
 0xb57   : > { %13606 = vmatpush3.bf16.msra.mxu0 %v14209_v26 }
 0xb58   : > { %v7269_v56 = vpack.c.bf16 %v7253_v32, %v7252_v63  ;;  %13687 = vmatprep.subr.bf16.mxu0 %v19925_v24  ;;  %v8400_v62 = vpop.permute.xlu0 %8399 }
 0xb59   : > { %v8405_v50 = vsel %vm1778_vm3, %v8400_v62, 0 }
 0xb5a   : > { %13600 = vmatmul.mubr.msk.bf16.vlgmr.msra.gmra.mrb[12].mxu1 %vm2531_vm4, %v7269_v56  ;;  %v8398_v59 = vpop.permute.xlu1 %8397 }
 0xb5b   : > { %13640 = vmatpush3.bf16.xpose.msra.mxu1 %v8303_v17  ;;  %13641 = vmatprep.mubr.msk.bf16.mxu1 %vm15064_vm2, %v19925_v24 }
 0xb5c   : > { %13645 = vmatprep.subr.bf16.mxu1 %v19925_v24  ;;  %v8451_v46 = vpop.permute.xlu0 %8450 }
 0xb5d   : > { %v8456_v3 = vsel %vm1778_vm3, %v8451_v46, 0 }
 0xb5e   : > { %v8449_v20 = vpop.permute.xlu1 %8448 }
 0xb60   : > { %v8502_v31 = vpop.permute.xlu0 %8501 }
 0xb61   : > { %v8507_v39 = vsel %vm1778_vm3, %v8502_v31, 0 }
 0xb62   : > { %13642 = vmatmul.mubr.msk.bf16.vlgmr.msra.gmra.mrb[16].mxu1 %vm1778_vm3, %v8296_v18  ;;  %v8500_v51 = vpop.permute.xlu1 %8499 }
 0xb63   : > { %13646 = vmatpush3.bf16.xpose.msra.mxu1 %v8354_v58  ;;  %13647 = vmatprep.mubr.msk.bf16.mxu1 %vm15064_vm2, %v19925_v24 }
 0xb64   : > { %13651 = vmatprep.subr.bf16.mxu1 %v19925_v24  ;;  %v8553_v54 = vpop.permute.xlu0 %8552 }
 0xb65   : > { %v8558_v38 = vsel %vm1778_vm3, %v8553_v54, 0 }
 0xb66   : > { %v8551_v53 = vpop.permute.xlu1 %8550 }
 0xb68   : > { %v8604_v61 = vpop.permute.xlu0 %8603 }
 0xb69   : > { %v8609_v8 = vsel %vm1778_vm3, %v8604_v61, 0 }
 0xb6a   : > { %13648 = vmatmul.mubr.msk.bf16.vlgmr.msra.gmra.mrb[20].mxu1 %vm1778_vm3, %v8347_v16  ;;  %v8602_v19 = vpop.permute.xlu1 %8601 }
 0xb6b   : > { %13652 = vmatpush3.bf16.xpose.msra.mxu1 %v8405_v50  ;;  %13653 = vmatprep.mubr.msk.bf16.mxu1 %vm15064_vm2, %v19925_v24 }
 0xb6c   : > { %13657 = vmatprep.subr.bf16.mxu1 %v19925_v24  ;;  %v8655_v21 = vpop.permute.xlu0 %8654 }
 0xb6d   : > { %v8660_v15 = vsel %vm1778_vm3, %v8655_v21, 0 }
 0xb6e   : > { %v8653_v14 = vpop.permute.xlu1 %8652 }
 0xb70   : > { %v8706_v48 = vpop.permute.xlu0 %8705 }
 0xb71   : > { %v8711_v40 = vsel %vm1778_vm3, %v8706_v48, 0 }
 0xb72   : > { %13654 = vmatmul.mubr.msk.bf16.vlgmr.msra.gmra.mrb[24].mxu1 %vm1778_vm3, %v8398_v59  ;;  %v8757_v47 = vpop.permute.xlu1 %8756 }
 0xb73   : > { %13658 = vmatpush3.bf16.xpose.msra.mxu1 %v8456_v3  ;;  %13659 = vmatprep.mubr.msk.bf16.mxu1 %vm15064_vm2, %v19925_v24  ;;  %v8762_v0 = vsel %vm1778_vm3, %v8757_v47, 0 }
 0xb74   : > { %13663 = vmatprep.subr.bf16.mxu1 %v19925_v24 }
 0xb76   : > { %v8755_v27 = vpop.permute.xlu1 %8754 }
 0xb7a   : > { %13660 = vmatmul.mubr.msk.bf16.vlgmr.msra.gmra.mrb[28].mxu1 %vm1778_vm3, %v8449_v20  ;;  %v8859_v10 = vpop.permute.xlu1 %8858 }
 0xb7b   : > { %13664 = vmatpush3.bf16.xpose.msra.mxu1 %v8507_v39  ;;  %13665 = vmatprep.mubr.msk.bf16.mxu1 %vm15064_vm2, %v19925_v24  ;;  %v8864_v9 = vsel %vm1778_vm3, %v8859_v10, 0 }
 0xb7c   : > { %13669 = vmatprep.subr.bf16.mxu1 %v19925_v24 }
 0xb7e   : > { %v8857_v13 = vpop.permute.xlu1 %8856 }
 0xb82   : > { %13666 = vmatmul.mubr.msk.bf16.vlgmr.msra.gmra.mrb[32].mxu1 %vm1778_vm3, %v8500_v51  ;;  %v8961_v49 = vpop.permute.xlu1 %8960 }
 0xb83   : > { %13670 = vmatpush3.bf16.xpose.msra.mxu1 %v8558_v38  ;;  %13671 = vmatprep.mubr.msk.bf16.mxu1 %vm15064_vm2, %v19925_v24  ;;  %v8966_v12 = vsel %vm1778_vm3, %v8961_v49, 0 }
 0xb84   : > { %13675 = vmatprep.subr.bf16.mxu1 %v19925_v24 }
 0xb86   : > { %v8959_v28 = vpop.permute.xlu1 %8958 }
 0xb8a   : > { %13672 = vmatmul.mubr.msk.bf16.vlgmr.msra.gmra.mrb[36].mxu1 %vm1778_vm3, %v8551_v53  ;;  %v9063_v29 = vpop.permute.xlu1 %9062 }
 0xb8b   : > { %13676 = vmatpush3.bf16.xpose.msra.mxu1 %v8609_v8  ;;  %13677 = vmatprep.mubr.msk.bf16.mxu1 %vm15064_vm2, %v19925_v24  ;;  %v9068_v41 = vsel %vm1778_vm3, %v9063_v29, 0 }
 0xb8c   : > { %13681 = vmatprep.subr.bf16.mxu1 %v19925_v24 }
 0xb8e   : > { %v9061_v35 = vpop.permute.xlu1 %9060 }
 0xb92   : > { %13678 = vmatmul.mubr.msk.bf16.vlgmr.msra.gmra.mrb[40].mxu1 %vm1778_vm3, %v8602_v19  ;;  %v9527_v5 = vpop.permute.xlu1 %9526 }
 0xb93   : > { %13682 = vmatpush3.bf16.xpose.msra.mxu1 %v8660_v15  ;;  %13683 = vmatprep.mubr.msk.bf16.mxu1 %vm15064_vm2, %v19925_v24 }
 0xb94   : > { %13693 = vmatprep.subr.bf16.mxu1 %v19925_v24 }
 0xb9a   : > { %13684 = vmatmul.mubr.msk.bf16.vlgmr.msra.gmra.mrb[44].mxu1 %vm1778_vm3, %v8653_v14 }
 0xb9b   : > { %13694 = vmatpush3.bf16.xpose.msra.mxu1 %v8762_v0  ;;  %13695 = vmatprep.mubr.msk.bf16.mxu1 %vm15064_vm2, %v19925_v24 }
 0xb9c   : > { %13705 = vmatprep.subr.bf16.mxu1 %v19925_v24 }
 0xba2   : > { %13696 = vmatmul.mubr.msk.bf16.vlgmr.msra.gmra.mrb[48].mxu1 %vm1778_vm3, %v8755_v27 }
 0xba3   : > { %13706 = vmatpush3.bf16.xpose.msra.mxu1 %v8864_v9  ;;  %13707 = vmatprep.mubr.msk.bf16.mxu1 %vm15064_vm2, %v19925_v24 }
 0xba4   : > { %13717 = vmatprep.subr.bf16.mxu1 %v19925_v24 }
 0xbaa   : > { %13708 = vmatmul.mubr.msk.bf16.vlgmr.msra.gmra.mrb[52].mxu1 %vm1778_vm3, %v8857_v13 }
 0xbab   : > { %13718 = vmatpush3.bf16.xpose.msra.mxu1 %v8966_v12  ;;  %13719 = vmatprep.mubr.msk.bf16.mxu1 %vm15064_vm2, %v19925_v24 }
 0xbac   : > { %13729 = vmatprep.subr.bf16.mxu1 %v19925_v24 }
 0xbb2   : > { %13720 = vmatmul.mubr.msk.bf16.vlgmr.msra.gmra.mrb[56].mxu1 %vm1778_vm3, %v8959_v28 }
 0xbb3   : > { %13730 = vmatpush3.bf16.xpose.msra.mxu1 %v9068_v41  ;;  %13731 = vmatprep.mubr.msk.bf16.mxu1 %vm15064_vm2, %v19925_v24 }
 0xbb4   : > { %13741 = vmatprep.subr.bf16.mxu1 %v19925_v24 }
 0xbba   : > { %13732 = vmatmul.mubr.msk.bf16.vlgmr.msra.gmra.mrb[60].mxu1 %vm1778_vm3, %v9061_v35 }
 0xbbb   : > { %13742 = vmatpush3.bf16.msra.mxu1 %v9527_v5  ;;  %13743 = vmatprep.mubr.msk.bf16.mxu1 %vm15064_vm2, %v19925_v24 }
 0xbbc   : > { %13753 = vmatprep.subr.bf16.mxu1 %v19925_v24 }
 0xbc4   : > { %v7310_v55 = vpop.f32.mrb[208].mxu0 }
 0xbc5   : > { %v13511_v22 = vpop.f32.mrb[209].mxu0 }
 0xbc6   : > { %v7313_v4 = vpop.f32.mrb[210].mxu0 }
 0xbc7   : > { %v8026_v23 = vpack.c.bf16 %v7313_v4, %v7310_v55  ;;  %v13512_v33 = vpop.f32.mrb[211].mxu0 }
 0xbc8   : > { %v7357_v25 = vpop.f32.mrb[240].mxu1 }
 0xbc9   : > { %v13517_v45 = vpop.f32.mrb[241].mxu1  ;;  %13607 = vmatprep.mubr.msk.bf16.mxu0 %vm1778_vm3, %v8026_v23 }
 0xbca   : > { %v7360_v1 = vpop.f32.mrb[242].mxu1 }
 0xbcb   : > { %v8027_v37 = vpack.c.bf16 %v7360_v1, %v7357_v25  ;;  %v13518_v42 = vpop.f32.mrb[243].mxu1 }
 0xbcc   : > { %v7404_v36 = vpop.f32.mrb[212].mxu0 }
 0xbcd   : > { %v13523_v52 = vpop.f32.mrb[213].mxu0  ;;  %13608 = vmatmul.mubr.msk.bf16.vlgmr.msra.gmra.mrb[176].mxu0 %vm1778_vm3, %v8027_v37 }
 0xbce   : > { %13688 = vmatpush3.bf16.xpose.msra.mxu0 %v8711_v40  ;;  %v7407_v2 = vpop.f32.mrb[214].mxu0 }
 0xbcf   : > { %v8028_v6 = vpack.c.bf16 %v7407_v2, %v7404_v36  ;;  %v13524_v11 = vpop.f32.mrb[215].mxu0  ;;  %13699 = vmatprep.subr.bf16.mxu0 %v19925_v24  ;;  %v8704_v2 = vpop.permute.xlu0 %8703 }
 0xbd0   : > { %v7451_v30 = vpop.f32.mrb[244].mxu1 }
 0xbd1   : > { %v13529_v26 = vpop.f32.mrb[245].mxu1  ;;  %13611 = vmatprep.mubr.msk.bf16.mxu0 %vm1778_vm3, %v8028_v6 }
 0xbd2   : > { %v7454_v34 = vpop.f32.mrb[246].mxu1 }
 0xbd3   : > { %v8029_v60 = vpack.c.bf16 %v7454_v34, %v7451_v30  ;;  %v13530_v63 = vpop.f32.mrb[247].mxu1  ;;  %v8808_v26 = vpop.permute.xlu0 %8807 }
 0xbd5   : > { %v7498_v32 = vpop.f32.mrb[216].mxu0  ;;  %13612 = vmatmul.mubr.msk.bf16.gmra.mrb[180].mxu0 %vm1778_vm3, %v8029_v60 }
 0xbd6   : > { %v13535_v57 = vpop.f32.mrb[217].mxu0 }
 0xbd7   : > { %v7501_v56 = vpop.f32.mrb[218].mxu0  ;;  %v8806_v57 = vpop.permute.xlu0 %8805 }
 0xbd8   : > { %v8030_v17 = vpack.c.bf16 %v7501_v56, %v7498_v32  ;;  %v13536_v18 = vpop.f32.mrb[219].mxu0 }
 0xbda   : > { %13615 = vmatprep.mubr.msk.bf16.mxu0 %vm1778_vm3, %v8030_v17 }
 0xbdd   : > { %v7545_v7 = vpop.f32.mrb[248].mxu1 }
 0xbde   : > { %v13541_v16 = vpop.f32.mrb[249].mxu1 }
 0xbdf   : > { %v7548_v58 = vpop.f32.mrb[250].mxu1 }
 0xbe0   : > { %v8031_v59 = vpack.c.bf16 %v7548_v58, %v7545_v7  ;;  %v13542_v62 = vpop.f32.mrb[251].mxu1 }
 0xbe1   : > { %v8910_v62 = vpop.permute.xlu0 %8909 }
 0xbe2   : > { %13616 = vmatmul.mubr.msk.bf16.gmra.mrb[184].mxu0 %vm1778_vm3, %v8031_v59  ;;  %v8813_v59 = vsel %vm1778_vm3, %v8808_v26, 0 }
 0xbe5   : > { %v7592_v50 = vpop.f32.mrb[220].mxu0 }
 0xbe6   : > { %v13547_v20 = vpop.f32.mrb[221].mxu0 }
 0xbe7   : > { %v7595_v46 = vpop.f32.mrb[222].mxu0 }
 0xbe8   : > { %v8032_v3 = vpack.c.bf16 %v7595_v46, %v7592_v50  ;;  %v13548_v51 = vpop.f32.mrb[223].mxu0 }
 0xbe9   : > { %v8908_v51 = vpop.permute.xlu0 %8907 }
 0xbea   : > { %13619 = vmatprep.mubr.msk.bf16.mxu0 %vm1778_vm3, %v8032_v3 }
 0xbed   : > { %v7639_v31 = vpop.f32.mrb[252].mxu1 }
 0xbee   : > { %v13553_v53 = vpop.f32.mrb[253].mxu1 }
 0xbef   : > { %v7642_v39 = vpop.f32.mrb[254].mxu1  ;;  %v8915_v53 = vsel %vm1778_vm3, %v8910_v62, 0 }
 0xbf0   : > { %v8033_v19 = vpack.c.bf16 %v7642_v39, %v7639_v31  ;;  %v13554_v54 = vpop.f32.mrb[255].mxu1 }
 0xbf1   : > { %v9012_v54 = vpop.permute.xlu0 %9011 }
 0xbf2   : > { %13620 = vmatmul.mubr.msk.bf16.gmra.mrb[188].mxu0 %vm1778_vm3, %v8033_v19 }
 0xbf5   : > { %v7686_v38 = vpop.f32.mrb[224].mxu0 }
 0xbf6   : > { %v13559_v14 = vpop.f32.mrb[225].mxu0 }
 0xbf7   : > { %v7689_v61 = vpop.f32.mrb[226].mxu0 }
 0xbf8   : > { %v8034_v8 = vpack.c.bf16 %v7689_v61, %v7686_v38  ;;  %v13560_v47 = vpop.f32.mrb[227].mxu0 }
 0xbfa   : > { %13623 = vmatprep.mubr.msk.bf16.mxu0 %vm1778_vm3, %v8034_v8 }
 0xbfd   : > { %v7733_v21 = vpop.f32.mrb[0].mxu1 }
 0xbfe   : > { %v13565_v27 = vpop.f32.mrb[1].mxu1 }
 0xbff   : > { %v7736_v15 = vpop.f32.mrb[2].mxu1  ;;  %v9010_v27 = vpop.permute.xlu0 %9009 }
 0xc00   : > { %v8035_v10 = vpack.c.bf16 %v7736_v15, %v7733_v21  ;;  %v13566_v0 = vpop.f32.mrb[3].mxu1  ;;  %v9017_v21 = vsel %vm1778_vm3, %v9012_v54, 0 }
 0xc02   : > { %13624 = vmatmul.mubr.msk.bf16.gmra.mrb[192].mxu0 %vm1778_vm3, %v8035_v10 }
 0xc05   : > { %v7780_v13 = vpop.f32.mrb[228].mxu0 }
 0xc06   : > { %v13571_v9 = vpop.f32.mrb[229].mxu0 }
 0xc07   : > { %v7783_v49 = vpop.f32.mrb[230].mxu0 }
 0xc08   : > { %v8036_v28 = vpack.c.bf16 %v7783_v49, %v7780_v13  ;;  %v13572_v12 = vpop.f32.mrb[231].mxu0 }
 0xc0a   : > { %13627 = vmatprep.mubr.msk.bf16.mxu0 %vm1778_vm3, %v8036_v28  ;;  %v9480_v28 = vpop.permute.xlu0 %9479 }
 0xc0d   : > { %v7827_v29 = vpop.f32.mrb[4].mxu1 }
 0xc0e   : > { %v13577_v41 = vpop.f32.mrb[5].mxu1 }
 0xc0f   : > { %v7830_v35 = vpop.f32.mrb[6].mxu1 }
 0xc10   : > { %v8037_v5 = vpack.c.bf16 %v7830_v35, %v7827_v29  ;;  %v13578_v55 = vpop.f32.mrb[7].mxu1 }
 0xc12   : > { %13628 = vmatmul.mubr.msk.bf16.gmra.mrb[196].mxu0 %vm1778_vm3, %v8037_v5 }
 0xc15   : > { %v7874_v22 = vpop.f32.mrb[232].mxu0 }
 0xc16   : > { %v13583_v4 = vpop.f32.mrb[233].mxu0 }
 0xc17   : > { %v7877_v23 = vpop.f32.mrb[234].mxu0 }
 0xc18   : > { %v8038_v33 = vpack.c.bf16 %v7877_v23, %v7874_v22  ;;  %v13584_v25 = vpop.f32.mrb[235].mxu0 }
 0xc1a   : > { %13631 = vmatprep.mubr.msk.bf16.mxu0 %vm1778_vm3, %v8038_v33 }
 0xc1d   : > { %v7921_v45 = vpop.f32.mrb[8].mxu1 }
 0xc1e   : > { %v13589_v48 = vpop.f32.mrb[9].mxu1 }
 0xc1f   : > { %v7924_v1 = vpop.f32.mrb[10].mxu1 }
 0xc20   : > { %v8039_v37 = vpack.c.bf16 %v7924_v1, %v7921_v45  ;;  %v13590_v42 = vpop.f32.mrb[11].mxu1 }
 0xc22   : > { %13632 = vmatmul.mubr.msk.bf16.gmra.mrb[200].mxu0 %vm1778_vm3, %v8039_v37 }
 0xc25   : > { %v7968_v36 = vpop.f32.mrb[236].mxu0 }
 0xc26   : > { %v13595_v40 = vpop.f32.mrb[237].mxu0 }
 0xc27   : > { %v7971_v52 = vpop.f32.mrb[238].mxu0 }
 0xc28   : > { %v8040_v6 = vpack.c.bf16 %v7971_v52, %v7968_v36  ;;  %v13596_v11 = vpop.f32.mrb[239].mxu0 }
 0xc2a   : > { %13635 = vmatprep.mubr.msk.bf16.mxu0 %vm1778_vm3, %v8040_v6 }
 0xc2d   : > { %v8015_v30 = vpop.f32.mrb[12].mxu1 }
 0xc2e   : > { %v13601_v34 = vpop.f32.mrb[13].mxu1 }
 0xc2f   : > { %v8018_v60 = vpop.f32.mrb[14].mxu1 }
 0xc30   : > { %v8041_v63 = vpack.c.bf16 %v8018_v60, %v8015_v30  ;;  %v13602_v32 = vpop.f32.mrb[15].mxu1 }
 0xc32   : > { %13636 = vmatmul.mubr.msk.bf16.gmra.mrb[204].mxu0 %vm1778_vm3, %v8041_v63 }
 0xc33   : > { %13689 = vmatprep.mubr.msk.bf16.mxu0 %vm15064_vm2, %v19925_v24 }
 0xc35   : > { %v18257_v56 = vpop.f32.mrb[16].mxu1 }
 0xc36   : > { %v13643_v17 = vpop.f32.mrb[17].mxu1  ;;  %v9111_v18 = vsel %vm2531_vm4, %v18257_v56, -inf }
 0xc37   : > { %9112 = vmax.xlane.f32.xlu0 %v9111_v18  ;;  %v18261_v7 = vpop.f32.mrb[18].mxu1 }
 0xc38   : > { %v13644_v16 = vpop.f32.mrb[19].mxu1  ;;  %v9114_v58 = vsel %vm2531_vm4, %v18261_v7, -inf }
 0xc39   : > { %9115 = vmax.xlane.f32.xlu1 %v9114_v58 }
 0xc3a   : > { %13690 = vmatmul.mubr.msk.bf16.vlgmr.msra.gmra.mrb[240].mxu0 %vm1778_vm3, %v8704_v2 }
 0xc3b   : > { %13700 = vmatpush3.bf16.xpose.msra.mxu0 %v8813_v59  ;;  %13701 = vmatprep.mubr.msk.bf16.mxu0 %vm15064_vm2, %v19925_v24 }
 0xc3c   : > { %13711 = vmatprep.subr.bf16.mxu0 %v19925_v24 }
 0xc3d   : > { %v18270_v50 = vpop.f32.mrb[20].mxu1 }
 0xc3e   : > { %v13649_v20 = vpop.f32.mrb[21].mxu1  ;;  %v9117_v46 = vsel %vm2531_vm4, %v18270_v50, -inf }
 0xc3f   : > { %9118 = vmax.xlane.f32.xlu0 %v9117_v46  ;;  %v18274_v3 = vpop.f32.mrb[22].mxu1 }
 0xc40   : > { %v13650_v31 = vpop.f32.mrb[23].mxu1  ;;  %v9120_v39 = vsel %vm2531_vm4, %v18274_v3, -inf }
 0xc42   : > { %13702 = vmatmul.mubr.msk.bf16.vlgmr.msra.gmra.mrb[244].mxu0 %vm1778_vm3, %v8806_v57 }
 0xc43   : > { %13712 = vmatpush3.bf16.xpose.msra.mxu0 %v8915_v53  ;;  %9121 = vmax.xlane.f32.xlu0 %v9120_v39 }
 0xc44   : > { %13713 = vmatprep.mubr.msk.bf16.mxu0 %vm15064_vm2, %v19925_v24  ;;  %13723 = vmatprep.subr.bf16.mxu0 %v19925_v24 }
 0xc45   : > { %v18283_v19 = vpop.f32.mrb[24].mxu1 }
 0xc46   : > { %v13655_v38 = vpop.f32.mrb[25].mxu1  ;;  %v9123_v14 = vsel %vm2531_vm4, %v18283_v19, -inf }
 0xc47   : > { %9124 = vmax.xlane.f32.xlu0 %v9123_v14  ;;  %v18287_v61 = vpop.f32.mrb[26].mxu1 }
 0xc48   : > { %v13656_v8 = vpop.f32.mrb[27].mxu1  ;;  %v9126_v47 = vsel %vm2531_vm4, %v18287_v61, -inf }
 0xc49   : > { %9127 = vmax.xlane.f32.xlu1 %v9126_v47 }
 0xc4a   : > { %13714 = vmatmul.mubr.msk.bf16.vlgmr.msra.gmra.mrb[248].mxu0 %vm1778_vm3, %v8908_v51 }
 0xc4b   : > { %13724 = vmatpush3.bf16.xpose.msra.mxu0 %v9017_v21  ;;  %13725 = vmatprep.mubr.msk.bf16.mxu0 %vm15064_vm2, %v19925_v24 }
 0xc4c   : > { %13735 = vmatprep.subr.bf16.mxu0 %v19925_v24 }
 0xc4d   : > { %v18296_v15 = vpop.f32.mrb[28].mxu1 }
 0xc4e   : > { %v13661_v10 = vpop.f32.mrb[29].mxu1  ;;  %v9129_v0 = vsel %vm2531_vm4, %v18296_v15, -inf }
 0xc4f   : > { %9130 = vmax.xlane.f32.xlu0 %v9129_v0  ;;  %v18300_v13 = vpop.f32.mrb[30].mxu1  ;;  %v18372_v10 = vpop.permute.xlu0 %9573 }
 0xc50   : > { %v13662_v9 = vpop.f32.mrb[31].mxu1  ;;  %v9132_v49 = vsel %vm2531_vm4, %v18300_v13, -inf  ;;  %v18374_v0 = vpop.permute.xlu1 %9620 }
 0xc51   : > { %9133 = vmax.xlane.f32.xlu1 %v9132_v49 }
 0xc52   : > { %13726 = vmatmul.mubr.msk.bf16.vlgmr.msra.gmra.mrb[252].mxu0 %vm1778_vm3, %v9010_v27 }
 0xc53   : > { %13736 = vmatpush3.bf16.msra.mxu0 %v9480_v28  ;;  %13737 = vmatprep.mubr.msk.bf16.mxu0 %vm15064_vm2, %v19925_v24  ;;  %v18376_v9 = vpop.permute.xlu0 %9667 }
 0xc54   : > { %13747 = vmatprep.subr.bf16.mxu0 %v19925_v24  ;;  %v18378_v49 = vpop.permute.xlu1 %9714 }
 0xc55   : > { %v18308_v12 = vpop.f32.mrb[32].mxu1 }
 0xc56   : > { %v13667_v29 = vpop.f32.mrb[33].mxu1  ;;  %v9135_v41 = vsel %vm2531_vm4, %v18308_v12, -inf }
 0xc57   : > { %9136 = vmax.xlane.f32.xlu0 %v9135_v41  ;;  %v18312_v35 = vpop.f32.mrb[34].mxu1  ;;  %v18380_v28 = vpop.permute.xlu0 %9761 }
 0xc58   : > { %v13668_v5 = vpop.f32.mrb[35].mxu1  ;;  %v9138_v55 = vsel %vm2531_vm4, %v18312_v35, -inf  ;;  %v18382_v29 = vpop.permute.xlu1 %9808 }
 0xc59   : > { %9139 = vmax.xlane.f32.xlu1 %v9138_v55 }
 0xc5d   : > { %v18316_v22 = vpop.f32.mrb[36].mxu1 }
 0xc5e   : > { %v13673_v4 = vpop.f32.mrb[37].mxu1  ;;  %v9141_v23 = vsel %vm2531_vm4, %v18316_v22, -inf }
 0xc5f   : > { %9142 = vmax.xlane.f32.xlu0 %v9141_v23  ;;  %v18320_v33 = vpop.f32.mrb[38].mxu1 }
 0xc60   : > { %v13674_v25 = vpop.f32.mrb[39].mxu1  ;;  %v9144_v45 = vsel %vm2531_vm4, %v18320_v33, -inf }
 0xc61   : > { %9145 = vmax.xlane.f32.xlu1 %v9144_v45 }
 0xc65   : > { %v18324_v48 = vpop.f32.mrb[40].mxu1 }
 0xc66   : > { %v13679_v1 = vpop.f32.mrb[41].mxu1  ;;  %v9147_v37 = vsel %vm2531_vm4, %v18324_v48, -inf }
 0xc67   : > { %9148 = vmax.xlane.f32.xlu0 %v9147_v37  ;;  %v18328_v42 = vpop.f32.mrb[42].mxu1 }
 0xc68   : > { %v13680_v36 = vpop.f32.mrb[43].mxu1  ;;  %v9150_v40 = vsel %vm2531_vm4, %v18328_v42, -inf }
 0xc69   : > { %9151 = vmax.xlane.f32.xlu1 %v9150_v40 }
 0xc6d   : > { %v18332_v52 = vpop.f32.mrb[44].mxu1 }
 0xc6e   : > { %v13685_v2 = vpop.f32.mrb[45].mxu1  ;;  %v9153_v6 = vsel %vm2531_vm4, %v18332_v52, -inf }
 0xc6f   : > { %9154 = vmax.xlane.f32.xlu0 %v9153_v6  ;;  %v18336_v11 = vpop.f32.mrb[46].mxu1 }
 0xc70   : > { %v13686_v30 = vpop.f32.mrb[47].mxu1  ;;  %v9156_v26 = vsel %vm2531_vm4, %v18336_v11, -inf }
 0xc71   : > { %9157 = vmax.xlane.f32.xlu1 %v9156_v26 }
 0xc75   : > { %v18340_v34 = vpop.f32.mrb[48].mxu1 }
 0xc76   : > { %v13697_v60 = vpop.f32.mrb[49].mxu1  ;;  %v9165_v63 = vsel %vm2531_vm4, %v18340_v34, -inf }
 0xc77   : > { %9166 = vmax.xlane.f32.xlu0 %v9165_v63  ;;  %v18344_v32 = vpop.f32.mrb[50].mxu1 }
 0xc78   : > { %v13698_v57 = vpop.f32.mrb[51].mxu1  ;;  %v9168_v17 = vsel %vm2531_vm4, %v18344_v32, -inf }
 0xc79   : > { %9169 = vmax.xlane.f32.xlu1 %v9168_v17 }
 0xc7d   : > { %v18348_v18 = vpop.f32.mrb[52].mxu1 }
 0xc7e   : > { %v13709_v16 = vpop.f32.mrb[53].mxu1  ;;  %v9177_v58 = vsel %vm2531_vm4, %v18348_v18, -inf }
 0xc7f   : > { %9178 = vmax.xlane.f32.xlu0 %v9177_v58  ;;  %v18352_v59 = vpop.f32.mrb[54].mxu1 }
 0xc80   : > { %v13710_v62 = vpop.f32.mrb[55].mxu1  ;;  %v9180_v20 = vsel %vm2531_vm4, %v18352_v59, -inf }
 0xc81   : > { %9181 = vmax.xlane.f32.xlu1 %v9180_v20 }
 0xc85   : > { %v18356_v46 = vpop.f32.mrb[56].mxu1 }
 0xc86   : > { %v13721_v51 = vpop.f32.mrb[57].mxu1  ;;  %v9189_v31 = vsel %vm2531_vm4, %v18356_v46, -inf }
 0xc87   : > { %9190 = vmax.xlane.f32.xlu0 %v9189_v31  ;;  %v18360_v53 = vpop.f32.mrb[58].mxu1 }
 0xc88   : > { %v13722_v39 = vpop.f32.mrb[59].mxu1  ;;  %v9192_v54 = vsel %vm2531_vm4, %v18360_v53, -inf }
 0xc89   : > { %9193 = vmax.xlane.f32.xlu1 %v9192_v54 }
 0xc8d   : > { %v18364_v38 = vpop.f32.mrb[60].mxu1 }
 0xc8e   : > { %v13733_v14 = vpop.f32.mrb[61].mxu1  ;;  %v9201_v8 = vsel %vm2531_vm4, %v18364_v38, -inf }
 0xc8f   : > { %9202 = vmax.xlane.f32.xlu0 %v9201_v8  ;;  %v18368_v47 = vpop.f32.mrb[62].mxu1 }
 0xc90   : > { %v13734_v21 = vpop.f32.mrb[63].mxu1  ;;  %v9204_v27 = vsel %vm2531_vm4, %v18368_v47, -inf }
 0xc91   : > { %9205 = vmax.xlane.f32.xlu1 %v9204_v27 }
 0xcc4   : > { %v9113_v41 = vpop.xlane.xlu0 %9112 }
 0xcc5   : > { %v9207_v5 = vsub.f32 %v18257_v56, %v9113_v41 }
 0xcc6   : > { %v9116_v55 = vpop.xlane.xlu1 %9115 }
 0xcc7   : > { %v9239_v4 = vmul.f32 1.442695, %v9207_v5  ;;  %v9208_v23 = vsub.f32 %v18261_v7, %v9116_v55 }
 0xcc9   : > { %14636 = vpow2.f32 %v9239_v4  ;;  %v9241_v25 = vmul.f32 1.442695, %v9208_v23 }
 0xccb   : > { %14638 = vpow2.f32 %v9241_v25 }
 0xccc   : > { %v9119_v45 = vpop.xlane.xlu0 %9118 }
 0xccd   : > { %v9209_v1 = vsub.f32 %v18270_v50, %v9119_v45 }
 0xccf   : > { %v9243_v37 = vmul.f32 1.442695, %v9209_v1 }
 0xcd0   : > { %v9122_v36 = vpop.xlane.xlu0 %9121 }
 0xcd1   : > { %14640 = vpow2.f32 %v9243_v37  ;;  %v9210_v40 = vsub.f32 %v18274_v3, %v9122_v36 }
 0xcd3   : > { %v18388_v2 = vpop.eup %14636  ;;  %v9245_v6 = vmul.f32 1.442695, %v9210_v40 }
 0xcd4   : > { %v9125_v30 = vpop.xlane.xlu0 %9124  ;;  %v9303_v56 = vsel %vm2531_vm4, %v18388_v2, 0.0 }
 0xcd5   : > { %v18392_v26 = vpop.eup %14638  ;;  %14642 = vpow2.f32 %v9245_v6  ;;  %v9211_v7 = vsub.f32 %v18283_v19, %v9125_v30  ;;  %v18395_v60 = vpop.f32.mrb[192].mxu0  ;;  %9304 = vadd.xlane.f32.xlu0 %v9303_v56 }
 0xcd6   : > { %v18397_v50 = vpop.f32.mrb[193].mxu0  ;;  %v9128_v63 = vpop.xlane.xlu1 %9127  ;;  %v9306_v3 = vsel %vm2531_vm4, %v18392_v26, 0.0 }
 0xcd7   : > { %v9247_v57 = vmul.f32 1.442695, %v9211_v7  ;;  %v9212_v17 = vsub.f32 %v18287_v61, %v9128_v63  ;;  %v18402_v16 = vpop.f32.mrb[194].mxu0  ;;  %9307 = vadd.xlane.f32.xlu1 %v9306_v3 }
 0xcd8   : > { %v18404_v58 = vpop.f32.mrb[195].mxu0 }
 0xcd9   : > { %14644 = vpow2.f32 %v9247_v57  ;;  %v9249_v62 = vmul.f32 1.442695, %v9212_v17 }
 0xcdb   : > { %v18406_v19 = vpop.eup %14640  ;;  %14646 = vpow2.f32 %v9249_v62 }
 0xcdc   : > { %v9131_v20 = vpop.xlane.xlu0 %9130  ;;  %v9309_v51 = vsel %vm2531_vm4, %v18406_v19, 0.0 }
 0xcdd   : > { %v9213_v31 = vsub.f32 %v18296_v15, %v9131_v20  ;;  %9310 = vadd.xlane.f32.xlu0 %v9309_v51 }
 0xcde   : > { %v9134_v39 = vpop.xlane.xlu1 %9133 }
 0xcdf   : > { %v18411_v54 = vpop.eup %14642  ;;  %v9251_v61 = vmul.f32 1.442695, %v9213_v31  ;;  %v9214_v14 = vsub.f32 %v18300_v13, %v9134_v39 }
 0xce0   : > { %v9312_v8 = vsel %vm2531_vm4, %v18411_v54, 0.0 }
 0xce1   : > { %14648 = vpow2.f32 %v9251_v61  ;;  %v9253_v21 = vmul.f32 1.442695, %v9214_v14  ;;  %9313 = vadd.xlane.f32.xlu1 %v9312_v8 }
 0xce3   : > { %v18416_v27 = vpop.eup %14644  ;;  %14650 = vpow2.f32 %v9253_v21 }
 0xce4   : > { %v9137_v41 = vpop.xlane.xlu0 %9136  ;;  %v9315_v15 = vsel %vm2531_vm4, %v18416_v27, 0.0 }
 0xce5   : > { %v18420_v5 = vpop.eup %14646  ;;  %v9215_v55 = vsub.f32 %v18308_v12, %v9137_v41  ;;  %v18423_v4 = vpop.f32.mrb[196].mxu0  ;;  %9316 = vadd.xlane.f32.xlu0 %v9315_v15 }
 0xce6   : > { %v18425_v13 = vpop.f32.mrb[197].mxu0  ;;  %v9140_v23 = vpop.xlane.xlu1 %9139  ;;  %v9318_v25 = vsel %vm2531_vm4, %v18420_v5, 0.0 }
 0xce7   : > { %v9255_v45 = vmul.f32 1.442695, %v9215_v55  ;;  %v9216_v1 = vsub.f32 %v18312_v35, %v9140_v23  ;;  %v18430_v37 = vpop.f32.mrb[198].mxu0  ;;  %9319 = vadd.xlane.f32.xlu1 %v9318_v25 }
 0xce8   : > { %v18432_v36 = vpop.f32.mrb[199].mxu0 }
 0xce9   : > { %14652 = vpow2.f32 %v9255_v45  ;;  %v9257_v40 = vmul.f32 1.442695, %v9216_v1 }
 0xceb   : > { %v18434_v12 = vpop.eup %14648  ;;  %14654 = vpow2.f32 %v9257_v40 }
 0xcec   : > { %v9143_v6 = vpop.xlane.xlu0 %9142  ;;  %v9321_v30 = vsel %vm2531_vm4, %v18434_v12, 0.0 }
 0xced   : > { %v18438_v56 = vpop.eup %14650  ;;  %v9217_v7 = vsub.f32 %v18316_v22, %v9143_v6  ;;  %9322 = vadd.xlane.f32.xlu0 %v9321_v30 }
 0xcee   : > { %v9146_v35 = vpop.xlane.xlu1 %9145  ;;  %v9324_v63 = vsel %vm2531_vm4, %v18438_v56, 0.0 }
 0xcef   : > { %v9259_v3 = vmul.f32 1.442695, %v9217_v7  ;;  %v9218_v57 = vsub.f32 %v18320_v33, %v9146_v35  ;;  %9325 = vadd.xlane.f32.xlu1 %v9324_v63 }
 0xcf1   : > { %14656 = vpow2.f32 %v9259_v3  ;;  %v9261_v17 = vmul.f32 1.442695, %v9218_v57 }
 0xcf3   : > { %v18444_v62 = vpop.eup %14652  ;;  %14658 = vpow2.f32 %v9261_v17 }
 0xcf4   : > { %v9149_v20 = vpop.xlane.xlu0 %9148  ;;  %v9327_v51 = vsel %vm2531_vm4, %v18444_v62, 0.0 }
 0xcf5   : > { %v18448_v31 = vpop.eup %14654  ;;  %v9219_v22 = vsub.f32 %v18324_v48, %v9149_v20  ;;  %v18451_v39 = vpop.f32.mrb[200].mxu0  ;;  %9328 = vadd.xlane.f32.xlu1 %v9327_v51 }
 0xcf6   : > { %v18453_v61 = vpop.f32.mrb[201].mxu0  ;;  %v9152_v33 = vpop.xlane.xlu1 %9151  ;;  %v9330_v14 = vsel %vm2531_vm4, %v18448_v31, 0.0 }
 0xcf7   : > { %v9263_v8 = vmul.f32 1.442695, %v9219_v22  ;;  %v9220_v21 = vsub.f32 %v18328_v42, %v9152_v33  ;;  %v18458_v41 = vpop.f32.mrb[202].mxu0  ;;  %9331 = vadd.xlane.f32.xlu0 %v9330_v14 }
 0xcf8   : > { %20184 = vst [vmem:[#allocation119_spill] sm:$0xff] %v18458_v41  ;;  %v18460_v15 = vpop.f32.mrb[203].mxu0 }
 0xcf9   : > { %20185 = vst [vmem:[#allocation114_spill] sm:$0xff] %v18460_v15  ;;  %14660 = vpow2.f32 %v9263_v8  ;;  %v9265_v55 = vmul.f32 1.442695, %v9220_v21 }
 0xcfb   : > { %v18462_v48 = vpop.eup %14656  ;;  %14662 = vpow2.f32 %v9265_v55 }
 0xcfc   : > { %v9155_v23 = vpop.xlane.xlu0 %9154  ;;  %v9333_v25 = vsel %vm2531_vm4, %v18462_v48, 0.0 }
 0xcfd   : > { %v18466_v45 = vpop.eup %14658  ;;  %v9221_v1 = vsub.f32 %v18332_v52, %v9155_v23  ;;  %9334 = vadd.xlane.f32.xlu0 %v9333_v25 }
 0xcfe   : > { %v9158_v42 = vpop.xlane.xlu1 %9157  ;;  %v9336_v40 = vsel %vm2531_vm4, %v18466_v45, 0.0 }
 0xcff   : > { %v9267_v6 = vmul.f32 1.442695, %v9221_v1  ;;  %v9222_v30 = vsub.f32 %v18336_v11, %v9158_v42  ;;  %9337 = vadd.xlane.f32.xlu1 %v9336_v40 }
 0xd01   : > { %14664 = vpow2.f32 %v9267_v6  ;;  %v9269_v7 = vmul.f32 1.442695, %v9222_v30 }
 0xd03   : > { %v18472_v35 = vpop.eup %14660  ;;  %14666 = vpow2.f32 %v9269_v7 }
 0xd04   : > { %v9167_v63 = vpop.xlane.xlu0 %9166  ;;  %v9339_v3 = vsel %vm2531_vm4, %v18472_v35, 0.0 }
 0xd05   : > { %v18476_v57 = vpop.eup %14662  ;;  %v9225_v52 = vsub.f32 %v18340_v34, %v9167_v63  ;;  %v18479_v17 = vpop.f32.mrb[204].mxu0  ;;  %9340 = vadd.xlane.f32.xlu1 %v9339_v3 }
 0xd06   : > { %20186 = vst [vmem:[#allocation69_spill] sm:$0xff] %v18479_v17  ;;  %v18481_v20 = vpop.f32.mrb[205].mxu0  ;;  %v9170_v11 = vpop.xlane.xlu1 %9169  ;;  %v9342_v51 = vsel %vm2531_vm4, %v18476_v57, 0.0 }
 0xd07   : > { %20187 = vst [vmem:[#allocation121_spill] sm:$0xff] %v18481_v20  ;;  %v9275_v22 = vmul.f32 1.442695, %v9225_v52  ;;  %v9226_v33 = vsub.f32 %v18344_v32, %v9170_v11  ;;  %v18486_v14 = vpop.f32.mrb[206].mxu0  ;;  %9343 = vadd.xlane.f32.xlu0 %v9342_v51 }
 0xd08   : > { %20188 = vst [vmem:[#allocation116_spill] sm:$0xff] %v18486_v14  ;;  %v18488_v8 = vpop.f32.mrb[207].mxu0 }
 0xd09   : > { %20189 = vst [vmem:[#allocation123_spill] sm:$0xff] %v18488_v8  ;;  %14668 = vpow2.f32 %v9275_v22  ;;  %v9277_v21 = vmul.f32 1.442695, %v9226_v33 }
 0xd0b   : > { %v18490_v34 = vpop.eup %14664  ;;  %14670 = vpow2.f32 %v9277_v21 }
 0xd0c   : > { %v9179_v55 = vpop.xlane.xlu0 %9178  ;;  %v9345_v23 = vsel %vm2531_vm4, %v18490_v34, 0.0 }
 0xd0d   : > { %v18494_v25 = vpop.eup %14666  ;;  %v9229_v1 = vsub.f32 %v18348_v18, %v9179_v55  ;;  %v18497_v42 = vpop.f32.mrb[240].mxu0  ;;  %9346 = vadd.xlane.f32.xlu0 %v9345_v23 }
 0xd0e   : > { %v13691_v32 = vpop.f32.mrb[241].mxu0  ;;  %v9182_v40 = vpop.xlane.xlu1 %9181  ;;  %v9348_v6 = vsel %vm2531_vm4, %v18494_v25, 0.0  ;;  %v9159_v52 = vsel %vm2531_vm4, %v18497_v42, -inf }
 0xd0f   : > { %v9283_v30 = vmul.f32 1.442695, %v9229_v1  ;;  %v9230_v7 = vsub.f32 %v18352_v59, %v9182_v40  ;;  %v18502_v63 = vpop.f32.mrb[242].mxu0  ;;  %9349 = vadd.xlane.f32.xlu1 %v9348_v6 }
 0xd10   : > { %v13692_v3 = vpop.f32.mrb[243].mxu0  ;;  %v9162_v11 = vsel %vm2531_vm4, %v18502_v63, -inf }
 0xd11   : > { %14672 = vpow2.f32 %v9283_v30  ;;  %v9285_v18 = vmul.f32 1.442695, %v9230_v7  ;;  %9160 = vmax.xlane.f32.xlu0 %v9159_v52 }
 0xd13   : > { %v18508_v51 = vpop.eup %14668  ;;  %14674 = vpow2.f32 %v9285_v18  ;;  %9163 = vmax.xlane.f32.xlu1 %v9162_v11 }
 0xd14   : > { %v9357_v59 = vsel %vm2531_vm4, %v18508_v51, 0.0 }
 0xd15   : > { %v18512_v22 = vpop.eup %14670  ;;  %v18514_v33 = vpop.f32.mrb[244].mxu0  ;;  %9358 = vadd.xlane.f32.xlu0 %v9357_v59 }
 0xd16   : > { %v13703_v21 = vpop.f32.mrb[245].mxu0  ;;  %v9360_v55 = vsel %vm2531_vm4, %v18512_v22, 0.0  ;;  %v9171_v32 = vsel %vm2531_vm4, %v18514_v33, -inf  ;;  %v9194_v8 = vpop.xlane.xlu1 %9193 }
 0xd17   : > { %v18518_v23 = vpop.f32.mrb[246].mxu0  ;;  %9361 = vadd.xlane.f32.xlu1 %v9360_v55  ;;  %v9234_v14 = vsub.f32 %v18360_v53, %v9194_v8 }
 0xd18   : > { %v13704_v1 = vpop.f32.mrb[247].mxu0  ;;  %v9174_v40 = vsel %vm2531_vm4, %v18518_v23, -inf }
 0xd19   : > { %9172 = vmax.xlane.f32.xlu0 %v9171_v32 }
 0xd1b   : > { %v18524_v6 = vpop.eup %14672  ;;  %9175 = vmax.xlane.f32.xlu1 %v9174_v40 }
 0xd1c   : > { %v9369_v30 = vsel %vm2531_vm4, %v18524_v6, 0.0 }
 0xd1d   : > { %v18528_v7 = vpop.eup %14674  ;;  %v18530_v3 = vpop.f32.mrb[248].mxu0  ;;  %9370 = vadd.xlane.f32.xlu0 %v9369_v30 }
 0xd1e   : > { %v13715_v52 = vpop.f32.mrb[249].mxu0  ;;  %v9372_v18 = vsel %vm2531_vm4, %v18528_v7, 0.0  ;;  %v9183_v21 = vsel %vm2531_vm4, %v18530_v3, -inf }
 0xd1f   : > { %v18534_v11 = vpop.f32.mrb[250].mxu0  ;;  %9373 = vadd.xlane.f32.xlu1 %v9372_v18  ;;  %v20190_v52 = vld [vmem:[#allocation56_spill] sm:$0xff]  ;;  %v20191_v18 = vld [vmem:[#allocation57_spill] sm:$0xff] }
 0xd20   : > { %v13716_v59 = vpop.f32.mrb[251].mxu0  ;;  %v9186_v55 = vsel %vm2531_vm4, %v18534_v11, -inf }
 0xd21   : > { %9184 = vmax.xlane.f32.xlu0 %v9183_v21  ;;  %v9191_v59 = vpop.xlane.xlu0 %9190 }
 0xd22   : > { %v9233_v21 = vsub.f32 %v18356_v46, %v9191_v59 }
 0xd23   : > { %9187 = vmax.xlane.f32.xlu1 %v9186_v55  ;;  %v9293_v55 = vmul.f32 1.442695, %v9234_v14  ;;  %v18564_v14 = vpop.xlane.xlu1 %9205 }
 0xd24   : > { %v9291_v20 = vmul.f32 1.442695, %v9233_v21 }
 0xd25   : > { %v18540_v1 = vpop.f32.mrb[252].mxu0 }
 0xd26   : > { %v13727_v32 = vpop.f32.mrb[253].mxu0  ;;  %14676 = vpow2.f32 %v9291_v20  ;;  %v9195_v46 = vsel %vm2531_vm4, %v18540_v1, -inf  ;;  %v18562_v20 = vpop.xlane.xlu0 %9202 }
 0xd27   : > { %v18542_v40 = vpop.f32.mrb[254].mxu0  ;;  %14678 = vpow2.f32 %v9293_v55 }
 0xd28   : > { %v13728_v30 = vpop.f32.mrb[255].mxu0  ;;  %v9198_v53 = vsel %vm2531_vm4, %v18542_v40, -inf }
 0xd30   : > { %v18550_v32 = vpop.eup %14676 }
 0xd31   : > { %v18552_v17 = vpop.eup %14678  ;;  %v9381_v30 = vsel %vm2531_vm4, %v18550_v32, 0.0 }
 0xd34   : > { %9902 = vrot.lane.b32.xlu1 %v20190_v52, %s15067_s18  ;;  %v9384_v52 = vsel %vm2531_vm4, %v18552_v17, 0.0 }
 0xd37   : > { %9855 = vrot.lane.b32.xlu0 %v20191_v18, %s15067_s18 }
 0xd56   : > { %9382 = vadd.xlane.f32.xlu0 %v9381_v30 }
 0xd58   : > { %9385 = vadd.xlane.f32.xlu1 %v9384_v52 }
 0xd5a   : > { %9196 = vmax.xlane.f32.xlu0 %v9195_v46 }
 0xd5c   : > { %9199 = vmax.xlane.f32.xlu1 %v9198_v53 }
 0xd62   : > { %v9305_v8 = vpop.xlane.xlu0 %9304 }
 0xd63   : > { %14680 = vrcp.f32 %v9305_v8 }
 0xd64   : > { %v9308_v18 = vpop.xlane.xlu1 %9307 }
 0xd65   : > { %14682 = vrcp.f32 %v9308_v18 }
 0xd6a   : > { %v9311_v59 = vpop.xlane.xlu0 %9310 }
 0xd6b   : > { %14684 = vrcp.f32 %v9311_v59 }
 0xd6d   : > { %v14681_v21 = vpop.eup %14680 }
 0xd6e   : > { %v9314_v55 = vpop.xlane.xlu1 %9313  ;;  %v9431_v52 = vmul.f32 %v14681_v21, %v18388_v2 }
 0xd6f   : > { %v14683_v30 = vpop.eup %14682  ;;  %14686 = vrcp.f32 %v9314_v55 }
 0xd70   : > { %v9432_v46 = vmul.f32 %v14683_v30, %v18392_v26 }
 0xd72   : > { %v9463_v15 = vpack.c.bf16 %v9432_v46, %v9431_v52  ;;  %v9317_v53 = vpop.xlane.xlu0 %9316 }
 0xd73   : > { %14688 = vrcp.f32 %v9317_v53 }
 0xd74   : > { %13738 = vmatmul.mubr.msk.bf16.vlgmr.msra.gmra.mrb[0].mxu0 %vm2531_vm4, %v9463_v15  ;;  %v9320_v41 = vpop.xlane.xlu1 %9319 }
 0xd75   : > { %13748 = vmatpush3.bf16.msra.mxu0 %v18372_v10  ;;  %14690 = vrcp.f32 %v9320_v41  ;;  %13749 = vmatprep.mubr.msk.bf16.mxu0 %vm15064_vm2, %v19925_v24  ;;  %v14685_v8 = vpop.eup %14684 }
 0xd76   : > { %13759 = vmatprep.subr.bf16.mxu0 %v19925_v24  ;;  %v9433_v2 = vmul.f32 %v14685_v8, %v18406_v19 }
 0xd79   : > { %v14687_v18 = vpop.eup %14686 }
 0xd7a   : > { %v9434_v26 = vmul.f32 %v14687_v18, %v18411_v54  ;;  %v9323_v59 = vpop.xlane.xlu0 %9322 }
 0xd7b   : > { %14692 = vrcp.f32 %v9323_v59 }
 0xd7c   : > { %v9464_v21 = vpack.c.bf16 %v9434_v26, %v9433_v2  ;;  %v9326_v55 = vpop.xlane.xlu1 %9325 }
 0xd7d   : > { %v14689_v15 = vpop.eup %14688  ;;  %14694 = vrcp.f32 %v9326_v55 }
 0xd7e   : > { %13744 = vmatmul.mubr.msk.bf16.vlgmr.msra.gmra.mrb[64].mxu1 %vm2531_vm4, %v9464_v21  ;;  %v9435_v41 = vmul.f32 %v14689_v15, %v18416_v27 }
 0xd7f   : > { %v14691_v10 = vpop.eup %14690  ;;  %13754 = vmatpush3.bf16.msra.mxu1 %v18374_v0  ;;  %13755 = vmatprep.mubr.msk.bf16.mxu1 %vm15064_vm2, %v19925_v24 }
 0xd80   : > { %v9436_v19 = vmul.f32 %v14691_v10, %v18420_v5  ;;  %13765 = vmatprep.subr.bf16.mxu1 %v19925_v24 }
 0xd82   : > { %v9465_v54 = vpack.c.bf16 %v9436_v19, %v9435_v41  ;;  %v9329_v30 = vpop.xlane.xlu1 %9328 }
 0xd83   : > { %14696 = vrcp.f32 %v9329_v30 }
 0xd84   : > { %v9332_v52 = vpop.xlane.xlu0 %9331  ;;  %13750 = vmatmul.mubr.msk.bf16.vlgmr.msra.gmra.mrb[4].mxu0 %vm2531_vm4, %v9465_v54 }
 0xd85   : > { %v14693_v46 = vpop.eup %14692  ;;  %14698 = vrcp.f32 %v9332_v52  ;;  %13760 = vmatpush3.bf16.msra.mxu0 %v18376_v9  ;;  %13761 = vmatprep.mubr.msk.bf16.mxu0 %vm15064_vm2, %v19925_v24 }
 0xd86   : > { %13771 = vmatprep.subr.bf16.mxu0 %v19925_v24  ;;  %v9437_v27 = vmul.f32 %v14693_v46, %v18434_v12 }
 0xd87   : > { %v14695_v0 = vpop.eup %14694 }
 0xd88   : > { %v9438_v5 = vmul.f32 %v14695_v0, %v18438_v56 }
 0xd8a   : > { %v9466_v53 = vpack.c.bf16 %v9438_v5, %v9437_v27  ;;  %v9335_v8 = vpop.xlane.xlu0 %9334 }
 0xd8b   : > { %14700 = vrcp.f32 %v9335_v8 }
 0xd8c   : > { %13756 = vmatmul.mubr.msk.bf16.vlgmr.msra.gmra.mrb[68].mxu1 %vm2531_vm4, %v9466_v53  ;;  %v9338_v18 = vpop.xlane.xlu1 %9337 }
 0xd8d   : > { %v14697_v2 = vpop.eup %14696  ;;  %13766 = vmatpush3.bf16.msra.mxu1 %v18378_v49  ;;  %14702 = vrcp.f32 %v9338_v18  ;;  %13767 = vmatprep.mubr.msk.bf16.mxu1 %vm15064_vm2, %v19925_v24 }
 0xd8e   : > { %13777 = vmatprep.subr.bf16.mxu1 %v19925_v24  ;;  %v9439_v12 = vmul.f32 %v14697_v2, %v18444_v62 }
 0xd8f   : > { %v14699_v9 = vpop.eup %14698 }
 0xd90   : > { %v9440_v56 = vmul.f32 %v14699_v9, %v18448_v31 }
 0xd92   : > { %v9467_v26 = vpack.c.bf16 %v9440_v56, %v9439_v12  ;;  %v9341_v59 = vpop.xlane.xlu1 %9340 }
 0xd93   : > { %14704 = vrcp.f32 %v9341_v59 }
 0xd94   : > { %v9344_v21 = vpop.xlane.xlu0 %9343  ;;  %13762 = vmatmul.mubr.msk.bf16.vlgmr.msra.gmra.mrb[8].mxu0 %vm2531_vm4, %v9467_v26 }
 0xd95   : > { %v14701_v55 = vpop.eup %14700  ;;  %14706 = vrcp.f32 %v9344_v21  ;;  %13772 = vmatpush3.bf16.msra.mxu0 %v18380_v28  ;;  %13773 = vmatprep.mubr.msk.bf16.mxu0 %vm15064_vm2, %v19925_v24 }
 0xd96   : > { %13783 = vmatprep.subr.bf16.mxu0 %v19925_v24  ;;  %v9441_v62 = vmul.f32 %v14701_v55, %v18462_v48 }
 0xd97   : > { %v14703_v49 = vpop.eup %14702 }
 0xd98   : > { %v9442_v31 = vmul.f32 %v14703_v49, %v18466_v45 }
 0xd9a   : > { %v9468_v15 = vpack.c.bf16 %v9442_v31, %v9441_v62  ;;  %v9347_v10 = vpop.xlane.xlu0 %9346 }
 0xd9b   : > { %14708 = vrcp.f32 %v9347_v10 }
 0xd9c   : > { %13768 = vmatmul.mubr.msk.bf16.vlgmr.msra.gmra.mrb[72].mxu1 %vm2531_vm4, %v9468_v15  ;;  %v9350_v41 = vpop.xlane.xlu1 %9349 }
 0xd9d   : > { %v14705_v19 = vpop.eup %14704  ;;  %13778 = vmatpush3.bf16.msra.mxu1 %v18382_v29  ;;  %14710 = vrcp.f32 %v9350_v41  ;;  %13779 = vmatprep.mubr.msk.bf16.mxu1 %vm15064_vm2, %v19925_v24 }
 0xd9e   : > { %v9161_v28 = vpop.xlane.xlu0 %9160  ;;  %13789 = vmatprep.subr.bf16.mxu1 %v19925_v24  ;;  %v9443_v45 = vmul.f32 %v14705_v19, %v18472_v35 }
 0xd9f   : > { %v14707_v54 = vpop.eup %14706  ;;  %v9223_v48 = vsub.f32 %v18497_v42, %v9161_v28 }
 0xda0   : > { %v9444_v30 = vmul.f32 %v14707_v54, %v18476_v57  ;;  %v9164_v52 = vpop.xlane.xlu1 %9163 }
 0xda1   : > { %v9271_v46 = vmul.f32 1.442695, %v9223_v48  ;;  %v9224_v0 = vsub.f32 %v18502_v63, %v9164_v52  ;;  %v20192_v48 = vld [vmem:[#allocation60_spill] sm:$0xff] }
 0xda2   : > { %v9469_v27 = vpack.c.bf16 %v9444_v30, %v9443_v45  ;;  %v9359_v29 = vpop.xlane.xlu0 %9358  ;;  %v20193_v45 = vld [vmem:[#allocation61_spill] sm:$0xff] }
 0xda3   : > { %14712 = vpow2.f32 %v9271_v46  ;;  %v9273_v5 = vmul.f32 1.442695, %v9224_v0  ;;  %v9237_v46 = vsub.f32 %v18364_v38, %v18562_v20 }
 0xda4   : > { %13774 = vmatmul.mubr.msk.bf16.vlgmr.msra.gmra.mrb[12].mxu0 %vm2531_vm4, %v9469_v27  ;;  %v9362_v53 = vpop.xlane.xlu1 %9361 }
 0xda5   : > { %v14709_v8 = vpop.eup %14708  ;;  %14714 = vpow2.f32 %v9273_v5  ;;  %13785 = vmatprep.mubr.msk.bf16.mxu0 %vm15064_vm2, %v19925_v24  ;;  %v9299_v5 = vmul.f32 1.442695, %v9237_v46 }
 0xda6   : > { %14716 = vrcp.f32 %v9362_v53  ;;  %v9173_v35 = vpop.xlane.xlu0 %9172  ;;  %v9445_v57 = vmul.f32 %v14709_v8, %v18490_v34 }
 0xda7   : > { %v14711_v42 = vpop.eup %14710  ;;  %14718 = vrcp.f32 %v9359_v29  ;;  %v9227_v30 = vsub.f32 %v18514_v33, %v9173_v35 }
 0xda8   : > { %v9446_v63 = vmul.f32 %v14711_v42, %v18494_v25  ;;  %v9176_v18 = vpop.xlane.xlu1 %9175 }
 0xda9   : > { %v9279_v52 = vmul.f32 1.442695, %v9227_v30 }
 0xdaa   : > { %v9470_v2 = vpack.c.bf16 %v9446_v63, %v9445_v57  ;;  %v9371_v9 = vpop.xlane.xlu0 %9370 }
 0xdab   : > { %14720 = vrcp.f32 %v9371_v9 }
 0xdac   : > { %13780 = vmatmul.mubr.msk.bf16.vlgmr.msra.gmra.mrb[76].mxu1 %vm2531_vm4, %v9470_v2  ;;  %v9374_v12 = vpop.xlane.xlu1 %9373 }
 0xdad   : > { %v18618_v56 = vpop.eup %14712  ;;  %13791 = vmatprep.mubr.msk.bf16.mxu1 %vm15064_vm2, %v19925_v24  ;;  %14722 = vrcp.f32 %v9374_v12 }
 0xdae   : > { %v9185_v26 = vpop.xlane.xlu0 %9184  ;;  %v9351_v59 = vsel %vm2531_vm4, %v18618_v56, 0.0  ;;  %14724 = vpow2.f32 %v9279_v52 }
 0xdaf   : > { %v18624_v34 = vpop.eup %14714  ;;  %9352 = vadd.xlane.f32.xlu1 %v9351_v59  ;;  %v9231_v29 = vsub.f32 %v18530_v3, %v9185_v26 }
 0xdb0   : > { %v14717_v25 = vpop.eup %14716  ;;  %v9188_v21 = vpop.xlane.xlu1 %9187  ;;  %v9354_v55 = vsel %vm2531_vm4, %v18624_v34, 0.0 }
 0xdb1   : > { %v14719_v49 = vpop.eup %14718  ;;  %9355 = vadd.xlane.f32.xlu0 %v9354_v55  ;;  %v9450_v62 = vmul.f32 %v14717_v25, %v18512_v22  ;;  %v9232_v53 = vsub.f32 %v18534_v11, %v9188_v21  ;;  %v9287_v33 = vmul.f32 1.442695, %v9231_v29 }
 0xdb2   : > { %v9856_v31 = vpop.permute.xlu0 %9855  ;;  %v9449_v15 = vmul.f32 %v14719_v49, %v18508_v51 }
 0xdb3   : > { %13784 = vmatpush3.bf16.msra.mxu0 %v9856_v31 }
 0xdb4   : > { %v9903_v10 = vpop.permute.xlu1 %9902  ;;  %13795 = vmatprep.subr.bf16.mxu0 %v19925_v24  ;;  %v9472_v19 = vpack.c.bf16 %v9450_v62, %v9449_v15 }
 0xdb5   : > { %13790 = vmatpush3.bf16.msra.mxu1 %v9903_v10  ;;  %v14721_v41 = vpop.eup %14720 }
 0xdb6   : > { %13801 = vmatprep.subr.bf16.mxu1 %v19925_v24  ;;  %v18634_v54 = vmul.f32 %v14721_v41, %v18524_v6  ;;  %v9228_v6 = vsub.f32 %v18518_v23, %v9176_v18  ;;  %v9289_v23 = vmul.f32 1.442695, %v9232_v53 }
 0xdb7   : > { %v14723_v28 = vpop.eup %14722 }
 0xdb8   : > { %13792 = vmatmul.mubr.msk.bf16.vlgmr.msra.gmra.mrb[80].mxu1 %vm2531_vm4, %v9472_v19  ;;  %v18637_v22 = vmul.f32 %v14723_v28, %v18528_v7  ;;  %v9238_v7 = vsub.f32 %v18368_v47, %v18564_v14  ;;  %v9281_v0 = vmul.f32 1.442695, %v9228_v6  ;;  %v18655_v8 = vpop.eup %14724 }
 0xdb9   : > { %13803 = vmatprep.mubr.msk.bf16.mxu1 %vm15064_vm2, %v19925_v24  ;;  %v9363_v20 = vsel %vm2531_vm4, %v18655_v8, 0.0 }
 0xdba   : > { %v9474_v51 = vpack.c.bf16 %v18637_v22, %v18634_v54  ;;  %v9301_v27 = vmul.f32 1.442695, %v9238_v7  ;;  %14726 = vpow2.f32 %v9281_v0 }
 0xdbc   : > { %14728 = vpow2.f32 %v9301_v27 }
 0xdbd   : > { %14730 = vpow2.f32 %v9299_v5 }
 0xdbe   : > { %14732 = vpow2.f32 %v9287_v33 }
 0xdbf   : > { %14734 = vpow2.f32 %v9289_v23 }
 0xdc0   : > { %9996 = vrot.lane.b32.xlu1 %v20192_v48, %s15067_s18 }
 0xdc4   : > { %v18657_v47 = vpop.eup %14726 }
 0xdc5   : > { %v9366_v11 = vsel %vm2531_vm4, %v18657_v47, 0.0 }
 0xdc6   : > { %v18661_v14 = vpop.eup %14728 }
 0xdc7   : > { %9949 = vrot.lane.b32.xlu0 %v20193_v45, %s15067_s18  ;;  %v18665_v35 = vpop.eup %14730  ;;  %v9396_v57 = vsel %vm2531_vm4, %v18661_v14, 0.0 }
 0xdc8   : > { %v18669_v63 = vpop.eup %14732  ;;  %v9393_v9 = vsel %vm2531_vm4, %v18665_v35, 0.0 }
 0xdc9   : > { %v18674_v12 = vpop.eup %14734  ;;  %v9375_v25 = vsel %vm2531_vm4, %v18669_v63, 0.0 }
 0xde3   : > { %v9383_v38 = vpop.xlane.xlu0 %9382 }
 0xde4   : > { %14736 = vrcp.f32 %v9383_v38  ;;  %9364 = vadd.xlane.f32.xlu1 %v9363_v20 }
 0xde5   : > { %v9386_v3 = vpop.xlane.xlu1 %9385 }
 0xde6   : > { %14738 = vrcp.f32 %v9386_v3  ;;  %9367 = vadd.xlane.f32.xlu0 %v9366_v11 }
 0xde7   : > { %v9197_v42 = vpop.xlane.xlu0 %9196 }
 0xde8   : > { %v9235_v18 = vsub.f32 %v18540_v1, %v9197_v42  ;;  %9397 = vadd.xlane.f32.xlu1 %v9396_v57  ;;  %v9378_v1 = vsel %vm2531_vm4, %v18674_v12, 0.0 }
 0xde9   : > { %v9200_v2 = vpop.xlane.xlu1 %9199 }
 0xdea   : > { %v9295_v26 = vmul.f32 1.442695, %v9235_v18  ;;  %v9236_v59 = vsub.f32 %v18542_v40, %v9200_v2  ;;  %9394 = vadd.xlane.f32.xlu0 %v9393_v9 }
 0xdec   : > { %14740 = vpow2.f32 %v9295_v26  ;;  %v9297_v21 = vmul.f32 1.442695, %v9236_v59  ;;  %9376 = vadd.xlane.f32.xlu1 %v9375_v25 }
 0xdee   : > { %v14737_v55 = vpop.eup %14736  ;;  %14742 = vpow2.f32 %v9297_v21  ;;  %9379 = vadd.xlane.f32.xlu0 %v9378_v1 }
 0xdef   : > { %v18682_v62 = vmul.f32 %v14737_v55, %v18550_v32  ;;  %v20194_v32 = vld [vmem:[#allocation64_spill] sm:$0xff] }
 0xdf0   : > { %v14739_v49 = vpop.eup %14738 }
 0xdf1   : > { %v18685_v31 = vmul.f32 %v14739_v49, %v18552_v17  ;;  %v20195_v17 = vld [vmem:[#allocation65_spill] sm:$0xff] }
 0xdf3   : > { %v9476_v40 = vpack.c.bf16 %v18685_v31, %v18682_v62 }
 0xdf6   : > { %v18689_v15 = vpop.eup %14740 }
 0xdf7   : > { %v9387_v10 = vsel %vm2531_vm4, %v18689_v15, 0.0 }
 0xdf8   : > { %v18693_v41 = vpop.eup %14742  ;;  %9388 = vadd.xlane.f32.xlu1 %v9387_v10 }
 0xdf9   : > { %v9390_v19 = vsel %vm2531_vm4, %v18693_v41, 0.0 }
 0xdfa   : > { %9391 = vadd.xlane.f32.xlu0 %v9390_v19 }
 0xe09   : > { %10090 = vrot.lane.b32.xlu1 %v20194_v32, %s15067_s18 }
 0xe0d   : > { %10137 = vrot.lane.b32.xlu1 %v20049_v43, %s15067_s18 }
 0xe10   : > { %10043 = vrot.lane.b32.xlu0 %v20195_v17, %s15067_s18 }
 0xe11   : > { %10184 = vrot.lane.b32.xlu1 %v20139_v44, %s15067_s18 }
 0xe3c   : > { %v9353_v28 = vpop.xlane.xlu1 %9352 }
 0xe3d   : > { %14744 = vrcp.f32 %v9353_v28 }
 0xe3e   : > { %v9356_v48 = vpop.xlane.xlu0 %9355 }
 0xe3f   : > { %14746 = vrcp.f32 %v9356_v48 }
 0xe40   : > { %v9997_v45 = vpop.permute.xlu1 %9996 }
 0xe41   : > { %13802 = vmatpush3.bf16.msra.mxu1 %v9997_v45 }
 0xe42   : > { %13813 = vmatprep.subr.bf16.mxu1 %v19925_v24 }
 0xe44   : > { %13804 = vmatmul.mubr.msk.bf16.vlgmr.msra.gmra.mrb[84].mxu1 %vm2531_vm4, %v9474_v51  ;;  %v9950_v51 = vpop.permute.xlu0 %9949 }
 0xe45   : > { %13815 = vmatprep.mubr.msk.bf16.mxu1 %vm15064_vm2, %v19925_v24 }
 0xe47   : > { %v14745_v43 = vpop.eup %14744  ;;  %v18712_v30 = vpop.f32.mrb[0].mxu0 }
 0xe48   : > { %v13739_v44 = vpop.f32.mrb[1].mxu0  ;;  %v9447_v52 = vmul.f32 %v14745_v43, %v18618_v56 }
 0xe49   : > { %v14747_v6 = vpop.eup %14746  ;;  %v18714_v7 = vpop.f32.mrb[2].mxu0 }
 0xe4a   : > { %v9448_v46 = vmul.f32 %v14747_v6, %v18624_v34  ;;  %v10235_v0 = vpack.c.bf16 %v18714_v7, %v18712_v30  ;;  %v13740_v54 = vpop.f32.mrb[3].mxu0 }
 0xe4c   : > { %v9471_v22 = vpack.c.bf16 %v9448_v46, %v9447_v52 }
 0xe4e   : > { %13786 = vmatmul.mubr.msk.bf16.vlgmr.msra.gmra.mrb[16].mxu0 %vm2531_vm4, %v9471_v22 }
 0xe4f   : > { %13796 = vmatpush3.bf16.msra.mxu0 %v9950_v51  ;;  %13797 = vmatprep.mubr.msk.bf16.mxu0 %vm15064_vm2, %v19925_v24 }
 0xe50   : > { %13807 = vmatprep.subr.bf16.mxu0 %v19925_v24 }
 0xe51   : > { %v18724_v27 = vpop.f32.mrb[64].mxu1 }
 0xe52   : > { %v13745_v29 = vpop.f32.mrb[65].mxu1 }
 0xe53   : > { %v18726_v56 = vpop.f32.mrb[66].mxu1 }
 0xe54   : > { %v10236_v34 = vpack.c.bf16 %v18726_v56, %v18724_v27  ;;  %v13746_v5 = vpop.f32.mrb[67].mxu1 }
 0xe57   : > { %v18730_v53 = vpop.f32.mrb[4].mxu0 }
 0xe58   : > { %v13751_v33 = vpop.f32.mrb[5].mxu0 }
 0xe59   : > { %v18732_v23 = vpop.f32.mrb[6].mxu0 }
 0xe5a   : > { %v10237_v38 = vpack.c.bf16 %v18732_v23, %v18730_v53  ;;  %v13752_v20 = vpop.f32.mrb[7].mxu0  ;;  %v14212_v23 = vld [vmem:[%s15436_s4] ss:$8 sps:$4 sm:$0xff]  }
 0xe5f   : > { %v18736_v3 = vpop.f32.mrb[68].mxu1 }
 0xe60   : > { %v13757_v11 = vpop.f32.mrb[69].mxu1 }
 0xe61   : > { %v18738_v42 = vpop.f32.mrb[70].mxu1 }
 0xe62   : > { %v10238_v57 = vpack.c.bf16 %v18738_v42, %v18736_v3  ;;  %v13758_v18 = vpop.f32.mrb[71].mxu1  ;;  %v14215_v3 = vld [vmem:[%s15436_s4 + $0x10] ss:$8 sps:$4 sm:$0xff]   ;;  %v14220_v42 = vld [vmem:[%s15436_s4 + $0x24] ss:$8 sps:$4 sm:$0xff]  }
 0xe67   : > { %v18742_v2 = vpop.f32.mrb[8].mxu0 }
 0xe68   : > { %v13763_v9 = vpop.f32.mrb[9].mxu0 }
 0xe69   : > { %v18744_v26 = vpop.f32.mrb[10].mxu0 }
 0xe6a   : > { %v10239_v59 = vpack.c.bf16 %v18744_v26, %v18742_v2  ;;  %v13764_v25 = vpop.f32.mrb[11].mxu0  ;;  %v14223_v2 = vld [vmem:[%s15436_s4 + $0x34] ss:$8 sps:$4 sm:$0xff]   ;;  %v14221_v26 = vld [vmem:[%s15436_s4 + $0x30] ss:$8 sps:$4 sm:$0xff]  }
 0xe6f   : > { %v18748_v21 = vpop.f32.mrb[72].mxu1 }
 0xe70   : > { %v13769_v1 = vpop.f32.mrb[73].mxu1 }
 0xe71   : > { %v9365_v55 = vpop.xlane.xlu1 %9364  ;;  %v18750_v49 = vpop.f32.mrb[74].mxu1 }
 0xe72   : > { %14748 = vrcp.f32 %v9365_v55  ;;  %v10240_v10 = vpack.c.bf16 %v18750_v49, %v18748_v21  ;;  %v13770_v19 = vpop.f32.mrb[75].mxu1  ;;  %v14224_v21 = vld [vmem:[%s15436_s4 + $0x40] ss:$8 sps:$4 sm:$0xff]   ;;  %v14229_v49 = vld [vmem:[%s15436_s4 + $0x54] ss:$8 sps:$4 sm:$0xff]  }
 0xe73   : > { %v9368_v32 = vpop.xlane.xlu0 %9367 }
 0xe74   : > { %14750 = vrcp.f32 %v9368_v32 }
 0xe75   : > { %v9398_v17 = vpop.xlane.xlu1 %9397 }
 0xe77   : > { %v18754_v28 = vpop.f32.mrb[12].mxu0  ;;  %v9395_v48 = vpop.xlane.xlu0 %9394 }
 0xe78   : > { %v13775_v45 = vpop.f32.mrb[13].mxu0 }
 0xe79   : > { %v18756_v43 = vpop.f32.mrb[14].mxu0  ;;  %v9377_v52 = vpop.xlane.xlu1 %9376 }
 0xe7a   : > { %v10241_v44 = vpack.c.bf16 %v18756_v43, %v18754_v28  ;;  %v13776_v6 = vpop.f32.mrb[15].mxu0  ;;  %v14232_v28 = vld [vmem:[%s15436_s4 + $0x64] ss:$8 sps:$4 sm:$0xff]   ;;  %v14230_v43 = vld [vmem:[%s15436_s4 + $0x60] ss:$8 sps:$4 sm:$0xff]  }
 0xe7b   : > { %v9380_v46 = vpop.xlane.xlu0 %9379 }
 0xe7c   : > { %v14749_v54 = vpop.eup %14748  ;;  %14752 = vrcp.f32 %v9380_v46 }
 0xe7d   : > { %14754 = vrcp.f32 %v9377_v52  ;;  %v9451_v51 = vmul.f32 %v14749_v54, %v18655_v8  ;;  %v14210_v54 = vld [vmem:[%s15429_s8 + $0x30] sm:$0xff]  }
 0xe7e   : > { %v14751_v22 = vpop.eup %14750  ;;  %14756 = vrcp.f32 %v9395_v48 }
 0xe7f   : > { %v9452_v29 = vmul.f32 %v14751_v22, %v18657_v47  ;;  %v18762_v5 = vpop.f32.mrb[76].mxu1  ;;  %14758 = vrcp.f32 %v9398_v17 }
 0xe80   : > { %v13781_v33 = vpop.f32.mrb[77].mxu1 }
 0xe81   : > { %v9473_v20 = vpack.c.bf16 %v9452_v29, %v9451_v51  ;;  %v18764_v11 = vpop.f32.mrb[78].mxu1 }
 0xe82   : > { %v10242_v18 = vpack.c.bf16 %v18764_v11, %v18762_v5  ;;  %v13782_v9 = vpop.f32.mrb[79].mxu1 }
 0xe83   : > { %13798 = vmatmul.mubr.msk.bf16.vlgmr.msra.gmra.mrb[20].mxu0 %vm2531_vm4, %v9473_v20  ;;  %v14211_v9 = vld [vmem:[%s15429_s8 + $0x38] sm:$0xff]  }
 0xe84   : > { %13809 = vmatprep.mubr.msk.bf16.mxu0 %vm15064_vm2, %v19925_v24 }
 0xe85   : > { %v9389_v8 = vpop.xlane.xlu1 %9388 }
 0xe86   : > { %v14753_v25 = vpop.eup %14752  ;;  %14760 = vrcp.f32 %v9389_v8 }
 0xe87   : > { %v9392_v47 = vpop.xlane.xlu0 %9391  ;;  %v14755_v1 = vpop.eup %14754  ;;  %v9456_v55 = vmul.f32 %v14753_v25, %v18674_v12 }
 0xe88   : > { %14762 = vrcp.f32 %v9392_v47  ;;  %v9455_v32 = vmul.f32 %v14755_v1, %v18669_v63  ;;  %v14757_v17 = vpop.eup %14756 }
 0xe89   : > { %v10091_v19 = vpop.permute.xlu1 %10090  ;;  %v14759_v63 = vpop.eup %14758  ;;  %v9461_v29 = vmul.f32 %v14757_v17, %v18665_v35 }
 0xe8a   : > { %13814 = vmatpush3.bf16.msra.mxu1 %v10091_v19  ;;  %v9475_v52 = vpack.c.bf16 %v9456_v55, %v9455_v32  ;;  %v9462_v31 = vmul.f32 %v14759_v63, %v18661_v14 }
 0xe8b   : > { %v10044_v48 = vpop.permute.xlu0 %10043  ;;  %v18773_v45 = vpop.f32.mrb[80].mxu1  ;;  %13825 = vmatprep.subr.bf16.mxu1 %v19925_v24 }
 0xe8c   : > { %v13793_v6 = vpop.f32.mrb[81].mxu1  ;;  %13808 = vmatpush3.bf16.msra.mxu0 %v10044_v48  ;;  %v9478_v33 = vpack.c.bf16 %v9462_v31, %v9461_v29 }
 0xe8d   : > { %13816 = vmatmul.mubr.msk.bf16.vlgmr.msra.gmra.mrb[88].mxu1 %vm2531_vm4, %v9476_v40  ;;  %v10138_v46 = vpop.permute.xlu1 %10137  ;;  %v9945_v12 = vpop.f32.mrb[82].mxu1  ;;  %13819 = vmatprep.subr.bf16.mxu0 %v19925_v24 }
 0xe8e   : > { %v10244_v22 = vpack.c.bf16 %v9945_v12, %v18773_v45  ;;  %v13794_v51 = vpop.f32.mrb[83].mxu1  ;;  %13827 = vmatprep.mubr.msk.bf16.mxu1 %vm15064_vm2, %v19925_v24 }
 0xe8f   : > { %13810 = vmatmul.mubr.msk.bf16.vlgmr.msra.gmra.mrb[24].mxu0 %vm2531_vm4, %v9475_v52 }
 0xe90   : > { %v14761_v62 = vpop.eup %14760  ;;  %13820 = vmatpush3.bf16.msra.mxu0 %v10138_v46  ;;  %13821 = vmatprep.mubr.msk.bf16.mxu0 %vm15064_vm2, %v19925_v24  ;;  %v14214_v24 = vld [vmem:[%s15436_s4 + $0x4] ss:$8 sps:$4 sm:$0xff]  }
 0xe91   : > { %v10185_v40 = vpop.permute.xlu1 %10184  ;;  %13831 = vmatprep.subr.bf16.mxu0 %v14210_v54  ;;  %v9459_v20 = vmul.f32 %v14761_v62, %v18689_v15 }
 0xe92   : > { %v14763_v5 = vpop.eup %14762  ;;  %13826 = vmatpush3.bf16.msra.mxu1 %v10185_v40 }
 0xe93   : > { %v9460_v11 = vmul.f32 %v14763_v5, %v18693_v41  ;;  %13917 = vmatprep.subr.bf16.mxu1 %v14210_v54 }
 0xe95   : > { %v9477_v35 = vpack.c.bf16 %v9460_v11, %v9459_v20  ;;  %13828 = vmatmul.mubr.msk.bf16.vlgmr.msra.gmra.mrb[92].mxu1 %vm2531_vm4, %v9478_v33  ;;  %v18853_v11 = vld [vmem:[%s20197_s22] ss:$0 sm:$0xff] }
 0xe96   : > { %13919 = vmatpush3.bf16.msra.mxu1 %v14210_v54 }
 0xe97   : > { %13822 = vmatmul.mubr.msk.bf16.vlgmr.msra.gmra.mrb[28].mxu0 %vm2531_vm4, %v9477_v35  ;;  %13918 = vmatprep.subr.bf16.mxu1 %v14211_v9  ;;  %v20198_v35 = vmov 0  }
 0xe98   : > { %13832 = vmatpush3.bf16.msra.mxu0 %v14210_v54  ;;  %13835 = vmatprep.mubr.msk.bf16.mxu0 %vm1778_vm3, %v10235_v0 }
 0xe99   : > { %13833 = vmatprep.subr.bf16.mxu0 %v14211_v9 }
 0xe9a   : > { %13920 = vmatpush3.bf16.msra.mxu1 %v14211_v9 }
 0xe9b   : > { %10777 = vmatprep.subr.bf16.mxu1 %v14214_v24 }
 0xe9c   : > { %13834 = vmatpush3.bf16.msra.mxu0 %v14211_v9 }
 0xe9f   : > { %13836 = vmatmul.mubr.msk.bf16.vlgmr.msra.gmra.mrb[176].mxu0 %vm1778_vm3, %v10236_v34 }
 0xea0   : > { %13839 = vmatprep.mubr.msk.bf16.mxu0 %vm1778_vm3, %v10237_v38  ;;  %v14217_v38 = vld [vmem:[%s15436_s4 + $0x14] ss:$8 sps:$4 sm:$0xff]  }
 0xea7   : > { %13840 = vmatmul.mubr.msk.bf16.gmra.mrb[180].mxu0 %vm1778_vm3, %v10238_v57  ;;  %v14218_v57 = vld [vmem:[%s15436_s4 + $0x20] ss:$8 sps:$4 sm:$0xff]  }
 0xea8   : > { %13843 = vmatprep.mubr.msk.bf16.mxu0 %vm1778_vm3, %v10239_v59  ;;  %v14226_v59 = vld [vmem:[%s15436_s4 + $0x44] ss:$8 sps:$4 sm:$0xff]  }
 0xeaf   : > { %13844 = vmatmul.mubr.msk.bf16.gmra.mrb[184].mxu0 %vm1778_vm3, %v10240_v10  ;;  %v14227_v10 = vld [vmem:[%s15436_s4 + $0x50] ss:$8 sps:$4 sm:$0xff]  }
 0xeb0   : > { %13847 = vmatprep.mubr.msk.bf16.mxu0 %vm1778_vm3, %v10241_v44  ;;  %v14235_v44 = vld [vmem:[%s15436_s4 + $0x74] ss:$8 sps:$4 sm:$0xff]  }
 0xeb7   : > { %13848 = vmatmul.mubr.msk.bf16.gmra.mrb[188].mxu0 %vm1778_vm3, %v10242_v18  ;;  %v14233_v18 = vld [vmem:[%s15436_s4 + $0x70] ss:$8 sps:$4 sm:$0xff]  }
 0xf17   : > { %v10036_v14 = vpop.f32.mrb[84].mxu1 }
 0xf18   : > { %v13805_v15 = vpop.f32.mrb[85].mxu1 }
 0xf19   : > { %v10039_v41 = vpop.f32.mrb[86].mxu1 }
 0xf1a   : > { %v10246_v30 = vpack.c.bf16 %v10039_v41, %v10036_v14  ;;  %v13806_v7 = vpop.f32.mrb[87].mxu1  ;;  %v18862_v41 = vld [vmem:[%s20200_s19] ss:$0 sm:$0xff] }
 0xf1b   : > { %v14764_v7 = vld [vmem:[#allocation2] sm:$0xff] }
 0xf21   : > { %v9895_v0 = vpop.f32.mrb[16].mxu0 }
 0xf22   : > { %v13787_v27 = vpop.f32.mrb[17].mxu0 }
 0xf23   : > { %v9898_v56 = vpop.f32.mrb[18].mxu0 }
 0xf24   : > { %v10243_v34 = vpack.c.bf16 %v9898_v56, %v9895_v0  ;;  %v13788_v53 = vpop.f32.mrb[19].mxu0 }
 0xf26   : > { %13851 = vmatprep.mubr.msk.bf16.mxu1 %vm1778_vm3, %v10243_v34 }
 0xf27   : > { %13852 = vmatmul.mubr.msk.bf16.vlgmr.msra.gmra.mrb[96].mxu1 %vm1778_vm3, %v10244_v22 }
 0xf28   : > { %10778 = vmatpush1.bf16.msra.mxu1 %v14212_v23  ;;  %v14765_v23 = vld [vmem:[#allocation2 + $0x8] sm:$0xff] }
 0xf29   : > { %10779 = vmatprep.subr.bf16.mxu1 %v14217_v38 }
 0xf2c   : > { %10780 = vmatpush1.bf16.msra.mxu1 %v14215_v3  ;;  %v18873_v3 = vld [vmem:[%s820_s28] ss:$0 sm:$0xff] }
 0xf2d   : > { %10781 = vmatprep.subr.bf16.mxu1 %v14220_v42  ;;  %v14766_v42 = vld [vmem:[#allocation2 + $0x18] sm:$0xff] }
 0xf30   : > { %10782 = vmatpush1.bf16.msra.mxu1 %v14218_v57 }
 0xf31   : > { %10783 = vmatprep.subr.bf16.mxu1 %v14223_v2 }
 0xf34   : > { %10784 = vmatpush1.bf16.msra.mxu1 %v14221_v26 }
 0xf35   : > { %10785 = vmatprep.subr.bf16.mxu1 %v14226_v59 }
 0xf38   : > { %10786 = vmatpush1.bf16.msra.mxu1 %v14224_v21  ;;  %v14767_v21 = vld [vmem:[#allocation2 + $0x10] sm:$0xff] }
 0xf39   : > { %10787 = vmatprep.subr.bf16.mxu1 %v14229_v49 }
 0xf3c   : > { %10788 = vmatpush1.bf16.msra.mxu1 %v14227_v10 }
 0xf3d   : > { %10789 = vmatprep.subr.bf16.mxu1 %v14232_v28 }
 0xf40   : > { %10790 = vmatpush1.bf16.msra.mxu1 %v14230_v43 }
 0xf41   : > { %10791 = vmatprep.subr.bf16.mxu1 %v14235_v44 }
 0xf44   : > { %10792 = vmatpush1.bf16.msra.mxu1 %v14233_v18 }
 0xf56   : > { %v9989_v8 = vpop.f32.mrb[20].mxu0 }
 0xf57   : > { %v13799_v25 = vpop.f32.mrb[21].mxu0 }
 0xf58   : > { %v9992_v47 = vpop.f32.mrb[22].mxu0 }
 0xf59   : > { %v10245_v1 = vpack.c.bf16 %v9992_v47, %v9989_v8  ;;  %v13800_v55 = vpop.f32.mrb[23].mxu0 }
 0xf5b   : > { %13855 = vmatprep.mubr.msk.bf16.mxu1 %vm1778_vm3, %v10245_v1 }
 0xf5c   : > { %13856 = vmatmul.mubr.msk.bf16.gmra.mrb[100].mxu1 %vm1778_vm3, %v10246_v30 }
 0xf60   : > { %v10130_v19 = vpop.f32.mrb[88].mxu1 }
 0xf61   : > { %v13817_v32 = vpop.f32.mrb[89].mxu1 }
 0xf62   : > { %v10083_v48 = vpop.f32.mrb[24].mxu0  ;;  %v10133_v45 = vpop.f32.mrb[90].mxu1 }
 0xf63   : > { %v10248_v17 = vpack.c.bf16 %v10133_v45, %v10130_v19  ;;  %v13811_v6 = vpop.f32.mrb[25].mxu0  ;;  %v13818_v52 = vpop.f32.mrb[91].mxu1  ;;  %v14768_v19 = vld [vmem:[#allocation2 + $0x28] sm:$0xff] }
 0xf64   : > { %v10086_v46 = vpop.f32.mrb[26].mxu0  ;;  %v14769_v6 = vld [vmem:[#allocation2 + $0x20] sm:$0xff] }
 0xf65   : > { %v10247_v12 = vpack.c.bf16 %v10086_v46, %v10083_v48  ;;  %v13812_v54 = vpop.f32.mrb[27].mxu0 }
 0xf67   : > { %13859 = vmatprep.mubr.msk.bf16.mxu1 %vm1778_vm3, %v10247_v12 }
 0xf68   : > { %v10224_v63 = vpop.f32.mrb[92].mxu1  ;;  %13860 = vmatmul.mubr.msk.bf16.gmra.mrb[104].mxu1 %vm1778_vm3, %v10248_v17 }
 0xf69   : > { %v13829_v22 = vpop.f32.mrb[93].mxu1 }
 0xf6a   : > { %v10177_v51 = vpop.f32.mrb[28].mxu0  ;;  %v10227_v29 = vpop.f32.mrb[94].mxu1 }
 0xf6b   : > { %v10250_v62 = vpack.c.bf16 %v10227_v29, %v10224_v63  ;;  %v13823_v31 = vpop.f32.mrb[29].mxu0  ;;  %v13830_v40 = vpop.f32.mrb[95].mxu1 }
 0xf6c   : > { %v10180_v5 = vpop.f32.mrb[30].mxu0 }
 0xf6d   : > { %v10249_v33 = vpack.c.bf16 %v10180_v5, %v10177_v51  ;;  %v13824_v20 = vpop.f32.mrb[31].mxu0 }
 0xf6e   : > { %v14771_v20 = vld [vmem:[#allocation2 + $0x30] sm:$0xff] }
 0xf6f   : > { %13863 = vmatprep.mubr.msk.bf16.mxu1 %vm1778_vm3, %v10249_v33 }
 0xf70   : > { %13864 = vmatmul.mubr.msk.bf16.gmra.mrb[108].mxu1 %vm1778_vm3, %v10250_v62  ;;  %v14770_v62 = vld [vmem:[#allocation2 + $0x38] sm:$0xff] }
 0xf71   : > { %10809 = vmatprep.mubr.bf16.mxu1 %v20198_v35 }
 0xf72   : > { %v13837_v9 = vpop.f32.mrb[176].mxu0 }
 0xf73   : > { %v10345_v24 = vpop.f32.mrb[177].mxu0  ;;  %v10513_v34 = vadd.f32 %v13837_v9, %v18853_v11 }
 0xf74   : > { %v10511_v14 = vadd.f32 %v18853_v11, %v10345_v24  ;;  %v13838_v15 = vpop.f32.mrb[178].mxu0 }
 0xf75   : > { %v10348_v30 = vpop.f32.mrb[179].mxu0  ;;  %v10514_v27 = vadd.f32 %v13838_v15, %v18853_v11  ;;  %v10545_v49 = vadd.f32 %v14767_v21, %v10513_v34 }
 0xf76   : > { %v10543_v0 = vadd.f32 %v14764_v7, %v10511_v14  ;;  %v10512_v56 = vadd.f32 %v18853_v11, %v10348_v30 }
 0xf77   : > { %v10546_v57 = vadd.f32 %v14766_v42, %v10514_v27  ;;  %v10584_v47 = vmul.f32 %v18862_v41, %v10545_v49  ;;  %v14773_v42 = vld [vmem:[#allocation2 + $0x40] sm:$0xff] }
 0xf78   : > { %v10582_v53 = vmul.f32 %v18862_v41, %v10543_v0  ;;  %v10544_v38 = vadd.f32 %v14765_v23, %v10512_v56 }
 0xf79   : > { %v10585_v18 = vmul.f32 %v18862_v41, %v10546_v57  ;;  %v18893_v17 = vadd.f32 %v18873_v3, %v10584_v47 }
 0xf7a   : > { %v10583_v2 = vmul.f32 %v18862_v41, %v10544_v38  ;;  %v13841_v26 = vpop.f32.mrb[180].mxu0  ;;  %v18877_v10 = vadd.f32 %v18873_v3, %v10582_v53  ;;  %v14772_v53 = vld [vmem:[#allocation2 + $0x48] sm:$0xff] }
 0xf7b   : > { %v10361_v59 = vpop.f32.mrb[181].mxu0  ;;  %v18890_v55 = vadd.f32 %v18873_v3, %v10585_v18  ;;  %v10517_v51 = vadd.f32 %v13841_v26, %v18853_v11 }
 0xf7c   : > { %v18880_v28 = vadd.f32 %v18873_v3, %v10583_v2  ;;  %v13842_v43 = vpop.f32.mrb[182].mxu0  ;;  %v10515_v1 = vadd.f32 %v18853_v11, %v10361_v59 }
 0xf7d   : > { %v10364_v44 = vpop.f32.mrb[183].mxu0  ;;  %v10670_v54 = vpack.c.bf16 %v18890_v55, %v18893_v17  ;;  %v10518_v63 = vadd.f32 %v13842_v43, %v18853_v11  ;;  %v10549_v9 = vadd.f32 %v14771_v20, %v10517_v51  ;;  %v14774_v43 = vld [vmem:[#allocation2 + $0x58] sm:$0xff] }
 0xf7e   : > { %v10669_v8 = vpack.c.bf16 %v18880_v28, %v18877_v10  ;;  %v10516_v25 = vadd.f32 %v18853_v11, %v10364_v44  ;;  %v10547_v52 = vadd.f32 %v14769_v6, %v10515_v1 }
 0xf7f   : > { %v10550_v31 = vadd.f32 %v14770_v62, %v10518_v63  ;;  %v10588_v27 = vmul.f32 %v18862_v41, %v10549_v9 }
 0xf80   : > { %10810 = vmatmul.mubr.bf16.vlgmr.msra.gmra.mrb[112].mxu1 %v10669_v8  ;;  %v10548_v32 = vadd.f32 %v14768_v19, %v10516_v25  ;;  %v10586_v29 = vmul.f32 %v18862_v41, %v10547_v52  ;;  %v14775_v8 = vld [vmem:[#allocation2 + $0x50] sm:$0xff]  ;;  %v14776_v52 = vld [vmem:[#allocation2 + $0x68] sm:$0xff] }
 0xf81   : > { %10819 = vmatprep.mubr.bf16.mxu1 %v20198_v35  ;;  %v10589_v30 = vmul.f32 %v18862_v41, %v10550_v31  ;;  %v18919_v38 = vadd.f32 %v18873_v3, %v10588_v27 }
 0xf82   : > { %v13845_v48 = vpop.f32.mrb[184].mxu0  ;;  %v10587_v22 = vmul.f32 %v18862_v41, %v10548_v32  ;;  %v18906_v24 = vadd.f32 %v18873_v3, %v10586_v29 }
 0xf83   : > { %v10377_v45 = vpop.f32.mrb[185].mxu0  ;;  %v18916_v34 = vadd.f32 %v18873_v3, %v10589_v30  ;;  %v10521_v21 = vadd.f32 %v13845_v48, %v18853_v11 }
 0xf84   : > { %v13846_v46 = vpop.f32.mrb[186].mxu0  ;;  %v18903_v40 = vadd.f32 %v18873_v3, %v10587_v22  ;;  %v10519_v56 = vadd.f32 %v18853_v11, %v10377_v45 }
 0xf85   : > { %v10380_v12 = vpop.f32.mrb[187].mxu0  ;;  %v10672_v2 = vpack.c.bf16 %v18916_v34, %v18919_v38  ;;  %v10522_v26 = vadd.f32 %v13846_v46, %v18853_v11  ;;  %v10553_v25 = vadd.f32 %v14775_v8, %v10521_v21  ;;  %v14242_v21 = vld [vmem:[%s15442_s12 + $0x58] sm:$0xff]   ;;  %v14246_v8 = vld [vmem:[%s15442_s12 + $0x68] sm:$0xff]  }
 0xf86   : > { %v10671_v7 = vpack.c.bf16 %v18903_v40, %v18906_v24  ;;  %v10520_v0 = vadd.f32 %v18853_v11, %v10380_v12  ;;  %v10551_v57 = vadd.f32 %v14773_v42, %v10519_v56  ;;  %v14237_v42 = vld [vmem:[%s15442_s12] sm:$0xff]  }
 0xf87   : > { %v10554_v44 = vadd.f32 %v14774_v43, %v10522_v26  ;;  %v10592_v48 = vmul.f32 %v18862_v41, %v10553_v25  ;;  %v14240_v26 = vld [vmem:[%s15442_s12 + $0x50] sm:$0xff]   ;;  %v14244_v43 = vld [vmem:[%s15442_s12 + $0x60] sm:$0xff]   ;;  %v14247_v25 = vld [vmem:[%s15442_s12 + $0x28] sm:$0xff]  }
 0xf88   : > { %10820 = vmatmul.mubr.bf16.gmra.mrb[116].mxu1 %v10670_v54  ;;  %v10552_v23 = vadd.f32 %v14772_v53, %v10520_v0  ;;  %v10590_v49 = vmul.f32 %v18862_v41, %v10551_v57  ;;  %v14777_v54 = vld [vmem:[#allocation2 + $0x60] sm:$0xff]  ;;  %v14238_v57 = vld [vmem:[%s15442_s12 + $0x48] sm:$0xff]  }
 0xf89   : > { %10829 = vmatprep.mubr.bf16.mxu1 %v20198_v35  ;;  %v10593_v1 = vmul.f32 %v18862_v41, %v10554_v44  ;;  %v18945_v12 = vadd.f32 %v18873_v3, %v10592_v48  ;;  %v14245_v44 = vld [vmem:[%s15442_s12 + $0x20] sm:$0xff]   ;;  %v14251_v48 = vld [vmem:[%s15442_s12 + $0x38] sm:$0xff]  }
 0xf8a   : > { %v13849_v5 = vpop.f32.mrb[188].mxu0  ;;  %v10591_v59 = vmul.f32 %v18862_v41, %v10552_v23  ;;  %v18932_v47 = vadd.f32 %v18873_v3, %v10590_v49  ;;  %v14236_v23 = vld [vmem:[%s15442_s12 + $0x40] sm:$0xff]   ;;  %v14243_v49 = vld [vmem:[%s15442_s12 + $0x18] sm:$0xff]  }
 0xf8b   : > { %v10393_v33 = vpop.f32.mrb[189].mxu0  ;;  %v18942_v6 = vadd.f32 %v18873_v3, %v10593_v1  ;;  %v10525_v62 = vadd.f32 %v13849_v5, %v18853_v11  ;;  %12737 = vmatprep.subr.bf16.mxu0 %v14236_v23  ;;  %v14248_v1 = vld [vmem:[%s15442_s12 + $0x70] sm:$0xff]  }
 0xf8c   : > { %v13850_v14 = vpop.f32.mrb[190].mxu0  ;;  %v18929_v18 = vadd.f32 %v18873_v3, %v10591_v59  ;;  %v10523_v45 = vadd.f32 %v18853_v11, %v10393_v33  ;;  %v14778_v33 = vld [vmem:[#allocation2 + $0x78] sm:$0xff]  ;;  %12738 = vmatpush3.bf16.msra.mxu0 %v14237_v42  ;;  %v14241_v59 = vld [vmem:[%s15442_s12 + $0x10] sm:$0xff]  }
 0xf8d   : > { %v10396_v15 = vpop.f32.mrb[191].mxu0  ;;  %v10674_v22 = vpack.c.bf16 %v18942_v6, %v18945_v12  ;;  %v10526_v51 = vadd.f32 %v13850_v14, %v18853_v11  ;;  %12739 = vmatprep.subr.bf16.mxu0 %v14238_v57 }
 0xf8e   : > { %v10673_v19 = vpack.c.bf16 %v18929_v18, %v18932_v47  ;;  %v10524_v32 = vadd.f32 %v18853_v11, %v10396_v15  ;;  %v10555_v63 = vadd.f32 %v14777_v54, %v10523_v45  ;;  %v14779_v15 = vld [vmem:[#allocation2 + $0x70] sm:$0xff] }
 0xf8f   : > { %v10558_v20 = vadd.f32 %v14778_v33, %v10526_v51  ;;  %v10557_v30 = vadd.f32 %v14779_v15, %v10525_v62 }
 0xf90   : > { %10830 = vmatmul.mubr.bf16.gmra.mrb[120].mxu1 %v10671_v7  ;;  %v10556_v46 = vadd.f32 %v14776_v52, %v10524_v32  ;;  %v10594_v31 = vmul.f32 %v18862_v41, %v10555_v63  ;;  %v14250_v32 = vld [vmem:[%s15442_s12 + $0x78] sm:$0xff]  }
 0xf91   : > { %10839 = vmatprep.mubr.bf16.mxu1 %v20198_v35  ;;  %v10597_v5 = vmul.f32 %v18862_v41, %v10558_v20  ;;  %v10596_v0 = vmul.f32 %v18862_v41, %v10557_v30 }
 0xf92   : > { %v10595_v29 = vmul.f32 %v18862_v41, %v10556_v46  ;;  %v18958_v14 = vadd.f32 %v18873_v3, %v10594_v31  ;;  %v14780_v31 = vld [vmem:[#allocation2 + $0x80] sm:$0xff] }
 0xf93   : > { %v18966_v27 = vadd.f32 %v18873_v3, %v10597_v5  ;;  %v18969_v56 = vadd.f32 %v18873_v3, %v10596_v0  ;;  %v14781_v5 = vld [vmem:[#allocation2 + $0x88] sm:$0xff] }
 0xf94   : > { %v18955_v9 = vadd.f32 %v18873_v3, %v10595_v29 }
 0xf95   : > { %v10676_v53 = vpack.c.bf16 %v18966_v27, %v18969_v56 }
 0xf96   : > { %v10675_v7 = vpack.c.bf16 %v18955_v9, %v18958_v14 }
 0xf98   : > { %10840 = vmatmul.mubr.bf16.gmra.mrb[124].mxu1 %v10672_v2  ;;  %v14239_v2 = vld [vmem:[%s15442_s12 + $0x8] sm:$0xff]  }
 0xf99   : > { %10849 = vmatprep.mubr.bf16.mxu1 %v20198_v35  ;;  %12740 = vmatpush3.bf16.msra.mxu0 %v14239_v2 }
 0xf9a   : > { %12741 = vmatprep.subr.bf16.mxu0 %v14240_v26 }
 0xf9d   : > { %12742 = vmatpush3.bf16.msra.mxu0 %v14241_v59 }
 0xf9e   : > { %12743 = vmatprep.subr.bf16.mxu0 %v14242_v21 }
 0xfa0   : > { %10850 = vmatmul.mubr.bf16.gmra.mrb[128].mxu1 %v10673_v19  ;;  %v14249_v19 = vld [vmem:[%s15442_s12 + $0x30] sm:$0xff]  }
 0xfa1   : > { %10859 = vmatprep.mubr.bf16.mxu1 %v20198_v35  ;;  %12744 = vmatpush3.bf16.msra.mxu0 %v14243_v49 }
 0xfa2   : > { %12745 = vmatprep.subr.bf16.mxu0 %v14244_v43 }
 0xfa5   : > { %12746 = vmatpush3.bf16.msra.mxu0 %v14245_v44 }
 0xfa6   : > { %12747 = vmatprep.subr.bf16.mxu0 %v14246_v8 }
 0xfa8   : > { %10860 = vmatmul.mubr.bf16.gmra.mrb[132].mxu1 %v10674_v22 }
 0xfa9   : > { %10869 = vmatprep.mubr.bf16.mxu1 %v20198_v35  ;;  %12748 = vmatpush3.bf16.msra.mxu0 %v14247_v25 }
 0xfaa   : > { %12749 = vmatprep.subr.bf16.mxu0 %v14248_v1 }
 0xfad   : > { %12750 = vmatpush3.bf16.msra.mxu0 %v14249_v19 }
 0xfae   : > { %12751 = vmatprep.subr.bf16.mxu0 %v14250_v32 }
 0xfb0   : > { %10870 = vmatmul.mubr.bf16.gmra.mrb[136].mxu1 %v10675_v7  ;;  %v14782_v7 = vld [vmem:[#allocation2 + $0x98] sm:$0xff] }
 0xfb1   : > { %10879 = vmatprep.mubr.bf16.mxu1 %v20198_v35  ;;  %12752 = vmatpush3.bf16.msra.mxu0 %v14251_v48 }
 0xfb8   : > { %10880 = vmatmul.mubr.bf16.gmra.mrb[140].mxu1 %v10676_v53  ;;  %v14783_v53 = vld [vmem:[#allocation2 + $0x90] sm:$0xff] }
 0xfb9   : > { %10889 = vmatprep.mubr.bf16.mxu1 %v20198_v35 }
 0xffa   : > { %v13853_v45 = vpop.f32.mrb[96].mxu1 }
 0xffb   : > { %v13921_v52 = vadd.f32 %v13853_v45, %v18395_v60  ;;  %v10409_v46 = vpop.f32.mrb[97].mxu1 }
 0xffc   : > { %v13922_v54 = vadd.f32 %v10409_v46, %v18397_v50  ;;  %v13854_v63 = vpop.f32.mrb[98].mxu1 }
 0xffd   : > { %v13923_v22 = vadd.f32 %v13854_v63, %v18402_v16  ;;  %v10412_v51 = vpop.f32.mrb[99].mxu1  ;;  %v10529_v30 = vadd.f32 %v13921_v52, %v18853_v11  ;;  %v14784_v52 = vld [vmem:[#allocation2 + $0xa0] sm:$0xff] }
 0xffe   : > { %v10527_v29 = vadd.f32 %v13922_v54, %v18853_v11  ;;  %v13924_v62 = vadd.f32 %v10412_v51, %v18404_v58  ;;  %v14785_v51 = vld [vmem:[#allocation2 + $0xa8] sm:$0xff] }
 0xfff   : > { %v10530_v20 = vadd.f32 %v13923_v22, %v18853_v11  ;;  %v10561_v23 = vadd.f32 %v14783_v53, %v10529_v30 }
0x1000   : > { %v10559_v33 = vadd.f32 %v14780_v31, %v10527_v29  ;;  %v10528_v15 = vadd.f32 %v13924_v62, %v18853_v11  ;;  %v14786_v29 = vld [vmem:[#allocation2 + $0xb8] sm:$0xff]  ;;  %v14787_v31 = vld [vmem:[#allocation2 + $0xb0] sm:$0xff] }
0x1001   : > { %v10562_v0 = vadd.f32 %v14782_v7, %v10530_v20  ;;  %v10600_v26 = vmul.f32 %v18862_v41, %v10561_v23 }
0x1002   : > { %v10598_v60 = vmul.f32 %v18862_v41, %v10559_v33  ;;  %v10560_v50 = vadd.f32 %v14781_v5, %v10528_v15 }
0x1003   : > { %v10601_v57 = vmul.f32 %v18862_v41, %v10562_v0  ;;  %v19015_v21 = vadd.f32 %v18873_v3, %v10600_v26  ;;  %v20203_v26 = vld [vmem:[#allocation114_spill] sm:$0xff] }
0x1004   : > { %v10599_v16 = vmul.f32 %v18862_v41, %v10560_v50  ;;  %v19001_v58 = vadd.f32 %v18873_v3, %v10598_v60 }
0x1005   : > { %v19012_v59 = vadd.f32 %v18873_v3, %v10601_v57 }
0x1006   : > { %v19004_v42 = vadd.f32 %v18873_v3, %v10599_v16  ;;  %v20202_v16 = vld [vmem:[#allocation119_spill] sm:$0xff] }
0x1007   : > { %v10678_v49 = vpack.c.bf16 %v19012_v59, %v19015_v21 }
0x1008   : > { %v10677_v2 = vpack.c.bf16 %v19004_v42, %v19001_v58 }
0x100a   : > { %10890 = vmatmul.mubr.bf16.gmra.mrb[144].mxu1 %v10677_v2 }
0x100b   : > { %10899 = vmatprep.mubr.bf16.mxu1 %v20198_v35 }
0x1012   : > { %10900 = vmatmul.mubr.bf16.gmra.mrb[148].mxu1 %v10678_v49 }
0x1013   : > { %10909 = vmatprep.mubr.bf16.mxu1 %v20198_v35 }
0x102f   : > { %v13857_v43 = vpop.f32.mrb[100].mxu1 }
0x1030   : > { %v13925_v44 = vadd.f32 %v13857_v43, %v18423_v4  ;;  %v10425_v8 = vpop.f32.mrb[101].mxu1 }
0x1031   : > { %v13926_v25 = vadd.f32 %v10425_v8, %v18425_v13  ;;  %v13858_v1 = vpop.f32.mrb[102].mxu1 }
0x1032   : > { %v13927_v19 = vadd.f32 %v13858_v1, %v18430_v37  ;;  %v10428_v32 = vpop.f32.mrb[103].mxu1  ;;  %v10533_v22 = vadd.f32 %v13925_v44, %v18853_v11  ;;  %v14788_v44 = vld [vmem:[#allocation2 + $0xc0] sm:$0xff] }
0x1033   : > { %v10531_v48 = vadd.f32 %v13926_v25, %v18853_v11  ;;  %v13928_v45 = vadd.f32 %v10428_v32, %v18432_v36  ;;  %v14789_v25 = vld [vmem:[#allocation2 + $0xc8] sm:$0xff]  ;;  %v20204_v32 = vld [vmem:[#allocation69_spill] sm:$0xff] }
0x1034   : > { %v10534_v54 = vadd.f32 %v13927_v19, %v18853_v11  ;;  %v10565_v33 = vadd.f32 %v14787_v31, %v10533_v22  ;;  %v20207_v31 = vld [vmem:[#allocation123_spill] sm:$0xff] }
0x1035   : > { %v10563_v46 = vadd.f32 %v14784_v52, %v10531_v48  ;;  %v10532_v63 = vadd.f32 %v13928_v45, %v18853_v11 }
0x1036   : > { %v10566_v62 = vadd.f32 %v14786_v29, %v10534_v54  ;;  %v10604_v57 = vmul.f32 %v18862_v41, %v10565_v33 }
0x1037   : > { %v10602_v4 = vmul.f32 %v18862_v41, %v10563_v46  ;;  %v10564_v13 = vadd.f32 %v14785_v51, %v10532_v63  ;;  %v20205_v63 = vld [vmem:[#allocation121_spill] sm:$0xff]  ;;  %v20206_v51 = vld [vmem:[#allocation116_spill] sm:$0xff] }
0x1038   : > { %v10605_v5 = vmul.f32 %v18862_v41, %v10566_v62 }
0x1039   : > { %v10603_v37 = vmul.f32 %v18862_v41, %v10564_v13  ;;  %v19031_v36 = vadd.f32 %v18873_v3, %v10602_v4 }
0x103b   : > { %v19034_v20 = vadd.f32 %v18873_v3, %v10603_v37  ;;  %v13861_v15 = vpop.f32.mrb[104].mxu1 }
0x103c   : > { %v13929_v30 = vadd.f32 %v13861_v15, %v18451_v39  ;;  %v10441_v60 = vpop.f32.mrb[105].mxu1  ;;  %v19047_v39 = vadd.f32 %v18873_v3, %v10605_v5  ;;  %v14790_v15 = vld [vmem:[#allocation2 + $0xd8] sm:$0xff] }
0x103d   : > { %v10679_v50 = vpack.c.bf16 %v19034_v20, %v19031_v36  ;;  %v13930_v7 = vadd.f32 %v10441_v60, %v18453_v61  ;;  %v13862_v0 = vpop.f32.mrb[106].mxu1  ;;  %v19051_v61 = vadd.f32 %v18873_v3, %v10604_v57 }
0x103e   : > { %v13931_v53 = vadd.f32 %v13862_v0, %v20202_v16  ;;  %v10444_v23 = vpop.f32.mrb[107].mxu1  ;;  %v10537_v62 = vadd.f32 %v13929_v30, %v18853_v11 }
0x103f   : > { %v10535_v2 = vadd.f32 %v13930_v7, %v18853_v11  ;;  %v13932_v49 = vadd.f32 %v10444_v23, %v20203_v26  ;;  %10910 = vmatmul.mubr.bf16.gmra.mrb[152].mxu1 %v10679_v50  ;;  %v10680_v52 = vpack.c.bf16 %v19047_v39, %v19051_v61  ;;  %v14791_v50 = vld [vmem:[#allocation2 + $0xd0] sm:$0xff]  ;;  %v10685_v23 = vld [vmem:[%s15493_s25] sm:$0x3] }
0x1040   : > { %10919 = vmatprep.mubr.bf16.mxu1 %v20198_v35  ;;  %v10538_v46 = vadd.f32 %v13931_v53, %v18853_v11  ;;  %v10569_v7 = vadd.f32 %v14791_v50, %v10537_v62  ;;  %v20208_v26 = vld [vmem:[#allocation31_spill] sm:$0xff] }
0x1041   : > { %v10536_v43 = vadd.f32 %v13932_v49, %v18853_v11  ;;  %v10567_v8 = vadd.f32 %v14788_v44, %v10535_v2  ;;  %v20209_v49 = vsub.s32 0, %v20208_v26 }
0x1042   : > { %v10570_v60 = vadd.f32 %v14790_v15, %v10538_v46  ;;  %v10608_v57 = vmul.f32 %v18862_v41, %v10569_v7 }
0x1043   : > { %v10568_v1 = vadd.f32 %v14789_v25, %v10536_v43  ;;  %v13865_v19 = vpop.f32.mrb[108].mxu1  ;;  %v10606_v37 = vmul.f32 %v18862_v41, %v10567_v8  ;;  %v19079_v43 = vrot.slane %v10685_v23, %v20209_v49  ;;  %v14792_v8 = vld [vmem:[#allocation2 + $0xe8] sm:$0xff] }
0x1044   : > { %v13933_v48 = vadd.f32 %v13865_v19, %v20204_v32  ;;  %v10457_v45 = vpop.f32.mrb[109].mxu1  ;;  %v10609_v16 = vmul.f32 %v18862_v41, %v10570_v60  ;;  %v19090_v32 = vadd.f32 %v18873_v3, %v10608_v57 }
0x1045   : > { %v10607_v54 = vmul.f32 %v18862_v41, %v10568_v1  ;;  %v13934_v22 = vadd.f32 %v10457_v45, %v20205_v63  ;;  %v13866_v4 = vpop.f32.mrb[110].mxu1  ;;  %v19068_v0 = vadd.f32 %v18873_v3, %v10606_v37  ;;  %v20210_v1 = vsub.s32 1, %v20208_v26  ;;  %v14793_v45 = vld [vmem:[#allocation2 + $0xe0] sm:$0xff] }
0x1046   : > { %v13935_v13 = vadd.f32 %v13866_v4, %v20206_v51  ;;  %v10460_v29 = vpop.f32.mrb[111].mxu1  ;;  %v19083_v44 = vadd.f32 %v18873_v3, %v10609_v16 }
0x1047   : > { %v13936_v33 = vadd.f32 %v10460_v29, %v20207_v31  ;;  %10920 = vmatmul.mubr.bf16.gmra.mrb[156].mxu1 %v10680_v52  ;;  %v19065_v5 = vadd.f32 %v18873_v3, %v10607_v54  ;;  %v10539_v2 = vadd.f32 %v13934_v22, %v18853_v11  ;;  %v19087_v19 = vrot.slane %v10685_v23, %v20210_v1 }
0x1048   : > { %10929 = vmatprep.mubr.bf16.mxu1 %v20198_v35  ;;  %v10682_v22 = vpack.c.bf16 %v19083_v44, %v19090_v32  ;;  %v10542_v4 = vadd.f32 %v13935_v13, %v18853_v11  ;;  %v14794_v13 = vld [vmem:[#allocation2 + $0xf8] sm:$0xff] }
0x1049   : > { %v10681_v30 = vpack.c.bf16 %v19065_v5, %v19068_v0  ;;  %v10540_v53 = vadd.f32 %v13936_v33, %v18853_v11  ;;  %v10571_v52 = vadd.f32 %v14793_v45, %v10539_v2  ;;  %v10541_v33 = vadd.f32 %v13933_v48, %v18853_v11  ;;  %v14795_v2 = vld [vmem:[#allocation2 + $0xf0] sm:$0xff] }
0x104a   : > { %v10574_v16 = vadd.f32 %v14794_v13, %v10542_v4 }
0x104b   : > { %v10572_v25 = vadd.f32 %v14792_v8, %v10540_v53  ;;  %v10610_v15 = vmul.f32 %v18862_v41, %v10571_v52  ;;  %v10573_v26 = vadd.f32 %v14795_v2, %v10541_v33 }
0x104c   : > { %v10613_v1 = vmul.f32 %v18862_v41, %v10574_v16 }
0x104d   : > { %v10611_v51 = vmul.f32 %v18862_v41, %v10572_v25  ;;  %v19107_v11 = vadd.f32 %v18873_v3, %v10610_v15 }
0x104f   : > { %10930 = vmatmul.mubr.bf16.gmra.mrb[160].mxu1 %v10681_v30  ;;  %v19104_v30 = vadd.f32 %v18873_v3, %v10611_v51 }
0x1050   : > { %10939 = vmatprep.mubr.bf16.mxu1 %v20198_v35 }
0x1051   : > { %v10683_v45 = vpack.c.bf16 %v19104_v30, %v19107_v11 }
0x1053   : > { %v10811_v46 = vpop.f32.mrb[112].mxu1 }
0x1054   : > { %v10812_v54 = vadd.f32 %v10811_v46, %v19079_v43  ;;  %v10813_v63 = vpop.f32.mrb[113].mxu1 }
0x1055   : > { %v10814_v29 = vadd.f32 %v10813_v63, %v19087_v19  ;;  %v10815_v62 = vpop.f32.mrb[114].mxu1 }
0x1056   : > { %v10816_v37 = vadd.f32 %v10815_v62, %v19079_v43  ;;  %v10817_v31 = vpop.f32.mrb[115].mxu1  ;;  %v10970_v50 = vmax.f32 %v10812_v54, 0.0  ;;  %v19119_v62 = vadd.f32 %v18873_v3, %v10613_v1 }
0x1057   : > { %v10818_v60 = vadd.f32 %v10817_v31, %v19087_v19  ;;  %10940 = vmatmul.mubr.bf16.gmra.mrb[164].mxu1 %v10682_v22  ;;  %v10971_v53 = vmax.f32 %v10814_v29, 0.0  ;;  %v10612_v22 = vmul.f32 %v18862_v41, %v10573_v26 }
0x1058   : > { %v10972_v7 = vmax.f32 %v10816_v37, 0.0  ;;  %10949 = vmatprep.mubr.bf16.mxu1 %v20198_v35 }
0x1059   : > { %v10973_v23 = vmax.f32 %v10818_v60, 0.0  ;;  %v19122_v15 = vadd.f32 %v18873_v3, %v10612_v22 }
0x105a   : > { %v11066_v57 = vpack.c.bf16 %v10972_v7, %v10970_v50 }
0x105b   : > { %v11067_v48 = vpack.c.bf16 %v10973_v23, %v10971_v53  ;;  %v10821_v49 = vpop.f32.mrb[116].mxu1  ;;  %v10684_v13 = vpack.c.bf16 %v19119_v62, %v19122_v15 }
0x105c   : > { %v10822_v8 = vadd.f32 %v10821_v49, %v19079_v43  ;;  %v10823_v25 = vpop.f32.mrb[117].mxu1 }
0x105d   : > { %v10824_v52 = vadd.f32 %v10823_v25, %v19087_v19  ;;  %v10825_v46 = vpop.f32.mrb[118].mxu1  ;;  %11233 = vmatprep.mubr.bf16.mxu0 %v11067_v48 }
0x105e   : > { %v10826_v54 = vadd.f32 %v10825_v46, %v19079_v43  ;;  %v10827_v63 = vpop.f32.mrb[119].mxu1  ;;  %11234 = vmatmul.mubr.bf16.vlgmr.msra.gmra.mrb[32].mxu0 %v11066_v57  ;;  %v10974_v51 = vmax.f32 %v10822_v8, 0.0 }
0x105f   : > { %v10828_v4 = vadd.f32 %v10827_v63, %v19087_v19  ;;  %10950 = vmatmul.mubr.bf16.gmra.mrb[168].mxu1 %v10683_v45  ;;  %v10975_v37 = vmax.f32 %v10824_v52, 0.0 }
0x1060   : > { %v10976_v29 = vmax.f32 %v10826_v54, 0.0  ;;  %10959 = vmatprep.mubr.bf16.mxu1 %v20198_v35 }
0x1061   : > { %v10977_v31 = vmax.f32 %v10828_v4, 0.0 }
0x1062   : > { %v11068_v33 = vpack.c.bf16 %v10976_v29, %v10974_v51 }
0x1063   : > { %v11069_v60 = vpack.c.bf16 %v10977_v31, %v10975_v37  ;;  %v10831_v50 = vpop.f32.mrb[120].mxu1 }
0x1064   : > { %v10832_v41 = vadd.f32 %v10831_v50, %v19079_v43  ;;  %v10833_v7 = vpop.f32.mrb[121].mxu1 }
0x1065   : > { %v10834_v16 = vadd.f32 %v10833_v7, %v19087_v19  ;;  %v10835_v35 = vpop.f32.mrb[122].mxu1  ;;  %11241 = vmatprep.mubr.bf16.mxu0 %v11069_v60 }
0x1066   : > { %v10836_v53 = vadd.f32 %v10835_v35, %v19079_v43  ;;  %v10837_v23 = vpop.f32.mrb[123].mxu1  ;;  %11242 = vmatmul.mubr.bf16.gmra.mrb[36].mxu0 %v11068_v33  ;;  %v10978_v3 = vmax.f32 %v10832_v41, 0.0 }
0x1067   : > { %v10838_v57 = vadd.f32 %v10837_v23, %v19087_v19  ;;  %10960 = vmatmul.mubr.bf16.gmra.mrb[172].mxu1 %v10684_v13  ;;  %v10979_v26 = vmax.f32 %v10834_v16, 0.0 }
0x1068   : > { %v10980_v2 = vmax.f32 %v10836_v53, 0.0 }
0x1069   : > { %v10981_v48 = vmax.f32 %v10838_v57, 0.0 }
0x106a   : > { %v11070_v49 = vpack.c.bf16 %v10980_v2, %v10978_v3 }
0x106b   : > { %v11071_v8 = vpack.c.bf16 %v10981_v48, %v10979_v26  ;;  %v10841_v25 = vpop.f32.mrb[124].mxu1 }
0x106c   : > { %v10842_v1 = vadd.f32 %v10841_v25, %v19079_v43  ;;  %v10843_v45 = vpop.f32.mrb[125].mxu1 }
0x106d   : > { %v10844_v52 = vadd.f32 %v10843_v45, %v19087_v19  ;;  %v10845_v46 = vpop.f32.mrb[126].mxu1  ;;  %11249 = vmatprep.mubr.bf16.mxu0 %v11071_v8 }
0x106e   : > { %v10846_v54 = vadd.f32 %v10845_v46, %v19079_v43  ;;  %v10847_v63 = vpop.f32.mrb[127].mxu1  ;;  %11250 = vmatmul.mubr.bf16.gmra.mrb[40].mxu0 %v11070_v49  ;;  %v10982_v4 = vmax.f32 %v10842_v1, 0.0 }
0x106f   : > { %v10848_v22 = vadd.f32 %v10847_v63, %v19087_v19  ;;  %v10983_v29 = vmax.f32 %v10844_v52, 0.0 }
0x1070   : > { %v10984_v51 = vmax.f32 %v10846_v54, 0.0 }
0x1071   : > { %v10985_v37 = vmax.f32 %v10848_v22, 0.0 }
0x1072   : > { %v11072_v31 = vpack.c.bf16 %v10984_v51, %v10982_v4 }
0x1073   : > { %v11073_v33 = vpack.c.bf16 %v10985_v37, %v10983_v29  ;;  %v10851_v60 = vpop.f32.mrb[128].mxu1 }
0x1074   : > { %v10852_v50 = vadd.f32 %v10851_v60, %v19079_v43  ;;  %v10853_v41 = vpop.f32.mrb[129].mxu1 }
0x1075   : > { %v10854_v7 = vadd.f32 %v10853_v41, %v19087_v19  ;;  %v10855_v13 = vpop.f32.mrb[130].mxu1  ;;  %11257 = vmatprep.mubr.bf16.mxu0 %v11073_v33 }
0x1076   : > { %v10856_v16 = vadd.f32 %v10855_v13, %v19079_v43  ;;  %v10857_v35 = vpop.f32.mrb[131].mxu1  ;;  %11258 = vmatmul.mubr.bf16.gmra.mrb[44].mxu0 %v11072_v31  ;;  %v10986_v23 = vmax.f32 %v10852_v50, 0.0 }
0x1077   : > { %v10858_v53 = vadd.f32 %v10857_v35, %v19087_v19  ;;  %v10987_v3 = vmax.f32 %v10854_v7, 0.0 }
0x1078   : > { %v10988_v57 = vmax.f32 %v10856_v16, 0.0 }
0x1079   : > { %v10989_v2 = vmax.f32 %v10858_v53, 0.0 }
0x107a   : > { %v11074_v26 = vpack.c.bf16 %v10988_v57, %v10986_v23 }
0x107b   : > { %v11075_v48 = vpack.c.bf16 %v10989_v2, %v10987_v3  ;;  %v10861_v49 = vpop.f32.mrb[132].mxu1 }
0x107c   : > { %v10862_v8 = vadd.f32 %v10861_v49, %v19079_v43  ;;  %v10863_v25 = vpop.f32.mrb[133].mxu1 }
0x107d   : > { %v10864_v1 = vadd.f32 %v10863_v25, %v19087_v19  ;;  %v10865_v45 = vpop.f32.mrb[134].mxu1  ;;  %11265 = vmatprep.mubr.bf16.mxu0 %v11075_v48 }
0x107e   : > { %v10866_v52 = vadd.f32 %v10865_v45, %v19079_v43  ;;  %v10867_v46 = vpop.f32.mrb[135].mxu1  ;;  %11266 = vmatmul.mubr.bf16.gmra.mrb[48].mxu0 %v11074_v26  ;;  %v10990_v63 = vmax.f32 %v10862_v8, 0.0 }
0x107f   : > { %v10868_v54 = vadd.f32 %v10867_v46, %v19087_v19  ;;  %v10991_v4 = vmax.f32 %v10864_v1, 0.0 }
0x1080   : > { %v10992_v22 = vmax.f32 %v10866_v52, 0.0 }
0x1081   : > { %v10993_v51 = vmax.f32 %v10868_v54, 0.0 }
0x1082   : > { %v11076_v29 = vpack.c.bf16 %v10992_v22, %v10990_v63 }
0x1083   : > { %v11077_v37 = vpack.c.bf16 %v10993_v51, %v10991_v4  ;;  %v10871_v31 = vpop.f32.mrb[136].mxu1 }
0x1084   : > { %v10872_v33 = vadd.f32 %v10871_v31, %v19079_v43  ;;  %v10873_v60 = vpop.f32.mrb[137].mxu1 }
0x1085   : > { %v10874_v50 = vadd.f32 %v10873_v60, %v19087_v19  ;;  %v10875_v41 = vpop.f32.mrb[138].mxu1  ;;  %11273 = vmatprep.mubr.bf16.mxu0 %v11077_v37 }
0x1086   : > { %v10876_v7 = vadd.f32 %v10875_v41, %v19079_v43  ;;  %v10877_v13 = vpop.f32.mrb[139].mxu1  ;;  %11274 = vmatmul.mubr.bf16.gmra.mrb[52].mxu0 %v11076_v29  ;;  %v10994_v35 = vmax.f32 %v10872_v33, 0.0 }
0x1087   : > { %v10878_v16 = vadd.f32 %v10877_v13, %v19087_v19  ;;  %v10995_v23 = vmax.f32 %v10874_v50, 0.0 }
0x1088   : > { %v10996_v53 = vmax.f32 %v10876_v7, 0.0 }
0x1089   : > { %v10997_v57 = vmax.f32 %v10878_v16, 0.0 }
0x108a   : > { %v11078_v3 = vpack.c.bf16 %v10996_v53, %v10994_v35 }
0x108b   : > { %v11079_v2 = vpack.c.bf16 %v10997_v57, %v10995_v23  ;;  %v10881_v26 = vpop.f32.mrb[140].mxu1 }
0x108c   : > { %v10882_v48 = vadd.f32 %v10881_v26, %v19079_v43  ;;  %v10883_v49 = vpop.f32.mrb[141].mxu1 }
0x108d   : > { %v10884_v8 = vadd.f32 %v10883_v49, %v19087_v19  ;;  %v10885_v25 = vpop.f32.mrb[142].mxu1  ;;  %11281 = vmatprep.mubr.bf16.mxu0 %v11079_v2 }
0x108e   : > { %v10886_v1 = vadd.f32 %v10885_v25, %v19079_v43  ;;  %v10887_v45 = vpop.f32.mrb[143].mxu1  ;;  %11282 = vmatmul.mubr.bf16.gmra.mrb[56].mxu0 %v11078_v3  ;;  %v10998_v46 = vmax.f32 %v10882_v48, 0.0 }
0x108f   : > { %v10888_v52 = vadd.f32 %v10887_v45, %v19087_v19  ;;  %v10999_v63 = vmax.f32 %v10884_v8, 0.0 }
0x1090   : > { %v11000_v54 = vmax.f32 %v10886_v1, 0.0 }
0x1091   : > { %v11001_v22 = vmax.f32 %v10888_v52, 0.0 }
0x1092   : > { %v11080_v4 = vpack.c.bf16 %v11000_v54, %v10998_v46 }
0x1093   : > { %v11081_v51 = vpack.c.bf16 %v11001_v22, %v10999_v63 }
0x1095   : > { %11289 = vmatprep.mubr.bf16.mxu0 %v11081_v51 }
0x1096   : > { %11290 = vmatmul.mubr.bf16.gmra.mrb[60].mxu0 %v11080_v4 }
0x10dd   : > { %v10891_v29 = vpop.f32.mrb[144].mxu1 }
0x10de   : > { %v10892_v37 = vadd.f32 %v10891_v29, %v19079_v43  ;;  %v10893_v31 = vpop.f32.mrb[145].mxu1 }
0x10df   : > { %v10894_v33 = vadd.f32 %v10893_v31, %v19087_v19  ;;  %v10895_v60 = vpop.f32.mrb[146].mxu1 }
0x10e0   : > { %v10896_v50 = vadd.f32 %v10895_v60, %v19079_v43  ;;  %v10897_v41 = vpop.f32.mrb[147].mxu1  ;;  %v11002_v13 = vmax.f32 %v10892_v37, 0.0 }
0x10e1   : > { %v10898_v7 = vadd.f32 %v10897_v41, %v19087_v19  ;;  %v11003_v35 = vmax.f32 %v10894_v33, 0.0 }
0x10e2   : > { %v11004_v16 = vmax.f32 %v10896_v50, 0.0 }
0x10e3   : > { %v11005_v53 = vmax.f32 %v10898_v7, 0.0 }
0x10e4   : > { %v11082_v23 = vpack.c.bf16 %v11004_v16, %v11002_v13 }
0x10e5   : > { %v11083_v57 = vpack.c.bf16 %v11005_v53, %v11003_v35  ;;  %v10901_v3 = vpop.f32.mrb[148].mxu1 }
0x10e6   : > { %v10902_v2 = vadd.f32 %v10901_v3, %v19079_v43  ;;  %v10903_v26 = vpop.f32.mrb[149].mxu1 }
0x10e7   : > { %v10904_v48 = vadd.f32 %v10903_v26, %v19087_v19  ;;  %v10905_v49 = vpop.f32.mrb[150].mxu1  ;;  %11297 = vmatprep.mubr.bf16.mxu0 %v11083_v57 }
0x10e8   : > { %v10906_v8 = vadd.f32 %v10905_v49, %v19079_v43  ;;  %v10907_v25 = vpop.f32.mrb[151].mxu1  ;;  %11298 = vmatmul.mubr.bf16.gmra.mrb[64].mxu0 %v11082_v23  ;;  %v11006_v45 = vmax.f32 %v10902_v2, 0.0 }
0x10e9   : > { %v10908_v1 = vadd.f32 %v10907_v25, %v19087_v19  ;;  %v11007_v46 = vmax.f32 %v10904_v48, 0.0 }
0x10ea   : > { %v11008_v52 = vmax.f32 %v10906_v8, 0.0 }
0x10eb   : > { %v11009_v54 = vmax.f32 %v10908_v1, 0.0 }
0x10ec   : > { %v11084_v63 = vpack.c.bf16 %v11008_v52, %v11006_v45 }
0x10ed   : > { %v11085_v22 = vpack.c.bf16 %v11009_v54, %v11007_v46 }
0x10ef   : > { %11305 = vmatprep.mubr.bf16.mxu0 %v11085_v22 }
0x10f0   : > { %11306 = vmatmul.mubr.bf16.gmra.mrb[68].mxu0 %v11084_v63 }
0x1112   : > { %v10911_v4 = vpop.f32.mrb[152].mxu1 }
0x1113   : > { %v10912_v51 = vadd.f32 %v10911_v4, %v19079_v43  ;;  %v10913_v29 = vpop.f32.mrb[153].mxu1 }
0x1114   : > { %v10914_v37 = vadd.f32 %v10913_v29, %v19087_v19  ;;  %v10915_v31 = vpop.f32.mrb[154].mxu1 }
0x1115   : > { %v10916_v33 = vadd.f32 %v10915_v31, %v19079_v43  ;;  %v10917_v60 = vpop.f32.mrb[155].mxu1  ;;  %v11010_v41 = vmax.f32 %v10912_v51, 0.0 }
0x1116   : > { %v10918_v50 = vadd.f32 %v10917_v60, %v19087_v19  ;;  %v11011_v13 = vmax.f32 %v10914_v37, 0.0 }
0x1117   : > { %v11012_v7 = vmax.f32 %v10916_v33, 0.0 }
0x1118   : > { %v11013_v16 = vmax.f32 %v10918_v50, 0.0 }
0x1119   : > { %v11086_v35 = vpack.c.bf16 %v11012_v7, %v11010_v41 }
0x111a   : > { %v11087_v53 = vpack.c.bf16 %v11013_v16, %v11011_v13  ;;  %v10921_v23 = vpop.f32.mrb[156].mxu1 }
0x111b   : > { %v10922_v57 = vadd.f32 %v10921_v23, %v19079_v43  ;;  %v10923_v3 = vpop.f32.mrb[157].mxu1 }
0x111c   : > { %v10924_v2 = vadd.f32 %v10923_v3, %v19087_v19  ;;  %v10925_v26 = vpop.f32.mrb[158].mxu1  ;;  %11313 = vmatprep.mubr.bf16.mxu0 %v11087_v53 }
0x111d   : > { %v10926_v48 = vadd.f32 %v10925_v26, %v19079_v43  ;;  %v10927_v49 = vpop.f32.mrb[159].mxu1  ;;  %11314 = vmatmul.mubr.bf16.gmra.mrb[72].mxu0 %v11086_v35  ;;  %v11014_v25 = vmax.f32 %v10922_v57, 0.0 }
0x111e   : > { %v10928_v8 = vadd.f32 %v10927_v49, %v19087_v19  ;;  %v11015_v45 = vmax.f32 %v10924_v2, 0.0 }
0x111f   : > { %v11016_v1 = vmax.f32 %v10926_v48, 0.0 }
0x1120   : > { %v11017_v52 = vmax.f32 %v10928_v8, 0.0 }
0x1121   : > { %v11088_v46 = vpack.c.bf16 %v11016_v1, %v11014_v25 }
0x1122   : > { %v11089_v54 = vpack.c.bf16 %v11017_v52, %v11015_v45  ;;  %v10931_v63 = vpop.f32.mrb[160].mxu1 }
0x1123   : > { %v10932_v22 = vadd.f32 %v10931_v63, %v19079_v43  ;;  %v10933_v4 = vpop.f32.mrb[161].mxu1  ;;  %v19179_v63 = vld [vmem:[%s827_s13] ss:$0 sm:$0xff] }
0x1124   : > { %v10934_v51 = vadd.f32 %v10933_v4, %v19087_v19  ;;  %v10935_v29 = vpop.f32.mrb[162].mxu1  ;;  %11321 = vmatprep.mubr.bf16.mxu0 %v11089_v54 }
0x1125   : > { %v10936_v37 = vadd.f32 %v10935_v29, %v19079_v43  ;;  %v10937_v31 = vpop.f32.mrb[163].mxu1  ;;  %11322 = vmatmul.mubr.bf16.gmra.mrb[76].mxu0 %v11088_v46  ;;  %v11018_v60 = vmax.f32 %v10932_v22, 0.0 }
0x1126   : > { %v10938_v33 = vadd.f32 %v10937_v31, %v19087_v19  ;;  %v11019_v41 = vmax.f32 %v10934_v51, 0.0 }
0x1127   : > { %v11020_v50 = vmax.f32 %v10936_v37, 0.0 }
0x1128   : > { %v11021_v7 = vmax.f32 %v10938_v33, 0.0 }
0x1129   : > { %v11090_v13 = vpack.c.bf16 %v11020_v50, %v11018_v60 }
0x112a   : > { %v11091_v16 = vpack.c.bf16 %v11021_v7, %v11019_v41  ;;  %v10941_v35 = vpop.f32.mrb[164].mxu1 }
0x112b   : > { %v10942_v53 = vadd.f32 %v10941_v35, %v19079_v43  ;;  %v10943_v23 = vpop.f32.mrb[165].mxu1 }
0x112c   : > { %v10944_v57 = vadd.f32 %v10943_v23, %v19087_v19  ;;  %v10945_v3 = vpop.f32.mrb[166].mxu1  ;;  %11329 = vmatprep.mubr.bf16.mxu0 %v11091_v16  ;;  %v19190_v16 = vld [vmem:[%s830_s5] ss:$0 sm:$0xff] }
0x112d   : > { %v10946_v2 = vadd.f32 %v10945_v3, %v19079_v43  ;;  %v10947_v26 = vpop.f32.mrb[167].mxu1  ;;  %11330 = vmatmul.mubr.bf16.gmra.mrb[80].mxu0 %v11090_v13  ;;  %v11022_v49 = vmax.f32 %v10942_v53, 0.0 }
0x112e   : > { %v10948_v48 = vadd.f32 %v10947_v26, %v19087_v19  ;;  %v11023_v25 = vmax.f32 %v10944_v57, 0.0 }
0x112f   : > { %v11024_v8 = vmax.f32 %v10946_v2, 0.0  ;;  %v19200_v2 = vld [vmem:[%s833_s9] ss:$0 sm:$0xff] }
0x1130   : > { %v11025_v1 = vmax.f32 %v10948_v48, 0.0 }
0x1131   : > { %v11092_v45 = vpack.c.bf16 %v11024_v8, %v11022_v49  ;;  %v12753_v52 = vpop.f32.mrb[32].mxu0 }
0x1132   : > { %v11093_v46 = vpack.c.bf16 %v11025_v1, %v11023_v25  ;;  %v10951_v54 = vpop.f32.mrb[168].mxu1  ;;  %v12754_v22 = vpop.f32.mrb[33].mxu0 }
0x1133   : > { %v10952_v4 = vadd.f32 %v10951_v54, %v19079_v43  ;;  %v12755_v51 = vadd.f32 %v12754_v22, %v12753_v52  ;;  %v10953_v29 = vpop.f32.mrb[169].mxu1  ;;  %v12756_v37 = vpop.f32.mrb[34].mxu0 }
0x1134   : > { %v10954_v31 = vadd.f32 %v10953_v29, %v19087_v19  ;;  %v10955_v33 = vpop.f32.mrb[170].mxu1  ;;  %v12757_v60 = vpop.f32.mrb[35].mxu0  ;;  %11337 = vmatprep.mubr.bf16.mxu0 %v11093_v46 }
0x1135   : > { %v11236_v50 = vadd.f32 %v12755_v51, %v19179_v63  ;;  %v10956_v41 = vadd.f32 %v10955_v33, %v19079_v43  ;;  %v12758_v7 = vadd.f32 %v12757_v60, %v12756_v37  ;;  %v10957_v13 = vpop.f32.mrb[171].mxu1  ;;  %11338 = vmatmul.mubr.bf16.gmra.mrb[84].mxu0 %v11092_v45  ;;  %v11026_v53 = vmax.f32 %v10952_v4, 0.0 }
0x1136   : > { %v10958_v35 = vadd.f32 %v10957_v13, %v19087_v19  ;;  %v11027_v26 = vmax.f32 %v10954_v31, 0.0 }
0x1137   : > { %v11362_v23 = vadd.f32 %v11236_v50, %v18877_v10  ;;  %v11028_v57 = vmax.f32 %v10956_v41, 0.0  ;;  %v11239_v3 = vadd.f32 %v12758_v7, %v19179_v63 }
0x1138   : > { %v11029_v48 = vmax.f32 %v10958_v35, 0.0 }
0x1139   : > { %v11401_v49 = vmul.f32 %v19190_v16, %v11362_v23  ;;  %v11094_v8 = vpack.c.bf16 %v11028_v57, %v11026_v53  ;;  %v11363_v25 = vadd.f32 %v11239_v3, %v18880_v28  ;;  %v12759_v1 = vpop.f32.mrb[36].mxu0 }
0x113a   : > { %v11095_v45 = vpack.c.bf16 %v11029_v48, %v11027_v26  ;;  %v10961_v52 = vpop.f32.mrb[172].mxu1  ;;  %v12760_v10 = vpop.f32.mrb[37].mxu0 }
0x113b   : > { %v19205_v46 = vadd.f32 %v19200_v2, %v11401_v49  ;;  %v11402_v54 = vmul.f32 %v19190_v16, %v11363_v25  ;;  %v10962_v22 = vadd.f32 %v10961_v52, %v19079_v43  ;;  %v12761_v4 = vadd.f32 %v12760_v10, %v12759_v1  ;;  %v10963_v51 = vpop.f32.mrb[173].mxu1  ;;  %v12762_v29 = vpop.f32.mrb[38].mxu0 }
0x113c   : > { %v10964_v37 = vadd.f32 %v10963_v51, %v19087_v19  ;;  %v10965_v31 = vpop.f32.mrb[174].mxu1  ;;  %v12763_v33 = vpop.f32.mrb[39].mxu0  ;;  %11345 = vmatprep.mubr.bf16.mxu0 %v11095_v45 }
0x113d   : > { %11472 = vst [vmem:[#allocation2] sm:$0xff] %v19205_v46  ;;  %v19212_v28 = vadd.f32 %v19200_v2, %v11402_v54  ;;  %v11244_v60 = vadd.f32 %v12761_v4, %v19179_v63  ;;  %v10966_v50 = vadd.f32 %v10965_v31, %v19079_v43  ;;  %v10967_v41 = vpop.f32.mrb[175].mxu1  ;;  %11346 = vmatmul.mubr.bf16.gmra.mrb[88].mxu0 %v11094_v8  ;;  %v11030_v35 = vmax.f32 %v10962_v22, 0.0 }
0x113e   : > { %v12764_v7 = vadd.f32 %v12763_v33, %v12762_v29  ;;  %v10968_v13 = vadd.f32 %v10967_v41, %v19087_v19  ;;  %v11031_v57 = vmax.f32 %v10964_v37, 0.0 }
0x113f   : > { %11473 = vst [vmem:[#allocation2 + $0x8] sm:$0xff] %v19212_v28  ;;  %v11364_v53 = vadd.f32 %v11244_v60, %v18893_v17  ;;  %v11032_v23 = vmax.f32 %v10966_v50, 0.0 }
0x1140   : > { %v11247_v3 = vadd.f32 %v12764_v7, %v19179_v63  ;;  %v11033_v26 = vmax.f32 %v10968_v13, 0.0 }
0x1141   : > { %v11403_v48 = vmul.f32 %v19190_v16, %v11364_v53  ;;  %v11096_v49 = vpack.c.bf16 %v11032_v23, %v11030_v35  ;;  %v12765_v25 = vpop.f32.mrb[40].mxu0 }
0x1142   : > { %v11365_v43 = vadd.f32 %v11247_v3, %v18890_v55  ;;  %v11097_v8 = vpack.c.bf16 %v11033_v26, %v11031_v57  ;;  %v12766_v1 = vpop.f32.mrb[41].mxu0 }
0x1143   : > { %v19223_v19 = vadd.f32 %v19200_v2, %v11403_v48  ;;  %v12767_v45 = vadd.f32 %v12766_v1, %v12765_v25  ;;  %v12768_v52 = vpop.f32.mrb[42].mxu0 }
0x1144   : > { %v11404_v17 = vmul.f32 %v19190_v16, %v11365_v43  ;;  %v12769_v10 = vpop.f32.mrb[43].mxu0  ;;  %11353 = vmatprep.mubr.bf16.mxu0 %v11097_v8 }
0x1145   : > { %11474 = vst [vmem:[#allocation2 + $0x10] sm:$0xff] %v19223_v19  ;;  %v11252_v54 = vadd.f32 %v12767_v45, %v19179_v63  ;;  %v12770_v22 = vadd.f32 %v12769_v10, %v12768_v52  ;;  %11354 = vmatmul.mubr.bf16.gmra.mrb[92].mxu0 %v11096_v49 }
0x1146   : > { %v19229_v4 = vadd.f32 %v19200_v2, %v11404_v17 }
0x1147   : > { %v11366_v55 = vadd.f32 %v11252_v54, %v18906_v24  ;;  %v11255_v51 = vadd.f32 %v12770_v22, %v19179_v63 }
0x1148   : > { %11475 = vst [vmem:[#allocation2 + $0x18] sm:$0xff] %v19229_v4 }
0x1149   : > { %v11405_v29 = vmul.f32 %v19190_v16, %v11366_v55  ;;  %v11367_v37 = vadd.f32 %v11255_v51, %v18903_v40  ;;  %v12771_v31 = vpop.f32.mrb[44].mxu0 }
0x114a   : > { %v12772_v33 = vpop.f32.mrb[45].mxu0 }
0x114b   : > { %v19237_v60 = vadd.f32 %v19200_v2, %v11405_v29  ;;  %v11406_v50 = vmul.f32 %v19190_v16, %v11367_v37  ;;  %v12773_v41 = vadd.f32 %v12772_v33, %v12771_v31  ;;  %v12774_v7 = vpop.f32.mrb[46].mxu0 }
0x114c   : > { %v12775_v13 = vpop.f32.mrb[47].mxu0 }
0x114d   : > { %11476 = vst [vmem:[#allocation2 + $0x20] sm:$0xff] %v19237_v60  ;;  %v19242_v24 = vadd.f32 %v19200_v2, %v11406_v50  ;;  %v11260_v35 = vadd.f32 %v12773_v41, %v19179_v63  ;;  %v12776_v53 = vadd.f32 %v12775_v13, %v12774_v7 }
0x114f   : > { %11477 = vst [vmem:[#allocation2 + $0x28] sm:$0xff] %v19242_v24  ;;  %v11368_v40 = vadd.f32 %v11260_v35, %v18919_v38  ;;  %v11263_v23 = vadd.f32 %v12776_v53, %v19179_v63 }
0x1151   : > { %v11407_v57 = vmul.f32 %v19190_v16, %v11368_v40  ;;  %v11369_v3 = vadd.f32 %v11263_v23, %v18916_v34  ;;  %v12777_v26 = vpop.f32.mrb[48].mxu0 }
0x1152   : > { %v12778_v48 = vpop.f32.mrb[49].mxu0 }
0x1153   : > { %v19251_v49 = vadd.f32 %v19200_v2, %v11407_v57  ;;  %v11408_v25 = vmul.f32 %v19190_v16, %v11369_v3  ;;  %v12779_v43 = vadd.f32 %v12778_v48, %v12777_v26  ;;  %v12780_v8 = vpop.f32.mrb[50].mxu0 }
0x1154   : > { %v12781_v1 = vpop.f32.mrb[51].mxu0 }
0x1155   : > { %11478 = vst [vmem:[#allocation2 + $0x30] sm:$0xff] %v19251_v49  ;;  %v19256_v38 = vadd.f32 %v19200_v2, %v11408_v25  ;;  %v11268_v45 = vadd.f32 %v12779_v43, %v19179_v63  ;;  %v12782_v52 = vadd.f32 %v12781_v1, %v12780_v8 }
0x1157   : > { %11479 = vst [vmem:[#allocation2 + $0x38] sm:$0xff] %v19256_v38  ;;  %v11370_v34 = vadd.f32 %v11268_v45, %v18932_v47  ;;  %v11271_v17 = vadd.f32 %v12782_v52, %v19179_v63 }
0x1159   : > { %v11409_v10 = vmul.f32 %v19190_v16, %v11370_v34  ;;  %v11371_v54 = vadd.f32 %v11271_v17, %v18929_v18  ;;  %v12783_v22 = vpop.f32.mrb[52].mxu0 }
0x115a   : > { %v12784_v55 = vpop.f32.mrb[53].mxu0 }
0x115b   : > { %v19265_v51 = vadd.f32 %v19200_v2, %v11409_v10  ;;  %v11410_v29 = vmul.f32 %v19190_v16, %v11371_v54  ;;  %v12785_v37 = vadd.f32 %v12784_v55, %v12783_v22  ;;  %v12786_v31 = vpop.f32.mrb[54].mxu0 }
0x115c   : > { %v12787_v33 = vpop.f32.mrb[55].mxu0 }
0x115d   : > { %11480 = vst [vmem:[#allocation2 + $0x40] sm:$0xff] %v19265_v51  ;;  %v19270_v47 = vadd.f32 %v19200_v2, %v11410_v29  ;;  %v11276_v50 = vadd.f32 %v12785_v37, %v19179_v63  ;;  %v12788_v41 = vadd.f32 %v12787_v33, %v12786_v31 }
0x115f   : > { %11481 = vst [vmem:[#allocation2 + $0x48] sm:$0xff] %v19270_v47  ;;  %v11372_v18 = vadd.f32 %v11276_v50, %v18945_v12  ;;  %v11279_v7 = vadd.f32 %v12788_v41, %v19179_v63 }
0x1161   : > { %v11411_v13 = vmul.f32 %v19190_v16, %v11372_v18  ;;  %v11373_v35 = vadd.f32 %v11279_v7, %v18942_v6  ;;  %v12789_v53 = vpop.f32.mrb[56].mxu0 }
0x1162   : > { %v12790_v40 = vpop.f32.mrb[57].mxu0 }
0x1163   : > { %v19279_v23 = vadd.f32 %v19200_v2, %v11411_v13  ;;  %v11412_v57 = vmul.f32 %v19190_v16, %v11373_v35  ;;  %v12791_v3 = vadd.f32 %v12790_v40, %v12789_v53  ;;  %v12792_v26 = vpop.f32.mrb[58].mxu0 }
0x1164   : > { %v12793_v48 = vpop.f32.mrb[59].mxu0 }
0x1165   : > { %11482 = vst [vmem:[#allocation2 + $0x50] sm:$0xff] %v19279_v23  ;;  %v19284_v12 = vadd.f32 %v19200_v2, %v11412_v57  ;;  %v11284_v25 = vadd.f32 %v12791_v3, %v19179_v63  ;;  %v12794_v43 = vadd.f32 %v12793_v48, %v12792_v26 }
0x1167   : > { %11483 = vst [vmem:[#allocation2 + $0x58] sm:$0xff] %v19284_v12  ;;  %v11374_v6 = vadd.f32 %v11284_v25, %v18958_v14  ;;  %v11287_v8 = vadd.f32 %v12794_v43, %v19179_v63 }
0x1169   : > { %v11413_v1 = vmul.f32 %v19190_v16, %v11374_v6  ;;  %v11375_v45 = vadd.f32 %v11287_v8, %v18955_v9  ;;  %v12795_v52 = vpop.f32.mrb[60].mxu0 }
0x116a   : > { %v12796_v34 = vpop.f32.mrb[61].mxu0 }
0x116b   : > { %v19293_v17 = vadd.f32 %v19200_v2, %v11413_v1  ;;  %v11414_v10 = vmul.f32 %v19190_v16, %v11375_v45  ;;  %v12797_v54 = vadd.f32 %v12796_v34, %v12795_v52  ;;  %v12798_v22 = vpop.f32.mrb[62].mxu0 }
0x116c   : > { %v12799_v55 = vpop.f32.mrb[63].mxu0 }
0x116d   : > { %11484 = vst [vmem:[#allocation2 + $0x60] sm:$0xff] %v19293_v17  ;;  %v19298_v14 = vadd.f32 %v19200_v2, %v11414_v10  ;;  %v11292_v29 = vadd.f32 %v12797_v54, %v19179_v63  ;;  %v12800_v37 = vadd.f32 %v12799_v55, %v12798_v22 }
0x116f   : > { %11485 = vst [vmem:[#allocation2 + $0x68] sm:$0xff] %v19298_v14  ;;  %v11376_v9 = vadd.f32 %v11292_v29, %v18969_v56  ;;  %v11295_v31 = vadd.f32 %v12800_v37, %v19179_v63 }
0x1171   : > { %v11415_v33 = vmul.f32 %v19190_v16, %v11376_v9  ;;  %v11377_v50 = vadd.f32 %v11295_v31, %v18966_v27 }
0x1173   : > { %v19307_v41 = vadd.f32 %v19200_v2, %v11415_v33  ;;  %v11416_v18 = vmul.f32 %v19190_v16, %v11377_v50 }
0x1175   : > { %11486 = vst [vmem:[#allocation2 + $0x70] sm:$0xff] %v19307_v41  ;;  %v19312_v7 = vadd.f32 %v19200_v2, %v11416_v18 }
0x1177   : > { %11487 = vst [vmem:[#allocation2 + $0x78] sm:$0xff] %v19312_v7 }
0x11bb   : > { %v12801_v13 = vpop.f32.mrb[64].mxu0 }
0x11bc   : > { %v12802_v56 = vpop.f32.mrb[65].mxu0 }
0x11bd   : > { %v12803_v35 = vadd.f32 %v12802_v56, %v12801_v13  ;;  %v12804_v53 = vpop.f32.mrb[66].mxu0 }
0x11be   : > { %v12805_v40 = vpop.f32.mrb[67].mxu0 }
0x11bf   : > { %v11300_v57 = vadd.f32 %v12803_v35, %v19179_v63  ;;  %v12806_v27 = vadd.f32 %v12805_v40, %v12804_v53 }
0x11c1   : > { %v11378_v3 = vadd.f32 %v11300_v57, %v19001_v58  ;;  %v11303_v26 = vadd.f32 %v12806_v27, %v19179_v63 }
0x11c3   : > { %v11417_v48 = vmul.f32 %v19190_v16, %v11378_v3  ;;  %v11379_v25 = vadd.f32 %v11303_v26, %v19004_v42  ;;  %v12807_v43 = vpop.f32.mrb[68].mxu0 }
0x11c4   : > { %v12808_v6 = vpop.f32.mrb[69].mxu0 }
0x11c5   : > { %v19321_v8 = vadd.f32 %v19200_v2, %v11417_v48  ;;  %v11418_v1 = vmul.f32 %v19190_v16, %v11379_v25  ;;  %v12809_v45 = vadd.f32 %v12808_v6, %v12807_v43  ;;  %v12810_v52 = vpop.f32.mrb[70].mxu0 }
0x11c6   : > { %v12811_v34 = vpop.f32.mrb[71].mxu0 }
0x11c7   : > { %11488 = vst [vmem:[#allocation2 + $0x80] sm:$0xff] %v19321_v8  ;;  %v19326_v58 = vadd.f32 %v19200_v2, %v11418_v1  ;;  %v11308_v10 = vadd.f32 %v12809_v45, %v19179_v63  ;;  %v12812_v54 = vadd.f32 %v12811_v34, %v12810_v52 }
0x11c9   : > { %11489 = vst [vmem:[#allocation2 + $0x88] sm:$0xff] %v19326_v58  ;;  %v11380_v42 = vadd.f32 %v11308_v10, %v19015_v21  ;;  %v11311_v22 = vadd.f32 %v12812_v54, %v19179_v63 }
0x11cb   : > { %v11419_v55 = vmul.f32 %v19190_v16, %v11380_v42  ;;  %v11381_v29 = vadd.f32 %v11311_v22, %v19012_v59 }
0x11cd   : > { %v19335_v37 = vadd.f32 %v19200_v2, %v11419_v55  ;;  %v11420_v9 = vmul.f32 %v19190_v16, %v11381_v29 }
0x11cf   : > { %11490 = vst [vmem:[#allocation2 + $0x90] sm:$0xff] %v19335_v37  ;;  %v19340_v31 = vadd.f32 %v19200_v2, %v11420_v9 }
0x11d1   : > { %11491 = vst [vmem:[#allocation2 + $0x98] sm:$0xff] %v19340_v31 }
0x11f0   : > { %v12813_v33 = vpop.f32.mrb[72].mxu0 }
0x11f1   : > { %v12814_v21 = vpop.f32.mrb[73].mxu0 }
0x11f2   : > { %v12815_v50 = vadd.f32 %v12814_v21, %v12813_v33  ;;  %v12816_v18 = vpop.f32.mrb[74].mxu0 }
0x11f3   : > { %v12817_v13 = vpop.f32.mrb[75].mxu0 }
0x11f4   : > { %v11316_v56 = vadd.f32 %v12815_v50, %v19179_v63  ;;  %v12818_v59 = vadd.f32 %v12817_v13, %v12816_v18 }
0x11f6   : > { %v11382_v35 = vadd.f32 %v11316_v56, %v19031_v36  ;;  %v11319_v53 = vadd.f32 %v12818_v59, %v19179_v63 }
0x11f8   : > { %v11421_v40 = vmul.f32 %v19190_v16, %v11382_v35  ;;  %v11383_v57 = vadd.f32 %v11319_v53, %v19034_v20  ;;  %v12819_v27 = vpop.f32.mrb[76].mxu0 }
0x11f9   : > { %v12820_v3 = vpop.f32.mrb[77].mxu0 }
0x11fa   : > { %v19349_v26 = vadd.f32 %v19200_v2, %v11421_v40  ;;  %v11422_v48 = vmul.f32 %v19190_v16, %v11383_v57  ;;  %v12821_v25 = vadd.f32 %v12820_v3, %v12819_v27  ;;  %v12822_v43 = vpop.f32.mrb[78].mxu0 }
0x11fb   : > { %v12823_v6 = vpop.f32.mrb[79].mxu0 }
0x11fc   : > { %11492 = vst [vmem:[#allocation2 + $0xa0] sm:$0xff] %v19349_v26  ;;  %v19354_v36 = vadd.f32 %v19200_v2, %v11422_v48  ;;  %v11324_v1 = vadd.f32 %v12821_v25, %v19179_v63  ;;  %v12824_v45 = vadd.f32 %v12823_v6, %v12822_v43 }
0x11fe   : > { %11493 = vst [vmem:[#allocation2 + $0xa8] sm:$0xff] %v19354_v36  ;;  %v11384_v20 = vadd.f32 %v11324_v1, %v19051_v61  ;;  %v11327_v52 = vadd.f32 %v12824_v45, %v19179_v63 }
0x1200   : > { %v11423_v34 = vmul.f32 %v19190_v16, %v11384_v20  ;;  %v11385_v10 = vadd.f32 %v11327_v52, %v19047_v39  ;;  %v12825_v54 = vpop.f32.mrb[80].mxu0 }
0x1201   : > { %v12826_v42 = vpop.f32.mrb[81].mxu0 }
0x1202   : > { %v19363_v22 = vadd.f32 %v19200_v2, %v11423_v34  ;;  %v11424_v55 = vmul.f32 %v19190_v16, %v11385_v10  ;;  %v12827_v29 = vadd.f32 %v12826_v42, %v12825_v54  ;;  %v12828_v9 = vpop.f32.mrb[82].mxu0 }
0x1203   : > { %v12829_v33 = vpop.f32.mrb[83].mxu0 }
0x1204   : > { %11494 = vst [vmem:[#allocation2 + $0xb0] sm:$0xff] %v19363_v22  ;;  %v19368_v61 = vadd.f32 %v19200_v2, %v11424_v55  ;;  %v11332_v21 = vadd.f32 %v12827_v29, %v19179_v63  ;;  %v12830_v50 = vadd.f32 %v12829_v33, %v12828_v9 }
0x1206   : > { %11495 = vst [vmem:[#allocation2 + $0xb8] sm:$0xff] %v19368_v61  ;;  %v11386_v39 = vadd.f32 %v11332_v21, %v19068_v0  ;;  %v11335_v18 = vadd.f32 %v12830_v50, %v19179_v63 }
0x1208   : > { %v11425_v13 = vmul.f32 %v19190_v16, %v11386_v39  ;;  %v11387_v56 = vadd.f32 %v11335_v18, %v19065_v5  ;;  %v12831_v59 = vpop.f32.mrb[84].mxu0 }
0x1209   : > { %v12832_v35 = vpop.f32.mrb[85].mxu0 }
0x120a   : > { %v19377_v53 = vadd.f32 %v19200_v2, %v11425_v13  ;;  %v11426_v40 = vmul.f32 %v19190_v16, %v11387_v56  ;;  %v12833_v57 = vadd.f32 %v12832_v35, %v12831_v59  ;;  %v12834_v27 = vpop.f32.mrb[86].mxu0 }
0x120b   : > { %v12835_v3 = vpop.f32.mrb[87].mxu0 }
0x120c   : > { %11496 = vst [vmem:[#allocation2 + $0xc0] sm:$0xff] %v19377_v53  ;;  %v19382_v0 = vadd.f32 %v19200_v2, %v11426_v40  ;;  %v11340_v48 = vadd.f32 %v12833_v57, %v19179_v63  ;;  %v12836_v25 = vadd.f32 %v12835_v3, %v12834_v27 }
0x120e   : > { %11497 = vst [vmem:[#allocation2 + $0xc8] sm:$0xff] %v19382_v0  ;;  %v11388_v5 = vadd.f32 %v11340_v48, %v19090_v32  ;;  %v11343_v43 = vadd.f32 %v12836_v25, %v19179_v63 }
0x1210   : > { %v11427_v6 = vmul.f32 %v19190_v16, %v11388_v5  ;;  %v11389_v1 = vadd.f32 %v11343_v43, %v19083_v44  ;;  %v12837_v45 = vpop.f32.mrb[88].mxu0 }
0x1211   : > { %v12838_v20 = vpop.f32.mrb[89].mxu0 }
0x1212   : > { %v19391_v52 = vadd.f32 %v19200_v2, %v11427_v6  ;;  %v11428_v34 = vmul.f32 %v19190_v16, %v11389_v1  ;;  %v12839_v10 = vadd.f32 %v12838_v20, %v12837_v45  ;;  %v12840_v54 = vpop.f32.mrb[90].mxu0  ;;  %v11532_v6 = vpack.c.bf16 (!%p12346_p7), %v19326_v58, %v19321_v8  ;;  %v14802_v8 = vld [vmem:[#allocation9 + $0x30] sm:$0xff] (!%p12346_p7)   ;;  %v14803_v58 = vld [vmem:[#allocation9 + $0x38] sm:$0xff] (!%p12346_p7)  }
0x1213   : > { %v12841_v42 = vpop.f32.mrb[91].mxu0  ;;  %v11525_v1 = vpack.c.bf16 (!%p12346_p7), %v19229_v4, %v19223_v19  ;;  %v11533_v45 = vpack.c.bf16 (!%p12346_p7), %v19340_v31, %v19335_v37  ;;  %v11526_v20 = vpack.c.bf16 (!%p12346_p7), %v19242_v24, %v19237_v60  ;;  %v11535_v19 = vpack.c.bf16 (!%p12346_p7), %v19368_v61, %v19363_v22 }
0x1214   : > { %11498 = vst [vmem:[#allocation2 + $0xd0] sm:$0xff] %v19391_v52  ;;  %v19396_v32 = vadd.f32 %v19200_v2, %v11428_v34  ;;  %v11348_v55 = vadd.f32 %v12839_v10, %v19179_v63  ;;  %v12842_v29 = vadd.f32 %v12841_v42, %v12840_v54  ;;  %13899 = vmatprep.mubr.bf16.mxu1 (!%p12346_p7), %v11532_v6 }
0x1215   : > { %v11534_v34 = vpack.c.bf16 (!%p12346_p7), %v19354_v36, %v19349_v26  ;;  %v11527_v10 = vpack.c.bf16 (!%p12346_p7), %v19256_v38, %v19251_v49  ;;  %v11528_v4 = vpack.c.bf16 (!%p12346_p7), %v19270_v47, %v19265_v51  ;;  %v11536_v37 = vpack.c.bf16 (!%p12346_p7), %v19382_v0, %v19377_v53 }
0x1216   : > { %11499 = vst [vmem:[#allocation2 + $0xd8] sm:$0xff] %v19396_v32  ;;  %v11390_v44 = vadd.f32 %v11348_v55, %v19107_v11  ;;  %v11351_v9 = vadd.f32 %v12842_v29, %v19179_v63  ;;  %v11529_v60 = vpack.c.bf16 (!%p12346_p7), %v19284_v12, %v19279_v23  ;;  %v11537_v24 = vpack.c.bf16 (!%p12346_p7), %v19396_v32, %v19391_v52  ;;  %v19463_v23 = vld [vmem:[%s20215_s11] ss:$0 sm:$0xff] (!%p12346_p7) }
0x1217   : > { %v11530_v49 = vpack.c.bf16 (!%p12346_p7), %v19298_v14, %v19293_v17  ;;  %v11531_v51 = vpack.c.bf16 (!%p12346_p7), %v19312_v7, %v19307_v41 }
0x1218   : > { %v11429_v33 = vmul.f32 %v19190_v16, %v11390_v44  ;;  %v11391_v21 = vadd.f32 %v11351_v9, %v19104_v30  ;;  %v12843_v50 = vpop.f32.mrb[92].mxu0 }
0x1219   : > { %v12844_v39 = vpop.f32.mrb[93].mxu0 }
0x121a   : > { %v19405_v18 = vadd.f32 %v19200_v2, %v11429_v33  ;;  %v11430_v13 = vmul.f32 %v19190_v16, %v11391_v21  ;;  %v12845_v56 = vadd.f32 %v12844_v39, %v12843_v50  ;;  %v12846_v59 = vpop.f32.mrb[94].mxu0 }
0x121b   : > { %v12847_v35 = vpop.f32.mrb[95].mxu0 }
0x121c   : > { %11500 = vst [vmem:[#allocation2 + $0xe0] sm:$0xff] %v19405_v18  ;;  %v19410_v11 = vadd.f32 %v19200_v2, %v11430_v13  ;;  %v11356_v40 = vadd.f32 %v12845_v56, %v19179_v63  ;;  %v12848_v57 = vadd.f32 %v12847_v35, %v12846_v59 }
0x121e   : > { %11501 = vst [vmem:[#allocation2 + $0xe8] sm:$0xff] %v19410_v11  ;;  %v11392_v30 = vadd.f32 %v11356_v40, %v19122_v15  ;;  %v11359_v27 = vadd.f32 %v12848_v57, %v19179_v63  ;;  %v14796_v15 = vld [vmem:[#allocation9] sm:$0xff] (!%p12346_p7)   ;;  %v14797_v63 = vld [vmem:[#allocation9 + $0x8] sm:$0xff] (!%p12346_p7)   ;;  %v11538_v38 = vpack.c.bf16 (!%p12346_p7), %v19410_v11, %v19405_v18 }
0x121f   : > { %13867 = vmatprep.subr.bf16.mxu0 (!%p12346_p7), %v14796_v15  ;;  %14017 = vmatprep.subr.bf16.mxu1 (!%p12346_p7), %v14796_v15 }
0x1220   : > { %v11431_v3 = vmul.f32 %v19190_v16, %v11392_v30  ;;  %v11393_v48 = vadd.f32 %v11359_v27, %v19119_v62  ;;  %11507 = sbr.rel (%p12346_p7) target bundleno = 4913 (0x1331), region = 112  ;;  %v11524_v62 = vpack.c.bf16 (!%p12346_p7), %v19212_v28, %v19205_v46  ;;  %13868 = vmatpush3.bf16.msra.mxu0 (!%p12346_p7), %v14796_v15  ;;  %14025 = vmatpush3.bf16.msra.mxu1 (!%p12346_p7), %v14796_v15  ;;  %v14800_v46 = vld [vmem:[#allocation9 + $0x20] sm:$0xff] (!%p12346_p7)   ;;  %v14801_v28 = vld [vmem:[#allocation9 + $0x28] sm:$0xff] (!%p12346_p7)  }
0x1221   : > { %13869 = vmatprep.subr.bf16.mxu0 (!%p12346_p7), %v14797_v63  ;;  %14018 = vmatprep.subr.bf16.mxu1 (!%p12346_p7), %v14797_v63 }
0x1222   : > { %v19419_v25 = vadd.f32 %v19200_v2, %v11431_v3  ;;  %v11432_v5 = vmul.f32 %v19190_v16, %v11393_v48  ;;  %v14798_v16 = vld [vmem:[#allocation9 + $0x10] sm:$0xff] (!%p12346_p7)   ;;  %13883 = vmatprep.mubr.bf16.mxu0 (!%p12346_p7), %v11524_v62 }
0x1224   : > { %11502 = vst [vmem:[#allocation2 + $0xf0] sm:$0xff] %v19419_v25  ;;  %v19424_v43 = vadd.f32 %v19200_v2, %v11432_v5  ;;  %13870 = vmatpush3.bf16.msra.mxu0 (!%p12346_p7), %v14797_v63  ;;  %14026 = vmatpush3.bf16.msra.mxu1 (!%p12346_p7), %v14797_v63  ;;  %v14799_v2 = vld [vmem:[#allocation9 + $0x18] sm:$0xff] (!%p12346_p7)  }
0x1225   : > { %13871 = vmatprep.subr.bf16.mxu0 (!%p12346_p7), %v14798_v16  ;;  %14019 = vmatprep.subr.bf16.mxu1 (!%p12346_p7), %v14798_v16 }
0x1226   : > { %11503 = vst [vmem:[#allocation2 + $0xf8] sm:$0xff] %v19424_v43  ;;  %v11539_v47 = vpack.c.bf16 (!%p12346_p7), %v19424_v43, %v19419_v25 }
0x1228   : > { %13872 = vmatpush3.bf16.msra.mxu0 %v14798_v16  ;;  %14027 = vmatpush3.bf16.msra.mxu1 %v14798_v16 }
0x1229   : > { %13873 = vmatprep.subr.bf16.mxu0 %v14799_v2  ;;  %14020 = vmatprep.subr.bf16.mxu1 %v14799_v2 }
0x122c   : > { %13874 = vmatpush3.bf16.msra.mxu0 %v14799_v2  ;;  %14028 = vmatpush3.bf16.msra.mxu1 %v14799_v2 }
0x122d   : > { %13875 = vmatprep.subr.bf16.mxu0 %v14800_v46  ;;  %14021 = vmatprep.subr.bf16.mxu1 %v14800_v46 }
0x1230   : > { %13876 = vmatpush3.bf16.msra.mxu0 %v14800_v46  ;;  %14029 = vmatpush3.bf16.msra.mxu1 %v14800_v46 }
0x1231   : > { %13877 = vmatprep.subr.bf16.mxu0 %v14801_v28  ;;  %14022 = vmatprep.subr.bf16.mxu1 %v14801_v28 }
0x1234   : > { %13878 = vmatpush3.bf16.msra.mxu0 %v14801_v28  ;;  %14030 = vmatpush3.bf16.msra.mxu1 %v14801_v28 }
0x1235   : > { %13879 = vmatprep.subr.bf16.mxu0 %v14802_v8  ;;  %14023 = vmatprep.subr.bf16.mxu1 %v14802_v8 }
0x1238   : > { %13880 = vmatpush3.bf16.msra.mxu0 %v14802_v8  ;;  %14031 = vmatpush3.bf16.msra.mxu1 %v14802_v8 }
0x1239   : > { %13881 = vmatprep.subr.bf16.mxu0 %v14803_v58  ;;  %14024 = vmatprep.subr.bf16.mxu1 %v14803_v58 }
0x123c   : > { %13882 = vmatpush3.bf16.msra.mxu0 %v14803_v58  ;;  %14032 = vmatpush3.bf16.msra.mxu1 %v14803_v58 }
0x123f   : > { %13884 = vmatmul.mubr.bf16.vlgmr.msra.gmra.mrb[0].mxu0 %v11525_v1  ;;  %13900 = vmatmul.mubr.bf16.vlgmr.msra.gmra.mrb[0].mxu1 %v11533_v45 }
0x1240   : > { %13887 = vmatprep.mubr.bf16.mxu0 %v11526_v20  ;;  %13903 = vmatprep.mubr.bf16.mxu1 %v11534_v34 }
0x1247   : > { %13888 = vmatmul.mubr.bf16.gmra.mrb[4].mxu0 %v11527_v10  ;;  %13904 = vmatmul.mubr.bf16.gmra.mrb[4].mxu1 %v11535_v19 }
0x1248   : > { %13891 = vmatprep.mubr.bf16.mxu0 %v11528_v4  ;;  %13907 = vmatprep.mubr.bf16.mxu1 %v11536_v37 }
0x124f   : > { %13892 = vmatmul.mubr.bf16.gmra.mrb[8].mxu0 %v11529_v60  ;;  %13908 = vmatmul.mubr.bf16.gmra.mrb[8].mxu1 %v11537_v24 }
0x1250   : > { %13895 = vmatprep.mubr.bf16.mxu0 %v11530_v49  ;;  %13911 = vmatprep.mubr.bf16.mxu1 %v11538_v38 }
0x1257   : > { %13896 = vmatmul.mubr.bf16.gmra.mrb[12].mxu0 %v11531_v51  ;;  %13912 = vmatmul.mubr.bf16.gmra.mrb[12].mxu1 %v11539_v47 }
0x1312   : > { %v13885_v12 = vpop.f32.mrb[0].mxu0  ;;  %v13901_v17 = vpop.f32.mrb[0].mxu1 }
0x1313   : > { %v11638_v14 = vadd.f32 %v13885_v12, %v19463_v23  ;;  %v11702_v31 = vadd.f32 %v13901_v17, %v19463_v23  ;;  %v11629_v41 = vpop.f32.mrb[1].mxu0  ;;  %v11693_v7 = vpop.f32.mrb[1].mxu1 }
0x1314   : > { %v11630_v26 = vadd.f32 %v19463_v23, %v11629_v41  ;;  %v11694_v36 = vadd.f32 %v19463_v23, %v11693_v7  ;;  %v13886_v22 = vpop.f32.mrb[2].mxu0  ;;  %v13902_v61 = vpop.f32.mrb[2].mxu1 }
0x1315   : > { %11758 = vst [vmem:[%s15503_s21 + $0x10] sm:$0xff] %v11638_v14  ;;  %11774 = vst [vmem:[%s15503_s21 + $0x90] sm:$0xff] %v11702_v31  ;;  %v11641_v53 = vadd.f32 %v13886_v22, %v19463_v23  ;;  %v11705_v0 = vadd.f32 %v13902_v61, %v19463_v23  ;;  %v11632_v52 = vpop.f32.mrb[3].mxu0  ;;  %v11696_v54 = vpop.f32.mrb[3].mxu1 }
0x1316   : > { %11756 = vst [vmem:[%s15503_s21] sm:$0xff] %v11630_v26  ;;  %11772 = vst [vmem:[%s15503_s21 + $0x80] sm:$0xff] %v11694_v36  ;;  %v11633_v42 = vadd.f32 %v19463_v23, %v11632_v52  ;;  %v11697_v32 = vadd.f32 %v19463_v23, %v11696_v54 }
0x1317   : > { %11759 = vst [vmem:[%s15503_s21 + $0x18] sm:$0xff] %v11641_v53  ;;  %11775 = vst [vmem:[%s15503_s21 + $0x98] sm:$0xff] %v11705_v0 }
0x1318   : > { %11757 = vst [vmem:[%s15503_s21 + $0x8] sm:$0xff] %v11633_v42  ;;  %11773 = vst [vmem:[%s15503_s21 + $0x88] sm:$0xff] %v11697_v32 }
0x131a   : > { %v13889_v55 = vpop.f32.mrb[4].mxu0  ;;  %v13905_v29 = vpop.f32.mrb[4].mxu1 }
0x131b   : > { %v11654_v44 = vadd.f32 %v13889_v55, %v19463_v23  ;;  %v11718_v9 = vadd.f32 %v13905_v29, %v19463_v23  ;;  %v11645_v33 = vpop.f32.mrb[5].mxu0  ;;  %v11709_v21 = vpop.f32.mrb[5].mxu1 }
0x131c   : > { %v11646_v50 = vadd.f32 %v19463_v23, %v11645_v33  ;;  %v11710_v39 = vadd.f32 %v19463_v23, %v11709_v21  ;;  %v13890_v18 = vpop.f32.mrb[6].mxu0  ;;  %v13906_v13 = vpop.f32.mrb[6].mxu1 }
0x131d   : > { %11762 = vst [vmem:[%s15503_s21 + $0x30] sm:$0xff] %v11654_v44  ;;  %11778 = vst [vmem:[%s15503_s21 + $0xb0] sm:$0xff] %v11718_v9  ;;  %v11657_v56 = vadd.f32 %v13890_v18, %v19463_v23  ;;  %v11721_v59 = vadd.f32 %v13906_v13, %v19463_v23  ;;  %v11648_v35 = vpop.f32.mrb[7].mxu0  ;;  %v11712_v11 = vpop.f32.mrb[7].mxu1 }
0x131e   : > { %11760 = vst [vmem:[%s15503_s21 + $0x20] sm:$0xff] %v11646_v50  ;;  %11776 = vst [vmem:[%s15503_s21 + $0xa0] sm:$0xff] %v11710_v39  ;;  %v11649_v40 = vadd.f32 %v19463_v23, %v11648_v35  ;;  %v11713_v57 = vadd.f32 %v19463_v23, %v11712_v11 }
0x131f   : > { %11763 = vst [vmem:[%s15503_s21 + $0x38] sm:$0xff] %v11657_v56  ;;  %11779 = vst [vmem:[%s15503_s21 + $0xb8] sm:$0xff] %v11721_v59 }
0x1320   : > { %11761 = vst [vmem:[%s15503_s21 + $0x28] sm:$0xff] %v11649_v40  ;;  %11777 = vst [vmem:[%s15503_s21 + $0xa8] sm:$0xff] %v11713_v57 }
0x1322   : > { %v13893_v30 = vpop.f32.mrb[8].mxu0  ;;  %v13909_v27 = vpop.f32.mrb[8].mxu1 }
0x1323   : > { %v11670_v3 = vadd.f32 %v13893_v30, %v19463_v23  ;;  %v11734_v48 = vadd.f32 %v13909_v27, %v19463_v23  ;;  %v11661_v25 = vpop.f32.mrb[9].mxu0  ;;  %v11725_v5 = vpop.f32.mrb[9].mxu1 }
0x1324   : > { %v11662_v43 = vadd.f32 %v19463_v23, %v11661_v25  ;;  %v11726_v15 = vadd.f32 %v19463_v23, %v11725_v5  ;;  %v13894_v63 = vpop.f32.mrb[10].mxu0  ;;  %v13910_v62 = vpop.f32.mrb[10].mxu1 }
0x1325   : > { %11766 = vst [vmem:[%s15503_s21 + $0x50] sm:$0xff] %v11670_v3  ;;  %11782 = vst [vmem:[%s15503_s21 + $0xd0] sm:$0xff] %v11734_v48  ;;  %v11673_v6 = vadd.f32 %v13894_v63, %v19463_v23  ;;  %v11737_v16 = vadd.f32 %v13910_v62, %v19463_v23  ;;  %v11664_v2 = vpop.f32.mrb[11].mxu0  ;;  %v11728_v46 = vpop.f32.mrb[11].mxu1 }
0x1326   : > { %11764 = vst [vmem:[%s15503_s21 + $0x40] sm:$0xff] %v11662_v43  ;;  %11780 = vst [vmem:[%s15503_s21 + $0xc0] sm:$0xff] %v11726_v15  ;;  %v11665_v28 = vadd.f32 %v19463_v23, %v11664_v2  ;;  %v11729_v8 = vadd.f32 %v19463_v23, %v11728_v46 }
0x1327   : > { %11767 = vst [vmem:[%s15503_s21 + $0x58] sm:$0xff] %v11673_v6  ;;  %11783 = vst [vmem:[%s15503_s21 + $0xd8] sm:$0xff] %v11737_v16 }
0x1328   : > { %11765 = vst [vmem:[%s15503_s21 + $0x48] sm:$0xff] %v11665_v28  ;;  %11781 = vst [vmem:[%s15503_s21 + $0xc8] sm:$0xff] %v11729_v8 }
0x132a   : > { %v13897_v58 = vpop.f32.mrb[12].mxu0  ;;  %v13913_v1 = vpop.f32.mrb[12].mxu1 }
0x132b   : > { %v11686_v45 = vadd.f32 %v13897_v58, %v19463_v23  ;;  %v11750_v20 = vadd.f32 %v13913_v1, %v19463_v23  ;;  %v11677_v34 = vpop.f32.mrb[13].mxu0  ;;  %v11741_v10 = vpop.f32.mrb[13].mxu1 }
0x132c   : > { %v11678_v19 = vadd.f32 %v19463_v23, %v11677_v34  ;;  %v11742_v4 = vadd.f32 %v19463_v23, %v11741_v10  ;;  %v13898_v37 = vpop.f32.mrb[14].mxu0  ;;  %v13914_v60 = vpop.f32.mrb[14].mxu1 }
0x132d   : > { %11770 = vst [vmem:[%s15503_s21 + $0x70] sm:$0xff] %v11686_v45  ;;  %11786 = vst [vmem:[%s15503_s21 + $0xf0] sm:$0xff] %v11750_v20  ;;  %v11689_v24 = vadd.f32 %v13898_v37, %v19463_v23  ;;  %v11753_v49 = vadd.f32 %v13914_v60, %v19463_v23  ;;  %v11680_v38 = vpop.f32.mrb[15].mxu0  ;;  %v11744_v51 = vpop.f32.mrb[15].mxu1 }
0x132e   : > { %11768 = vst [vmem:[%s15503_s21 + $0x60] sm:$0xff] %v11678_v19  ;;  %11784 = vst [vmem:[%s15503_s21 + $0xe0] sm:$0xff] %v11742_v4  ;;  %v11681_v47 = vadd.f32 %v19463_v23, %v11680_v38  ;;  %v11745_v12 = vadd.f32 %v19463_v23, %v11744_v51 }
0x132f   : > { %11771 = vst [vmem:[%s15503_s21 + $0x78] sm:$0xff] %v11689_v24  ;;  %11787 = vst [vmem:[%s15503_s21 + $0xf8] sm:$0xff] %v11753_v49 }
0x1330   : > { %11769 = vst [vmem:[%s15503_s21 + $0x68] sm:$0xff] %v11681_v47  ;;  %11785 = vst [vmem:[%s15503_s21 + $0xe8] sm:$0xff] %v11745_v12 }
0x1331 PF: > { %s20216_s3 = sld [smem:[#allocation17_spill]]  ;;  %s20217_s2 = sld [smem:[#allocation29_spill]] }
0x1332   : > { %s12367_s6 = sshll.u32 %s15040_s30, 12  ;;  %s20218_s4 = sld [smem:[#allocation159_spill]] }
0x1333   : > { %s11803_s22 = sshll.u32 %s15503_s21, 4  ;;  %s15068_s30 = smov [#allocation11]   ;;  %s19536_s22 = int_to_ptr.vmem [resolvable:$true] %s11803_s22 }
0x1334   : > { %s14922_s0 = scalar_lea.vmem %s19536_s22, 4096  ;;  %s14926_s19 = sshll.u32 %s15068_s30, 4  ;;  %s14927_s19 = int_to_ptr.vmem [resolvable:$false] %s14926_s19 }
0x1335   : > { %p14923_p0 = scmp.ne.s32.totalorder %s19536_s22, %s14922_s0  ;;  %s14928_s20 = scalar_lea.vmem %s14927_s19, 8192 }
0x1336   : > { %p14929_p4 = scmp.lt.s32.totalorder %s19536_s22, %s14927_s19  ;;  %p14930_p5 = scmp.lt.s32.totalorder %s14928_s20, %s14922_s0 }
0x1337   : > { %s20219_s27 = sand.u32 1, %s20216_s3   ;;  %p20220_p10 = scmp.ne.s32.totalorder %s20217_s2, 0 }
0x1338   : > { %s19533_s15 = scalar_lea.hbm %s20218_s4, %s12367_s6  ;;  %s19540_s24 = scalar_lea.sflag [#allocation5], %s20219_s27 }
0x1339   : > { %p14924_p13 = pnand %p14923_p0, %p20220_p10  ;;  %p14931_p9 = por %p14930_p5, %p14929_p4 }
0x133b   : > { %p14925_p11 = pneg %p14924_p13 }
0x133d   : > { %p14932_p3 = pnand %p14931_p9, %p14925_p11 }
0x133f   : > { %14935 = shalt.err (!%p14932_p3)
}
0x1340   : > { %s14936_s21 = scalar_lea.hbm %s19533_s15, 4096  ;;  %s14940_s25 = scalar_lea.hbm %s20218_s4, 8192 }
0x1341   : > { %p14937_p2 = scmp.ne.s32.totalorder %s19533_s15, %s14936_s21  ;;  %p14941_p12 = scmp.lt.u32.totalorder %s19533_s15, %s20218_s4 }
0x1342   : > { %p14942_p1 = scmp.lt.u32.totalorder %s14940_s25, %s14936_s21  ;;  %p14944_p0 = scmp.lt.u32.totalorder %s14936_s21, %s19533_s15 }
0x1343   : > { %p14938_p6 = pnand %p14937_p2, %p20220_p10 }
0x1344   : > { %p14943_p7 = por %p14942_p1, %p14941_p12 }
0x1345   : > { %p14939_p8 = pneg %p14938_p6 }
0x1346   : > { %p14945_p13 = por %p14944_p0, %p14943_p7 }
0x1348   : > { %p14946_p11 = pnand %p14945_p13, %p14939_p8 }
0x134a   : > { %14949 = shalt.err (!%p14946_p11)
}
0x134b   : > { %s15069_s13 = smov 128   ;;  %s15070_s7 = smov 8  }
0x134c   : > { %14047 = dma.vmem_to_hbm [thread:$0]  (%p20220_p10), %s19536_s22, 4096, %s19533_s15, %s19540_s24, %s15069_s13, %s15069_s13, %s15070_s7  }
0x134d PF: > { %s20221_s14 = sld [smem:[#allocation24_spill]]  ;;  %s20222_s26 = sld [smem:[#allocation16_spill]] }
0x134e   : > { %s20223_s23 = sld [smem:[#allocation30_spill]] }
0x1353   : > { %p14070_p4 = scmp.ge.s32.totalorder %s20221_s14, 2  ;;  %s11818_s17 = sand.u32 1, %s20222_s26  }
0x1354   : > { %p20224_p5 = scmp.ne.s32.totalorder %s20223_s23, 0  ;;  %s11819_s29 = scalar_lea.sflag [#allocation5], %s11818_s17 }
0x1356   : > { %p14064_p9 = pnand %p14070_p4, %p20224_p5 }
0x1358   : > { %15007 = dma.done.wait (!%p14064_p9), %s11819_s29, 4096  }
0x1359   : > { %15009 = vsyncadd (!%p14064_p9), %s11819_s29, 4294963200  ;;  %s37_s1 = sadd.s32 1, %s20221_s14   ;;  %s20225_s24 = sld [smem:[#allocation17_spill]] }
0x135a   : > { %p34_p3 = scmp.ge.s32.totalorder %s37_s1, 6   ;;  %s20226_s25 = sld [smem:[#allocation18_spill]] }
0x135b   : > { %s20227_s26 = sld [smem:[#allocation28_spill]]  ;;  %s20228_s27 = sld [smem:[#allocation19_spill]] }
0x135c   : > { %s20229_s28 = sld [smem:[#allocation20_spill]]  ;;  %s20230_s29 = sld [smem:[#allocation27_spill]] }
0x135d   : > { %s20231_s0 = sld [smem:[#allocation22_spill]]  ;;  %s20232_s30 = sld [smem:[#allocation23_spill]] }
0x135e   : > { %s20233_s18 = sld [smem:[#allocation25_spill]]  ;;  %s20234_s19 = sld [smem:[#allocation26_spill]] }
0x135f   :  { %36 = sbr.rel (!%p34_p3) target bundleno = 31 (0x1f), region = 199 }
0x1366   :  { %11824 = vsyncpa [#allocation4], 1 }
0x1367   :  { %11826 = vsyncpa [#allocation4 + $0x1], 1 }
0x1368   :  { %11827 = vsyncpa [#allocation7], 1 }
0x1369   :  { %11829 = vsyncpa [#allocation7 + $0x1], 1 }
0x136a   :  { %11830 = vsyncpa [#allocation10], 1 }
0x136b   :  { %11831 = vsyncpa [#allocation5], 1 }
0x136c   :  { %11833 = vsyncpa [#allocation5 + $0x1], 1 }

</bundles_post_ra>
